<compile_context>
chip_gen: v5e
topology: v5e:2x2
jax: 0.10.0
libtpu: 0.0.40
codegen_flags: <defaults>
</compile_context>

<pallas_src>
import jax
import jax.numpy as jnp
import numpy as np
from jax.experimental import pallas as pl
from jax.experimental.pallas import tpu as pltpu


# ---------------------------------------------------------------------------
# conv1 band geometry (static, depends only on the 28x28 / stride-2 shapes).
# Output row `oh` of conv1 reads input image rows 2*oh-1..2*oh+1, i.e. flat
# input columns [max(0,2*oh-1)*28, (2*oh+2)*28).  For 13 of the 14 output rows
# that window fits inside a 128-aligned 256-wide slice of the 784-long input
# row; the last row needs the full 784 columns (handled as a separate band).
# ---------------------------------------------------------------------------
def _conv1_bands():
    meta = []
    for oh in range(14):
        lo = max(0, 2 * oh - 1) * 28
        hi = (2 * oh + 2) * 28
        a = (lo // 128) * 128
        if a + 256 > 784:
            a = 512
        if hi <= a + 256:
            meta.append(("win", a, 256))
        else:
            meta.append(("full", 0, 784))
    return meta


# ---------------------------------------------------------------------------
# Pallas kernel factory: fully fused conv1+conv2+conv3 (banded matmuls) +
# bias + ReLU + 4x4 average pool, everything VMEM-resident per batch tile.
# ---------------------------------------------------------------------------
def _build_kernel(TB):
    meta = _conv1_bands()

    def kernel(x_ref, w1w_ref, w1f_ref, b1_ref, w2_ref, b2_ref,
               w3_ref, b3_ref, pool_ref, o_ref, xb_ref, h1_ref, h2_ref):
        # In-kernel f32 -> bf16 cast of the streamed batch tile (VPU filler).
        xb_ref[...] = x_ref[...].astype(jnp.bfloat16)

        # h1 layout: 15 blocks of 256 lanes; block 0 is the conv1 "row -1" zero
        # padding, blocks 1..14 hold conv1 output rows oh=0..13 as (c, ow)+pad.
        h1_ref[:, 0:256] = jnp.zeros((TB, 256), jnp.bfloat16)

        # ---- conv1: 14 banded matmuls (K window <= 256, aligned slices). ----
        b1 = b1_ref[...]                                  # (1, 256) f32
        wi = fi = 0
        for oh in range(14):
            kind, a, wdt = meta[oh]
            lhs = xb_ref[:, a:a + wdt]                    # (TB, 256) or (TB, 784)
            if kind == "win":
                rhs = w1w_ref[wi]; wi += 1                # (256, 256) bf16
            else:
                rhs = w1f_ref[fi]; fi += 1                # (784, 256) bf16
            acc = jnp.dot(lhs, rhs, preferred_element_type=jnp.float32)
            h1_ref[:, (oh + 1) * 256:(oh + 2) * 256] = (
                jnp.maximum(acc + b1, 0.0).astype(jnp.bfloat16))

        # ---- conv2: 7 banded matmuls, each reads 3 adjacent h1 row-blocks. ---
        b2 = b2_ref[...]                                  # (1, 128) f32
        for o2 in range(7):
            lhs = h1_ref[:, o2 * 512:o2 * 512 + 768]      # (TB, 768) bf16
            acc = jnp.dot(lhs, w2_ref[o2], preferred_element_type=jnp.float32)
            h2_ref[:, o2 * 128:(o2 + 1) * 128] = (
                jnp.maximum(acc + b2, 0.0).astype(jnp.bfloat16))

        # ---- conv3 (dense, tiny) + fused 4x4 average pool (lane-dense out). --
        h3 = jnp.maximum(
            jnp.dot(h2_ref[...], w3_ref[...], preferred_element_type=jnp.float32)
            + b3_ref[...], 0.0)                           # (TB, 256) f32
        o_ref[...] = jnp.dot(h3, pool_ref[...], preferred_element_type=jnp.float32)

    return kernel


def fused_forward(prep, x2d):
    B = x2d.shape[0]
    # Batch tiling: one padded grid step for small batches; 256/512-row tiles
    # (>= 2 tiles -> megacore "parallel" sharding) for large ones.  Budget is
    # re-derived for v7x's 64 MiB/TC: <= ~20 MB used at TILE_B=512.
    if B <= 512:
        TB = max(8, ((B + 7) // 8) * 8)
    elif B <= 2048:
        TB = 256
    else:
        TB = 512
    Bp = ((B + TB - 1) // TB) * TB
    if Bp != B:
        x2d = jnp.pad(x2d, ((0, Bp - B), (0, 0)))

    w1w, w1f, w2, w3, pool = prep["w1w"], prep["w1f"], prep["w2"], prep["w3"], prep["pool"]
    b1, b2, b3 = prep["b1"], prep["b2"], prep["b3"]

    def resident(shape):
        # Weight/bias blocks never change across the grid: single-buffer them.
        ndim = len(shape)
        idx = lambda i: (0,) * ndim
        try:
            return pl.BlockSpec(shape, idx, pipeline_mode=pl.Buffered(1))
        except (AttributeError, TypeError):   # older jax without pipeline_mode
            return pl.BlockSpec(shape, idx)

    prod = lambda a: int(np.prod(a.shape))
    flops = 2 * Bp * (prod(w1w) + prod(w1f) + prod(w2) + prod(w3) + prod(pool))
    bytes_accessed = (Bp * 784 * 4 + Bp * 128 * 4
                      + sum(prod(prep[k]) * prep[k].dtype.itemsize for k in prep))

    out = pl.pallas_call(
        _build_kernel(TB),
        out_shape=jax.ShapeDtypeStruct((Bp, 128), jnp.float32),
        grid=(Bp // TB,),
        in_specs=[
            pl.BlockSpec((TB, 784), lambda i: (i, 0)),    # streamed f32 batch tile
            resident(w1w.shape),                          # conv1 windowed bands
            resident(w1f.shape),                          # conv1 full-width band
            resident(b1.shape),
            resident(w2.shape),                           # conv2 bands
            resident(b2.shape),
            resident(w3.shape),                           # conv3 dense
            resident(b3.shape),
            resident(pool.shape),                         # avg-pool matrix (padded)
        ],
        out_specs=pl.BlockSpec((TB, 128), lambda i: (i, 0)),
        scratch_shapes=[
            pltpu.VMEM((TB, 784), jnp.bfloat16),          # bf16 copy of x tile
            pltpu.VMEM((TB, 3840), jnp.bfloat16),         # conv1 activations
            pltpu.VMEM((TB, 896), jnp.bfloat16),          # conv2 activations
        ],
        compiler_params=pltpu.CompilerParams(
            dimension_semantics=("parallel",),            # megacore-shard batch tiles
            vmem_limit_bytes=40 * 1024 * 1024,            # fits v5e/v6e and v7x (64 MiB/TC)
        ),
        cost_estimate=pl.CostEstimate(flops=flops, transcendentals=0,
                                      bytes_accessed=bytes_accessed),
    )(x2d, w1w, w1f, b1, w2, b2, w3, b3, pool)
    return out[:B, :10]


@jax.jit
def mnist_cnn_forward(prep, xb):
    x2d = xb.reshape(-1, 784)                 # mirrors xb.view(-1, 1, 28, 28)
    return fused_forward(prep, x2d)


# ---------------------------------------------------------------------------
# One-time weight preprocessing (plain JAX/numpy, runs once):
#  - unroll each stride-2 conv by pushing an identity basis through it,
#  - re-order outputs into (output-row, channel, col)-padded block layouts,
#  - cut the per-output-row bands (the only nonzero rows) used by the kernel.
# ---------------------------------------------------------------------------
def _conv_s2(x, w, b):
    y = jax.lax.conv_general_dilated(
        x, w, window_strides=(2, 2), padding=((1, 1), (1, 1)),
        dimension_numbers=("NCHW", "OIHW", "NCHW"),
        precision=jax.lax.Precision.HIGHEST)
    return y + b[None, :, None, None]


def _unroll(w, in_shape):
    cin, H, W = in_shape
    nin = cin * H * W
    basis = jnp.eye(nin, dtype=jnp.float32).reshape(nin, cin, H, W)
    y = jax.lax.conv_general_dilated(
        basis, w, window_strides=(2, 2), padding=((1, 1), (1, 1)),
        dimension_numbers=("NCHW", "OIHW", "NCHW"),
        precision=jax.lax.Precision.HIGHEST)
    return np.asarray(y)                      # (nin, cout, Ho, Wo)


def prepare_matmul_params(params):
    meta = _conv1_bands()

    # conv1: (784 -> 14 blocks x 256), then per-output-row bands.
    y1 = _unroll(params["w1"], (1, 28, 28))                       # (784,16,14,14)
    t1 = np.transpose(y1, (0, 2, 1, 3)).reshape(784, 14, 224)
    t1 = np.pad(t1, ((0, 0), (0, 0), (0, 32))).reshape(784, 3584)
    w1_win, w1_full = [], []
    for oh, (kind, a, wdt) in enumerate(meta):
        cols = t1[:, oh * 256:(oh + 1) * 256]
        rest = np.delete(cols, np.s_[a:a + wdt], axis=0)
        assert np.all(rest == 0.0), "conv1 band window missed taps"
        (w1_win if kind == "win" else w1_full).append(cols[a:a + wdt])
    assert len(w1_full) == 1
    w1w = np.stack(w1_win)                                        # (13,256,256)
    w1f = np.stack(w1_full)                                       # (1,784,256)

    # conv2: rows re-indexed to the h1 layout (zero block + 14x256), 7 bands.
    y2 = _unroll(params["w2"], (16, 14, 14))                      # (3136,16,7,7)
    t2 = np.transpose(y2, (0, 2, 1, 3)).reshape(3136, 7, 112)
    t2 = np.pad(t2, ((0, 0), (0, 0), (0, 16))).reshape(3136, 896)
    t2n = np.zeros((3840, 896), np.float32)
    c, oh, ow = np.meshgrid(np.arange(16), np.arange(14), np.arange(14), indexing="ij")
    t2n[((oh + 1) * 256 + c * 14 + ow).reshape(-1)] = t2
    w2b = []
    for o2 in range(7):
        cols = t2n[:, o2 * 128:(o2 + 1) * 128]
        rest = np.delete(cols, np.s_[o2 * 512:o2 * 512 + 768], axis=0)
        assert np.all(rest == 0.0), "conv2 band window missed taps"
        w2b.append(cols[o2 * 512:o2 * 512 + 768])
    w2b = np.stack(w2b)                                           # (7,768,128)

    # conv3: rows re-indexed to the h2 layout (7x128); kept dense (tiny).
    y3 = _unroll(params["w3"], (16, 7, 7))                        # (784,10,4,4)
    t3 = y3.reshape(784, 160)
    t3n = np.zeros((896, 256), np.float32)
    c2, o2g, ow2 = np.meshgrid(np.arange(16), np.arange(7), np.arange(7), indexing="ij")
    t3n[(o2g * 128 + c2 * 7 + ow2).reshape(-1), :160] = t3

    # 4x4 average pool over NCHW-flat (10,4,4), output padded to 128 lanes.
    pool = np.zeros((256, 128), np.float32)
    for cc in range(10):
        pool[cc * 16:(cc + 1) * 16, cc] = 1.0 / 16.0

    # Biases in the padded block layouts (identical for every row block).
    b1r = np.zeros((1, 256), np.float32); b1r[0, :224] = np.repeat(np.asarray(params["b1"]), 14)
    b2r = np.zeros((1, 128), np.float32); b2r[0, :112] = np.repeat(np.asarray(params["b2"]), 7)
    b3r = np.zeros((1, 256), np.float32); b3r[0, :160] = np.repeat(np.asarray(params["b3"]), 16)

    bf16 = lambda a: jnp.asarray(a, jnp.bfloat16)
    return dict(w1w=bf16(w1w), w1f=bf16(w1f), b1=jnp.asarray(b1r),
                w2=bf16(w2b), b2=jnp.asarray(b2r),
                w3=bf16(t3n), b3=jnp.asarray(b3r),
                pool=jnp.asarray(pool))


# ---------------------------------------------------------------------------
# Model parameters (PyTorch Conv2d default init) and f32 reference forward.
# ---------------------------------------------------------------------------
def init_params(key):
    ks = jax.random.split(key, 6)

    def conv_init(kw_, kb_, cout, cin, k=3):
        fan_in = cin * k * k
        bound = 1.0 / np.sqrt(fan_in)
        w = jax.random.uniform(kw_, (cout, cin, k, k), jnp.float32, -bound, bound)
        b = jax.random.uniform(kb_, (cout,), jnp.float32, -bound, bound)
        return w, b

    w1, b1 = conv_init(ks[0], ks[1], 16, 1)
    w2, b2 = conv_init(ks[2], ks[3], 16, 16)
    w3, b3 = conv_init(ks[4], ks[5], 10, 16)
    return dict(w1=w1, b1=b1, w2=w2, b2=b2, w3=w3, b3=b3)


def reference_forward(params, xb):
    x = xb.reshape(-1, 1, 28, 28)
    x = jax.nn.relu(_conv_s2(x, params["w1"], params["b1"]))
    x = jax.nn.relu(_conv_s2(x, params["w2"], params["b2"]))
    x = jax.nn.relu(_conv_s2(x, params["w3"], params["b3"]))
    return jnp.mean(x, axis=(2, 3))           # avg_pool2d(4) on 4x4 -> (B, 10)


if __name__ == "__main__":
    key = jax.random.PRNGKey(0)
    pkey, xkey = jax.random.split(key)
    params = init_params(pkey)
    prep = prepare_matmul_params(params)      # one-time weight preprocessing

    # Exercise both tiling paths: single padded tile (B=28 -> TB=32, grid=1)
    # and the multi-tile path (B=640 -> TB=256, grid=3, with padded rows).
    for batch in (28, 640):
        x = jax.random.normal(jax.random.fold_in(xkey, batch), (batch, 784),
                              dtype=jnp.float32)
        out = jax.block_until_ready(mnist_cnn_forward(prep, x))
        assert out.shape == (batch, 10), out.shape
        ref = jax.block_until_ready(reference_forward(params, x))
        # bf16 weights/activations with f32 accumulation: observed |err| ~ 1e-3.
        np.testing.assert_allclose(np.asarray(out), np.asarray(ref),
                                   rtol=2e-2, atol=2e-2)

    print("KERNEL_OK")
</pallas_src>

<mosaic_0001>
module attributes {stable_mosaic.version = 11 : i64} {
  func.func @kernel(%arg0: i32, %arg1: memref<32x784xf32, #tpu.memory_space<vmem>>, %arg2: memref<13x256x256xbf16, #tpu.memory_space<vmem>>, %arg3: memref<1x784x256xbf16, #tpu.memory_space<vmem>>, %arg4: memref<1x256xf32, #tpu.memory_space<vmem>>, %arg5: memref<7x768x128xbf16, #tpu.memory_space<vmem>>, %arg6: memref<1x128xf32, #tpu.memory_space<vmem>>, %arg7: memref<896x256xbf16, #tpu.memory_space<vmem>>, %arg8: memref<1x256xf32, #tpu.memory_space<vmem>>, %arg9: memref<256x128xf32, #tpu.memory_space<vmem>>, %arg10: memref<32x128xf32, #tpu.memory_space<vmem>>, %arg11: memref<32x784xbf16, #tpu.memory_space<vmem>>, %arg12: memref<32x3840xbf16, #tpu.memory_space<vmem>>, %arg13: memref<32x896xbf16, #tpu.memory_space<vmem>>) attributes {dimension_semantics = [#tpu.dimension_semantics<parallel>], iteration_bounds = array<i64: 1>, scalar_prefetch = 0 : i64, scratch_operands = 3 : i64, tpu.core_type = #tpu.core_type<tc>, window_params = [{transform_indices = @transform_0, window_bounds = array<i64: 32, 784>}, {pipeline_mode = #tpu.pipeline_mode<synchronous>, transform_indices = @transform_1, window_bounds = array<i64: 13, 256, 256>}, {pipeline_mode = #tpu.pipeline_mode<synchronous>, transform_indices = @transform_2, window_bounds = array<i64: 1, 784, 256>}, {pipeline_mode = #tpu.pipeline_mode<synchronous>, transform_indices = @transform_3, window_bounds = array<i64: 1, 256>}, {pipeline_mode = #tpu.pipeline_mode<synchronous>, transform_indices = @transform_4, window_bounds = array<i64: 7, 768, 128>}, {pipeline_mode = #tpu.pipeline_mode<synchronous>, transform_indices = @transform_5, window_bounds = array<i64: 1, 128>}, {pipeline_mode = #tpu.pipeline_mode<synchronous>, transform_indices = @transform_6, window_bounds = array<i64: 896, 256>}, {pipeline_mode = #tpu.pipeline_mode<synchronous>, transform_indices = @transform_7, window_bounds = array<i64: 1, 256>}, {pipeline_mode = #tpu.pipeline_mode<synchronous>, transform_indices = @transform_8, window_bounds = array<i64: 256, 128>}, {transform_indices = @transform_9, window_bounds = array<i64: 32, 128>}]} {
    %c0 = arith.constant 0 : index
    %c0_0 = arith.constant 0 : index
    %0 = vector.load %arg1[%c0, %c0_0] : memref<32x784xf32, #tpu.memory_space<vmem>>, vector<32x784xf32>
    %1 = arith.truncf %0 : vector<32x784xf32> to vector<32x784xbf16>
    %c0_1 = arith.constant 0 : index
    %c0_2 = arith.constant 0 : index
    %2 = vector.load %arg11[%c0_1, %c0_2] : memref<32x784xbf16, #tpu.memory_space<vmem>>, vector<32x784xbf16>
    tpu.vector_store %arg11[%c0_1, %c0_2], %1 {strides = array<i32>} : memref<32x784xbf16, #tpu.memory_space<vmem>>, vector<32x784xbf16>,
    %cst = arith.constant 0.000000e+00 : bf16
    %3 = vector.broadcast %cst : bf16 to vector<32x256xbf16>
    %c0_3 = arith.constant 0 : index
    %c0_4 = arith.constant 0 : index
    %4 = vector.load %arg12[%c0_3, %c0_4] : memref<32x3840xbf16, #tpu.memory_space<vmem>>, vector<32x256xbf16>
    tpu.vector_store %arg12[%c0_3, %c0_4], %3 {strides = array<i32>} : memref<32x3840xbf16, #tpu.memory_space<vmem>>, vector<32x256xbf16>,
    %c0_5 = arith.constant 0 : index
    %c0_6 = arith.constant 0 : index
    %5 = vector.load %arg4[%c0_5, %c0_6] : memref<1x256xf32, #tpu.memory_space<vmem>>, vector<1x256xf32>
    %c0_7 = arith.constant 0 : index
    %c0_8 = arith.constant 0 : index
    %6 = vector.load %arg11[%c0_7, %c0_8] : memref<32x784xbf16, #tpu.memory_space<vmem>>, vector<32x256xbf16>
    %c0_9 = arith.constant 0 : index
    %c0_10 = arith.constant 0 : index
    %c0_11 = arith.constant 0 : index
    %7 = vector.load %arg2[%c0_9, %c0_10, %c0_11] : memref<13x256x256xbf16, #tpu.memory_space<vmem>>, vector<1x256x256xbf16>
    %8 = vector.shape_cast %7 : vector<1x256x256xbf16> to vector<256x256xbf16>
    %cst_12 = arith.constant dense<0.000000e+00> : vector<32x256xf32>
    %9 = tpu.matmul %6, %8, %cst_12 {dimension_numbers = #tpu.dot_dimension_numbers<[1], [0], [0], [1], [0, 0, 1, 1], [], []>} : vector<32x256xbf16>, vector<256x256xbf16>, vector<32x256xf32> -> vector<32x256xf32>
    %10 = vector.broadcast %5 : vector<1x256xf32> to vector<32x256xf32>
    %11 = arith.addf %9, %10 : vector<32x256xf32>
    %cst_13 = arith.constant 0.000000e+00 : f32
    %12 = vector.broadcast %cst_13 : f32 to vector<32x256xf32>
    %13 = arith.maximumf %11, %12 : vector<32x256xf32>
    %14 = arith.truncf %13 : vector<32x256xf32> to vector<32x256xbf16>
    %c0_14 = arith.constant 0 : index
    %c256 = arith.constant 256 : index
    %15 = vector.load %arg12[%c0_14, %c256] : memref<32x3840xbf16, #tpu.memory_space<vmem>>, vector<32x256xbf16>
    tpu.vector_store %arg12[%c0_14, %c256], %14 {strides = array<i32>} : memref<32x3840xbf16, #tpu.memory_space<vmem>>, vector<32x256xbf16>,
    %c0_15 = arith.constant 0 : index
    %c0_16 = arith.constant 0 : index
    %16 = vector.load %arg11[%c0_15, %c0_16] : memref<32x784xbf16, #tpu.memory_space<vmem>>, vector<32x256xbf16>
    %c1 = arith.constant 1 : index
    %c0_17 = arith.constant 0 : index
    %c0_18 = arith.constant 0 : index
    %17 = vector.load %arg2[%c1, %c0_17, %c0_18] : memref<13x256x256xbf16, #tpu.memory_space<vmem>>, vector<1x256x256xbf16>
    %18 = vector.shape_cast %17 : vector<1x256x256xbf16> to vector<256x256xbf16>
    %cst_19 = arith.constant dense<0.000000e+00> : vector<32x256xf32>
    %19 = tpu.matmul %16, %18, %cst_19 {dimension_numbers = #tpu.dot_dimension_numbers<[1], [0], [0], [1], [0, 0, 1, 1], [], []>} : vector<32x256xbf16>, vector<256x256xbf16>, vector<32x256xf32> -> vector<32x256xf32>
    %20 = vector.broadcast %5 : vector<1x256xf32> to vector<32x256xf32>
    %21 = arith.addf %19, %20 : vector<32x256xf32>
    %cst_20 = arith.constant 0.000000e+00 : f32
    %22 = vector.broadcast %cst_20 : f32 to vector<32x256xf32>
    %23 = arith.maximumf %21, %22 : vector<32x256xf32>
    %24 = arith.truncf %23 : vector<32x256xf32> to vector<32x256xbf16>
    %c0_21 = arith.constant 0 : index
    %c512 = arith.constant 512 : index
    %25 = vector.load %arg12[%c0_21, %c512] : memref<32x3840xbf16, #tpu.memory_space<vmem>>, vector<32x256xbf16>
    tpu.vector_store %arg12[%c0_21, %c512], %24 {strides = array<i32>} : memref<32x3840xbf16, #tpu.memory_space<vmem>>, vector<32x256xbf16>,
    %c0_22 = arith.constant 0 : index
    %c0_23 = arith.constant 0 : index
    %26 = vector.load %arg11[%c0_22, %c0_23] : memref<32x784xbf16, #tpu.memory_space<vmem>>, vector<32x256xbf16>
    %c2 = arith.constant 2 : index
    %c0_24 = arith.constant 0 : index
    %c0_25 = arith.constant 0 : index
    %27 = vector.load %arg2[%c2, %c0_24, %c0_25] : memref<13x256x256xbf16, #tpu.memory_space<vmem>>, vector<1x256x256xbf16>
    %28 = vector.shape_cast %27 : vector<1x256x256xbf16> to vector<256x256xbf16>
    %cst_26 = arith.constant dense<0.000000e+00> : vector<32x256xf32>
    %29 = tpu.matmul %26, %28, %cst_26 {dimension_numbers = #tpu.dot_dimension_numbers<[1], [0], [0], [1], [0, 0, 1, 1], [], []>} : vector<32x256xbf16>, vector<256x256xbf16>, vector<32x256xf32> -> vector<32x256xf32>
    %30 = vector.broadcast %5 : vector<1x256xf32> to vector<32x256xf32>
    %31 = arith.addf %29, %30 : vector<32x256xf32>
    %cst_27 = arith.constant 0.000000e+00 : f32
    %32 = vector.broadcast %cst_27 : f32 to vector<32x256xf32>
    %33 = arith.maximumf %31, %32 : vector<32x256xf32>
    %34 = arith.truncf %33 : vector<32x256xf32> to vector<32x256xbf16>
    %c0_28 = arith.constant 0 : index
    %c768 = arith.constant 768 : index
    %35 = vector.load %arg12[%c0_28, %c768] : memref<32x3840xbf16, #tpu.memory_space<vmem>>, vector<32x256xbf16>
    tpu.vector_store %arg12[%c0_28, %c768], %34 {strides = array<i32>} : memref<32x3840xbf16, #tpu.memory_space<vmem>>, vector<32x256xbf16>,
    %c0_29 = arith.constant 0 : index
    %c128 = arith.constant 128 : index
    %36 = vector.load %arg11[%c0_29, %c128] : memref<32x784xbf16, #tpu.memory_space<vmem>>, vector<32x256xbf16>
    %c3 = arith.constant 3 : index
    %c0_30 = arith.constant 0 : index
    %c0_31 = arith.constant 0 : index
    %37 = vector.load %arg2[%c3, %c0_30, %c0_31] : memref<13x256x256xbf16, #tpu.memory_space<vmem>>, vector<1x256x256xbf16>
    %38 = vector.shape_cast %37 : vector<1x256x256xbf16> to vector<256x256xbf16>
    %cst_32 = arith.constant dense<0.000000e+00> : vector<32x256xf32>
    %39 = tpu.matmul %36, %38, %cst_32 {dimension_numbers = #tpu.dot_dimension_numbers<[1], [0], [0], [1], [0, 0, 1, 1], [], []>} : vector<32x256xbf16>, vector<256x256xbf16>, vector<32x256xf32> -> vector<32x256xf32>
    %40 = vector.broadcast %5 : vector<1x256xf32> to vector<32x256xf32>
    %41 = arith.addf %39, %40 : vector<32x256xf32>
    %cst_33 = arith.constant 0.000000e+00 : f32
    %42 = vector.broadcast %cst_33 : f32 to vector<32x256xf32>
    %43 = arith.maximumf %41, %42 : vector<32x256xf32>
    %44 = arith.truncf %43 : vector<32x256xf32> to vector<32x256xbf16>
    %c0_34 = arith.constant 0 : index
    %c1024 = arith.constant 1024 : index
    %45 = vector.load %arg12[%c0_34, %c1024] : memref<32x3840xbf16, #tpu.memory_space<vmem>>, vector<32x256xbf16>
    tpu.vector_store %arg12[%c0_34, %c1024], %44 {strides = array<i32>} : memref<32x3840xbf16, #tpu.memory_space<vmem>>, vector<32x256xbf16>,
    %c0_35 = arith.constant 0 : index
    %c128_36 = arith.constant 128 : index
    %46 = vector.load %arg11[%c0_35, %c128_36] : memref<32x784xbf16, #tpu.memory_space<vmem>>, vector<32x256xbf16>
    %c4 = arith.constant 4 : index
    %c0_37 = arith.constant 0 : index
    %c0_38 = arith.constant 0 : index
    %47 = vector.load %arg2[%c4, %c0_37, %c0_38] : memref<13x256x256xbf16, #tpu.memory_space<vmem>>, vector<1x256x256xbf16>
    %48 = vector.shape_cast %47 : vector<1x256x256xbf16> to vector<256x256xbf16>
    %cst_39 = arith.constant dense<0.000000e+00> : vector<32x256xf32>
    %49 = tpu.matmul %46, %48, %cst_39 {dimension_numbers = #tpu.dot_dimension_numbers<[1], [0], [0], [1], [0, 0, 1, 1], [], []>} : vector<32x256xbf16>, vector<256x256xbf16>, vector<32x256xf32> -> vector<32x256xf32>
    %50 = vector.broadcast %5 : vector<1x256xf32> to vector<32x256xf32>
    %51 = arith.addf %49, %50 : vector<32x256xf32>
    %cst_40 = arith.constant 0.000000e+00 : f32
    %52 = vector.broadcast %cst_40 : f32 to vector<32x256xf32>
    %53 = arith.maximumf %51, %52 : vector<32x256xf32>
    %54 = arith.truncf %53 : vector<32x256xf32> to vector<32x256xbf16>
    %c0_41 = arith.constant 0 : index
    %c1280 = arith.constant 1280 : index
    %55 = vector.load %arg12[%c0_41, %c1280] : memref<32x3840xbf16, #tpu.memory_space<vmem>>, vector<32x256xbf16>
    tpu.vector_store %arg12[%c0_41, %c1280], %54 {strides = array<i32>} : memref<32x3840xbf16, #tpu.memory_space<vmem>>, vector<32x256xbf16>,
    %c0_42 = arith.constant 0 : index
    %c128_43 = arith.constant 128 : index
    %56 = vector.load %arg11[%c0_42, %c128_43] : memref<32x784xbf16, #tpu.memory_space<vmem>>, vector<32x256xbf16>
    %c5 = arith.constant 5 : index
    %c0_44 = arith.constant 0 : index
    %c0_45 = arith.constant 0 : index
    %57 = vector.load %arg2[%c5, %c0_44, %c0_45] : memref<13x256x256xbf16, #tpu.memory_space<vmem>>, vector<1x256x256xbf16>
    %58 = vector.shape_cast %57 : vector<1x256x256xbf16> to vector<256x256xbf16>
    %cst_46 = arith.constant dense<0.000000e+00> : vector<32x256xf32>
    %59 = tpu.matmul %56, %58, %cst_46 {dimension_numbers = #tpu.dot_dimension_numbers<[1], [0], [0], [1], [0, 0, 1, 1], [], []>} : vector<32x256xbf16>, vector<256x256xbf16>, vector<32x256xf32> -> vector<32x256xf32>
    %60 = vector.broadcast %5 : vector<1x256xf32> to vector<32x256xf32>
    %61 = arith.addf %59, %60 : vector<32x256xf32>
    %cst_47 = arith.constant 0.000000e+00 : f32
    %62 = vector.broadcast %cst_47 : f32 to vector<32x256xf32>
    %63 = arith.maximumf %61, %62 : vector<32x256xf32>
    %64 = arith.truncf %63 : vector<32x256xf32> to vector<32x256xbf16>
    %c0_48 = arith.constant 0 : index
    %c1536 = arith.constant 1536 : index
    %65 = vector.load %arg12[%c0_48, %c1536] : memref<32x3840xbf16, #tpu.memory_space<vmem>>, vector<32x256xbf16>
    tpu.vector_store %arg12[%c0_48, %c1536], %64 {strides = array<i32>} : memref<32x3840xbf16, #tpu.memory_space<vmem>>, vector<32x256xbf16>,
    %c0_49 = arith.constant 0 : index
    %c256_50 = arith.constant 256 : index
    %66 = vector.load %arg11[%c0_49, %c256_50] : memref<32x784xbf16, #tpu.memory_space<vmem>>, vector<32x256xbf16>
    %c6 = arith.constant 6 : index
    %c0_51 = arith.constant 0 : index
    %c0_52 = arith.constant 0 : index
    %67 = vector.load %arg2[%c6, %c0_51, %c0_52] : memref<13x256x256xbf16, #tpu.memory_space<vmem>>, vector<1x256x256xbf16>
    %68 = vector.shape_cast %67 : vector<1x256x256xbf16> to vector<256x256xbf16>
    %cst_53 = arith.constant dense<0.000000e+00> : vector<32x256xf32>
    %69 = tpu.matmul %66, %68, %cst_53 {dimension_numbers = #tpu.dot_dimension_numbers<[1], [0], [0], [1], [0, 0, 1, 1], [], []>} : vector<32x256xbf16>, vector<256x256xbf16>, vector<32x256xf32> -> vector<32x256xf32>
    %70 = vector.broadcast %5 : vector<1x256xf32> to vector<32x256xf32>
    %71 = arith.addf %69, %70 : vector<32x256xf32>
    %cst_54 = arith.constant 0.000000e+00 : f32
    %72 = vector.broadcast %cst_54 : f32 to vector<32x256xf32>
    %73 = arith.maximumf %71, %72 : vector<32x256xf32>
    %74 = arith.truncf %73 : vector<32x256xf32> to vector<32x256xbf16>
    %c0_55 = arith.constant 0 : index
    %c1792 = arith.constant 1792 : index
    %75 = vector.load %arg12[%c0_55, %c1792] : memref<32x3840xbf16, #tpu.memory_space<vmem>>, vector<32x256xbf16>
    tpu.vector_store %arg12[%c0_55, %c1792], %74 {strides = array<i32>} : memref<32x3840xbf16, #tpu.memory_space<vmem>>, vector<32x256xbf16>,
    %c0_56 = arith.constant 0 : index
    %c256_57 = arith.constant 256 : index
    %76 = vector.load %arg11[%c0_56, %c256_57] : memref<32x784xbf16, #tpu.memory_space<vmem>>, vector<32x256xbf16>
    %c7 = arith.constant 7 : index
    %c0_58 = arith.constant 0 : index
    %c0_59 = arith.constant 0 : index
    %77 = vector.load %arg2[%c7, %c0_58, %c0_59] : memref<13x256x256xbf16, #tpu.memory_space<vmem>>, vector<1x256x256xbf16>
    %78 = vector.shape_cast %77 : vector<1x256x256xbf16> to vector<256x256xbf16>
    %cst_60 = arith.constant dense<0.000000e+00> : vector<32x256xf32>
    %79 = tpu.matmul %76, %78, %cst_60 {dimension_numbers = #tpu.dot_dimension_numbers<[1], [0], [0], [1], [0, 0, 1, 1], [], []>} : vector<32x256xbf16>, vector<256x256xbf16>, vector<32x256xf32> -> vector<32x256xf32>
    %80 = vector.broadcast %5 : vector<1x256xf32> to vector<32x256xf32>
    %81 = arith.addf %79, %80 : vector<32x256xf32>
    %cst_61 = arith.constant 0.000000e+00 : f32
    %82 = vector.broadcast %cst_61 : f32 to vector<32x256xf32>
    %83 = arith.maximumf %81, %82 : vector<32x256xf32>
    %84 = arith.truncf %83 : vector<32x256xf32> to vector<32x256xbf16>
    %c0_62 = arith.constant 0 : index
    %c2048 = arith.constant 2048 : index
    %85 = vector.load %arg12[%c0_62, %c2048] : memref<32x3840xbf16, #tpu.memory_space<vmem>>, vector<32x256xbf16>
    tpu.vector_store %arg12[%c0_62, %c2048], %84 {strides = array<i32>} : memref<32x3840xbf16, #tpu.memory_space<vmem>>, vector<32x256xbf16>,
    %c0_63 = arith.constant 0 : index
    %c384 = arith.constant 384 : index
    %86 = vector.load %arg11[%c0_63, %c384] : memref<32x784xbf16, #tpu.memory_space<vmem>>, vector<32x256xbf16>
    %c8 = arith.constant 8 : index
    %c0_64 = arith.constant 0 : index
    %c0_65 = arith.constant 0 : index
    %87 = vector.load %arg2[%c8, %c0_64, %c0_65] : memref<13x256x256xbf16, #tpu.memory_space<vmem>>, vector<1x256x256xbf16>
    %88 = vector.shape_cast %87 : vector<1x256x256xbf16> to vector<256x256xbf16>
    %cst_66 = arith.constant dense<0.000000e+00> : vector<32x256xf32>
    %89 = tpu.matmul %86, %88, %cst_66 {dimension_numbers = #tpu.dot_dimension_numbers<[1], [0], [0], [1], [0, 0, 1, 1], [], []>} : vector<32x256xbf16>, vector<256x256xbf16>, vector<32x256xf32> -> vector<32x256xf32>
    %90 = vector.broadcast %5 : vector<1x256xf32> to vector<32x256xf32>
    %91 = arith.addf %89, %90 : vector<32x256xf32>
    %cst_67 = arith.constant 0.000000e+00 : f32
    %92 = vector.broadcast %cst_67 : f32 to vector<32x256xf32>
    %93 = arith.maximumf %91, %92 : vector<32x256xf32>
    %94 = arith.truncf %93 : vector<32x256xf32> to vector<32x256xbf16>
    %c0_68 = arith.constant 0 : index
    %c2304 = arith.constant 2304 : index
    %95 = vector.load %arg12[%c0_68, %c2304] : memref<32x3840xbf16, #tpu.memory_space<vmem>>, vector<32x256xbf16>
    tpu.vector_store %arg12[%c0_68, %c2304], %94 {strides = array<i32>} : memref<32x3840xbf16, #tpu.memory_space<vmem>>, vector<32x256xbf16>,
    %c0_69 = arith.constant 0 : index
    %c384_70 = arith.constant 384 : index
    %96 = vector.load %arg11[%c0_69, %c384_70] : memref<32x784xbf16, #tpu.memory_space<vmem>>, vector<32x256xbf16>
    %c9 = arith.constant 9 : index
    %c0_71 = arith.constant 0 : index
    %c0_72 = arith.constant 0 : index
    %97 = vector.load %arg2[%c9, %c0_71, %c0_72] : memref<13x256x256xbf16, #tpu.memory_space<vmem>>, vector<1x256x256xbf16>
    %98 = vector.shape_cast %97 : vector<1x256x256xbf16> to vector<256x256xbf16>
    %cst_73 = arith.constant dense<0.000000e+00> : vector<32x256xf32>
    %99 = tpu.matmul %96, %98, %cst_73 {dimension_numbers = #tpu.dot_dimension_numbers<[1], [0], [0], [1], [0, 0, 1, 1], [], []>} : vector<32x256xbf16>, vector<256x256xbf16>, vector<32x256xf32> -> vector<32x256xf32>
    %100 = vector.broadcast %5 : vector<1x256xf32> to vector<32x256xf32>
    %101 = arith.addf %99, %100 : vector<32x256xf32>
    %cst_74 = arith.constant 0.000000e+00 : f32
    %102 = vector.broadcast %cst_74 : f32 to vector<32x256xf32>
    %103 = arith.maximumf %101, %102 : vector<32x256xf32>
    %104 = arith.truncf %103 : vector<32x256xf32> to vector<32x256xbf16>
    %c0_75 = arith.constant 0 : index
    %c2560 = arith.constant 2560 : index
    %105 = vector.load %arg12[%c0_75, %c2560] : memref<32x3840xbf16, #tpu.memory_space<vmem>>, vector<32x256xbf16>
    tpu.vector_store %arg12[%c0_75, %c2560], %104 {strides = array<i32>} : memref<32x3840xbf16, #tpu.memory_space<vmem>>, vector<32x256xbf16>,
    %c0_76 = arith.constant 0 : index
    %c512_77 = arith.constant 512 : index
    %106 = vector.load %arg11[%c0_76, %c512_77] : memref<32x784xbf16, #tpu.memory_space<vmem>>, vector<32x256xbf16>
    %c10 = arith.constant 10 : index
    %c0_78 = arith.constant 0 : index
    %c0_79 = arith.constant 0 : index
    %107 = vector.load %arg2[%c10, %c0_78, %c0_79] : memref<13x256x256xbf16, #tpu.memory_space<vmem>>, vector<1x256x256xbf16>
    %108 = vector.shape_cast %107 : vector<1x256x256xbf16> to vector<256x256xbf16>
    %cst_80 = arith.constant dense<0.000000e+00> : vector<32x256xf32>
    %109 = tpu.matmul %106, %108, %cst_80 {dimension_numbers = #tpu.dot_dimension_numbers<[1], [0], [0], [1], [0, 0, 1, 1], [], []>} : vector<32x256xbf16>, vector<256x256xbf16>, vector<32x256xf32> -> vector<32x256xf32>
    %110 = vector.broadcast %5 : vector<1x256xf32> to vector<32x256xf32>
    %111 = arith.addf %109, %110 : vector<32x256xf32>
    %cst_81 = arith.constant 0.000000e+00 : f32
    %112 = vector.broadcast %cst_81 : f32 to vector<32x256xf32>
    %113 = arith.maximumf %111, %112 : vector<32x256xf32>
    %114 = arith.truncf %113 : vector<32x256xf32> to vector<32x256xbf16>
    %c0_82 = arith.constant 0 : index
    %c2816 = arith.constant 2816 : index
    %115 = vector.load %arg12[%c0_82, %c2816] : memref<32x3840xbf16, #tpu.memory_space<vmem>>, vector<32x256xbf16>
    tpu.vector_store %arg12[%c0_82, %c2816], %114 {strides = array<i32>} : memref<32x3840xbf16, #tpu.memory_space<vmem>>, vector<32x256xbf16>,
    %c0_83 = arith.constant 0 : index
    %c512_84 = arith.constant 512 : index
    %116 = vector.load %arg11[%c0_83, %c512_84] : memref<32x784xbf16, #tpu.memory_space<vmem>>, vector<32x256xbf16>
    %c11 = arith.constant 11 : index
    %c0_85 = arith.constant 0 : index
    %c0_86 = arith.constant 0 : index
    %117 = vector.load %arg2[%c11, %c0_85, %c0_86] : memref<13x256x256xbf16, #tpu.memory_space<vmem>>, vector<1x256x256xbf16>
    %118 = vector.shape_cast %117 : vector<1x256x256xbf16> to vector<256x256xbf16>
    %cst_87 = arith.constant dense<0.000000e+00> : vector<32x256xf32>
    %119 = tpu.matmul %116, %118, %cst_87 {dimension_numbers = #tpu.dot_dimension_numbers<[1], [0], [0], [1], [0, 0, 1, 1], [], []>} : vector<32x256xbf16>, vector<256x256xbf16>, vector<32x256xf32> -> vector<32x256xf32>
    %120 = vector.broadcast %5 : vector<1x256xf32> to vector<32x256xf32>
    %121 = arith.addf %119, %120 : vector<32x256xf32>
    %cst_88 = arith.constant 0.000000e+00 : f32
    %122 = vector.broadcast %cst_88 : f32 to vector<32x256xf32>
    %123 = arith.maximumf %121, %122 : vector<32x256xf32>
    %124 = arith.truncf %123 : vector<32x256xf32> to vector<32x256xbf16>
    %c0_89 = arith.constant 0 : index
    %c3072 = arith.constant 3072 : index
    %125 = vector.load %arg12[%c0_89, %c3072] : memref<32x3840xbf16, #tpu.memory_space<vmem>>, vector<32x256xbf16>
    tpu.vector_store %arg12[%c0_89, %c3072], %124 {strides = array<i32>} : memref<32x3840xbf16, #tpu.memory_space<vmem>>, vector<32x256xbf16>,
    %c0_90 = arith.constant 0 : index
    %c512_91 = arith.constant 512 : index
    %126 = vector.load %arg11[%c0_90, %c512_91] : memref<32x784xbf16, #tpu.memory_space<vmem>>, vector<32x256xbf16>
    %c12 = arith.constant 12 : index
    %c0_92 = arith.constant 0 : index
    %c0_93 = arith.constant 0 : index
    %127 = vector.load %arg2[%c12, %c0_92, %c0_93] : memref<13x256x256xbf16, #tpu.memory_space<vmem>>, vector<1x256x256xbf16>
    %128 = vector.shape_cast %127 : vector<1x256x256xbf16> to vector<256x256xbf16>
    %cst_94 = arith.constant dense<0.000000e+00> : vector<32x256xf32>
    %129 = tpu.matmul %126, %128, %cst_94 {dimension_numbers = #tpu.dot_dimension_numbers<[1], [0], [0], [1], [0, 0, 1, 1], [], []>} : vector<32x256xbf16>, vector<256x256xbf16>, vector<32x256xf32> -> vector<32x256xf32>
    %130 = vector.broadcast %5 : vector<1x256xf32> to vector<32x256xf32>
    %131 = arith.addf %129, %130 : vector<32x256xf32>
    %cst_95 = arith.constant 0.000000e+00 : f32
    %132 = vector.broadcast %cst_95 : f32 to vector<32x256xf32>
    %133 = arith.maximumf %131, %132 : vector<32x256xf32>
    %134 = arith.truncf %133 : vector<32x256xf32> to vector<32x256xbf16>
    %c0_96 = arith.constant 0 : index
    %c3328 = arith.constant 3328 : index
    %135 = vector.load %arg12[%c0_96, %c3328] : memref<32x3840xbf16, #tpu.memory_space<vmem>>, vector<32x256xbf16>
    tpu.vector_store %arg12[%c0_96, %c3328], %134 {strides = array<i32>} : memref<32x3840xbf16, #tpu.memory_space<vmem>>, vector<32x256xbf16>,
    %c0_97 = arith.constant 0 : index
    %c0_98 = arith.constant 0 : index
    %136 = vector.load %arg11[%c0_97, %c0_98] : memref<32x784xbf16, #tpu.memory_space<vmem>>, vector<32x784xbf16>
    %c0_99 = arith.constant 0 : index
    %c0_100 = arith.constant 0 : index
    %c0_101 = arith.constant 0 : index
    %137 = vector.load %arg3[%c0_99, %c0_100, %c0_101] : memref<1x784x256xbf16, #tpu.memory_space<vmem>>, vector<1x784x256xbf16>
    %138 = vector.shape_cast %137 : vector<1x784x256xbf16> to vector<784x256xbf16>
    %cst_102 = arith.constant dense<0.000000e+00> : vector<32x256xf32>
    %139 = tpu.matmul %136, %138, %cst_102 {dimension_numbers = #tpu.dot_dimension_numbers<[1], [0], [0], [1], [0, 0, 1, 1], [], []>} : vector<32x784xbf16>, vector<784x256xbf16>, vector<32x256xf32> -> vector<32x256xf32>
    %140 = vector.broadcast %5 : vector<1x256xf32> to vector<32x256xf32>
    %141 = arith.addf %139, %140 : vector<32x256xf32>
    %cst_103 = arith.constant 0.000000e+00 : f32
    %142 = vector.broadcast %cst_103 : f32 to vector<32x256xf32>
    %143 = arith.maximumf %141, %142 : vector<32x256xf32>
    %144 = arith.truncf %143 : vector<32x256xf32> to vector<32x256xbf16>
    %c0_104 = arith.constant 0 : index
    %c3584 = arith.constant 3584 : index
    %145 = vector.load %arg12[%c0_104, %c3584] : memref<32x3840xbf16, #tpu.memory_space<vmem>>, vector<32x256xbf16>
    tpu.vector_store %arg12[%c0_104, %c3584], %144 {strides = array<i32>} : memref<32x3840xbf16, #tpu.memory_space<vmem>>, vector<32x256xbf16>,
    %c0_105 = arith.constant 0 : index
    %c0_106 = arith.constant 0 : index
    %146 = vector.load %arg6[%c0_105, %c0_106] : memref<1x128xf32, #tpu.memory_space<vmem>>, vector<1x128xf32>
    %c0_107 = arith.constant 0 : index
    %c0_108 = arith.constant 0 : index
    %147 = vector.load %arg12[%c0_107, %c0_108] : memref<32x3840xbf16, #tpu.memory_space<vmem>>, vector<32x768xbf16>
    %c0_109 = arith.constant 0 : index
    %c0_110 = arith.constant 0 : index
    %c0_111 = arith.constant 0 : index
    %148 = vector.load %arg5[%c0_109, %c0_110, %c0_111] : memref<7x768x128xbf16, #tpu.memory_space<vmem>>, vector<1x768x128xbf16>
    %149 = vector.shape_cast %148 : vector<1x768x128xbf16> to vector<768x128xbf16>
    %cst_112 = arith.constant dense<0.000000e+00> : vector<32x128xf32>
    %150 = tpu.matmul %147, %149, %cst_112 {dimension_numbers = #tpu.dot_dimension_numbers<[1], [0], [0], [1], [0, 0, 1, 1], [], []>} : vector<32x768xbf16>, vector<768x128xbf16>, vector<32x128xf32> -> vector<32x128xf32>
    %151 = vector.broadcast %146 : vector<1x128xf32> to vector<32x128xf32>
    %152 = arith.addf %150, %151 : vector<32x128xf32>
    %cst_113 = arith.constant 0.000000e+00 : f32
    %153 = vector.broadcast %cst_113 : f32 to vector<32x128xf32>
    %154 = arith.maximumf %152, %153 : vector<32x128xf32>
    %155 = arith.truncf %154 : vector<32x128xf32> to vector<32x128xbf16>
    %c0_114 = arith.constant 0 : index
    %c0_115 = arith.constant 0 : index
    %156 = vector.load %arg13[%c0_114, %c0_115] : memref<32x896xbf16, #tpu.memory_space<vmem>>, vector<32x128xbf16>
    tpu.vector_store %arg13[%c0_114, %c0_115], %155 {strides = array<i32>} : memref<32x896xbf16, #tpu.memory_space<vmem>>, vector<32x128xbf16>,
    %c0_116 = arith.constant 0 : index
    %c512_117 = arith.constant 512 : index
    %157 = vector.load %arg12[%c0_116, %c512_117] : memref<32x3840xbf16, #tpu.memory_space<vmem>>, vector<32x768xbf16>
    %c1_118 = arith.constant 1 : index
    %c0_119 = arith.constant 0 : index
    %c0_120 = arith.constant 0 : index
    %158 = vector.load %arg5[%c1_118, %c0_119, %c0_120] : memref<7x768x128xbf16, #tpu.memory_space<vmem>>, vector<1x768x128xbf16>
    %159 = vector.shape_cast %158 : vector<1x768x128xbf16> to vector<768x128xbf16>
    %cst_121 = arith.constant dense<0.000000e+00> : vector<32x128xf32>
    %160 = tpu.matmul %157, %159, %cst_121 {dimension_numbers = #tpu.dot_dimension_numbers<[1], [0], [0], [1], [0, 0, 1, 1], [], []>} : vector<32x768xbf16>, vector<768x128xbf16>, vector<32x128xf32> -> vector<32x128xf32>
    %161 = vector.broadcast %146 : vector<1x128xf32> to vector<32x128xf32>
    %162 = arith.addf %160, %161 : vector<32x128xf32>
    %cst_122 = arith.constant 0.000000e+00 : f32
    %163 = vector.broadcast %cst_122 : f32 to vector<32x128xf32>
    %164 = arith.maximumf %162, %163 : vector<32x128xf32>
    %165 = arith.truncf %164 : vector<32x128xf32> to vector<32x128xbf16>
    %c0_123 = arith.constant 0 : index
    %c128_124 = arith.constant 128 : index
    %166 = vector.load %arg13[%c0_123, %c128_124] : memref<32x896xbf16, #tpu.memory_space<vmem>>, vector<32x128xbf16>
    tpu.vector_store %arg13[%c0_123, %c128_124], %165 {strides = array<i32>} : memref<32x896xbf16, #tpu.memory_space<vmem>>, vector<32x128xbf16>,
    %c0_125 = arith.constant 0 : index
    %c1024_126 = arith.constant 1024 : index
    %167 = vector.load %arg12[%c0_125, %c1024_126] : memref<32x3840xbf16, #tpu.memory_space<vmem>>, vector<32x768xbf16>
    %c2_127 = arith.constant 2 : index
    %c0_128 = arith.constant 0 : index
    %c0_129 = arith.constant 0 : index
    %168 = vector.load %arg5[%c2_127, %c0_128, %c0_129] : memref<7x768x128xbf16, #tpu.memory_space<vmem>>, vector<1x768x128xbf16>
    %169 = vector.shape_cast %168 : vector<1x768x128xbf16> to vector<768x128xbf16>
    %cst_130 = arith.constant dense<0.000000e+00> : vector<32x128xf32>
    %170 = tpu.matmul %167, %169, %cst_130 {dimension_numbers = #tpu.dot_dimension_numbers<[1], [0], [0], [1], [0, 0, 1, 1], [], []>} : vector<32x768xbf16>, vector<768x128xbf16>, vector<32x128xf32> -> vector<32x128xf32>
    %171 = vector.broadcast %146 : vector<1x128xf32> to vector<32x128xf32>
    %172 = arith.addf %170, %171 : vector<32x128xf32>
    %cst_131 = arith.constant 0.000000e+00 : f32
    %173 = vector.broadcast %cst_131 : f32 to vector<32x128xf32>
    %174 = arith.maximumf %172, %173 : vector<32x128xf32>
    %175 = arith.truncf %174 : vector<32x128xf32> to vector<32x128xbf16>
    %c0_132 = arith.constant 0 : index
    %c256_133 = arith.constant 256 : index
    %176 = vector.load %arg13[%c0_132, %c256_133] : memref<32x896xbf16, #tpu.memory_space<vmem>>, vector<32x128xbf16>
    tpu.vector_store %arg13[%c0_132, %c256_133], %175 {strides = array<i32>} : memref<32x896xbf16, #tpu.memory_space<vmem>>, vector<32x128xbf16>,
    %c0_134 = arith.constant 0 : index
    %c1536_135 = arith.constant 1536 : index
    %177 = vector.load %arg12[%c0_134, %c1536_135] : memref<32x3840xbf16, #tpu.memory_space<vmem>>, vector<32x768xbf16>
    %c3_136 = arith.constant 3 : index
    %c0_137 = arith.constant 0 : index
    %c0_138 = arith.constant 0 : index
    %178 = vector.load %arg5[%c3_136, %c0_137, %c0_138] : memref<7x768x128xbf16, #tpu.memory_space<vmem>>, vector<1x768x128xbf16>
    %179 = vector.shape_cast %178 : vector<1x768x128xbf16> to vector<768x128xbf16>
    %cst_139 = arith.constant dense<0.000000e+00> : vector<32x128xf32>
    %180 = tpu.matmul %177, %179, %cst_139 {dimension_numbers = #tpu.dot_dimension_numbers<[1], [0], [0], [1], [0, 0, 1, 1], [], []>} : vector<32x768xbf16>, vector<768x128xbf16>, vector<32x128xf32> -> vector<32x128xf32>
    %181 = vector.broadcast %146 : vector<1x128xf32> to vector<32x128xf32>
    %182 = arith.addf %180, %181 : vector<32x128xf32>
    %cst_140 = arith.constant 0.000000e+00 : f32
    %183 = vector.broadcast %cst_140 : f32 to vector<32x128xf32>
    %184 = arith.maximumf %182, %183 : vector<32x128xf32>
    %185 = arith.truncf %184 : vector<32x128xf32> to vector<32x128xbf16>
    %c0_141 = arith.constant 0 : index
    %c384_142 = arith.constant 384 : index
    %186 = vector.load %arg13[%c0_141, %c384_142] : memref<32x896xbf16, #tpu.memory_space<vmem>>, vector<32x128xbf16>
    tpu.vector_store %arg13[%c0_141, %c384_142], %185 {strides = array<i32>} : memref<32x896xbf16, #tpu.memory_space<vmem>>, vector<32x128xbf16>,
    %c0_143 = arith.constant 0 : index
    %c2048_144 = arith.constant 2048 : index
    %187 = vector.load %arg12[%c0_143, %c2048_144] : memref<32x3840xbf16, #tpu.memory_space<vmem>>, vector<32x768xbf16>
    %c4_145 = arith.constant 4 : index
    %c0_146 = arith.constant 0 : index
    %c0_147 = arith.constant 0 : index
    %188 = vector.load %arg5[%c4_145, %c0_146, %c0_147] : memref<7x768x128xbf16, #tpu.memory_space<vmem>>, vector<1x768x128xbf16>
    %189 = vector.shape_cast %188 : vector<1x768x128xbf16> to vector<768x128xbf16>
    %cst_148 = arith.constant dense<0.000000e+00> : vector<32x128xf32>
    %190 = tpu.matmul %187, %189, %cst_148 {dimension_numbers = #tpu.dot_dimension_numbers<[1], [0], [0], [1], [0, 0, 1, 1], [], []>} : vector<32x768xbf16>, vector<768x128xbf16>, vector<32x128xf32> -> vector<32x128xf32>
    %191 = vector.broadcast %146 : vector<1x128xf32> to vector<32x128xf32>
    %192 = arith.addf %190, %191 : vector<32x128xf32>
    %cst_149 = arith.constant 0.000000e+00 : f32
    %193 = vector.broadcast %cst_149 : f32 to vector<32x128xf32>
    %194 = arith.maximumf %192, %193 : vector<32x128xf32>
    %195 = arith.truncf %194 : vector<32x128xf32> to vector<32x128xbf16>
    %c0_150 = arith.constant 0 : index
    %c512_151 = arith.constant 512 : index
    %196 = vector.load %arg13[%c0_150, %c512_151] : memref<32x896xbf16, #tpu.memory_space<vmem>>, vector<32x128xbf16>
    tpu.vector_store %arg13[%c0_150, %c512_151], %195 {strides = array<i32>} : memref<32x896xbf16, #tpu.memory_space<vmem>>, vector<32x128xbf16>,
    %c0_152 = arith.constant 0 : index
    %c2560_153 = arith.constant 2560 : index
    %197 = vector.load %arg12[%c0_152, %c2560_153] : memref<32x3840xbf16, #tpu.memory_space<vmem>>, vector<32x768xbf16>
    %c5_154 = arith.constant 5 : index
    %c0_155 = arith.constant 0 : index
    %c0_156 = arith.constant 0 : index
    %198 = vector.load %arg5[%c5_154, %c0_155, %c0_156] : memref<7x768x128xbf16, #tpu.memory_space<vmem>>, vector<1x768x128xbf16>
    %199 = vector.shape_cast %198 : vector<1x768x128xbf16> to vector<768x128xbf16>
    %cst_157 = arith.constant dense<0.000000e+00> : vector<32x128xf32>
    %200 = tpu.matmul %197, %199, %cst_157 {dimension_numbers = #tpu.dot_dimension_numbers<[1], [0], [0], [1], [0, 0, 1, 1], [], []>} : vector<32x768xbf16>, vector<768x128xbf16>, vector<32x128xf32> -> vector<32x128xf32>
    %201 = vector.broadcast %146 : vector<1x128xf32> to vector<32x128xf32>
    %202 = arith.addf %200, %201 : vector<32x128xf32>
    %cst_158 = arith.constant 0.000000e+00 : f32
    %203 = vector.broadcast %cst_158 : f32 to vector<32x128xf32>
    %204 = arith.maximumf %202, %203 : vector<32x128xf32>
    %205 = arith.truncf %204 : vector<32x128xf32> to vector<32x128xbf16>
    %c0_159 = arith.constant 0 : index
    %c640 = arith.constant 640 : index
    %206 = vector.load %arg13[%c0_159, %c640] : memref<32x896xbf16, #tpu.memory_space<vmem>>, vector<32x128xbf16>
    tpu.vector_store %arg13[%c0_159, %c640], %205 {strides = array<i32>} : memref<32x896xbf16, #tpu.memory_space<vmem>>, vector<32x128xbf16>,
    %c0_160 = arith.constant 0 : index
    %c3072_161 = arith.constant 3072 : index
    %207 = vector.load %arg12[%c0_160, %c3072_161] : memref<32x3840xbf16, #tpu.memory_space<vmem>>, vector<32x768xbf16>
    %c6_162 = arith.constant 6 : index
    %c0_163 = arith.constant 0 : index
    %c0_164 = arith.constant 0 : index
    %208 = vector.load %arg5[%c6_162, %c0_163, %c0_164] : memref<7x768x128xbf16, #tpu.memory_space<vmem>>, vector<1x768x128xbf16>
    %209 = vector.shape_cast %208 : vector<1x768x128xbf16> to vector<768x128xbf16>
    %cst_165 = arith.constant dense<0.000000e+00> : vector<32x128xf32>
    %210 = tpu.matmul %207, %209, %cst_165 {dimension_numbers = #tpu.dot_dimension_numbers<[1], [0], [0], [1], [0, 0, 1, 1], [], []>} : vector<32x768xbf16>, vector<768x128xbf16>, vector<32x128xf32> -> vector<32x128xf32>
    %211 = vector.broadcast %146 : vector<1x128xf32> to vector<32x128xf32>
    %212 = arith.addf %210, %211 : vector<32x128xf32>
    %cst_166 = arith.constant 0.000000e+00 : f32
    %213 = vector.broadcast %cst_166 : f32 to vector<32x128xf32>
    %214 = arith.maximumf %212, %213 : vector<32x128xf32>
    %215 = arith.truncf %214 : vector<32x128xf32> to vector<32x128xbf16>
    %c0_167 = arith.constant 0 : index
    %c768_168 = arith.constant 768 : index
    %216 = vector.load %arg13[%c0_167, %c768_168] : memref<32x896xbf16, #tpu.memory_space<vmem>>, vector<32x128xbf16>
    tpu.vector_store %arg13[%c0_167, %c768_168], %215 {strides = array<i32>} : memref<32x896xbf16, #tpu.memory_space<vmem>>, vector<32x128xbf16>,
    %c0_169 = arith.constant 0 : index
    %c0_170 = arith.constant 0 : index
    %217 = vector.load %arg13[%c0_169, %c0_170] : memref<32x896xbf16, #tpu.memory_space<vmem>>, vector<32x896xbf16>
    %c0_171 = arith.constant 0 : index
    %c0_172 = arith.constant 0 : index
    %218 = vector.load %arg7[%c0_171, %c0_172] : memref<896x256xbf16, #tpu.memory_space<vmem>>, vector<896x256xbf16>
    %cst_173 = arith.constant dense<0.000000e+00> : vector<32x256xf32>
    %219 = tpu.matmul %217, %218, %cst_173 {dimension_numbers = #tpu.dot_dimension_numbers<[1], [0], [0], [1], [0, 0, 1, 1], [], []>} : vector<32x896xbf16>, vector<896x256xbf16>, vector<32x256xf32> -> vector<32x256xf32>
    %c0_174 = arith.constant 0 : index
    %c0_175 = arith.constant 0 : index
    %220 = vector.load %arg8[%c0_174, %c0_175] : memref<1x256xf32, #tpu.memory_space<vmem>>, vector<1x256xf32>
    %221 = vector.broadcast %220 : vector<1x256xf32> to vector<32x256xf32>
    %222 = arith.addf %219, %221 : vector<32x256xf32>
    %cst_176 = arith.constant 0.000000e+00 : f32
    %223 = vector.broadcast %cst_176 : f32 to vector<32x256xf32>
    %224 = arith.maximumf %222, %223 : vector<32x256xf32>
    %c0_177 = arith.constant 0 : index
    %c0_178 = arith.constant 0 : index
    %225 = vector.load %arg9[%c0_177, %c0_178] : memref<256x128xf32, #tpu.memory_space<vmem>>, vector<256x128xf32>
    %cst_179 = arith.constant dense<0.000000e+00> : vector<32x128xf32>
    %226 = tpu.matmul %224, %225, %cst_179 {dimension_numbers = #tpu.dot_dimension_numbers<[1], [0], [0], [1], [0, 0, 1, 1], [], []>} : vector<32x256xf32>, vector<256x128xf32>, vector<32x128xf32> -> vector<32x128xf32>
    %c0_180 = arith.constant 0 : index
    %c0_181 = arith.constant 0 : index
    %227 = vector.load %arg10[%c0_180, %c0_181] : memref<32x128xf32, #tpu.memory_space<vmem>>, vector<32x128xf32>
    tpu.vector_store %arg10[%c0_180, %c0_181], %226 {strides = array<i32>} : memref<32x128xf32, #tpu.memory_space<vmem>>, vector<32x128xf32>,
    return
  }
  func.func @transform_0(%arg0: i32) -> (i32, i32) {
    %c0_i32 = arith.constant 0 : i32
    %c0_i32_0 = arith.constant 0 : i32
    return %arg0, %c0_i32 : i32, i32
  }
  func.func @transform_1(%arg0: i32) -> (i32, i32, i32) {
    %c0_i32 = arith.constant 0 : i32
    %c0_i32_0 = arith.constant 0 : i32
    %c0_i32_1 = arith.constant 0 : i32
    %c0_i32_2 = arith.constant 0 : i32
    return %c0_i32, %c0_i32_0, %c0_i32_1 : i32, i32, i32
  }
  func.func @transform_2(%arg0: i32) -> (i32, i32, i32) {
    %c0_i32 = arith.constant 0 : i32
    %c0_i32_0 = arith.constant 0 : i32
    %c0_i32_1 = arith.constant 0 : i32
    %c0_i32_2 = arith.constant 0 : i32
    return %c0_i32, %c0_i32_0, %c0_i32_1 : i32, i32, i32
  }
  func.func @transform_3(%arg0: i32) -> (i32, i32) {
    %c0_i32 = arith.constant 0 : i32
    %c0_i32_0 = arith.constant 0 : i32
    %c0_i32_1 = arith.constant 0 : i32
    return %c0_i32, %c0_i32_0 : i32, i32
  }
  func.func @transform_4(%arg0: i32) -> (i32, i32, i32) {
    %c0_i32 = arith.constant 0 : i32
    %c0_i32_0 = arith.constant 0 : i32
    %c0_i32_1 = arith.constant 0 : i32
    %c0_i32_2 = arith.constant 0 : i32
    return %c0_i32, %c0_i32_0, %c0_i32_1 : i32, i32, i32
  }
  func.func @transform_5(%arg0: i32) -> (i32, i32) {
    %c0_i32 = arith.constant 0 : i32
    %c0_i32_0 = arith.constant 0 : i32
    %c0_i32_1 = arith.constant 0 : i32
    return %c0_i32, %c0_i32_0 : i32, i32
  }
  func.func @transform_6(%arg0: i32) -> (i32, i32) {
    %c0_i32 = arith.constant 0 : i32
    %c0_i32_0 = arith.constant 0 : i32
    %c0_i32_1 = arith.constant 0 : i32
    return %c0_i32, %c0_i32_0 : i32, i32
  }
  func.func @transform_7(%arg0: i32) -> (i32, i32) {
    %c0_i32 = arith.constant 0 : i32
    %c0_i32_0 = arith.constant 0 : i32
    %c0_i32_1 = arith.constant 0 : i32
    return %c0_i32, %c0_i32_0 : i32, i32
  }
  func.func @transform_8(%arg0: i32) -> (i32, i32) {
    %c0_i32 = arith.constant 0 : i32
    %c0_i32_0 = arith.constant 0 : i32
    %c0_i32_1 = arith.constant 0 : i32
    return %c0_i32, %c0_i32_0 : i32, i32
  }
  func.func @transform_9(%arg0: i32) -> (i32, i32) {
    %c0_i32 = arith.constant 0 : i32
    %c0_i32_0 = arith.constant 0 : i32
    return %arg0, %c0_i32 : i32, i32
  }
}

</mosaic_0001>

<bundles_post_ra>
// kernel: mnist_cnn_forward.1
= control target key start
LH: loop header
LB: loop body
LE: loop exit
PB: predicated region body
PF: predicated region fallthrough
CT: control target
= control target key end

     0   :  { %14 = vsyncpa [#allocation6], 0  ;;  %s17172_s0 = inlined_call_operand.vmem [shape: f32[32,784], index: 0, kind: input, shape index: {}]   ;;  %s17173_s1 = inlined_call_operand.hbm [shape: bf16[13,256,256], index: 1, kind: input, shape index: {}]   ;;  %s17174_s2 = inlined_call_operand.hbm [shape: bf16[1,784,256], index: 2, kind: input, shape index: {}]   ;;  %s17175_s3 = inlined_call_operand.hbm [shape: f32[1,256], index: 3, kind: input, shape index: {}]   ;;  %s17176_s4 = inlined_call_operand.hbm [shape: bf16[7,768,128], index: 4, kind: input, shape index: {}]   ;;  %s17177_s5 = inlined_call_operand.hbm [shape: f32[1,128], index: 5, kind: input, shape index: {}]   ;;  %s17178_s6 = inlined_call_operand.hbm [shape: bf16[896,256], index: 6, kind: input, shape index: {}]   ;;  %s17179_s7 = inlined_call_operand.hbm [shape: f32[1,256], index: 7, kind: input, shape index: {}]   ;;  %s17180_s8 = inlined_call_operand.hbm [shape: f32[256,128], index: 8, kind: input, shape index: {}]   ;;  %s17181_s9 = inlined_call_operand.vmem [shape: f32[32,128], index: 9, kind: output, shape index: {}]  }
   0x1   :  { %15 = vsyncpa [#allocation8], 0 }
   0x2   :  { %16 = vsyncpa [#allocation11], 0 }
   0x3   :  { %17 = vsyncpa [#allocation14], 0 }
   0x4   :  { %18 = vsyncpa [#allocation17], 0  ;;  %s38_s11 = sshll.u32 %s17174_s2, 4  ;;  %s16281_s12 = smov [#allocation7]   ;;  %s39_s11 = int_to_ptr.hbm [resolvable:$true] %s38_s11 }
   0x5   :  { %s40_s13 = sshll.u32 %s16281_s12, 4  ;;  %s62_s16 = sshll.u32 %s17176_s4, 4  ;;  %s41_s13 = int_to_ptr.vmem [resolvable:$true] %s40_s13  ;;  %s63_s16 = int_to_ptr.hbm [resolvable:$true] %s62_s16 }
   0x6   :  { %s16282_s17 = smov 128   ;;  %s16283_s18 = smov 8  }
   0x7   :  { %46 = dma.hbm_to_vmem [thread:$0]  %s39_s11, 12544, %s41_s13, [#allocation8], %s16282_s17, %s16282_s17, %s16283_s18  }
   0x8   :  { %s16284_s19 = smov [#allocation10]   ;;  %s16285_s21 = smov 64  }
   0x9   :  { %s64_s20 = sshll.u32 %s16284_s19, 4  ;;  %s16286_s2 = smov 4   ;;  %s65_s20 = int_to_ptr.vmem [resolvable:$true] %s64_s20 }
   0xa   :  { %70 = dma.hbm_to_vmem [thread:$0]  %s63_s16, 43008, %s65_s20, [#allocation11], %s16285_s21, %s16285_s21, %s16286_s2  }
   0xb   :  { %s86_s24 = sshll.u32 %s17178_s6, 4  ;;  %s16287_s25 = smov [#allocation13]   ;;  %s87_s24 = int_to_ptr.hbm [resolvable:$true] %s86_s24 }
   0xc   :  { %s88_s4 = sshll.u32 %s16287_s25, 4  ;;  %s25_s28 = sshll.u32 %s17173_s1, 4  ;;  %s89_s4 = int_to_ptr.vmem [resolvable:$true] %s88_s4  ;;  %s26_s28 = int_to_ptr.hbm [resolvable:$true] %s25_s28 }
   0xd   :  { %94 = dma.hbm_to_vmem [thread:$0]  %s87_s24, 14336, %s89_s4, [#allocation14], %s16282_s17, %s16282_s17, %s16283_s18  }
   0xe   :  { %s16288_s29 = smov [#allocation5]   ;;  %s52_s12 = sshll.u32 %s17175_s3, 4  ;;  %s53_s12 = int_to_ptr.hbm [resolvable:$true] %s52_s12 }
   0xf   :  { %s27_s30 = sshll.u32 %s16288_s29, 4  ;;  %s76_s1 = sshll.u32 %s17177_s5, 4  ;;  %s28_s30 = int_to_ptr.vmem [resolvable:$true] %s27_s30  ;;  %s77_s1 = int_to_ptr.hbm [resolvable:$true] %s76_s1 }
  0x10   :  { %33 = dma.hbm_to_vmem [thread:$0]  %s26_s28, 53248, %s28_s30, [#allocation6], %s16282_s17, %s16282_s17, %s16283_s18  }
  0x11   :  { %s16289_s14 = smov [#allocation9]   ;;  %s16290_s16 = smov [#allocation12]  }
  0x12   :  { %s54_s15 = sshll.u32 %s16289_s14, 4  ;;  %s78_s19 = sshll.u32 %s16290_s16, 4  ;;  %s55_s15 = int_to_ptr.vmem [resolvable:$true] %s54_s15  ;;  %s79_s19 = int_to_ptr.vmem [resolvable:$true] %s78_s19 }
  0x13   :  { %57 = dma.hbm_to_vmem [thread:$0]  %s53_s12, 32, %s55_s15, [#allocation8]  }
  0x14   :  { %s100_s3 = sshll.u32 %s17179_s7, 4  ;;  %s110_s23 = sshll.u32 %s17180_s8, 4  ;;  %s101_s3 = int_to_ptr.hbm [resolvable:$true] %s100_s3  ;;  %s111_s23 = int_to_ptr.hbm [resolvable:$true] %s110_s23 }
  0x15   :  { %81 = dma.hbm_to_vmem [thread:$0]  %s77_s1, 16, %s79_s19, [#allocation11]  }
  0x16   :  { %s16291_s24 = smov [#allocation15]   ;;  %s16292_s25 = smov [#allocation16]  }
  0x17   :  { %s102_s5 = sshll.u32 %s16291_s24, 4  ;;  %s112_s4 = sshll.u32 %s16292_s25, 4  ;;  %s103_s5 = int_to_ptr.vmem [resolvable:$true] %s102_s5  ;;  %s113_s4 = int_to_ptr.vmem [resolvable:$true] %s112_s4 }
  0x18   :  { %105 = dma.hbm_to_vmem [thread:$0]  %s101_s3, 32, %s103_s5, [#allocation14]  }
  0x19   :  { %118 = dma.hbm_to_vmem [thread:$0]  %s111_s23, 4096, %s113_s4, [#allocation17], %s16282_s17, %s16282_s17, %s16283_s18  }
  0x1a   :  { %16271 = dma.done.wait [#allocation6], 53248  }
  0x1b   :  { %16272 = vsyncadd [#allocation6], 4294914048 }
  0x1c   :  { %16273 = dma.done.wait [#allocation8], 12576  }
  0x1d   :  { %16274 = vsyncadd [#allocation8], 4294954720 }
  0x1e   :  { %16275 = dma.done.wait [#allocation11], 43024  }
  0x1f   :  { %16276 = vsyncadd [#allocation11], 4294924272 }
  0x20   :  { %16277 = dma.done.wait [#allocation14], 14368  }
  0x21   :  { %16278 = vsyncadd [#allocation14], 4294952928 }
  0x22   :  { %16279 = dma.done.wait [#allocation17], 4096  }
  0x23   :  { %16280 = vsyncadd [#allocation17], 4294963200  ;;  %v10503_v0 = vld [vmem:[#allocation5 + $0x70] sm:$0xf]  ;;  %v14956_v1 = vld [vmem:[#allocation5 + $0x74] sm:$0xf0] }
  0x24   :  { %v10567_v2 = vld [vmem:[#allocation5 + $0xf0] sm:$0xf]  ;;  %v10504_v3 = vor.u32 %v14956_v1, %v10503_v0  ;;  %v14972_v4 = vld [vmem:[#allocation5 + $0xf4] sm:$0xf0]  ;;  %v14955_v5 = vld [vmem:[#allocation5 + $0x74] sm:$0xf] }
  0x25   :  { %v10505_v6 = vld [vmem:[#allocation5 + $0x78] sm:$0xf0]  ;;  %v10568_v7 = vor.u32 %v14972_v4, %v10567_v2  ;;  %v14971_v9 = vld [vmem:[#allocation5 + $0xf4] sm:$0xf]  ;;  %v10495_v11 = vld [vmem:[#allocation5 + $0x60] sm:$0xf] }
  0x26   :  { %v10508_v8 = vor.u32 %v14955_v5, %v10505_v6  ;;  %v10569_v10 = vld [vmem:[#allocation5 + $0xf8] sm:$0xf0]  ;;  %439 = vmatpush.bf16.msra.mxu0 %v10504_v3  ;;  %v14954_v13 = vld [vmem:[#allocation5 + $0x64] sm:$0xf0]  ;;  %v10559_v14 = vld [vmem:[#allocation5 + $0xe0] sm:$0xf] }
  0x27   :  { %v10572_v12 = vor.u32 %v14971_v9, %v10569_v10  ;;  %v14970_v15 = vld [vmem:[#allocation5 + $0xe4] sm:$0xf0]  ;;  %458 = vmatpush.bf16.msra.mxu1 %v10568_v7  ;;  %v10496_v16 = vor.u32 %v14954_v13, %v10495_v11  ;;  %v14953_v18 = vld [vmem:[#allocation5 + $0x64] sm:$0xf]  ;;  %v10497_v19 = vld [vmem:[#allocation5 + $0x68] sm:$0xf0] }
  0x28   :  { %477 = vmatpush.bf16.msra.mxu2 %v10508_v8  ;;  %v10560_v17 = vor.u32 %v14970_v15, %v10559_v14  ;;  %v14969_v20 = vld [vmem:[#allocation5 + $0xe4] sm:$0xf]  ;;  %v10500_v21 = vor.u32 %v14953_v18, %v10497_v19  ;;  %v10561_v22 = vld [vmem:[#allocation5 + $0xe8] sm:$0xf0]  ;;  %v10487_v23 = vld [vmem:[#allocation5 + $0x50] sm:$0xf] }
  0x29   :  { %496 = vmatpush.bf16.msra.mxu3 %v10572_v12  ;;  %v14952_v24 = vld [vmem:[#allocation5 + $0x54] sm:$0xf0]  ;;  %v10564_v25 = vor.u32 %v14969_v20, %v10561_v22  ;;  %v10551_v26 = vld [vmem:[#allocation5 + $0xd0] sm:$0xf]  ;;  %v14951_v28 = vld [vmem:[#allocation5 + $0x54] sm:$0xf] }
  0x2a   :  { %v14968_v27 = vld [vmem:[#allocation5 + $0xd4] sm:$0xf0]  ;;  %440 = vmatpush.bf16.msra.mxu0 %v10496_v16  ;;  %v10488_v29 = vor.u32 %v14952_v24, %v10487_v23  ;;  %v10489_v30 = vld [vmem:[#allocation5 + $0x58] sm:$0xf0]  ;;  %v14967_v31 = vld [vmem:[#allocation5 + $0xd4] sm:$0xf] }
  0x2b   :  { %v10553_v32 = vld [vmem:[#allocation5 + $0xd8] sm:$0xf0]  ;;  %459 = vmatpush.bf16.msra.mxu1 %v10560_v17  ;;  %v10552_v33 = vor.u32 %v14968_v27, %v10551_v26  ;;  %v10492_v34 = vor.u32 %v14951_v28, %v10489_v30  ;;  %v10479_v35 = vld [vmem:[#allocation5 + $0x40] sm:$0xf]  ;;  %v14950_v36 = vld [vmem:[#allocation5 + $0x44] sm:$0xf0] }
  0x2c   :  { %478 = vmatpush.bf16.msra.mxu2 %v10500_v21  ;;  %v10543_v37 = vld [vmem:[#allocation5 + $0xc0] sm:$0xf]  ;;  %v10556_v38 = vor.u32 %v14967_v31, %v10553_v32  ;;  %v14966_v39 = vld [vmem:[#allocation5 + $0xc4] sm:$0xf0]  ;;  %v14949_v40 = vld [vmem:[#allocation5 + $0x44] sm:$0xf]  ;;  %v10480_v44 = vor.u32 %v14950_v36, %v10479_v35 }
  0x2d   :  { %497 = vmatpush.bf16.msra.mxu3 %v10564_v25  ;;  %v10481_v41 = vld [vmem:[#allocation5 + $0x48] sm:$0xf0]  ;;  %v14965_v42 = vld [vmem:[#allocation5 + $0xc4] sm:$0xf]  ;;  %v10544_v45 = vor.u32 %v14966_v39, %v10543_v37  ;;  %v10471_v47 = vld [vmem:[#allocation5 + $0x30] sm:$0xf] }
  0x2e   :  { %v10545_v43 = vld [vmem:[#allocation5 + $0xc8] sm:$0xf0]  ;;  %441 = vmatpush.bf16.msra.mxu0 %v10488_v29  ;;  %v10484_v46 = vor.u32 %v14949_v40, %v10481_v41  ;;  %v14948_v48 = vld [vmem:[#allocation5 + $0x34] sm:$0xf0]  ;;  %v10535_v49 = vld [vmem:[#allocation5 + $0xb0] sm:$0xf] }
  0x2f   :  { %460 = vmatpush.bf16.msra.mxu1 %v10552_v33  ;;  %v10548_v50 = vor.u32 %v14965_v42, %v10545_v43  ;;  %v14964_v51 = vld [vmem:[#allocation5 + $0xb4] sm:$0xf0]  ;;  %v14947_v52 = vld [vmem:[#allocation5 + $0x34] sm:$0xf]  ;;  %v10473_v53 = vld [vmem:[#allocation5 + $0x38] sm:$0xf0]  ;;  %v10472_v56 = vor.u32 %v14948_v48, %v10471_v47 }
  0x30   :  { %479 = vmatpush.bf16.msra.mxu2 %v10492_v34  ;;  %v14963_v54 = vld [vmem:[#allocation5 + $0xb4] sm:$0xf]  ;;  %v10537_v55 = vld [vmem:[#allocation5 + $0xb8] sm:$0xf0]  ;;  %v10536_v57 = vor.u32 %v14964_v51, %v10535_v49  ;;  %v10476_v58 = vor.u32 %v14947_v52, %v10473_v53  ;;  %v10463_v59 = vld [vmem:[#allocation5 + $0x20] sm:$0xf] }
  0x31   :  { %498 = vmatpush.bf16.msra.mxu3 %v10556_v38  ;;  %v14946_v60 = vld [vmem:[#allocation5 + $0x24] sm:$0xf0]  ;;  %v10527_v61 = vld [vmem:[#allocation5 + $0xa0] sm:$0xf]  ;;  %v10540_v62 = vor.u32 %v14963_v54, %v10537_v55  ;;  %v14945_v0 = vld [vmem:[#allocation5 + $0x24] sm:$0xf] }
  0x32   :  { %442 = vmatpush.bf16.msra.mxu0 %v10480_v44  ;;  %v14962_v63 = vld [vmem:[#allocation5 + $0xa4] sm:$0xf0]  ;;  %v10465_v1 = vld [vmem:[#allocation5 + $0x28] sm:$0xf0]  ;;  %v14961_v2 = vld [vmem:[#allocation5 + $0xa4] sm:$0xf]  ;;  %v10464_v5 = vor.u32 %v14946_v60, %v10463_v59 }
  0x33   :  { %461 = vmatpush.bf16.msra.mxu1 %v10544_v45  ;;  %v10529_v3 = vld [vmem:[#allocation5 + $0xa8] sm:$0xf0]  ;;  %v10455_v4 = vld [vmem:[#allocation5 + $0x10] sm:$0xf]  ;;  %v14944_v6 = vld [vmem:[#allocation5 + $0x14] sm:$0xf0]  ;;  %v10528_v9 = vor.u32 %v14962_v63, %v10527_v61  ;;  %v10468_v10 = vor.u32 %v14945_v0, %v10465_v1 }
  0x34   :  { %480 = vmatpush.bf16.msra.mxu2 %v10484_v46  ;;  %v10519_v7 = vld [vmem:[#allocation5 + $0x90] sm:$0xf]  ;;  %v14960_v8 = vld [vmem:[#allocation5 + $0x94] sm:$0xf0]  ;;  %v14943_v11 = vld [vmem:[#allocation5 + $0x14] sm:$0xf]  ;;  %v10532_v14 = vor.u32 %v14961_v2, %v10529_v3  ;;  %v10456_v22 = vor.u32 %v14944_v6, %v10455_v4 }
  0x35   :  { %499 = vmatpush.bf16.msra.mxu3 %v10548_v50  ;;  %v10457_v12 = vld [vmem:[#allocation5 + $0x18] sm:$0xf0]  ;;  %v14959_v13 = vld [vmem:[#allocation5 + $0x94] sm:$0xf]  ;;  %v152_v16 = vld [vmem:[%s17172_s0] sm:$0xff]  ;;  %v10520_v27 = vor.u32 %v14960_v8, %v10519_v7  ;;  %vm199_vm0 = vcmask 125952  }
  0x36   :  { %443 = vmatpush.bf16.msra.mxu0 %v10472_v56  ;;  %v10521_v15 = vld [vmem:[#allocation5 + $0x98] sm:$0xf0]  ;;  %v153_v17 = vld [vmem:[%s17172_s0 + $0x8] sm:$0xff]  ;;  %v10447_v18 = vld [vmem:[#allocation5] sm:$0xf]  ;;  %v10460_v28 = vor.u32 %v14943_v11, %v10457_v12  ;;  %vm4913_vm1 = vcmask 130048  }
  0x37   :  { %462 = vmatpush.bf16.msra.mxu1 %v10536_v57  ;;  %v159_v19 = vld [vmem:[%s17172_s0 + $0x38] sm:$0xff]  ;;  %v160_v20 = vld [vmem:[%s17172_s0 + $0x40] sm:$0xff]  ;;  %v180_v21 = vpack.c.bf16 %v153_v17, %v152_v16  ;;  %v14942_v23 = vld [vmem:[#allocation5 + $0x4] sm:$0xf0]  ;;  %v10524_v31 = vor.u32 %v14959_v13, %v10521_v15 }
  0x38   :  { %481 = vmatpush.bf16.msra.mxu2 %v10476_v58  ;;  %v10511_v24 = vld [vmem:[#allocation5 + $0x80] sm:$0xf]  ;;  %v14958_v25 = vld [vmem:[#allocation5 + $0x84] sm:$0xf0]  ;;  %v184_v26 = vpack.c.bf16 %v160_v20, %v159_v19  ;;  %v14941_v29 = vld [vmem:[#allocation5 + $0x4] sm:$0xf]  ;;  %v10448_v37 = vor.u32 %v14942_v23, %v10447_v18 }
  0x39   :  { %500 = vmatpush.bf16.msra.mxu3 %v10540_v62  ;;  %v10449_v30 = vld [vmem:[#allocation5 + $0x8] sm:$0xf0]  ;;  %196 = vst [vmem:[#allocation2] sm:$0xff] %v180_v21  ;;  %v14957_v32 = vld [vmem:[#allocation5 + $0x84] sm:$0xf]  ;;  %v10512_v41 = vor.u32 %v14958_v25, %v10511_v24  ;;  %v166_v44 = vld [vmem:[%s17172_s0 + $0x70] sm:$0xff] }
  0x3a   :  { %444 = vmatpush.bf16.msra.mxu0 %v10464_v5  ;;  %v10513_v33 = vld [vmem:[#allocation5 + $0x88] sm:$0xf0]  ;;  %201 = vst [vmem:[#allocation2 + $0x1c] sm:$0xff] %v184_v26  ;;  %v14991_v34 = vld [vmem:[#allocation5 + $0x174] sm:$0xf]  ;;  %v10452_v42 = vor.u32 %v14941_v29, %v10449_v30  ;;  %v167_v45 = vld [vmem:[%s17172_s0 + $0x78] sm:$0xff] }
  0x3b   :  { %463 = vmatpush.bf16.msra.mxu1 %v10528_v9  ;;  %v10649_v35 = vld [vmem:[#allocation5 + $0x178] sm:$0xf0]  ;;  %v10647_v36 = vld [vmem:[#allocation5 + $0x170] sm:$0xf]  ;;  %v14992_v38 = vld [vmem:[#allocation5 + $0x174] sm:$0xf0]  ;;  %v10516_v46 = vor.u32 %v14957_v32, %v10513_v33  ;;  %v188_v59 = vpack.c.bf16 %v167_v45, %v166_v44 }
  0x3c   :  { %482 = vmatpush.bf16.msra.mxu2 %v10468_v10  ;;  %v10711_v39 = vld [vmem:[#allocation5 + $0x1f0] sm:$0xf]  ;;  %v15008_v40 = vld [vmem:[#allocation5 + $0x1f4] sm:$0xf0]  ;;  %v15007_v43 = vld [vmem:[#allocation5 + $0x1f4] sm:$0xf]  ;;  %v10652_v47 = vor.u32 %v14991_v34, %v10649_v35  ;;  %v10648_v51 = vor.u32 %v14992_v38, %v10647_v36 }
  0x3d   :  { %501 = vmatpush.bf16.msra.mxu3 %v10532_v14  ;;  %v10713_v48 = vld [vmem:[#allocation5 + $0x1f8] sm:$0xf0]  ;;  %v14989_v49 = vld [vmem:[#allocation5 + $0x164] sm:$0xf]  ;;  %v10641_v50 = vld [vmem:[#allocation5 + $0x168] sm:$0xf0]  ;;  %v10712_v52 = vor.u32 %v15008_v40, %v10711_v39 }
  0x3e   :  { %445 = vmatpush.bf16.msra.mxu0 %v10456_v22  ;;  %v10639_v53 = vld [vmem:[#allocation5 + $0x160] sm:$0xf]  ;;  %v14990_v54 = vld [vmem:[#allocation5 + $0x164] sm:$0xf0]  ;;  %v10716_v62 = vor.u32 %v15007_v43, %v10713_v48  ;;  %v15005_v63 = vld [vmem:[#allocation5 + $0x1e4] sm:$0xf]  ;;  %v10644_v2 = vor.u32 %v14989_v49, %v10641_v50 }
  0x3f   :  { %464 = vmatpush.bf16.msra.mxu1 %v10520_v27  ;;  %v10703_v55 = vld [vmem:[#allocation5 + $0x1e0] sm:$0xf]  ;;  %v15006_v58 = vld [vmem:[#allocation5 + $0x1e4] sm:$0xf0]  ;;  %v10705_v3 = vld [vmem:[#allocation5 + $0x1e8] sm:$0xf0]  ;;  %v10640_v6 = vor.u32 %v14990_v54, %v10639_v53 }
  0x40   :  { %483 = vmatpush.bf16.msra.mxu2 %v10460_v28  ;;  %v10431_v56 = vld [vmem:[#allocation2] sm:$0xf]  ;;  %v14937_v57 = vld [vmem:[#allocation2 + $0x4] sm:$0xf]  ;;  %v14987_v4 = vld [vmem:[#allocation5 + $0x154] sm:$0xf]  ;;  %v10704_v7 = vor.u32 %v15006_v58, %v10703_v55  ;;  %v10708_v15 = vor.u32 %v15005_v63, %v10705_v3 }
  0x41   :  { %502 = vmatpush.bf16.msra.mxu3 %v10524_v31  ;;  %v14938_v60 = vld [vmem:[#allocation2 + $0x18] sm:$0xf0]  ;;  %v10433_v61 = vld [vmem:[#allocation2 + $0x1c] sm:$0xf0]  ;;  %v10631_v8 = vld [vmem:[#allocation5 + $0x150] sm:$0xf] }
  0x42   :  { %446 = vmatpush.bf16.msra.mxu0 %v10448_v37  ;;  %v10432_v0 = vor.u32 %v14938_v60, %v10431_v56  ;;  %v10436_v1 = vor.u32 %v14937_v57, %v10433_v61  ;;  %v10633_v5 = vld [vmem:[#allocation5 + $0x158] sm:$0xf0]  ;;  %v14988_v9 = vld [vmem:[#allocation5 + $0x154] sm:$0xf0]  ;;  %v10695_v10 = vld [vmem:[#allocation5 + $0x1d0] sm:$0xf] }
  0x43   :  { %465 = vmatpush.bf16.msra.mxu1 %v10512_v41  ;;  %v15004_v11 = vld [vmem:[#allocation5 + $0x1d4] sm:$0xf0]  ;;  %v173_v12 = vld [vmem:[%s17172_s0 + $0xa8] sm:$0xff]  ;;  %v174_v13 = vld [vmem:[%s17172_s0 + $0xb0] sm:$0xff]  ;;  %205 = vst [vmem:[#allocation2 + $0x38] sm:$0xff] %v188_v59  ;;  %v10636_v16 = vor.u32 %v14987_v4, %v10633_v5  ;;  %v10632_v20 = vor.u32 %v14988_v9, %v10631_v8 }
  0x44   :  { %484 = vmatpush.bf16.msra.mxu2 %v10452_v42  ;;  %v192_v14 = vpack.c.bf16 %v174_v13, %v173_v12  ;;  %v15003_v17 = vld [vmem:[#allocation5 + $0x1d4] sm:$0xf]  ;;  %v10697_v18 = vld [vmem:[#allocation5 + $0x1d8] sm:$0xf0]  ;;  %v14985_v19 = vld [vmem:[#allocation5 + $0x144] sm:$0xf]  ;;  %v10696_v21 = vor.u32 %v15004_v11, %v10695_v10 }
  0x45   :  { %503 = vmatpush.bf16.msra.mxu3 %v10516_v46  ;;  %447 = vmatmul.bf16.vlgmr.msra.gmra.mxu0 %v10432_v0  ;;  %v10625_v22 = vld [vmem:[#allocation5 + $0x148] sm:$0xf0]  ;;  %v10623_v23 = vld [vmem:[#allocation5 + $0x140] sm:$0xf]  ;;  %v14986_v24 = vld [vmem:[#allocation5 + $0x144] sm:$0xf0]  ;;  %v10700_v27 = vor.u32 %v15003_v17, %v10697_v18 }
  0x46   :  { %748 = vmatpush.bf16.msrb.mxu0 %v10648_v51  ;;  %466 = vmatmul.bf16.vlgmr.msra.gmra.mxu1 %v10436_v1  ;;  %209 = vst [vmem:[#allocation2 + $0x54] sm:$0xff] %v192_v14  ;;  %v10687_v25 = vld [vmem:[#allocation5 + $0x1c0] sm:$0xf]  ;;  %v15002_v26 = vld [vmem:[#allocation5 + $0x1c4] sm:$0xf0]  ;;  %v10628_v28 = vor.u32 %v14985_v19, %v10625_v22  ;;  %v10624_v31 = vor.u32 %v14986_v24, %v10623_v23 }
  0x47   :  { %767 = vmatpush.bf16.msrb.mxu1 %v10712_v52  ;;  %485 = vmatmul.bf16.vlgmr.msra.gmra.mxu2 %v10432_v0  ;;  %v15001_v29 = vld [vmem:[#allocation5 + $0x1c4] sm:$0xf]  ;;  %v10689_v30 = vld [vmem:[#allocation5 + $0x1c8] sm:$0xf0]  ;;  %v10688_v32 = vor.u32 %v15002_v26, %v10687_v25  ;;  %v14983_v33 = vld [vmem:[#allocation5 + $0x134] sm:$0xf] }
  0x48   :  { %786 = vmatpush.bf16.msrb.mxu2 %v10652_v47  ;;  %504 = vmatmul.bf16.vlgmr.msra.gmra.mxu3 %v10436_v1  ;;  %v10617_v34 = vld [vmem:[#allocation5 + $0x138] sm:$0xf0]  ;;  %v10615_v35 = vld [vmem:[#allocation5 + $0x130] sm:$0xf]  ;;  %v14984_v36 = vld [vmem:[#allocation5 + $0x134] sm:$0xf0]  ;;  %v10692_v42 = vor.u32 %v15001_v29, %v10689_v30 }
  0x49   :  { %805 = vmatpush.bf16.msrb.mxu3 %v10716_v62  ;;  %v10679_v37 = vld [vmem:[#allocation5 + $0x1b0] sm:$0xf]  ;;  %v15000_v38 = vld [vmem:[#allocation5 + $0x1b4] sm:$0xf0]  ;;  %v14999_v41 = vld [vmem:[#allocation5 + $0x1b4] sm:$0xf]  ;;  %v10620_v45 = vor.u32 %v14983_v33, %v10617_v34  ;;  %v10616_v47 = vor.u32 %v14984_v36, %v10615_v35 }
  0x4a   :  { %749 = vmatpush.bf16.msrb.mxu0 %v10640_v6  ;;  %v10439_v39 = vld [vmem:[#allocation2 + $0x38] sm:$0xf]  ;;  %v14939_v40 = vld [vmem:[#allocation2 + $0x3c] sm:$0xf]  ;;  %v10680_v48 = vor.u32 %v15000_v38, %v10679_v37  ;;  %v14981_v49 = vld [vmem:[#allocation5 + $0x124] sm:$0xf] }
  0x4b   :  { %768 = vmatpush.bf16.msrb.mxu1 %v10704_v7  ;;  %v10681_v46 = vld [vmem:[#allocation5 + $0x1b8] sm:$0xf0]  ;;  %v10609_v50 = vld [vmem:[#allocation5 + $0x128] sm:$0xf0]  ;;  %v10607_v51 = vld [vmem:[#allocation5 + $0x120] sm:$0xf] }
  0x4c   :  { %787 = vmatpush.bf16.msrb.mxu2 %v10644_v2  ;;  %v14982_v54 = vld [vmem:[#allocation5 + $0x124] sm:$0xf0]  ;;  %v10671_v55 = vld [vmem:[#allocation5 + $0x1a0] sm:$0xf]  ;;  %v10684_v57 = vor.u32 %v14999_v41, %v10681_v46  ;;  %v10612_v58 = vor.u32 %v14981_v49, %v10609_v50  ;;  %v14997_v59 = vld [vmem:[#allocation5 + $0x1a4] sm:$0xf] }
  0x4d   :  { %806 = vmatpush.bf16.msrb.mxu3 %v10708_v15  ;;  %v14940_v43 = vld [vmem:[#allocation2 + $0x50] sm:$0xf0]  ;;  %v10441_v44 = vld [vmem:[#allocation2 + $0x54] sm:$0xf0]  ;;  %v14998_v56 = vld [vmem:[#allocation5 + $0x1a4] sm:$0xf0]  ;;  %v10608_v61 = vor.u32 %v14982_v54, %v10607_v51 }
  0x4e   :  { %750 = vmatpush.bf16.msrb.mxu0 %v10632_v20  ;;  %v10440_v52 = vor.u32 %v14940_v43, %v10439_v39  ;;  %v10444_v53 = vor.u32 %v14939_v40, %v10441_v44  ;;  %v10673_v60 = vld [vmem:[#allocation5 + $0x1a8] sm:$0xf0]  ;;  %v10672_v62 = vor.u32 %v14998_v56, %v10671_v55  ;;  %v14979_v63 = vld [vmem:[#allocation5 + $0x114] sm:$0xf]  ;;  %v10601_v0 = vld [vmem:[#allocation5 + $0x118] sm:$0xf0] }
  0x4f   :  { %769 = vmatpush.bf16.msrb.mxu1 %v10696_v21  ;;  %v10599_v1 = vld [vmem:[#allocation5 + $0x110] sm:$0xf]  ;;  %v14980_v2 = vld [vmem:[#allocation5 + $0x114] sm:$0xf0]  ;;  %v10676_v5 = vor.u32 %v14997_v59, %v10673_v60  ;;  %v10604_v6 = vor.u32 %v14979_v63, %v10601_v0  ;;  %v14995_v7 = vld [vmem:[#allocation5 + $0x194] sm:$0xf] }
  0x50   :  { %788 = vmatpush.bf16.msrb.mxu2 %v10636_v16  ;;  %v10663_v3 = vld [vmem:[#allocation5 + $0x190] sm:$0xf]  ;;  %v14996_v4 = vld [vmem:[#allocation5 + $0x194] sm:$0xf0]  ;;  %v10665_v8 = vld [vmem:[#allocation5 + $0x198] sm:$0xf0]  ;;  %v10600_v10 = vor.u32 %v14980_v2, %v10599_v1 }
  0x51   :  { %807 = vmatpush.bf16.msrb.mxu3 %v10700_v27  ;;  %v14977_v9 = vld [vmem:[#allocation5 + $0x104] sm:$0xf]  ;;  %v10664_v11 = vor.u32 %v14996_v4, %v10663_v3  ;;  %v10593_v12 = vld [vmem:[#allocation5 + $0x108] sm:$0xf0]  ;;  %v10591_v13 = vld [vmem:[#allocation5 + $0x100] sm:$0xf]  ;;  %v10668_v21 = vor.u32 %v14995_v7, %v10665_v8 }
  0x52   :  { %751 = vmatpush.bf16.msrb.mxu0 %v10624_v31  ;;  %v14978_v14 = vld [vmem:[#allocation5 + $0x104] sm:$0xf0]  ;;  %v10655_v15 = vld [vmem:[#allocation5 + $0x180] sm:$0xf]  ;;  %v15027_v17 = vld [vmem:[#allocation5 + $0x274] sm:$0xf]  ;;  %v10596_v22 = vor.u32 %v14977_v9, %v10593_v12 }
  0x53   :  { %770 = vmatpush.bf16.msrb.mxu1 %v10688_v32  ;;  %v14994_v16 = vld [vmem:[#allocation5 + $0x184] sm:$0xf0]  ;;  %v10793_v18 = vld [vmem:[#allocation5 + $0x278] sm:$0xf0]  ;;  %v10791_v19 = vld [vmem:[#allocation5 + $0x270] sm:$0xf]  ;;  %v10592_v25 = vor.u32 %v14978_v14, %v10591_v13 }
  0x54   :  { %789 = vmatpush.bf16.msrb.mxu2 %v10628_v28  ;;  %v15028_v20 = vld [vmem:[#allocation5 + $0x274] sm:$0xf0]  ;;  %v10855_v23 = vld [vmem:[#allocation5 + $0x2f0] sm:$0xf]  ;;  %v10656_v26 = vor.u32 %v14994_v16, %v10655_v15  ;;  %v14993_v27 = vld [vmem:[#allocation5 + $0x184] sm:$0xf]  ;;  %v10796_v30 = vor.u32 %v15027_v17, %v10793_v18 }
  0x55   :  { %808 = vmatpush.bf16.msrb.mxu3 %v10692_v42  ;;  %452 = vmatmul.bf16.gmra.mxu0 %v10440_v52  ;;  %v15044_v24 = vld [vmem:[#allocation5 + $0x2f4] sm:$0xf0]  ;;  %v10657_v28 = vld [vmem:[#allocation5 + $0x188] sm:$0xf0]  ;;  %v10575_v29 = vld [vmem:[#allocation2] sm:$0xf]  ;;  %v10792_v31 = vor.u32 %v15028_v20, %v10791_v19 }
  0x56   :  { %752 = vmatpush.bf16.msrb.mxu0 %v10616_v47  ;;  %471 = vmatmul.bf16.gmra.mxu1 %v10444_v53  ;;  %v15043_v32 = vld [vmem:[#allocation5 + $0x2f4] sm:$0xf]  ;;  %v10857_v33 = vld [vmem:[#allocation5 + $0x2f8] sm:$0xf0]  ;;  %v14973_v35 = vld [vmem:[#allocation2 + $0x4] sm:$0xf]  ;;  %v10856_v37 = vor.u32 %v15044_v24, %v10855_v23  ;;  %v10660_v38 = vor.u32 %v14993_v27, %v10657_v28 }
  0x57   :  { %771 = vmatpush.bf16.msrb.mxu1 %v10680_v48  ;;  %490 = vmatmul.bf16.gmra.mxu2 %v10440_v52  ;;  %v14974_v34 = vld [vmem:[#allocation2 + $0x18] sm:$0xf0]  ;;  %v10577_v36 = vld [vmem:[#allocation2 + $0x1c] sm:$0xf0]  ;;  %v15025_v39 = vld [vmem:[#allocation5 + $0x264] sm:$0xf]  ;;  %v10860_v41 = vor.u32 %v15043_v32, %v10857_v33 }
  0x58   :  { %790 = vmatpush.bf16.msrb.mxu2 %v10620_v45  ;;  %509 = vmatmul.bf16.gmra.mxu3 %v10444_v53  ;;  %v10785_v40 = vld [vmem:[#allocation5 + $0x268] sm:$0xf0]  ;;  %v10783_v42 = vld [vmem:[#allocation5 + $0x260] sm:$0xf]  ;;  %v15026_v43 = vld [vmem:[#allocation5 + $0x264] sm:$0xf0]  ;;  %v10576_v45 = vor.u32 %v14974_v34, %v10575_v29  ;;  %v10580_v46 = vor.u32 %v14973_v35, %v10577_v36 }
  0x59   :  { %809 = vmatpush.bf16.msrb.mxu3 %v10684_v57  ;;  %v10847_v44 = vld [vmem:[#allocation5 + $0x2e0] sm:$0xf]  ;;  %v15042_v47 = vld [vmem:[#allocation5 + $0x2e4] sm:$0xf0]  ;;  %v15041_v48 = vld [vmem:[#allocation5 + $0x2e4] sm:$0xf]  ;;  %v10788_v50 = vor.u32 %v15025_v39, %v10785_v40  ;;  %v10784_v51 = vor.u32 %v15026_v43, %v10783_v42 }
  0x5a   :  { %753 = vmatpush.bf16.msrb.mxu0 %v10608_v61  ;;  %v10849_v49 = vld [vmem:[#allocation5 + $0x2e8] sm:$0xf0]  ;;  %v15023_v52 = vld [vmem:[#allocation5 + $0x254] sm:$0xf]  ;;  %v10777_v53 = vld [vmem:[#allocation5 + $0x258] sm:$0xf0]  ;;  %v10848_v54 = vor.u32 %v15042_v47, %v10847_v44 }
  0x5b   :  { %772 = vmatpush.bf16.msrb.mxu1 %v10672_v62  ;;  %v10852_v55 = vor.u32 %v15041_v48, %v10849_v49  ;;  %v10775_v56 = vld [vmem:[#allocation5 + $0x250] sm:$0xf]  ;;  %v15024_v57 = vld [vmem:[#allocation5 + $0x254] sm:$0xf0]  ;;  %v15039_v60 = vld [vmem:[#allocation5 + $0x2d4] sm:$0xf]  ;;  %v10780_v62 = vor.u32 %v15023_v52, %v10777_v53 }
  0x5c   :  { %791 = vmatpush.bf16.msrb.mxu2 %v10612_v58  ;;  %v10839_v58 = vld [vmem:[#allocation5 + $0x2d0] sm:$0xf]  ;;  %v15040_v59 = vld [vmem:[#allocation5 + $0x2d4] sm:$0xf0]  ;;  %v10841_v61 = vld [vmem:[#allocation5 + $0x2d8] sm:$0xf0]  ;;  %v10776_v63 = vor.u32 %v15024_v57, %v10775_v56 }
  0x5d   :  { %810 = vmatpush.bf16.msrb.mxu3 %v10676_v5  ;;  %v15021_v0 = vld [vmem:[#allocation5 + $0x244] sm:$0xf]  ;;  %v10769_v1 = vld [vmem:[#allocation5 + $0x248] sm:$0xf0]  ;;  %v10840_v2 = vor.u32 %v15040_v59, %v10839_v58  ;;  %v10844_v3 = vor.u32 %v15039_v60, %v10841_v61  ;;  %v10767_v4 = vld [vmem:[#allocation5 + $0x240] sm:$0xf] }
  0x5e   :  { %754 = vmatpush.bf16.msrb.mxu0 %v10600_v10  ;;  %v15022_v5 = vld [vmem:[#allocation5 + $0x244] sm:$0xf0]  ;;  %v15037_v8 = vld [vmem:[#allocation5 + $0x2c4] sm:$0xf]  ;;  %v10833_v9 = vld [vmem:[#allocation5 + $0x2c8] sm:$0xf0]  ;;  %v10772_v10 = vor.u32 %v15021_v0, %v10769_v1 }
  0x5f   :  { %773 = vmatpush.bf16.msrb.mxu1 %v10664_v11  ;;  %v15038_v7 = vld [vmem:[#allocation5 + $0x2c4] sm:$0xf0]  ;;  %v10768_v11 = vor.u32 %v15022_v5, %v10767_v4  ;;  %v15019_v12 = vld [vmem:[#allocation5 + $0x234] sm:$0xf]  ;;  %v10761_v13 = vld [vmem:[#allocation5 + $0x238] sm:$0xf0]  ;;  %v10836_v15 = vor.u32 %v15037_v8, %v10833_v9 }
  0x60   :  { %792 = vmatpush.bf16.msrb.mxu2 %v10604_v6  ;;  %v10831_v6 = vld [vmem:[#allocation5 + $0x2c0] sm:$0xf]  ;;  %v10583_v16 = vld [vmem:[#allocation2 + $0x38] sm:$0xf]  ;;  %v10759_v17 = vld [vmem:[#allocation5 + $0x230] sm:$0xf] }
  0x61   :  { %811 = vmatpush.bf16.msrb.mxu3 %v10668_v21  ;;  %v10832_v14 = vor.u32 %v15038_v7, %v10831_v6  ;;  %v15020_v18 = vld [vmem:[#allocation5 + $0x234] sm:$0xf0]  ;;  %v10823_v19 = vld [vmem:[#allocation5 + $0x2b0] sm:$0xf]  ;;  %v15035_v21 = vld [vmem:[#allocation5 + $0x2b4] sm:$0xf] }
  0x62   :  { %755 = vmatpush.bf16.msrb.mxu0 %v10592_v25  ;;  %v15036_v20 = vld [vmem:[#allocation5 + $0x2b4] sm:$0xf0]  ;;  %v14976_v23 = vld [vmem:[#allocation2 + $0x50] sm:$0xf0]  ;;  %v14975_v24 = vld [vmem:[#allocation2 + $0x3c] sm:$0xf]  ;;  %v10760_v27 = vor.u32 %v15020_v18, %v10759_v17 }
  0x63   :  { %774 = vmatpush.bf16.msrb.mxu1 %v10656_v26  ;;  %v10585_v25 = vld [vmem:[#allocation2 + $0x54] sm:$0xf0]  ;;  %v10764_v26 = vor.u32 %v15019_v12, %v10761_v13  ;;  %v15017_v28 = vld [vmem:[#allocation5 + $0x224] sm:$0xf]  ;;  %v10753_v29 = vld [vmem:[#allocation5 + $0x228] sm:$0xf0]  ;;  %v10584_v35 = vor.u32 %v14976_v23, %v10583_v16 }
  0x64   :  { %793 = vmatpush.bf16.msrb.mxu2 %v10596_v22  ;;  %v10825_v22 = vld [vmem:[#allocation5 + $0x2b8] sm:$0xf0]  ;;  %v10751_v32 = vld [vmem:[#allocation5 + $0x220] sm:$0xf]  ;;  %v15018_v33 = vld [vmem:[#allocation5 + $0x224] sm:$0xf0]  ;;  %v10588_v36 = vor.u32 %v14975_v24, %v10585_v25  ;;  %v10756_v40 = vor.u32 %v15017_v28, %v10753_v29 }
  0x65   :  { %812 = vmatpush.bf16.msrb.mxu3 %v10660_v38  ;;  %756 = vmatmul.bf16.vlgmr.msrb.gmra.mxu0 %v10576_v45  ;;  %v10815_v34 = vld [vmem:[#allocation5 + $0x2a0] sm:$0xf]  ;;  %v15033_v38 = vld [vmem:[#allocation5 + $0x2a4] sm:$0xf]  ;;  %v10817_v39 = vld [vmem:[#allocation5 + $0x2a8] sm:$0xf0] }
  0x66   :  { %1057 = vmatpush.bf16.msra.mxu0 %v10792_v31  ;;  %775 = vmatmul.bf16.vlgmr.msrb.gmra.mxu1 %v10580_v46  ;;  %v10828_v31 = vor.u32 %v15035_v21, %v10825_v22  ;;  %v15015_v42 = vld [vmem:[#allocation5 + $0x214] sm:$0xf]  ;;  %v10745_v43 = vld [vmem:[#allocation5 + $0x218] sm:$0xf0]  ;;  %v15016_v47 = vld [vmem:[#allocation5 + $0x214] sm:$0xf0] }
  0x67   :  { %1076 = vmatpush.bf16.msra.mxu1 %v10856_v37  ;;  %794 = vmatmul.bf16.vlgmr.msrb.gmra.mxu2 %v10576_v45  ;;  %v15034_v37 = vld [vmem:[#allocation5 + $0x2a4] sm:$0xf0]  ;;  %v10820_v45 = vor.u32 %v15033_v38, %v10817_v39  ;;  %v10807_v48 = vld [vmem:[#allocation5 + $0x290] sm:$0xf]  ;;  %v15032_v49 = vld [vmem:[#allocation5 + $0x294] sm:$0xf0]  ;;  %v10748_v53 = vor.u32 %v15015_v42, %v10745_v43 }
  0x68   :  { %1095 = vmatpush.bf16.msra.mxu2 %v10796_v30  ;;  %813 = vmatmul.bf16.vlgmr.msrb.gmra.mxu3 %v10580_v46  ;;  %v10824_v30 = vor.u32 %v15036_v20, %v10823_v19  ;;  %v10816_v44 = vor.u32 %v15034_v37, %v10815_v34  ;;  %v10743_v46 = vld [vmem:[#allocation5 + $0x210] sm:$0xf]  ;;  %v15013_v52 = vld [vmem:[#allocation5 + $0x204] sm:$0xf]  ;;  %v10735_v56 = vld [vmem:[#allocation5 + $0x200] sm:$0xf]  ;;  %v10808_v58 = vor.u32 %v15032_v49, %v10807_v48 }
  0x69   :  { %1114 = vmatpush.bf16.msra.mxu3 %v10860_v41  ;;  %v10752_v41 = vor.u32 %v15018_v33, %v10751_v32  ;;  %v15014_v57 = vld [vmem:[#allocation5 + $0x204] sm:$0xf0]  ;;  %v10799_v60 = vld [vmem:[#allocation5 + $0x280] sm:$0xf]  ;;  %v15063_v0 = vld [vmem:[#allocation5 + $0x374] sm:$0xf] }
  0x6a   :  { %1058 = vmatpush.bf16.msra.mxu0 %v10784_v51  ;;  %v10809_v51 = vld [vmem:[#allocation5 + $0x298] sm:$0xf0]  ;;  %v15030_v61 = vld [vmem:[#allocation5 + $0x284] sm:$0xf0]  ;;  %v10999_v4 = vld [vmem:[#allocation5 + $0x3f0] sm:$0xf]  ;;  %v10736_v6 = vor.u32 %v15014_v57, %v10735_v56 }
  0x6b   :  { %1077 = vmatpush.bf16.msra.mxu1 %v10848_v54  ;;  %v10744_v54 = vor.u32 %v15016_v47, %v10743_v46  ;;  %v10937_v1 = vld [vmem:[#allocation5 + $0x378] sm:$0xf0]  ;;  %v15080_v7 = vld [vmem:[#allocation5 + $0x3f4] sm:$0xf0]  ;;  %v15079_v8 = vld [vmem:[#allocation5 + $0x3f4] sm:$0xf] }
  0x6c   :  { %1096 = vmatpush.bf16.msra.mxu2 %v10788_v50  ;;  %v15031_v50 = vld [vmem:[#allocation5 + $0x294] sm:$0xf]  ;;  %v11001_v9 = vld [vmem:[#allocation5 + $0x3f8] sm:$0xf0]  ;;  %v10719_v12 = vld [vmem:[#allocation2] sm:$0xf]  ;;  %v10940_v13 = vor.u32 %v15063_v0, %v10937_v1  ;;  %v11000_v18 = vor.u32 %v15080_v7, %v10999_v4 }
  0x6d   :  { %1115 = vmatpush.bf16.msra.mxu3 %v10852_v55  ;;  %v10737_v55 = vld [vmem:[#allocation5 + $0x208] sm:$0xf0]  ;;  %v10812_v59 = vor.u32 %v15031_v50, %v10809_v51  ;;  %v15009_v16 = vld [vmem:[#allocation2 + $0x4] sm:$0xf]  ;;  %v10721_v17 = vld [vmem:[#allocation2 + $0x1c] sm:$0xf0]  ;;  %v11004_v19 = vor.u32 %v15079_v8, %v11001_v9 }
  0x6e   :  { %1059 = vmatpush.bf16.msra.mxu0 %v10776_v63  ;;  %v10801_v63 = vld [vmem:[#allocation5 + $0x288] sm:$0xf0]  ;;  %v10740_v5 = vor.u32 %v15013_v52, %v10737_v55  ;;  %v15061_v20 = vld [vmem:[#allocation5 + $0x364] sm:$0xf]  ;;  %v10927_v22 = vld [vmem:[#allocation5 + $0x360] sm:$0xf] }
  0x6f   :  { %1078 = vmatpush.bf16.msra.mxu1 %v10840_v2  ;;  %v10935_v2 = vld [vmem:[#allocation5 + $0x370] sm:$0xf]  ;;  %v10929_v21 = vld [vmem:[#allocation5 + $0x368] sm:$0xf0]  ;;  %v15062_v23 = vld [vmem:[#allocation5 + $0x364] sm:$0xf0] }
  0x70   :  { %1097 = vmatpush.bf16.msra.mxu2 %v10780_v62  ;;  %v15029_v62 = vld [vmem:[#allocation5 + $0x284] sm:$0xf]  ;;  %v10991_v24 = vld [vmem:[#allocation5 + $0x3e0] sm:$0xf]  ;;  %v10993_v29 = vld [vmem:[#allocation5 + $0x3e8] sm:$0xf0]  ;;  %v10932_v33 = vor.u32 %v15061_v20, %v10929_v21  ;;  %v10928_v34 = vor.u32 %v15062_v23, %v10927_v22 }
  0x71   :  { %1116 = vmatpush.bf16.msra.mxu3 %v10844_v3  ;;  %v15064_v3 = vld [vmem:[#allocation5 + $0x374] sm:$0xf0]  ;;  %v15077_v28 = vld [vmem:[#allocation5 + $0x3e4] sm:$0xf]  ;;  %v10919_v32 = vld [vmem:[#allocation5 + $0x350] sm:$0xf] }
  0x72   :  { %1060 = vmatpush.bf16.msra.mxu0 %v10768_v11  ;;  %v10804_v11 = vor.u32 %v15029_v62, %v10801_v63  ;;  %v161_v37 = vld [vmem:[%s17172_s0 + $0x48] sm:$0xff]  ;;  %v10996_v39 = vor.u32 %v15077_v28, %v10993_v29  ;;  %v162_v42 = vld [vmem:[%s17172_s0 + $0x50] sm:$0xff]  ;;  %v10985_v46 = vld [vmem:[#allocation5 + $0x3d8] sm:$0xf0] }
  0x73   :  { %1079 = vmatpush.bf16.msra.mxu1 %v10832_v14  ;;  %v10936_v14 = vor.u32 %v15064_v3, %v10935_v2  ;;  %v185_v47 = vpack.c.bf16 %v162_v42, %v161_v37  ;;  %v15057_v50 = vld [vmem:[#allocation5 + $0x344] sm:$0xf]  ;;  %v10913_v51 = vld [vmem:[#allocation5 + $0x348] sm:$0xf0]  ;;  %v15058_v55 = vld [vmem:[#allocation5 + $0x344] sm:$0xf0] }
  0x74   :  { %1098 = vmatpush.bf16.msra.mxu2 %v10772_v10  ;;  %v10800_v10 = vor.u32 %v15030_v61, %v10799_v60  ;;  %v10975_v56 = vld [vmem:[#allocation5 + $0x3c0] sm:$0xf]  ;;  %v15074_v57 = vld [vmem:[#allocation5 + $0x3c4] sm:$0xf0]  ;;  %v10916_v60 = vor.u32 %v15057_v50, %v10913_v51  ;;  %v15055_v62 = vld [vmem:[#allocation5 + $0x334] sm:$0xf] }
  0x75   :  { %1117 = vmatpush.bf16.msra.mxu3 %v10836_v15  ;;  %761 = vmatmul.bf16.gmra.mxu0 %v10584_v35  ;;  %v15010_v15 = vld [vmem:[#allocation2 + $0x18] sm:$0xf0]  ;;  %202 = vst [vmem:[#allocation2 + $0x24] sm:$0xff] %v185_v47  ;;  %v10976_v0 = vor.u32 %v15074_v57, %v10975_v56  ;;  %v10727_v2 = vld [vmem:[#allocation2 + $0x38] sm:$0xf] }
  0x76   :  { %1061 = vmatpush.bf16.msra.mxu0 %v10760_v27  ;;  %780 = vmatmul.bf16.gmra.mxu1 %v10588_v36  ;;  %v10720_v25 = vor.u32 %v15010_v15, %v10719_v12  ;;  %v15078_v27 = vld [vmem:[#allocation5 + $0x3e4] sm:$0xf0]  ;;  %v10905_v63 = vld [vmem:[#allocation5 + $0x338] sm:$0xf0]  ;;  %v15012_v3 = vld [vmem:[#allocation2 + $0x50] sm:$0xf0] }
  0x77   :  { %1080 = vmatpush.bf16.msra.mxu1 %v10824_v30  ;;  %799 = vmatmul.bf16.gmra.mxu2 %v10584_v35  ;;  %v15059_v30 = vld [vmem:[#allocation5 + $0x354] sm:$0xf]  ;;  %v10992_v38 = vor.u32 %v15078_v27, %v10991_v24  ;;  %v15011_v4 = vld [vmem:[#allocation2 + $0x3c] sm:$0xf]  ;;  %v10967_v7 = vld [vmem:[#allocation5 + $0x3b0] sm:$0xf] }
  0x78   :  { %1099 = vmatpush.bf16.msra.mxu2 %v10764_v26  ;;  %818 = vmatmul.bf16.gmra.mxu3 %v10588_v36  ;;  %v10724_v26 = vor.u32 %v15009_v16, %v10721_v17  ;;  %v154_v35 = vld [vmem:[%s17172_s0 + $0x10] sm:$0xff]  ;;  %v155_v36 = vld [vmem:[%s17172_s0 + $0x18] sm:$0xff]  ;;  %v168_v12 = vld [vmem:[%s17172_s0 + $0x80] sm:$0xff] }
  0x79   :  { %1118 = vmatpush.bf16.msra.mxu3 %v10828_v31  ;;  %v10921_v31 = vld [vmem:[#allocation5 + $0x358] sm:$0xf0]  ;;  %v181_v43 = vpack.c.bf16 %v155_v36, %v154_v35  ;;  %v15072_v8 = vld [vmem:[#allocation5 + $0x3b4] sm:$0xf0]  ;;  %v15071_v9 = vld [vmem:[#allocation5 + $0x3b4] sm:$0xf] }
  0x7a   :  { %1062 = vmatpush.bf16.msra.mxu0 %v10752_v41  ;;  %v10983_v41 = vld [vmem:[#allocation5 + $0x3d0] sm:$0xf]  ;;  %v10924_v48 = vor.u32 %v15059_v30, %v10921_v31  ;;  %v15053_v16 = vld [vmem:[#allocation5 + $0x324] sm:$0xf]  ;;  %v10897_v17 = vld [vmem:[#allocation5 + $0x328] sm:$0xf0]  ;;  %v10968_v20 = vor.u32 %v15072_v8, %v10967_v7 }
  0x7b   :  { %1081 = vmatpush.bf16.msra.mxu1 %v10816_v44  ;;  %v15076_v44 = vld [vmem:[#allocation5 + $0x3d4] sm:$0xf0]  ;;  %197 = vst [vmem:[#allocation2 + $0x8] sm:$0xff] %v181_v43  ;;  %v15054_v22 = vld [vmem:[#allocation5 + $0x324] sm:$0xf0]  ;;  %v176_v30 = vld [vmem:[%s17172_s0 + $0xc0] sm:$0xff]  ;;  %v10900_v31 = vor.u32 %v15053_v16, %v10897_v17 }
  0x7c   :  { %1100 = vmatpush.bf16.msra.mxu2 %v10756_v40  ;;  %v15060_v40 = vld [vmem:[#allocation5 + $0x354] sm:$0xf0]  ;;  %v10984_v52 = vor.u32 %v15076_v44, %v10983_v41  ;;  %v10959_v23 = vld [vmem:[#allocation5 + $0x3a0] sm:$0xf]  ;;  %v15070_v24 = vld [vmem:[#allocation5 + $0x3a4] sm:$0xf0] }
  0x7d   :  { %1119 = vmatpush.bf16.msra.mxu3 %v10820_v45  ;;  %v15075_v45 = vld [vmem:[#allocation5 + $0x3d4] sm:$0xf]  ;;  %v10920_v49 = vor.u32 %v15060_v40, %v10919_v32  ;;  %v15069_v27 = vld [vmem:[#allocation5 + $0x3a4] sm:$0xf]  ;;  %v10961_v28 = vld [vmem:[#allocation5 + $0x3a8] sm:$0xf0]  ;;  %v10960_v37 = vor.u32 %v15070_v24, %v10959_v23 }
  0x7e   :  { %1063 = vmatpush.bf16.msra.mxu0 %v10744_v54  ;;  %v10911_v54 = vld [vmem:[#allocation5 + $0x340] sm:$0xf]  ;;  %v175_v29 = vld [vmem:[%s17172_s0 + $0xb8] sm:$0xff]  ;;  %v10887_v35 = vld [vmem:[#allocation5 + $0x310] sm:$0xf] }
  0x7f   :  { %1082 = vmatpush.bf16.msra.mxu1 %v10808_v58  ;;  %v15073_v58 = vld [vmem:[#allocation5 + $0x3c4] sm:$0xf]  ;;  %v10912_v61 = vor.u32 %v15058_v55, %v10911_v54  ;;  %v193_v36 = vpack.c.bf16 %v176_v30, %v175_v29  ;;  %v10951_v40 = vld [vmem:[#allocation5 + $0x390] sm:$0xf]  ;;  %v15068_v41 = vld [vmem:[#allocation5 + $0x394] sm:$0xf0] }
  0x80   :  { %1101 = vmatpush.bf16.msra.mxu2 %v10748_v53  ;;  %v10988_v53 = vor.u32 %v15075_v45, %v10985_v46  ;;  %v15067_v42 = vld [vmem:[#allocation5 + $0x394] sm:$0xf]  ;;  %v10953_v43 = vld [vmem:[#allocation5 + $0x398] sm:$0xf0]  ;;  %v15049_v44 = vld [vmem:[#allocation5 + $0x304] sm:$0xf]  ;;  %v10952_v50 = vor.u32 %v15068_v41, %v10951_v40 }
  0x81   :  { %1120 = vmatpush.bf16.msra.mxu3 %v10812_v59  ;;  %v10977_v59 = vld [vmem:[#allocation5 + $0x3c8] sm:$0xf0]  ;;  %210 = vst [vmem:[#allocation2 + $0x5c] sm:$0xff] %v193_v36  ;;  %v10956_v51 = vor.u32 %v15067_v42, %v10953_v43  ;;  %v15065_v54 = vld [vmem:[#allocation5 + $0x384] sm:$0xf] }
  0x82   :  { %1064 = vmatpush.bf16.msra.mxu0 %v10736_v6  ;;  %v10980_v1 = vor.u32 %v15073_v58, %v10977_v59  ;;  %v15056_v6 = vld [vmem:[#allocation5 + $0x334] sm:$0xf0]  ;;  %v10881_v47 = vld [vmem:[#allocation5 + $0x308] sm:$0xf0]  ;;  %v15099_v56 = vld [vmem:[#allocation5 + $0x474] sm:$0xf] }
  0x83   :  { %1083 = vmatpush.bf16.msra.mxu1 %v10800_v10  ;;  %v10969_v10 = vld [vmem:[#allocation5 + $0x3b8] sm:$0xf0]  ;;  %v10945_v55 = vld [vmem:[#allocation5 + $0x388] sm:$0xf0]  ;;  %v11079_v58 = vld [vmem:[#allocation5 + $0x470] sm:$0xf] }
  0x84   :  { %1102 = vmatpush.bf16.msra.mxu2 %v10740_v5  ;;  %v10903_v5 = vld [vmem:[#allocation5 + $0x330] sm:$0xf]  ;;  %v10972_v21 = vor.u32 %v15071_v9, %v10969_v10  ;;  %v11081_v57 = vld [vmem:[#allocation5 + $0x478] sm:$0xf0]  ;;  %v15100_v59 = vld [vmem:[#allocation5 + $0x474] sm:$0xf0] }
  0x85   :  { %1121 = vmatpush.bf16.msra.mxu3 %v10804_v11  ;;  %1065 = vmatmul.bf16.vlgmr.msra.gmra.mxu0 %v10720_v25  ;;  %v10729_v11 = vld [vmem:[#allocation2 + $0x54] sm:$0xf0]  ;;  %v10904_v15 = vor.u32 %v15056_v6, %v10903_v5  ;;  %v11084_v5 = vor.u32 %v15099_v56, %v11081_v57  ;;  %v11080_v6 = vor.u32 %v15100_v59, %v11079_v58  ;;  %v15046_v7 = vld [vmem:[#allocation2 + $0x1c] sm:$0xf0]  ;;  %v15045_v8 = vld [vmem:[#allocation2 + $0x8] sm:$0xf] }
  0x86   :  { %1366 = vmatpush.bf16.msrb.mxu0 %v10936_v14  ;;  %1084 = vmatmul.bf16.vlgmr.msra.gmra.mxu1 %v10724_v26  ;;  %v10908_v14 = vor.u32 %v15055_v62, %v10905_v63  ;;  %v15116_v63 = vld [vmem:[#allocation5 + $0x4f4] sm:$0xf0]  ;;  %v10865_v9 = vld [vmem:[#allocation2 + $0x20] sm:$0xf0]  ;;  %v11135_v16 = vld [vmem:[#allocation5 + $0x4e0] sm:$0xf] }
  0x87   :  { %1385 = vmatpush.bf16.msrb.mxu1 %v11000_v18  ;;  %1103 = vmatmul.bf16.vlgmr.msra.gmra.mxu2 %v10720_v25  ;;  %v10895_v18 = vld [vmem:[#allocation5 + $0x320] sm:$0xf]  ;;  %v10728_v25 = vor.u32 %v15012_v3, %v10727_v2  ;;  %v10948_v3 = vor.u32 %v15065_v54, %v10945_v55  ;;  %v15095_v24 = vld [vmem:[#allocation5 + $0x454] sm:$0xf]  ;;  %v15096_v29 = vld [vmem:[#allocation5 + $0x454] sm:$0xf0] }
  0x88   :  { %1404 = vmatpush.bf16.msrb.mxu2 %v10940_v13  ;;  %1122 = vmatmul.bf16.vlgmr.msra.gmra.mxu3 %v10724_v26  ;;  %v169_v13 = vld [vmem:[%s17172_s0 + $0x88] sm:$0xff]  ;;  %v10732_v26 = vor.u32 %v15011_v4, %v10729_v11  ;;  %v10896_v32 = vor.u32 %v15054_v22, %v10895_v18  ;;  %v10863_v4 = vld [vmem:[#allocation2 + $0x4] sm:$0xf]  ;;  %v10868_v18 = vor.u32 %v15045_v8, %v10865_v9  ;;  %v11127_v30 = vld [vmem:[#allocation5 + $0x4d0] sm:$0xf] }
  0x89   :  { %1423 = vmatpush.bf16.msrb.mxu3 %v11004_v19  ;;  %v189_v19 = vpack.c.bf16 %v169_v13, %v168_v12  ;;  %v15097_v12 = vld [vmem:[#allocation5 + $0x464] sm:$0xf]  ;;  %v11073_v13 = vld [vmem:[#allocation5 + $0x468] sm:$0xf0]  ;;  %v10864_v17 = vor.u32 %v15046_v7, %v10863_v4  ;;  %v11055_v40 = vld [vmem:[#allocation5 + $0x440] sm:$0xf] }
  0x8a   :  { %1367 = vmatpush.bf16.msrb.mxu0 %v10928_v34  ;;  %v10889_v34 = vld [vmem:[#allocation5 + $0x318] sm:$0xf0]  ;;  %v11076_v22 = vor.u32 %v15097_v12, %v11073_v13  ;;  %v15093_v36 = vld [vmem:[#allocation5 + $0x444] sm:$0xf]  ;;  %v15094_v41 = vld [vmem:[#allocation5 + $0x444] sm:$0xf0] }
  0x8b   :  { %1386 = vmatpush.bf16.msrb.mxu1 %v10992_v38  ;;  %206 = vst [vmem:[#allocation2 + $0x40] sm:$0xff] %v189_v19  ;;  %v10964_v38 = vor.u32 %v15069_v27, %v10961_v28  ;;  %v15114_v19 = vld [vmem:[#allocation5 + $0x4e4] sm:$0xf0]  ;;  %v11063_v28 = vld [vmem:[#allocation5 + $0x450] sm:$0xf] }
  0x8c   :  { %1405 = vmatpush.bf16.msrb.mxu2 %v10932_v33  ;;  %v15051_v33 = vld [vmem:[#allocation5 + $0x314] sm:$0xf]  ;;  %v11119_v42 = vld [vmem:[#allocation5 + $0x4c0] sm:$0xf]  ;;  %v15110_v43 = vld [vmem:[#allocation5 + $0x4c4] sm:$0xf0] }
  0x8d   :  { %1424 = vmatpush.bf16.msrb.mxu3 %v10996_v39  ;;  %v15052_v39 = vld [vmem:[#allocation5 + $0x314] sm:$0xf0]  ;;  %v10892_v45 = vor.u32 %v15051_v33, %v10889_v34  ;;  %v11129_v33 = vld [vmem:[#allocation5 + $0x4d8] sm:$0xf0]  ;;  %v11111_v55 = vld [vmem:[#allocation5 + $0x4b0] sm:$0xf] }
  0x8e   :  { %1368 = vmatpush.bf16.msrb.mxu0 %v10920_v49  ;;  %v10888_v46 = vor.u32 %v15052_v39, %v10887_v35  ;;  %v15050_v49 = vld [vmem:[#allocation5 + $0x304] sm:$0xf0]  ;;  %v11064_v35 = vor.u32 %v15096_v29, %v11063_v28  ;;  %v15092_v54 = vld [vmem:[#allocation5 + $0x434] sm:$0xf0]  ;;  %v15107_v57 = vld [vmem:[#allocation5 + $0x4b4] sm:$0xf] }
  0x8f   :  { %1387 = vmatpush.bf16.msrb.mxu1 %v10984_v52  ;;  %v10943_v52 = vld [vmem:[#allocation5 + $0x380] sm:$0xf]  ;;  %v15108_v56 = vld [vmem:[#allocation5 + $0x4b4] sm:$0xf0]  ;;  %v11113_v58 = vld [vmem:[#allocation5 + $0x4b8] sm:$0xf0] }
  0x90   :  { %1406 = vmatpush.bf16.msrb.mxu2 %v10924_v48  ;;  %v10879_v48 = vld [vmem:[#allocation5 + $0x300] sm:$0xf]  ;;  %v15048_v59 = vld [vmem:[#allocation2 + $0x54] sm:$0xf0]  ;;  %v15106_v9 = vld [vmem:[#allocation5 + $0x4a4] sm:$0xf0] }
  0x91   :  { %1425 = vmatpush.bf16.msrb.mxu3 %v10988_v53  ;;  %v15066_v53 = vld [vmem:[#allocation5 + $0x384] sm:$0xf0]  ;;  %v10880_v62 = vor.u32 %v15050_v49, %v10879_v48  ;;  %v15091_v48 = vld [vmem:[#allocation5 + $0x434] sm:$0xf]  ;;  %v11049_v49 = vld [vmem:[#allocation5 + $0x438] sm:$0xf0] }
  0x92   :  { %1369 = vmatpush.bf16.msrb.mxu0 %v10912_v61  ;;  %v10884_v61 = vor.u32 %v15049_v44, %v10881_v47  ;;  %v10944_v2 = vor.u32 %v15066_v53, %v10943_v52  ;;  %v15109_v44 = vld [vmem:[#allocation5 + $0x4c4] sm:$0xf]  ;;  %v11056_v47 = vor.u32 %v15094_v41, %v11055_v40  ;;  %v10871_v52 = vld [vmem:[#allocation2 + $0x3c] sm:$0xf]  ;;  %v11047_v53 = vld [vmem:[#allocation5 + $0x430] sm:$0xf] }
  0x93   :  { %1388 = vmatpush.bf16.msrb.mxu1 %v10976_v0  ;;  %v15115_v0 = vld [vmem:[#allocation5 + $0x4f4] sm:$0xf]  ;;  %v11039_v4 = vld [vmem:[#allocation5 + $0x420] sm:$0xf]  ;;  %v10872_v7 = vor.u32 %v15048_v59, %v10871_v52  ;;  %v15086_v29 = vld [vmem:[#allocation5 + $0x404] sm:$0xf0] }
  0x94   :  { %1407 = vmatpush.bf16.msrb.mxu2 %v10916_v60  ;;  %v11143_v60 = vld [vmem:[#allocation5 + $0x4f0] sm:$0xf]  ;;  %v11023_v28 = vld [vmem:[#allocation5 + $0x400] sm:$0xf]  ;;  %v15081_v52 = vld [vmem:[#allocation2 + $0x8] sm:$0xf] }
  0x95   :  { %1426 = vmatpush.bf16.msrb.mxu3 %v10980_v1  ;;  %1070 = vmatmul.bf16.gmra.mxu0 %v10728_v25  ;;  %v11145_v1 = vld [vmem:[#allocation5 + $0x4f8] sm:$0xf0]  ;;  %v11144_v10 = vor.u32 %v15116_v63, %v11143_v60  ;;  %v15047_v60 = vld [vmem:[#allocation2 + $0x40] sm:$0xf]  ;;  %v11048_v63 = vor.u32 %v15092_v54, %v11047_v53  ;;  %v11287_v40 = vld [vmem:[#allocation5 + $0x5f0] sm:$0xf] }
  0x96   :  { %1370 = vmatpush.bf16.msrb.mxu0 %v10904_v15  ;;  %1089 = vmatmul.bf16.gmra.mxu1 %v10732_v26  ;;  %v11148_v11 = vor.u32 %v15115_v0, %v11145_v1  ;;  %v15098_v15 = vld [vmem:[#allocation5 + $0x464] sm:$0xf0]  ;;  %v15089_v0 = vld [vmem:[#allocation5 + $0x424] sm:$0xf]  ;;  %v11041_v1 = vld [vmem:[#allocation5 + $0x428] sm:$0xf0] }
  0x97   :  { %1389 = vmatpush.bf16.msrb.mxu1 %v10968_v20  ;;  %1108 = vmatmul.bf16.gmra.mxu2 %v10728_v25  ;;  %v15113_v20 = vld [vmem:[#allocation5 + $0x4e4] sm:$0xf]  ;;  %v11065_v25 = vld [vmem:[#allocation5 + $0x458] sm:$0xf0]  ;;  %v11044_v12 = vor.u32 %v15089_v0, %v11041_v1  ;;  %v11215_v59 = vld [vmem:[#allocation5 + $0x560] sm:$0xf] }
  0x98   :  { %1408 = vmatpush.bf16.msrb.mxu2 %v10908_v14  ;;  %1127 = vmatmul.bf16.gmra.mxu3 %v10732_v26  ;;  %v11071_v14 = vld [vmem:[#allocation5 + $0x460] sm:$0xf]  ;;  %v11136_v26 = vor.u32 %v15114_v19, %v11135_v16  ;;  %v11068_v34 = vor.u32 %v15095_v24, %v11065_v25  ;;  %v15088_v19 = vld [vmem:[#allocation5 + $0x414] sm:$0xf0]  ;;  %v15085_v24 = vld [vmem:[#allocation5 + $0x404] sm:$0xf] }
  0x99   :  { %1427 = vmatpush.bf16.msrb.mxu3 %v10972_v21  ;;  %v11137_v21 = vld [vmem:[#allocation5 + $0x4e8] sm:$0xf0]  ;;  %v11072_v23 = vor.u32 %v15098_v15, %v11071_v14  ;;  %v15087_v14 = vld [vmem:[#allocation5 + $0x414] sm:$0xf]  ;;  %v11033_v15 = vld [vmem:[#allocation5 + $0x418] sm:$0xf0] }
  0x9a   :  { %1371 = vmatpush.bf16.msrb.mxu0 %v10896_v32  ;;  %v11140_v27 = vor.u32 %v15113_v20, %v11137_v21  ;;  %v15111_v32 = vld [vmem:[#allocation5 + $0x4d4] sm:$0xf]  ;;  %v11095_v20 = vld [vmem:[#allocation5 + $0x490] sm:$0xf]  ;;  %v15104_v21 = vld [vmem:[#allocation5 + $0x494] sm:$0xf0]  ;;  %v11036_v25 = vor.u32 %v15087_v14, %v11033_v15 }
  0x9b   :  { %1390 = vmatpush.bf16.msrb.mxu1 %v10960_v37  ;;  %v11057_v37 = vld [vmem:[#allocation5 + $0x448] sm:$0xf0]  ;;  %v11132_v39 = vor.u32 %v15111_v32, %v11129_v33  ;;  %v11087_v32 = vld [vmem:[#allocation5 + $0x480] sm:$0xf]  ;;  %v15102_v33 = vld [vmem:[#allocation5 + $0x484] sm:$0xf0] }
  0x9c   :  { %1409 = vmatpush.bf16.msrb.mxu2 %v10900_v31  ;;  %v15112_v31 = vld [vmem:[#allocation5 + $0x4d4] sm:$0xf0]  ;;  %v11009_v53 = vld [vmem:[#allocation2 + $0x20] sm:$0xf0]  ;;  %v15150_v0 = vld [vmem:[#allocation5 + $0x5e4] sm:$0xf0] }
  0x9d   :  { %1428 = vmatpush.bf16.msrb.mxu3 %v10964_v38  ;;  %v11128_v38 = vor.u32 %v15112_v31, %v11127_v30  ;;  %v11096_v30 = vor.u32 %v15104_v21, %v11095_v20  ;;  %v15149_v1 = vld [vmem:[#allocation5 + $0x5e4] sm:$0xf]  ;;  %v11271_v14 = vld [vmem:[#allocation5 + $0x5d0] sm:$0xf]  ;;  %v15148_v15 = vld [vmem:[#allocation5 + $0x5d4] sm:$0xf0] }
  0x9e   :  { %1372 = vmatpush.bf16.msrb.mxu0 %v10888_v46  ;;  %v11060_v46 = vor.u32 %v15093_v36, %v11057_v37  ;;  %v15135_v36 = vld [vmem:[#allocation5 + $0x574] sm:$0xf]  ;;  %v11225_v37 = vld [vmem:[#allocation5 + $0x578] sm:$0xf0] }
  0x9f   :  { %1391 = vmatpush.bf16.msrb.mxu1 %v10952_v50  ;;  %v11120_v50 = vor.u32 %v15110_v43, %v11119_v42  ;;  %v11024_v42 = vor.u32 %v15086_v29, %v11023_v28  ;;  %v15152_v43 = vld [vmem:[#allocation5 + $0x5f4] sm:$0xf0]  ;;  %v11263_v28 = vld [vmem:[#allocation5 + $0x5c0] sm:$0xf] }
  0xa0   :  { %1410 = vmatpush.bf16.msrb.mxu2 %v10892_v45  ;;  %v11121_v45 = vld [vmem:[#allocation5 + $0x4c8] sm:$0xf0]  ;;  %v11288_v54 = vor.u32 %v15152_v43, %v11287_v40  ;;  %v15127_v40 = vld [vmem:[#allocation5 + $0x534] sm:$0xf] }
  0xa1   :  { %1429 = vmatpush.bf16.msrb.mxu3 %v10956_v51  ;;  %v11124_v51 = vor.u32 %v15109_v44, %v11121_v45  ;;  %v15151_v44 = vld [vmem:[#allocation5 + $0x5f4] sm:$0xf]  ;;  %v11289_v45 = vld [vmem:[#allocation5 + $0x5f8] sm:$0xf0] }
  0xa2   :  { %1373 = vmatpush.bf16.msrb.mxu0 %v10880_v62  ;;  %v11052_v62 = vor.u32 %v15091_v48, %v11049_v49  ;;  %v11007_v48 = vld [vmem:[#allocation2 + $0x4] sm:$0xf]  ;;  %v11228_v49 = vor.u32 %v15135_v36, %v11225_v37 }
  0xa3   :  { %1392 = vmatpush.bf16.msrb.mxu1 %v10944_v2  ;;  %v11112_v2 = vor.u32 %v15108_v56, %v11111_v55  ;;  %v11292_v55 = vor.u32 %v15151_v44, %v11289_v45  ;;  %v217_v56 = vld [vmem:[#allocation9] sm:$0x3]  ;;  %v11015_v45 = vld [vmem:[#allocation2 + $0x3c] sm:$0xf] }
  0xa4   :  { %1411 = vmatpush.bf16.msrb.mxu2 %v10884_v61  ;;  %v10873_v61 = vld [vmem:[#allocation2 + $0x58] sm:$0xf0] }
  0xa5   :  { %1430 = vmatpush.bf16.msrb.mxu3 %v10948_v3  ;;  %1374 = vmatmul.bf16.vlgmr.msrb.gmra.mxu0 %v10864_v17  ;;  %v11116_v3 = vor.u32 %v15107_v57, %v11113_v58  ;;  %v10876_v8 = vor.u32 %v15047_v60, %v10873_v61  ;;  %v15133_v57 = vld [vmem:[#allocation5 + $0x564] sm:$0xf]  ;;  %v11217_v58 = vld [vmem:[#allocation5 + $0x568] sm:$0xf0]  ;;  %v15134_v60 = vld [vmem:[#allocation5 + $0x564] sm:$0xf0] }
  0xa6   :  { %1675 = vmatpush.bf16.msra.mxu0 %v11080_v6  ;;  %1393 = vmatmul.bf16.vlgmr.msrb.gmra.mxu1 %v10868_v18  ;;  %v11103_v6 = vld [vmem:[#allocation5 + $0x4a0] sm:$0xf] }
  0xa7   :  { %1694 = vmatpush.bf16.msra.mxu1 %v11144_v10  ;;  %1412 = vmatmul.bf16.vlgmr.msrb.gmra.mxu2 %v10864_v17  ;;  %v15105_v10 = vld [vmem:[#allocation5 + $0x4a4] sm:$0xf]  ;;  %v11104_v16 = vor.u32 %v15106_v9, %v11103_v6  ;;  %v11279_v61 = vld [vmem:[#allocation5 + $0x5e0] sm:$0xf]  ;;  %v11220_v6 = vor.u32 %v15133_v57, %v11217_v58  ;;  %v11209_v9 = vld [vmem:[#allocation5 + $0x558] sm:$0xf0] }
  0xa8   :  { %1713 = vmatpush.bf16.msra.mxu2 %v11084_v5  ;;  %1431 = vmatmul.bf16.vlgmr.msrb.gmra.mxu3 %v10868_v18  ;;  %v15090_v5 = vld [vmem:[#allocation5 + $0x424] sm:$0xf0]  ;;  %v11031_v18 = vld [vmem:[#allocation5 + $0x410] sm:$0xf]  ;;  %v11017_v57 = vld [vmem:[#allocation2 + $0x58] sm:$0xf0] }
  0xa9   :  { %1732 = vmatpush.bf16.msra.mxu3 %v11148_v11  ;;  %v11105_v11 = vld [vmem:[#allocation5 + $0x4a8] sm:$0xf0]  ;;  %v11040_v13 = vor.u32 %v15090_v5, %v11039_v4 }
  0xaa   :  { %1676 = vmatpush.bf16.msra.mxu0 %v11072_v23  ;;  %v11108_v17 = vor.u32 %v15105_v10, %v11105_v11  ;;  %v11097_v23 = vld [vmem:[#allocation5 + $0x498] sm:$0xf0]  ;;  %v11280_v10 = vor.u32 %v15150_v0, %v11279_v61  ;;  %v11185_v61 = vld [vmem:[#allocation5 + $0x528] sm:$0xf0] }
  0xab   :  { %1695 = vmatpush.bf16.msra.mxu1 %v11136_v26  ;;  %v11032_v26 = vor.u32 %v15088_v19, %v11031_v18  ;;  %v16431_v19 = vperm.slane %v217_v56, 1 }
  0xac   :  { %1714 = vmatpush.bf16.msra.mxu2 %v11076_v22  ;;  %v15103_v22 = vld [vmem:[#allocation5 + $0x494] sm:$0xf] }
  0xad   :  { %1733 = vmatpush.bf16.msra.mxu3 %v11140_v27  ;;  %v11025_v27 = vld [vmem:[#allocation5 + $0x408] sm:$0xf0]  ;;  %v11100_v31 = vor.u32 %v15103_v22, %v11097_v23  ;;  %v15129_v22 = vld [vmem:[#allocation5 + $0x544] sm:$0xf] }
  0xae   :  { %1677 = vmatpush.bf16.msra.mxu0 %v11064_v35  ;;  %v11089_v35 = vld [vmem:[#allocation5 + $0x488] sm:$0xf0]  ;;  %v11028_v41 = vor.u32 %v15085_v24, %v11025_v27  ;;  %v11272_v24 = vor.u32 %v15148_v15, %v11271_v14  ;;  %v15130_v27 = vld [vmem:[#allocation5 + $0x544] sm:$0xf0] }
  0xaf   :  { %1696 = vmatpush.bf16.msra.mxu1 %v11128_v38  ;;  %v11223_v38 = vld [vmem:[#allocation5 + $0x570] sm:$0xf]  ;;  %v11201_v23 = vld [vmem:[#allocation5 + $0x548] sm:$0xf0] }
  0xb0   :  { %1715 = vmatpush.bf16.msra.mxu2 %v11068_v34  ;;  %v15101_v34 = vld [vmem:[#allocation5 + $0x484] sm:$0xf] }
  0xb1   :  { %1734 = vmatpush.bf16.msra.mxu3 %v11132_v39  ;;  %v15136_v39 = vld [vmem:[#allocation5 + $0x574] sm:$0xf0] }
  0xb2   :  { %1678 = vmatpush.bf16.msra.mxu0 %v11056_v47  ;;  %v11092_v47 = vor.u32 %v15101_v34, %v11089_v35 }
  0xb3   :  { %1697 = vmatpush.bf16.msra.mxu1 %v11120_v50  ;;  %v11224_v50 = vor.u32 %v15136_v39, %v11223_v38  ;;  %v11204_v38 = vor.u32 %v15129_v22, %v11201_v23 }
  0xb4   :  { %1716 = vmatpush.bf16.msra.mxu2 %v11060_v46  ;;  %v11088_v46 = vor.u32 %v15102_v33, %v11087_v32  ;;  %v15145_v32 = vld [vmem:[#allocation5 + $0x5c4] sm:$0xf]  ;;  %v11265_v33 = vld [vmem:[#allocation5 + $0x5c8] sm:$0xf0] }
  0xb5   :  { %1735 = vmatpush.bf16.msra.mxu3 %v11124_v51  ;;  %1379 = vmatmul.bf16.gmra.mxu0 %v10872_v7  ;;  %v15082_v51 = vld [vmem:[#allocation2 + $0x1c] sm:$0xf0]  ;;  %v11268_v44 = vor.u32 %v15145_v32, %v11265_v33  ;;  %v15121_v33 = vld [vmem:[#allocation5 + $0x504] sm:$0xf] }
  0xb6   :  { %1679 = vmatpush.bf16.msra.mxu0 %v11048_v63  ;;  %1398 = vmatmul.bf16.gmra.mxu1 %v10876_v8  ;;  %v11012_v63 = vor.u32 %v15081_v52, %v11009_v53  ;;  %v11257_v52 = vld [vmem:[#allocation5 + $0x5b8] sm:$0xf0] }
  0xb7   :  { %1698 = vmatpush.bf16.msra.mxu1 %v11112_v2  ;;  %1417 = vmatmul.bf16.gmra.mxu2 %v10872_v7  ;;  %v11281_v2 = vld [vmem:[#allocation5 + $0x5e8] sm:$0xf0]  ;;  %v11216_v7 = vor.u32 %v15134_v60, %v11215_v59  ;;  %v15125_v60 = vld [vmem:[#allocation5 + $0x524] sm:$0xf] }
  0xb8   :  { %1717 = vmatpush.bf16.msra.mxu2 %v11052_v62  ;;  %1436 = vmatmul.bf16.gmra.mxu3 %v10876_v8  ;;  %v11008_v62 = vor.u32 %v15082_v51, %v11007_v48  ;;  %v15131_v8 = vld [vmem:[#allocation5 + $0x554] sm:$0xf]  ;;  %v11284_v11 = vor.u32 %v15149_v1, %v11281_v2  ;;  %v15128_v48 = vld [vmem:[#allocation5 + $0x534] sm:$0xf0]  ;;  %v11183_v1 = vld [vmem:[#allocation5 + $0x520] sm:$0xf] }
  0xb9   :  { %1736 = vmatpush.bf16.msra.mxu3 %v11116_v3  ;;  %v16428_v3 = vperm.slane %v217_v56, 0  ;;  %v11212_v20 = vor.u32 %v15131_v8, %v11209_v9  ;;  %v15143_v51 = vld [vmem:[#allocation5 + $0x5b4] sm:$0xf]  ;;  %v15083_v56 = vld [vmem:[#allocation2 + $0x40] sm:$0xf] }
  0xba   :  { %1680 = vmatpush.bf16.msra.mxu0 %v11040_v13  ;;  %v15132_v13 = vld [vmem:[#allocation5 + $0x554] sm:$0xf0]  ;;  %v11260_v0 = vor.u32 %v15143_v51, %v11257_v52  ;;  %v15126_v2 = vld [vmem:[#allocation5 + $0x524] sm:$0xf0]  ;;  %v11020_v8 = vor.u32 %v15083_v56, %v11017_v57  ;;  %v11431_v56 = vld [vmem:[#allocation5 + $0x6f0] sm:$0xf] }
  0xbb   :  { %1699 = vmatpush.bf16.msra.mxu1 %v11104_v16  ;;  %v15147_v16 = vld [vmem:[#allocation5 + $0x5d4] sm:$0xf]  ;;  %v15142_v9 = vld [vmem:[#allocation5 + $0x5a4] sm:$0xf0]  ;;  %v15172_v51 = vld [vmem:[#allocation5 + $0x674] sm:$0xf0] }
  0xbc   :  { %1718 = vmatpush.bf16.msra.mxu2 %v11044_v12  ;;  %v11207_v12 = vld [vmem:[#allocation5 + $0x550] sm:$0xf]  ;;  %v15188_v57 = vld [vmem:[#allocation5 + $0x6f4] sm:$0xf0] }
  0xbd   :  { %1737 = vmatpush.bf16.msra.mxu3 %v11108_v17  ;;  %v11273_v17 = vld [vmem:[#allocation5 + $0x5d8] sm:$0xf0]  ;;  %v11208_v21 = vor.u32 %v15132_v13, %v11207_v12 }
  0xbe   :  { %1681 = vmatpush.bf16.msra.mxu0 %v11032_v26  ;;  %v11199_v26 = vld [vmem:[#allocation5 + $0x540] sm:$0xf] }
  0xbf   :  { %1700 = vmatpush.bf16.msra.mxu1 %v11096_v30  ;;  %v11200_v39 = vor.u32 %v15130_v27, %v11199_v26  ;;  %v11239_v26 = vld [vmem:[#allocation5 + $0x590] sm:$0xf]  ;;  %v15140_v27 = vld [vmem:[#allocation5 + $0x594] sm:$0xf0] }
  0xc0   :  { %1719 = vmatpush.bf16.msra.mxu2 %v11036_v25  ;;  %v11276_v25 = vor.u32 %v15147_v16, %v11273_v17  ;;  %v11188_v16 = vor.u32 %v15125_v60, %v11185_v61  ;;  %v11184_v17 = vor.u32 %v15126_v2, %v11183_v1  ;;  %v15187_v60 = vld [vmem:[#allocation5 + $0x6f4] sm:$0xf]  ;;  %v11433_v61 = vld [vmem:[#allocation5 + $0x6f8] sm:$0xf0]  ;;  %v11151_v1 = vld [vmem:[#allocation2 + $0x4] sm:$0xf] }
  0xc1   :  { %1738 = vmatpush.bf16.msra.mxu3 %v11100_v31  ;;  %v15146_v31 = vld [vmem:[#allocation5 + $0x5c4] sm:$0xf0]  ;;  %v15118_v2 = vld [vmem:[#allocation2 + $0x1c] sm:$0xf0] }
  0xc2   :  { %1682 = vmatpush.bf16.msra.mxu0 %v11024_v42  ;;  %v448_v4 = vpop.f32.mrf.mxu0  ;;  %v11264_v43 = vor.u32 %v15146_v31, %v11263_v28  ;;  %v15139_v28 = vld [vmem:[#allocation5 + $0x594] sm:$0xf] }
  0xc3   :  { %1701 = vmatpush.bf16.msra.mxu1 %v11088_v46  ;;  %v467_v5 = vpop.f32.mrf.mxu1  ;;  %v449_v18 = vadd.f32 %v448_v4, %v16428_v3  ;;  %v15084_v46 = vld [vmem:[#allocation2 + $0x54] sm:$0xf0]  ;;  %v11247_v4 = vld [vmem:[#allocation5 + $0x5a0] sm:$0xf] }
  0xc4   :  { %1720 = vmatpush.bf16.msra.mxu2 %v11028_v41  ;;  %v11193_v41 = vld [vmem:[#allocation5 + $0x538] sm:$0xf0]  ;;  %v11248_v22 = vor.u32 %v15142_v9, %v11247_v4 }
  0xc5   :  { %1739 = vmatpush.bf16.msra.mxu3 %v11092_v47  ;;  %1683 = vmatmul.bf16.vlgmr.msra.gmra.mxu0 %v11008_v62  ;;  %v468_v34 = vadd.f32 %v467_v5, %v449_v18  ;;  %v11191_v47 = vld [vmem:[#allocation5 + $0x530] sm:$0xf]  ;;  %v11196_v58 = vor.u32 %v15127_v40, %v11193_v41  ;;  %v15123_v18 = vld [vmem:[#allocation5 + $0x514] sm:$0xf]  ;;  %v15138_v40 = vld [vmem:[#allocation5 + $0x584] sm:$0xf0] }
  0xc6   :  { %1984 = vmatpush.bf16.msrb.mxu0 %v11224_v50  ;;  %1702 = vmatmul.bf16.vlgmr.msra.gmra.mxu1 %v11012_v63  ;;  %v15144_v50 = vld [vmem:[#allocation5 + $0x5b4] sm:$0xf0]  ;;  %v11192_v59 = vor.u32 %v15128_v48, %v11191_v47 }
  0xc7   :  { %2003 = vmatpush.bf16.msrb.mxu1 %v11288_v54  ;;  %1721 = vmatmul.bf16.vlgmr.msra.gmra.mxu2 %v11008_v62  ;;  %v515_v53 = vmax.f32 %v468_v34, 0.0  ;;  %v11169_v34 = vld [vmem:[#allocation5 + $0x508] sm:$0xf0] }
  0xc8   :  { %2022 = vmatpush.bf16.msrb.mxu2 %v11228_v49  ;;  %1740 = vmatmul.bf16.vlgmr.msra.gmra.mxu3 %v11012_v63  ;;  %v11255_v49 = vld [vmem:[#allocation5 + $0x5b0] sm:$0xf] }
  0xc9   :  { %2041 = vmatpush.bf16.msrb.mxu3 %v11292_v55  ;;  %v11256_v63 = vor.u32 %v15144_v50, %v11255_v49  ;;  %v11369_v49 = vld [vmem:[#allocation5 + $0x678] sm:$0xf0]  ;;  %v11367_v50 = vld [vmem:[#allocation5 + $0x670] sm:$0xf] }
  0xca   :  { %1985 = vmatpush.bf16.msrb.mxu0 %v11216_v7  ;;  %v486_v29 = vpop.f32.mrf.mxu2  ;;  %v450_v36 = vpop.f32.mrf.mxu0  ;;  %v11016_v7 = vor.u32 %v15084_v46, %v11015_v45  ;;  %v11233_v45 = vld [vmem:[#allocation5 + $0x588] sm:$0xf0]  ;;  %v15171_v46 = vld [vmem:[#allocation5 + $0x674] sm:$0xf] }
  0xcb   :  { %2004 = vmatpush.bf16.msrb.mxu1 %v11280_v10  ;;  %v505_v30 = vpop.f32.mrf.mxu3  ;;  %v487_v35 = vadd.f32 %v486_v29, %v16431_v19  ;;  %v469_v37 = vpop.f32.mrf.mxu1  ;;  %v451_v55 = vadd.f32 %v450_v36, %v16428_v3  ;;  %v15141_v10 = vld [vmem:[#allocation5 + $0x5a4] sm:$0xf]  ;;  %v11241_v29 = vld [vmem:[#allocation5 + $0x598] sm:$0xf0]  ;;  %v11372_v4 = vor.u32 %v15171_v46, %v11369_v49 }
  0xcc   :  { %2023 = vmatpush.bf16.msrb.mxu2 %v11220_v6  ;;  %v15165_v49 = vld [vmem:[#allocation5 + $0x644] sm:$0xf] }
  0xcd   :  { %2042 = vmatpush.bf16.msrb.mxu3 %v11284_v11  ;;  %v506_v42 = vadd.f32 %v505_v30, %v487_v35  ;;  %v11249_v11 = vld [vmem:[#allocation5 + $0x5a8] sm:$0xf0]  ;;  %v470_v12 = vadd.f32 %v469_v37, %v451_v55  ;;  %v11167_v35 = vld [vmem:[#allocation5 + $0x500] sm:$0xf] }
  0xce   :  { %1986 = vmatpush.bf16.msrb.mxu0 %v11208_v21  ;;  %v11252_v23 = vor.u32 %v15141_v10, %v11249_v11  ;;  %v15117_v10 = vld [vmem:[#allocation2 + $0x8] sm:$0xf]  ;;  %v11153_v11 = vld [vmem:[#allocation2 + $0x20] sm:$0xf0] }
  0xcf   :  { %2005 = vmatpush.bf16.msrb.mxu1 %v11272_v24  ;;  %v516_v54 = vmax.f32 %v506_v42, 0.0  ;;  %v11175_v24 = vld [vmem:[#allocation5 + $0x510] sm:$0xf]  ;;  %v517_v30 = vmax.f32 %v470_v12, 0.0  ;;  %v11240_v42 = vor.u32 %v15140_v27, %v11239_v26  ;;  %v11436_v12 = vor.u32 %v15187_v60, %v11433_v61  ;;  %v11425_v26 = vld [vmem:[#allocation5 + $0x6e8] sm:$0xf0] }
  0xd0   :  { %2024 = vmatpush.bf16.msrb.mxu2 %v11212_v20  ;;  %v11177_v20 = vld [vmem:[#allocation5 + $0x518] sm:$0xf0]  ;;  %v15181_v60 = vld [vmem:[#allocation5 + $0x6c4] sm:$0xf]  ;;  %v11409_v61 = vld [vmem:[#allocation5 + $0x6c8] sm:$0xf0] }
  0xd1   :  { %2043 = vmatpush.bf16.msrb.mxu3 %v11276_v25  ;;  %v523_v62 = vpack.c.bf16 %v516_v54, %v515_v53  ;;  %v15124_v25 = vld [vmem:[#allocation5 + $0x514] sm:$0xf0]  ;;  %v11180_v36 = vor.u32 %v15123_v18, %v11177_v20  ;;  %v11423_v18 = vld [vmem:[#allocation5 + $0x6e0] sm:$0xf] }
  0xd2   :  { %1987 = vmatpush.bf16.msrb.mxu0 %v11200_v39  ;;  %v488_v5 = vpop.f32.mrf.mxu2  ;;  %v453_v14 = vpop.f32.mrf.mxu0  ;;  %v11176_v37 = vor.u32 %v15124_v25, %v11175_v24  ;;  %v11231_v39 = vld [vmem:[#allocation5 + $0x580] sm:$0xf]  ;;  %v15186_v24 = vld [vmem:[#allocation5 + $0x6e4] sm:$0xf0]  ;;  %v15185_v25 = vld [vmem:[#allocation5 + $0x6e4] sm:$0xf] }
  0xd3   :  { %2006 = vmatpush.bf16.msrb.mxu1 %v11264_v43  ;;  %v507_v6 = vpop.f32.mrf.mxu3  ;;  %527 = vst [vmem:[#allocation3 + $0x8] sm:$0xff] %v523_v62  ;;  %v489_v13 = vadd.f32 %v488_v5, %v16431_v19  ;;  %v472_v15 = vpop.f32.mrf.mxu1  ;;  %v454_v32 = vadd.f32 %v453_v14, %v16428_v3  ;;  %v11244_v43 = vor.u32 %v15139_v28, %v11241_v29  ;;  %v11361_v14 = vld [vmem:[#allocation5 + $0x668] sm:$0xf0] }
  0xd4   :  { %2025 = vmatpush.bf16.msrb.mxu2 %v11204_v38  ;;  %v15122_v38 = vld [vmem:[#allocation5 + $0x504] sm:$0xf0]  ;;  %v11368_v5 = vor.u32 %v15172_v51, %v11367_v50  ;;  %v11345_v50 = vld [vmem:[#allocation5 + $0x648] sm:$0xf0] }
  0xd5   :  { %2044 = vmatpush.bf16.msrb.mxu3 %v11268_v44  ;;  %v508_v21 = vadd.f32 %v507_v6, %v489_v13  ;;  %1688 = vmatmul.bf16.gmra.mxu0 %v11016_v7  ;;  %v15137_v44 = vld [vmem:[#allocation5 + $0x584] sm:$0xf]  ;;  %v473_v52 = vadd.f32 %v472_v15, %v454_v32  ;;  %v11432_v6 = vor.u32 %v15188_v57, %v11431_v56  ;;  %v11407_v56 = vld [vmem:[#allocation5 + $0x6c0] sm:$0xf] }
  0xd6   :  { %1988 = vmatpush.bf16.msrb.mxu0 %v11192_v59  ;;  %1707 = vmatmul.bf16.gmra.mxu1 %v11020_v8  ;;  %v11168_v59 = vor.u32 %v15122_v38, %v11167_v35  ;;  %v15169_v13 = vld [vmem:[#allocation5 + $0x664] sm:$0xf]  ;;  %v11351_v38 = vld [vmem:[#allocation5 + $0x650] sm:$0xf] }
  0xd7   :  { %2007 = vmatpush.bf16.msrb.mxu1 %v11256_v63  ;;  %v518_v31 = vmax.f32 %v508_v21, 0.0  ;;  %1726 = vmatmul.bf16.gmra.mxu2 %v11016_v7  ;;  %v11232_v63 = vor.u32 %v15138_v40, %v11231_v39  ;;  %v519_v7 = vmax.f32 %v473_v52, 0.0  ;;  %v15168_v39 = vld [vmem:[#allocation5 + $0x654] sm:$0xf0]  ;;  %v11415_v40 = vld [vmem:[#allocation5 + $0x6d0] sm:$0xf] }
  0xd8   :  { %2026 = vmatpush.bf16.msrb.mxu2 %v11196_v58  ;;  %1745 = vmatmul.bf16.gmra.mxu3 %v11020_v8  ;;  %v11172_v58 = vor.u32 %v15121_v33, %v11169_v34  ;;  %v15167_v33 = vld [vmem:[#allocation5 + $0x654] sm:$0xf]  ;;  %v11353_v34 = vld [vmem:[#allocation5 + $0x658] sm:$0xf0] }
  0xd9   :  { %2045 = vmatpush.bf16.msrb.mxu3 %v11260_v0  ;;  %v524_v41 = vpack.c.bf16 %v518_v31, %v517_v30  ;;  %v11236_v0 = vor.u32 %v15137_v44, %v11233_v45  ;;  %v11364_v31 = vor.u32 %v15169_v13, %v11361_v14  ;;  %v15164_v13 = vld [vmem:[#allocation5 + $0x634] sm:$0xf0]  ;;  %v11399_v14 = vld [vmem:[#allocation5 + $0x6b0] sm:$0xf] }
  0xda   :  { %1989 = vmatpush.bf16.msrb.mxu0 %v11184_v17  ;;  %v491_v47 = vpop.f32.mrf.mxu2  ;;  %v455_v54 = vpop.f32.mrf.mxu0  ;;  %v15170_v17 = vld [vmem:[#allocation5 + $0x664] sm:$0xf0] }
  0xdb   :  { %2008 = vmatpush.bf16.msrb.mxu1 %v11248_v22  ;;  %v510_v48 = vpop.f32.mrf.mxu3  ;;  %528 = vst [vmem:[#allocation3 + $0x80] sm:$0xff] %v524_v41  ;;  %v492_v53 = vadd.f32 %v491_v47, %v16431_v19  ;;  %v474_v55 = vpop.f32.mrf.mxu1  ;;  %v456_v9 = vadd.f32 %v455_v54, %v16428_v3  ;;  %v11152_v22 = vor.u32 %v15118_v2, %v11151_v1  ;;  %v15184_v41 = vld [vmem:[#allocation5 + $0x6d4] sm:$0xf0]  ;;  %v11343_v54 = vld [vmem:[#allocation5 + $0x640] sm:$0xf] }
  0xdc   :  { %2027 = vmatpush.bf16.msrb.mxu2 %v11188_v16  ;;  %v11359_v16 = vld [vmem:[#allocation5 + $0x660] sm:$0xf]  ;;  %v11356_v47 = vor.u32 %v15167_v33, %v11353_v34  ;;  %v11416_v52 = vor.u32 %v15184_v41, %v11415_v40  ;;  %v11348_v2 = vor.u32 %v15165_v49, %v11345_v50  ;;  %v11393_v40 = vld [vmem:[#allocation5 + $0x6a8] sm:$0xf0] }
  0xdd   :  { %2046 = vmatpush.bf16.msrb.mxu3 %v11252_v23  ;;  %v511_v62 = vadd.f32 %v510_v48, %v492_v53  ;;  %v11156_v23 = vor.u32 %v15117_v10, %v11153_v11  ;;  %v475_v27 = vadd.f32 %v474_v55, %v456_v9  ;;  %v11360_v32 = vor.u32 %v15170_v17, %v11359_v16  ;;  %v15166_v55 = vld [vmem:[#allocation5 + $0x644] sm:$0xf0]  ;;  %v11159_v10 = vld [vmem:[#allocation2 + $0x3c] sm:$0xf]  ;;  %v15120_v11 = vld [vmem:[#allocation2 + $0x54] sm:$0xf0] }
  0xde   :  { %1990 = vmatpush.bf16.msrb.mxu0 %v11176_v37  ;;  %v11428_v37 = vor.u32 %v15185_v25, %v11425_v26  ;;  %v11352_v48 = vor.u32 %v15168_v39, %v11351_v38  ;;  %v11412_v9 = vor.u32 %v15181_v60, %v11409_v61  ;;  %v15179_v16 = vld [vmem:[#allocation5 + $0x6b4] sm:$0xf]  ;;  %v11401_v17 = vld [vmem:[#allocation5 + $0x6b8] sm:$0xf0]  ;;  %v15161_v26 = vld [vmem:[#allocation5 + $0x624] sm:$0xf] }
  0xdf   :  { %2009 = vmatpush.bf16.msrb.mxu1 %v11240_v42  ;;  %v520_v8 = vmax.f32 %v511_v62, 0.0  ;;  %v15183_v42 = vld [vmem:[#allocation5 + $0x6d4] sm:$0xf]  ;;  %v521_v44 = vmax.f32 %v475_v27, 0.0  ;;  %v11329_v27 = vld [vmem:[#allocation5 + $0x628] sm:$0xf0] }
  0xe0   :  { %2028 = vmatpush.bf16.msrb.mxu2 %v11180_v36  ;;  %v11424_v36 = vor.u32 %v15186_v24, %v11423_v18  ;;  %v11391_v33 = vld [vmem:[#allocation5 + $0x6a0] sm:$0xf]  ;;  %v15178_v38 = vld [vmem:[#allocation5 + $0x6a4] sm:$0xf0]  ;;  %v15177_v39 = vld [vmem:[#allocation5 + $0x6a4] sm:$0xf] }
  0xe1   :  { %2047 = vmatpush.bf16.msrb.mxu3 %v11244_v43  ;;  %v525_v15 = vpack.c.bf16 %v520_v8, %v519_v7  ;;  %v11417_v43 = vld [vmem:[#allocation5 + $0x6d8] sm:$0xf0]  ;;  %v11392_v50 = vor.u32 %v15178_v38, %v11391_v33  ;;  %v15157_v61 = vld [vmem:[#allocation5 + $0x604] sm:$0xf] }
  0xe2   :  { %1991 = vmatpush.bf16.msrb.mxu0 %v11168_v59  ;;  %v493_v20 = vpop.f32.mrf.mxu2  ;;  %v757_v29 = vpop.f32.mrf.mxu0  ;;  %v11420_v53 = vor.u32 %v15183_v42, %v11417_v43  ;;  %v15182_v59 = vld [vmem:[#allocation5 + $0x6c4] sm:$0xf0] }
  0xe3   :  { %2010 = vmatpush.bf16.msrb.mxu1 %v11232_v63  ;;  %v512_v21 = vpop.f32.mrf.mxu3  ;;  %529 = vst [vmem:[#allocation3 + $0xf8] sm:$0xff] %v525_v15  ;;  %v494_v28 = vadd.f32 %v493_v20, %v16431_v19  ;;  %v776_v30 = vpop.f32.mrf.mxu1  ;;  %v758_v46 = vadd.f32 %v757_v29, %v16428_v3  ;;  %v11408_v8 = vor.u32 %v15182_v59, %v11407_v56  ;;  %v15180_v15 = vld [vmem:[#allocation5 + $0x6b4] sm:$0xf0]  ;;  %v15175_v56 = vld [vmem:[#allocation5 + $0x694] sm:$0xf] }
  0xe4   :  { %2029 = vmatpush.bf16.msrb.mxu2 %v11172_v58  ;;  %v11400_v29 = vor.u32 %v15180_v15, %v11399_v14  ;;  %v11513_v14 = vld [vmem:[#allocation5 + $0x778] sm:$0xf0]  ;;  %v11511_v15 = vld [vmem:[#allocation5 + $0x770] sm:$0xf] }
  0xe5   :  { %2048 = vmatpush.bf16.msrb.mxu3 %v11236_v0  ;;  %v513_v35 = vadd.f32 %v512_v21, %v494_v28  ;;  %1992 = vmatmul.bf16.vlgmr.msrb.gmra.mxu0 %v11152_v22  ;;  %v777_v62 = vadd.f32 %v776_v30, %v758_v46  ;;  %v11404_v30 = vor.u32 %v15179_v16, %v11401_v17  ;;  %v15208_v16 = vld [vmem:[#allocation5 + $0x774] sm:$0xf0] }
  0xe6   :  { %2293 = vmatpush.bf16.msra.mxu0 %v11368_v5  ;;  %2011 = vmatmul.bf16.vlgmr.msrb.gmra.mxu1 %v11156_v23  ;;  %v15163_v5 = vld [vmem:[#allocation5 + $0x634] sm:$0xf] }
  0xe7   :  { %2312 = vmatpush.bf16.msra.mxu1 %v11432_v6  ;;  %v522_v45 = vmax.f32 %v513_v35, 0.0  ;;  %2030 = vmatmul.bf16.vlgmr.msrb.gmra.mxu2 %v11152_v22  ;;  %v11337_v6 = vld [vmem:[#allocation5 + $0x638] sm:$0xf0]  ;;  %v824_v18 = vmax.f32 %v777_v62, 0.0  ;;  %v15119_v22 = vld [vmem:[#allocation2 + $0x40] sm:$0xf] }
  0xe8   :  { %2331 = vmatpush.bf16.msra.mxu2 %v11372_v4  ;;  %2049 = vmatmul.bf16.vlgmr.msrb.gmra.mxu3 %v11156_v23  ;;  %v11344_v4 = vor.u32 %v15166_v55, %v11343_v54  ;;  %v11161_v23 = vld [vmem:[#allocation2 + $0x58] sm:$0xf0]  ;;  %v11340_v24 = vor.u32 %v15163_v5, %v11337_v6  ;;  %v11383_v54 = vld [vmem:[#allocation5 + $0x690] sm:$0xf]  ;;  %v15176_v55 = vld [vmem:[#allocation5 + $0x694] sm:$0xf0] }
  0xe9   :  { %2350 = vmatpush.bf16.msra.mxu3 %v11436_v12  ;;  %v526_v51 = vpack.c.bf16 %v522_v45, %v521_v44  ;;  %v11335_v12 = vld [vmem:[#allocation5 + $0x630] sm:$0xf]  ;;  %v11332_v45 = vor.u32 %v15161_v26, %v11329_v27  ;;  %v11313_v62 = vld [vmem:[#allocation5 + $0x608] sm:$0xf0]  ;;  %v15174_v5 = vld [vmem:[#allocation5 + $0x684] sm:$0xf0] }
  0xea   :  { %2294 = vmatpush.bf16.msra.mxu0 %v11360_v32  ;;  %v795_v57 = vpop.f32.mrf.mxu2  ;;  %v759_v0 = vpop.f32.mrf.mxu0  ;;  %v11336_v25 = vor.u32 %v15164_v13, %v11335_v12  ;;  %v15162_v32 = vld [vmem:[#allocation5 + $0x624] sm:$0xf0]  ;;  %v15223_v26 = vld [vmem:[#allocation5 + $0x7f4] sm:$0xf]  ;;  %v11577_v27 = vld [vmem:[#allocation5 + $0x7f8] sm:$0xf0] }
  0xeb   :  { %2313 = vmatpush.bf16.msra.mxu1 %v11424_v36  ;;  %v814_v58 = vpop.f32.mrf.mxu3  ;;  %530 = vst [vmem:[#allocation3 + $0x170] sm:$0xff] %v526_v51  ;;  %v796_v63 = vadd.f32 %v795_v57, %v16431_v19  ;;  %v778_v1 = vpop.f32.mrf.mxu1  ;;  %v760_v21 = vadd.f32 %v759_v0, %v16428_v3  ;;  %v11160_v36 = vor.u32 %v15120_v11, %v11159_v10  ;;  %v11385_v57 = vld [vmem:[#allocation5 + $0x698] sm:$0xf0]  ;;  %v11377_v10 = vld [vmem:[#allocation5 + $0x688] sm:$0xf0] }
  0xec   :  { %2332 = vmatpush.bf16.msra.mxu2 %v11364_v31  ;;  %v11327_v31 = vld [vmem:[#allocation5 + $0x620] sm:$0xf]  ;;  %v11396_v51 = vor.u32 %v15177_v39, %v11393_v40  ;;  %v15207_v11 = vld [vmem:[#allocation5 + $0x774] sm:$0xf]  ;;  %v15153_v39 = vld [vmem:[#allocation2 + $0xc] sm:$0xf] }
  0xed   :  { %2351 = vmatpush.bf16.msra.mxu3 %v11428_v37  ;;  %v815_v7 = vadd.f32 %v814_v58, %v796_v63  ;;  %v11164_v37 = vor.u32 %v15119_v22, %v11161_v23  ;;  %v779_v41 = vadd.f32 %v778_v1, %v760_v21  ;;  %v11328_v46 = vor.u32 %v15162_v32, %v11327_v31  ;;  %v11311_v63 = vld [vmem:[#allocation5 + $0x600] sm:$0xf]  ;;  %v11575_v22 = vld [vmem:[#allocation5 + $0x7f0] sm:$0xf]  ;;  %v15224_v23 = vld [vmem:[#allocation5 + $0x7f4] sm:$0xf0] }
  0xee   :  { %2295 = vmatpush.bf16.msra.mxu0 %v11352_v48  ;;  %v11321_v48 = vld [vmem:[#allocation5 + $0x618] sm:$0xf0]  ;;  %v11295_v31 = vld [vmem:[#allocation2 + $0x8] sm:$0xf]  ;;  %v15154_v32 = vld [vmem:[#allocation2 + $0x20] sm:$0xf0]  ;;  %v11516_v33 = vor.u32 %v15207_v11, %v11513_v14 }
  0xef   :  { %2314 = vmatpush.bf16.msra.mxu1 %v11416_v52  ;;  %v825_v20 = vmax.f32 %v815_v7, 0.0  ;;  %v11319_v52 = vld [vmem:[#allocation5 + $0x610] sm:$0xf]  ;;  %v826_v58 = vmax.f32 %v779_v41, 0.0  ;;  %v11384_v7 = vor.u32 %v15176_v55, %v11383_v54  ;;  %v11297_v40 = vld [vmem:[#allocation2 + $0x24] sm:$0xf0]  ;;  %v11580_v41 = vor.u32 %v15223_v26, %v11577_v27 }
  0xf0   :  { %2333 = vmatpush.bf16.msra.mxu2 %v11356_v47  ;;  %v15159_v47 = vld [vmem:[#allocation5 + $0x614] sm:$0xf]  ;;  %v11569_v54 = vld [vmem:[#allocation5 + $0x7e8] sm:$0xf0]  ;;  %v15201_v14 = vld [vmem:[#allocation5 + $0x744] sm:$0xf] }
  0xf1   :  { %2352 = vmatpush.bf16.msra.mxu3 %v11420_v53  ;;  %v832_v28 = vpack.c.bf16 %v825_v20, %v824_v18  ;;  %v15160_v53 = vld [vmem:[#allocation5 + $0x614] sm:$0xf0]  ;;  %v11324_v0 = vor.u32 %v15159_v47, %v11321_v48  ;;  %v11567_v47 = vld [vmem:[#allocation5 + $0x7e0] sm:$0xf]  ;;  %v15217_v26 = vld [vmem:[#allocation5 + $0x7c4] sm:$0xf] }
  0xf2   :  { %2296 = vmatpush.bf16.msra.mxu0 %v11344_v4  ;;  %v797_v34 = vpop.f32.mrf.mxu2  ;;  %v762_v43 = vpop.f32.mrf.mxu0  ;;  %v11320_v1 = vor.u32 %v15160_v53, %v11319_v52  ;;  %v11375_v4 = vld [vmem:[#allocation5 + $0x680] sm:$0xf]  ;;  %v15222_v52 = vld [vmem:[#allocation5 + $0x7e4] sm:$0xf0]  ;;  %v15221_v53 = vld [vmem:[#allocation5 + $0x7e4] sm:$0xf] }
  0xf3   :  { %2315 = vmatpush.bf16.msra.mxu1 %v11408_v8  ;;  %v816_v35 = vpop.f32.mrf.mxu3  ;;  %836 = vst [vmem:[#allocation3 + $0x10] sm:$0xff] %v832_v28  ;;  %v798_v42 = vadd.f32 %v797_v34, %v16431_v19  ;;  %v781_v44 = vpop.f32.mrf.mxu1  ;;  %v763_v60 = vadd.f32 %v762_v43, %v16428_v3  ;;  %v11388_v8 = vor.u32 %v15175_v56, %v11385_v57  ;;  %v11505_v43 = vld [vmem:[#allocation5 + $0x768] sm:$0xf0] }
  0xf4   :  { %2334 = vmatpush.bf16.msra.mxu2 %v11348_v2  ;;  %v15158_v2 = vld [vmem:[#allocation5 + $0x604] sm:$0xf0]  ;;  %v11512_v34 = vor.u32 %v15208_v16, %v11511_v15  ;;  %v11489_v15 = vld [vmem:[#allocation5 + $0x748] sm:$0xf0] }
  0xf5   :  { %2353 = vmatpush.bf16.msra.mxu3 %v11412_v9  ;;  %v817_v49 = vadd.f32 %v816_v35, %v798_v42  ;;  %1997 = vmatmul.bf16.gmra.mxu0 %v11160_v36  ;;  %v15173_v9 = vld [vmem:[#allocation5 + $0x684] sm:$0xf]  ;;  %v782_v17 = vadd.f32 %v781_v44, %v763_v60  ;;  %v11576_v35 = vor.u32 %v15224_v23, %v11575_v22  ;;  %v11551_v22 = vld [vmem:[#allocation5 + $0x7c0] sm:$0xf]  ;;  %v11553_v27 = vld [vmem:[#allocation5 + $0x7c8] sm:$0xf0] }
  0xf6   :  { %2297 = vmatpush.bf16.msra.mxu0 %v11336_v25  ;;  %2016 = vmatmul.bf16.gmra.mxu1 %v11164_v37  ;;  %v11312_v25 = vor.u32 %v15158_v2, %v11311_v63  ;;  %v15205_v42 = vld [vmem:[#allocation5 + $0x764] sm:$0xf]  ;;  %v11495_v2 = vld [vmem:[#allocation5 + $0x750] sm:$0xf] }
  0xf7   :  { %2316 = vmatpush.bf16.msra.mxu1 %v11400_v29  ;;  %v827_v59 = vmax.f32 %v817_v49, 0.0  ;;  %2035 = vmatmul.bf16.gmra.mxu2 %v11160_v36  ;;  %v11376_v29 = vor.u32 %v15174_v5, %v11375_v4  ;;  %v828_v36 = vmax.f32 %v782_v17, 0.0  ;;  %v15204_v4 = vld [vmem:[#allocation5 + $0x754] sm:$0xf0]  ;;  %v11559_v5 = vld [vmem:[#allocation5 + $0x7d0] sm:$0xf] }
  0xf8   :  { %2335 = vmatpush.bf16.msra.mxu2 %v11340_v24  ;;  %2054 = vmatmul.bf16.gmra.mxu3 %v11164_v37  ;;  %v11316_v24 = vor.u32 %v15157_v61, %v11313_v62  ;;  %v15203_v61 = vld [vmem:[#allocation5 + $0x754] sm:$0xf]  ;;  %v11497_v62 = vld [vmem:[#allocation5 + $0x758] sm:$0xf0] }
  0xf9   :  { %2354 = vmatpush.bf16.msra.mxu3 %v11404_v30  ;;  %v833_v6 = vpack.c.bf16 %v827_v59, %v826_v58  ;;  %v11380_v30 = vor.u32 %v15173_v9, %v11377_v10  ;;  %v11508_v59 = vor.u32 %v15205_v42, %v11505_v43  ;;  %v15200_v42 = vld [vmem:[#allocation5 + $0x734] sm:$0xf0]  ;;  %v11543_v43 = vld [vmem:[#allocation5 + $0x7b0] sm:$0xf] }
  0xfa   :  { %2298 = vmatpush.bf16.msra.mxu0 %v11328_v46  ;;  %v800_v12 = vpop.f32.mrf.mxu2  ;;  %v764_v20 = vpop.f32.mrf.mxu0  ;;  %v15206_v46 = vld [vmem:[#allocation5 + $0x764] sm:$0xf0] }
  0xfb   :  { %2317 = vmatpush.bf16.msra.mxu1 %v11392_v50  ;;  %v819_v13 = vpop.f32.mrf.mxu3  ;;  %837 = vst [vmem:[#allocation3 + $0x88] sm:$0xff] %v833_v6  ;;  %v801_v18 = vadd.f32 %v800_v12, %v16431_v19  ;;  %v783_v21 = vpop.f32.mrf.mxu1  ;;  %v765_v38 = vadd.f32 %v764_v20, %v16428_v3  ;;  %v11296_v50 = vor.u32 %v15154_v32, %v11295_v31  ;;  %v15220_v6 = vld [vmem:[#allocation5 + $0x7d4] sm:$0xf0]  ;;  %v11487_v20 = vld [vmem:[#allocation5 + $0x740] sm:$0xf] }
  0xfc   :  { %2336 = vmatpush.bf16.msra.mxu2 %v11332_v45  ;;  %v11503_v45 = vld [vmem:[#allocation5 + $0x760] sm:$0xf]  ;;  %v11500_v12 = vor.u32 %v15203_v61, %v11497_v62  ;;  %v11560_v17 = vor.u32 %v15220_v6, %v11559_v5  ;;  %v11492_v32 = vor.u32 %v15201_v14, %v11489_v15  ;;  %v11537_v5 = vld [vmem:[#allocation5 + $0x7a8] sm:$0xf0]  ;;  %v11463_v14 = vld [vmem:[#allocation5 + $0x710] sm:$0xf] }
  0xfd   :  { %2355 = vmatpush.bf16.msra.mxu3 %v11396_v51  ;;  %v820_v28 = vadd.f32 %v819_v13, %v801_v18  ;;  %v11300_v51 = vor.u32 %v15153_v39, %v11297_v40  ;;  %v784_v55 = vadd.f32 %v783_v21, %v765_v38  ;;  %v11504_v60 = vor.u32 %v15206_v46, %v11503_v45  ;;  %v15202_v21 = vld [vmem:[#allocation5 + $0x744] sm:$0xf0]  ;;  %v11303_v39 = vld [vmem:[#allocation2 + $0x40] sm:$0xf]  ;;  %v15156_v40 = vld [vmem:[#allocation2 + $0x58] sm:$0xf0] }
  0xfe   :  { %2299 = vmatpush.bf16.msra.mxu0 %v11320_v1  ;;  %v11572_v1 = vor.u32 %v15221_v53, %v11569_v54  ;;  %v11496_v13 = vor.u32 %v15204_v4, %v11495_v2  ;;  %v11556_v38 = vor.u32 %v15217_v26, %v11553_v27  ;;  %v15215_v45 = vld [vmem:[#allocation5 + $0x7b4] sm:$0xf]  ;;  %v11545_v46 = vld [vmem:[#allocation5 + $0x7b8] sm:$0xf0]  ;;  %v15197_v54 = vld [vmem:[#allocation5 + $0x724] sm:$0xf] }
  0xff   :  { %2318 = vmatpush.bf16.msra.mxu1 %v11384_v7  ;;  %v829_v37 = vmax.f32 %v820_v28, 0.0  ;;  %v15219_v7 = vld [vmem:[#allocation5 + $0x7d4] sm:$0xf]  ;;  %v830_v9 = vmax.f32 %v784_v55, 0.0  ;;  %v11473_v55 = vld [vmem:[#allocation5 + $0x728] sm:$0xf0] }
 0x100   :  { %2337 = vmatpush.bf16.msra.mxu2 %v11324_v0  ;;  %v11568_v0 = vor.u32 %v15222_v52, %v11567_v47  ;;  %v11535_v61 = vld [vmem:[#allocation5 + $0x7a0] sm:$0xf]  ;;  %v15214_v2 = vld [vmem:[#allocation5 + $0x7a4] sm:$0xf0]  ;;  %v15213_v4 = vld [vmem:[#allocation5 + $0x7a4] sm:$0xf] }
 0x101   :  { %2356 = vmatpush.bf16.msra.mxu3 %v11388_v8  ;;  %v834_v44 = vpack.c.bf16 %v829_v37, %v828_v36  ;;  %v11561_v8 = vld [vmem:[#allocation5 + $0x7d8] sm:$0xf0]  ;;  %v15196_v15 = vld [vmem:[#allocation5 + $0x714] sm:$0xf0] }
 0x102   :  { %2300 = vmatpush.bf16.msra.mxu0 %v11312_v25  ;;  %v802_v48 = vpop.f32.mrf.mxu2  ;;  %v1066_v57 = vpop.f32.mrf.mxu0  ;;  %v11564_v18 = vor.u32 %v15219_v7, %v11561_v8  ;;  %v15218_v25 = vld [vmem:[#allocation5 + $0x7c4] sm:$0xf0] }
 0x103   :  { %2319 = vmatpush.bf16.msra.mxu1 %v11376_v29  ;;  %v821_v49 = vpop.f32.mrf.mxu3  ;;  %838 = vst [vmem:[#allocation3 + $0x100] sm:$0xff] %v834_v44  ;;  %v803_v56 = vadd.f32 %v802_v48, %v16431_v19  ;;  %v1085_v58 = vpop.f32.mrf.mxu1  ;;  %v1067_v11 = vadd.f32 %v1066_v57, %v16428_v3  ;;  %v11552_v37 = vor.u32 %v15218_v25, %v11551_v22  ;;  %v15216_v44 = vld [vmem:[#allocation5 + $0x7b4] sm:$0xf0]  ;;  %v15211_v22 = vld [vmem:[#allocation5 + $0x794] sm:$0xf] }
 0x104   :  { %2338 = vmatpush.bf16.msra.mxu2 %v11316_v24  ;;  %v11544_v57 = vor.u32 %v15216_v44, %v11543_v43  ;;  %v16454_v25 = vld [vmem:[#allocation5 + $0x708] sm:$0xf0] }
 0x105   :  { %2357 = vmatpush.bf16.msra.mxu3 %v11380_v30  ;;  %v822_v63 = vadd.f32 %v821_v49, %v803_v56  ;;  %2301 = vmatmul.bf16.vlgmr.msra.gmra.mxu0 %v11296_v50  ;;  %v1086_v28 = vadd.f32 %v1085_v58, %v1067_v11  ;;  %v11548_v58 = vor.u32 %v15215_v45, %v11545_v46  ;;  %v15244_v45 = vld [vmem:[#allocation5 + $0x874] sm:$0xf0]  ;;  %v11719_v46 = vld [vmem:[#allocation5 + $0x8f0] sm:$0xf] }
 0x106   :  { %2602 = vmatpush.bf16.msrb.mxu0 %v11512_v34  ;;  %2320 = vmatmul.bf16.vlgmr.msra.gmra.mxu1 %v11300_v51  ;;  %v15199_v34 = vld [vmem:[#allocation5 + $0x734] sm:$0xf]  ;;  %v11476_v11 = vor.u32 %v15197_v54, %v11473_v55  ;;  %v11721_v54 = vld [vmem:[#allocation5 + $0x8f8] sm:$0xf0]  ;;  %v156_v55 = vld [vmem:[%s17172_s0 + $0x20] sm:$0xff] }
 0x107   :  { %2621 = vmatpush.bf16.msrb.mxu1 %v11576_v35  ;;  %v831_v10 = vmax.f32 %v822_v63, 0.0  ;;  %2339 = vmatmul.bf16.vlgmr.msra.gmra.mxu2 %v11296_v50  ;;  %v11481_v35 = vld [vmem:[#allocation5 + $0x738] sm:$0xf0]  ;;  %v1133_v47 = vmax.f32 %v1086_v28, 0.0  ;;  %v15155_v50 = vld [vmem:[#allocation2 + $0x44] sm:$0xf] }
 0x108   :  { %2640 = vmatpush.bf16.msrb.mxu2 %v11516_v33  ;;  %2358 = vmatmul.bf16.vlgmr.msra.gmra.mxu3 %v11300_v51  ;;  %v11488_v33 = vor.u32 %v15202_v21, %v11487_v20  ;;  %v11305_v51 = vld [vmem:[#allocation2 + $0x5c] sm:$0xf0]  ;;  %v11484_v52 = vor.u32 %v15199_v34, %v11481_v35  ;;  %v11527_v20 = vld [vmem:[#allocation5 + $0x790] sm:$0xf]  ;;  %v15212_v21 = vld [vmem:[#allocation5 + $0x794] sm:$0xf0] }
 0x109   :  { %2659 = vmatpush.bf16.msrb.mxu3 %v11580_v41  ;;  %v835_v16 = vpack.c.bf16 %v831_v10, %v830_v9  ;;  %v11479_v41 = vld [vmem:[#allocation5 + $0x730] sm:$0xf]  ;;  %v15195_v10 = vld [vmem:[#allocation5 + $0x714] sm:$0xf]  ;;  %v15210_v34 = vld [vmem:[#allocation5 + $0x784] sm:$0xf0] }
 0x10a   :  { %2603 = vmatpush.bf16.msrb.mxu0 %v11504_v60  ;;  %v1104_v23 = vpop.f32.mrf.mxu2  ;;  %v1068_v30 = vpop.f32.mrf.mxu0  ;;  %v11480_v53 = vor.u32 %v15200_v42, %v11479_v41  ;;  %v15198_v60 = vld [vmem:[#allocation5 + $0x724] sm:$0xf0]  ;;  %v15209_v35 = vld [vmem:[#allocation5 + $0x784] sm:$0xf]  ;;  %v11657_v41 = vld [vmem:[#allocation5 + $0x878] sm:$0xf0] }
 0x10b   :  { %2622 = vmatpush.bf16.msrb.mxu1 %v11568_v0  ;;  %v1123_v24 = vpop.f32.mrf.mxu3  ;;  %839 = vst [vmem:[#allocation3 + $0x178] sm:$0xff] %v835_v16  ;;  %v1105_v29 = vadd.f32 %v1104_v23, %v16431_v19  ;;  %v1087_v31 = vpop.f32.mrf.mxu1  ;;  %v1069_v49 = vadd.f32 %v1068_v30, %v16428_v3  ;;  %v11304_v0 = vor.u32 %v15156_v40, %v11303_v39  ;;  %v11529_v23 = vld [vmem:[#allocation5 + $0x798] sm:$0xf0]  ;;  %v15194_v30 = vld [vmem:[#allocation5 + $0x704] sm:$0xf0] }
 0x10c   :  { %2641 = vmatpush.bf16.msrb.mxu2 %v11508_v59  ;;  %v11471_v59 = vld [vmem:[#allocation5 + $0x720] sm:$0xf]  ;;  %v11532_v39 = vor.u32 %v15211_v22, %v11529_v23  ;;  %v15243_v40 = vld [vmem:[#allocation5 + $0x874] sm:$0xf]  ;;  %v11655_v42 = vld [vmem:[#allocation5 + $0x870] sm:$0xf] }
 0x10d   :  { %2660 = vmatpush.bf16.msrb.mxu3 %v11572_v1  ;;  %v1124_v36 = vadd.f32 %v1123_v24, %v1105_v29  ;;  %v11308_v1 = vor.u32 %v15155_v50, %v11305_v51  ;;  %v1088_v6 = vadd.f32 %v1087_v31, %v1069_v49  ;;  %v16452_v24 = vld [vmem:[#allocation5 + $0x704] sm:$0xf]  ;;  %v11455_v29 = vld [vmem:[#allocation5 + $0x700] sm:$0xf] }
 0x10e   :  { %2604 = vmatpush.bf16.msrb.mxu0 %v11496_v13  ;;  %v11465_v13 = vld [vmem:[#allocation5 + $0x718] sm:$0xf0]  ;;  %v11519_v31 = vld [vmem:[#allocation5 + $0x780] sm:$0xf] }
 0x10f   :  { %2623 = vmatpush.bf16.msrb.mxu1 %v11560_v17  ;;  %v1134_v48 = vmax.f32 %v1124_v36, 0.0  ;;  %v11536_v17 = vor.u32 %v15214_v2, %v11535_v61  ;;  %v1135_v26 = vmax.f32 %v1088_v6, 0.0  ;;  %v11521_v36 = vld [vmem:[#allocation5 + $0x788] sm:$0xf0]  ;;  %v164_v61 = vld [vmem:[%s17172_s0 + $0x60] sm:$0xff]  ;;  %v11656_v6 = vor.u32 %v15244_v45, %v11655_v42 }
 0x110   :  { %2642 = vmatpush.bf16.msrb.mxu2 %v11500_v12  ;;  %v11472_v12 = vor.u32 %v15198_v60, %v11471_v59  ;;  %v157_v59 = vld [vmem:[%s17172_s0 + $0x28] sm:$0xff]  ;;  %v163_v60 = vld [vmem:[%s17172_s0 + $0x58] sm:$0xff]  ;;  %v15190_v2 = vld [vmem:[#allocation2 + $0x20] sm:$0xf0] }
 0x111   :  { %2661 = vmatpush.bf16.msrb.mxu3 %v11564_v18  ;;  %v1141_v56 = vpack.c.bf16 %v1134_v48, %v1133_v47  ;;  %v11540_v18 = vor.u32 %v15213_v4, %v11537_v5  ;;  %v15260_v47 = vld [vmem:[#allocation5 + $0x8f4] sm:$0xf0]  ;;  %v15189_v4 = vld [vmem:[#allocation2 + $0xc] sm:$0xf]  ;;  %v11660_v5 = vor.u32 %v15243_v40, %v11657_v41  ;;  %v11703_v40 = vld [vmem:[#allocation5 + $0x8d0] sm:$0xf] }
 0x112   :  { %2605 = vmatpush.bf16.msrb.mxu0 %v11488_v33  ;;  %v1106_v62 = vpop.f32.mrf.mxu2  ;;  %v1071_v8 = vpop.f32.mrf.mxu0  ;;  %v11464_v33 = vor.u32 %v15196_v15, %v11463_v14  ;;  %v11649_v14 = vld [vmem:[#allocation5 + $0x868] sm:$0xf0]  ;;  %v15256_v41 = vld [vmem:[#allocation5 + $0x8d4] sm:$0xf0]  ;;  %v15255_v42 = vld [vmem:[#allocation5 + $0x8d4] sm:$0xf] }
 0x113   :  { %2624 = vmatpush.bf16.msrb.mxu1 %v11552_v37  ;;  %v1125_v63 = vpop.f32.mrf.mxu3  ;;  %1145 = vst [vmem:[#allocation3 + $0x18] sm:$0xff] %v1141_v56  ;;  %v1107_v7 = vadd.f32 %v1106_v62, %v16431_v19  ;;  %v1090_v9 = vpop.f32.mrf.mxu1  ;;  %v1072_v28 = vadd.f32 %v1071_v8, %v16428_v3  ;;  %v11456_v56 = vor.u32 %v15194_v30, %v11455_v29 }
 0x114   :  { %2643 = vmatpush.bf16.msrb.mxu2 %v11492_v32  ;;  %v11468_v32 = vor.u32 %v15195_v10, %v11465_v13  ;;  %v15241_v13 = vld [vmem:[#allocation5 + $0x864] sm:$0xf] }
 0x115   :  { %2662 = vmatpush.bf16.msrb.mxu3 %v11556_v38  ;;  %v1126_v16 = vadd.f32 %v1125_v63, %v1107_v7  ;;  %2306 = vmatmul.bf16.gmra.mxu0 %v11304_v0  ;;  %v11528_v38 = vor.u32 %v15212_v21, %v11527_v20  ;;  %v1091_v48 = vadd.f32 %v1090_v9, %v1072_v28 }
 0x116   :  { %2606 = vmatpush.bf16.msrb.mxu0 %v11480_v53  ;;  %2325 = vmatmul.bf16.gmra.mxu1 %v11308_v1  ;;  %v15259_v53 = vld [vmem:[#allocation5 + $0x8f4] sm:$0xf]  ;;  %v182_v63 = vpack.c.bf16 %v157_v59, %v156_v55  ;;  %v11720_v7 = vor.u32 %v15260_v47, %v11719_v46  ;;  %v15237_v47 = vld [vmem:[#allocation5 + $0x844] sm:$0xf]  ;;  %v11704_v55 = vor.u32 %v15256_v41, %v11703_v40  ;;  %v11697_v59 = vld [vmem:[#allocation5 + $0x8c8] sm:$0xf0] }
 0x117   :  { %2625 = vmatpush.bf16.msrb.mxu1 %v11544_v57  ;;  %v1136_v27 = vmax.f32 %v1126_v16, 0.0  ;;  %2344 = vmatmul.bf16.gmra.mxu2 %v11304_v0  ;;  %v11520_v57 = vor.u32 %v15210_v34, %v11519_v31  ;;  %v186_v0 = vpack.c.bf16 %v164_v61, %v163_v60  ;;  %v1137_v8 = vmax.f32 %v1091_v48, 0.0  ;;  %v11647_v16 = vld [vmem:[#allocation5 + $0x860] sm:$0xf]  ;;  %v11641_v34 = vld [vmem:[#allocation5 + $0x858] sm:$0xf0] }
 0x118   :  { %2644 = vmatpush.bf16.msrb.mxu2 %v11484_v52  ;;  %2363 = vmatmul.bf16.gmra.mxu3 %v11308_v1  ;;  %v11460_v52 = vor.u32 %v16452_v24, %v16454_v25  ;;  %v11439_v1 = vld [vmem:[#allocation2 + $0x8] sm:$0xf]  ;;  %198 = vst [vmem:[#allocation2 + $0x10] sm:$0xff] %v182_v63  ;;  %v15257_v25 = vld [vmem:[#allocation5 + $0x8e4] sm:$0xf]  ;;  %v11652_v31 = vor.u32 %v15241_v13, %v11649_v14 }
 0x119   :  { %2663 = vmatpush.bf16.msrb.mxu3 %v11548_v58  ;;  %v1142_v37 = vpack.c.bf16 %v1136_v27, %v1135_v26  ;;  %v11524_v58 = vor.u32 %v15209_v35, %v11521_v36  ;;  %203 = vst [vmem:[#allocation2 + $0x2c] sm:$0xff] %v186_v0  ;;  %v11440_v22 = vor.u32 %v15190_v2, %v11439_v1  ;;  %v15258_v24 = vld [vmem:[#allocation5 + $0x8e4] sm:$0xf0]  ;;  %v11713_v26 = vld [vmem:[#allocation5 + $0x8e8] sm:$0xf0] }
 0x11a   :  { %2607 = vmatpush.bf16.msrb.mxu0 %v11472_v12  ;;  %v1109_v43 = vpop.f32.mrf.mxu2  ;;  %v1073_v50 = vpop.f32.mrf.mxu0  ;;  %v11724_v12 = vor.u32 %v15259_v53, %v11721_v54  ;;  %v11633_v48 = vld [vmem:[#allocation5 + $0x848] sm:$0xf0]  ;;  %v11695_v53 = vld [vmem:[#allocation5 + $0x8c0] sm:$0xf] }
 0x11b   :  { %2626 = vmatpush.bf16.msrb.mxu1 %v11536_v17  ;;  %v1128_v44 = vpop.f32.mrf.mxu3  ;;  %1146 = vst [vmem:[#allocation3 + $0x90] sm:$0xff] %v1142_v37  ;;  %v1110_v49 = vadd.f32 %v1109_v43, %v16431_v19  ;;  %v1092_v51 = vpop.f32.mrf.mxu1  ;;  %v1074_v10 = vadd.f32 %v1073_v50, %v16428_v3  ;;  %v15242_v17 = vld [vmem:[#allocation5 + $0x864] sm:$0xf0]  ;;  %v11716_v37 = vor.u32 %v15257_v25, %v11713_v26  ;;  %v11705_v43 = vld [vmem:[#allocation5 + $0x8d8] sm:$0xf0] }
 0x11c   :  { %2645 = vmatpush.bf16.msrb.mxu2 %v11476_v11  ;;  %v11441_v11 = vld [vmem:[#allocation2 + $0x24] sm:$0xf0]  ;;  %v11636_v2 = vor.u32 %v15237_v47, %v11633_v48  ;;  %v11447_v14 = vld [vmem:[#allocation2 + $0x40] sm:$0xf]  ;;  %v11689_v25 = vld [vmem:[#allocation5 + $0x8b8] sm:$0xf0] }
 0x11d   :  { %2664 = vmatpush.bf16.msrb.mxu3 %v11540_v18  ;;  %v1129_v62 = vadd.f32 %v1128_v44, %v1110_v49  ;;  %v11711_v18 = vld [vmem:[#allocation5 + $0x8e0] sm:$0xf]  ;;  %v11444_v23 = vor.u32 %v15189_v4, %v11441_v11  ;;  %v1093_v27 = vadd.f32 %v1092_v51, %v1074_v10  ;;  %v15235_v4 = vld [vmem:[#allocation5 + $0x834] sm:$0xf]  ;;  %v171_v10 = vld [vmem:[%s17172_s0 + $0x98] sm:$0xff] }
 0x11e   :  { %2608 = vmatpush.bf16.msrb.mxu0 %v11464_v33  ;;  %v15239_v33 = vld [vmem:[#allocation5 + $0x854] sm:$0xf]  ;;  %v11712_v36 = vor.u32 %v15258_v24, %v11711_v18  ;;  %v11631_v51 = vld [vmem:[#allocation5 + $0x840] sm:$0xf]  ;;  %v177_v11 = vld [vmem:[%s17172_s0 + $0xc8] sm:$0xff] }
 0x11f   :  { %2627 = vmatpush.bf16.msrb.mxu1 %v11528_v38  ;;  %v1138_v9 = vmax.f32 %v1129_v62, 0.0  ;;  %v11639_v38 = vld [vmem:[#allocation5 + $0x850] sm:$0xf]  ;;  %v1139_v44 = vmax.f32 %v1093_v27, 0.0  ;;  %v11644_v49 = vor.u32 %v15239_v33, %v11641_v34  ;;  %v15236_v18 = vld [vmem:[#allocation5 + $0x834] sm:$0xf0] }
 0x120   :  { %2646 = vmatpush.bf16.msrb.mxu2 %v11468_v32  ;;  %v11648_v32 = vor.u32 %v15242_v17, %v11647_v16  ;;  %v15191_v16 = vld [vmem:[#allocation2 + $0x44] sm:$0xf]  ;;  %v11623_v17 = vld [vmem:[#allocation5 + $0x830] sm:$0xf]  ;;  %v15251_v24 = vld [vmem:[#allocation5 + $0x8b4] sm:$0xf] }
 0x121   :  { %2665 = vmatpush.bf16.msrb.mxu3 %v11532_v39  ;;  %v1143_v15 = vpack.c.bf16 %v1138_v9, %v1137_v8  ;;  %v15240_v39 = vld [vmem:[#allocation5 + $0x854] sm:$0xf0]  ;;  %v11617_v33 = vld [vmem:[#allocation5 + $0x828] sm:$0xf0] }
 0x122   :  { %2609 = vmatpush.bf16.msrb.mxu0 %v11456_v56  ;;  %v1111_v20 = vpop.f32.mrf.mxu2  ;;  %v1375_v29 = vpop.f32.mrf.mxu0  ;;  %v11640_v50 = vor.u32 %v15240_v39, %v11639_v38  ;;  %v11708_v56 = vor.u32 %v15255_v42, %v11705_v43  ;;  %v15234_v38 = vld [vmem:[#allocation5 + $0x824] sm:$0xf0]  ;;  %v11679_v39 = vld [vmem:[#allocation5 + $0x8a0] sm:$0xf] }
 0x123   :  { %2628 = vmatpush.bf16.msrb.mxu1 %v11520_v57  ;;  %v1130_v21 = vpop.f32.mrf.mxu3  ;;  %1147 = vst [vmem:[#allocation3 + $0x108] sm:$0xff] %v1143_v15  ;;  %v1112_v28 = vadd.f32 %v1111_v20, %v16431_v19  ;;  %v1394_v30 = vpop.f32.mrf.mxu1  ;;  %v1376_v46 = vadd.f32 %v1375_v29, %v16428_v3  ;;  %v15254_v57 = vld [vmem:[#allocation5 + $0x8c4] sm:$0xf0]  ;;  %v15192_v15 = vld [vmem:[#allocation2 + $0x58] sm:$0xf0] }
 0x124   :  { %2647 = vmatpush.bf16.msrb.mxu2 %v11460_v52  ;;  %v15238_v52 = vld [vmem:[#allocation5 + $0x844] sm:$0xf0]  ;;  %v11696_v8 = vor.u32 %v15254_v57, %v11695_v53  ;;  %v11687_v20 = vld [vmem:[#allocation5 + $0x8b0] sm:$0xf]  ;;  %v11449_v29 = vld [vmem:[#allocation2 + $0x5c] sm:$0xf0]  ;;  %v11448_v42 = vor.u32 %v15192_v15, %v11447_v14 }
 0x125   :  { %2666 = vmatpush.bf16.msrb.mxu3 %v11524_v58  ;;  %v1131_v35 = vadd.f32 %v1130_v21, %v1112_v28  ;;  %2610 = vmatmul.bf16.vlgmr.msrb.gmra.mxu0 %v11440_v22  ;;  %v15253_v58 = vld [vmem:[#allocation5 + $0x8c4] sm:$0xf]  ;;  %v1395_v62 = vadd.f32 %v1394_v30, %v1376_v46  ;;  %v11452_v43 = vor.u32 %v15191_v16, %v11449_v29  ;;  %v11681_v46 = vld [vmem:[#allocation5 + $0x8a8] sm:$0xf0]  ;;  %v15231_v53 = vld [vmem:[#allocation5 + $0x814] sm:$0xf] }
 0x126   :  { %2911 = vmatpush.bf16.msra.mxu0 %v11656_v6  ;;  %2629 = vmatmul.bf16.vlgmr.msrb.gmra.mxu1 %v11444_v23  ;;  %v170_v6 = vld [vmem:[%s17172_s0 + $0x90] sm:$0xff]  ;;  %v11700_v9 = vor.u32 %v15253_v58, %v11697_v59  ;;  %v15232_v59 = vld [vmem:[#allocation5 + $0x814] sm:$0xf0]  ;;  %v15245_v15 = vld [vmem:[#allocation5 + $0x884] sm:$0xf] }
 0x127   :  { %2930 = vmatpush.bf16.msra.mxu1 %v11720_v7  ;;  %v1140_v45 = vmax.f32 %v1131_v35, 0.0  ;;  %2648 = vmatmul.bf16.vlgmr.msrb.gmra.mxu2 %v11440_v22  ;;  %v11632_v7 = vor.u32 %v15238_v52, %v11631_v51  ;;  %v190_v21 = vpack.c.bf16 %v171_v10, %v170_v6  ;;  %v1442_v26 = vmax.f32 %v1395_v62, 0.0  ;;  %v11607_v58 = vld [vmem:[#allocation5 + $0x810] sm:$0xf]  ;;  %v15247_v62 = vld [vmem:[#allocation5 + $0x894] sm:$0xf] }
 0x128   :  { %2949 = vmatpush.bf16.msra.mxu2 %v11660_v5  ;;  %2667 = vmatmul.bf16.vlgmr.msrb.gmra.mxu3 %v11444_v23  ;;  %v11625_v5 = vld [vmem:[#allocation5 + $0x838] sm:$0xf0]  ;;  %v15252_v23 = vld [vmem:[#allocation5 + $0x8b4] sm:$0xf0]  ;;  %v11599_v6 = vld [vmem:[#allocation5 + $0x800] sm:$0xf] }
 0x129   :  { %2968 = vmatpush.bf16.msra.mxu3 %v11724_v12  ;;  %v1144_v54 = vpack.c.bf16 %v1140_v45, %v1139_v44  ;;  %v178_v12 = vld [vmem:[%s17172_s0 + $0xd0] sm:$0xff]  ;;  %207 = vst [vmem:[#allocation2 + $0x48] sm:$0xff] %v190_v21  ;;  %v11628_v30 = vor.u32 %v15235_v4, %v11625_v5  ;;  %v11688_v35 = vor.u32 %v15252_v23, %v11687_v20  ;;  %v15250_v44 = vld [vmem:[#allocation5 + $0x8a4] sm:$0xf0]  ;;  %v15249_v45 = vld [vmem:[#allocation5 + $0x8a4] sm:$0xf] }
 0x12a   :  { %2912 = vmatpush.bf16.msra.mxu0 %v11648_v32  ;;  %v1413_v60 = vpop.f32.mrf.mxu2  ;;  %v1377_v0 = vpop.f32.mrf.mxu0  ;;  %v194_v22 = vpack.c.bf16 %v178_v12, %v177_v11  ;;  %v15233_v32 = vld [vmem:[#allocation5 + $0x824] sm:$0xf]  ;;  %v11684_v57 = vor.u32 %v15249_v45, %v11681_v46  ;;  %v11601_v5 = vld [vmem:[#allocation5 + $0x808] sm:$0xf0]  ;;  %v11663_v10 = vld [vmem:[#allocation5 + $0x880] sm:$0xf] }
 0x12b   :  { %2931 = vmatpush.bf16.msra.mxu1 %v11712_v36  ;;  %v1432_v61 = vpop.f32.mrf.mxu3  ;;  %1148 = vst [vmem:[#allocation3 + $0x180] sm:$0xff] %v1144_v54  ;;  %v1414_v63 = vadd.f32 %v1413_v60, %v16431_v19  ;;  %v1396_v1 = vpop.f32.mrf.mxu1  ;;  %v1378_v28 = vadd.f32 %v1377_v0, %v16428_v3  ;;  %v11692_v36 = vor.u32 %v15251_v24, %v11689_v25  ;;  %v11609_v54 = vld [vmem:[#allocation5 + $0x818] sm:$0xf0]  ;;  %v11671_v60 = vld [vmem:[#allocation5 + $0x890] sm:$0xf] }
 0x12c   :  { %2950 = vmatpush.bf16.msra.mxu2 %v11652_v31  ;;  %v11624_v31 = vor.u32 %v15236_v18, %v11623_v17  ;;  %211 = vst [vmem:[#allocation2 + $0x64] sm:$0xff] %v194_v22  ;;  %v11620_v51 = vor.u32 %v15233_v32, %v11617_v33  ;;  %v15229_v4 = vld [vmem:[#allocation5 + $0x804] sm:$0xf]  ;;  %v15246_v11 = vld [vmem:[#allocation5 + $0x884] sm:$0xf0] }
 0x12d   :  { %2969 = vmatpush.bf16.msra.mxu3 %v11716_v37  ;;  %v1433_v13 = vadd.f32 %v1432_v61, %v1414_v63  ;;  %v11615_v37 = vld [vmem:[#allocation5 + $0x820] sm:$0xf]  ;;  %v1397_v47 = vadd.f32 %v1396_v1, %v1378_v28  ;;  %v15248_v61 = vld [vmem:[#allocation5 + $0x894] sm:$0xf0]  ;;  %v11673_v63 = vld [vmem:[#allocation5 + $0x898] sm:$0xf0] }
 0x12e   :  { %2913 = vmatpush.bf16.msra.mxu0 %v11640_v50  ;;  %v11616_v52 = vor.u32 %v15234_v38, %v11615_v37  ;;  %v11676_v14 = vor.u32 %v15247_v62, %v11673_v63  ;;  %v11665_v16 = vld [vmem:[#allocation5 + $0x888] sm:$0xf0]  ;;  %v15279_v17 = vld [vmem:[#allocation5 + $0x974] sm:$0xf]  ;;  %v11801_v21 = vld [vmem:[#allocation5 + $0x978] sm:$0xf0] }
 0x12f   :  { %2932 = vmatpush.bf16.msra.mxu1 %v11704_v55  ;;  %v1443_v27 = vmax.f32 %v1433_v13, 0.0  ;;  %v1444_v0 = vmax.f32 %v1397_v47, 0.0  ;;  %v11672_v13 = vor.u32 %v15248_v61, %v11671_v60  ;;  %v11799_v22 = vld [vmem:[#allocation5 + $0x970] sm:$0xf]  ;;  %v15280_v23 = vld [vmem:[#allocation5 + $0x974] sm:$0xf0] }
 0x130   :  { %2951 = vmatpush.bf16.msra.mxu2 %v11644_v49  ;;  %v11863_v28 = vld [vmem:[#allocation5 + $0x9f0] sm:$0xf]  ;;  %v15296_v29 = vld [vmem:[#allocation5 + $0x9f4] sm:$0xf0]  ;;  %v15295_v32 = vld [vmem:[#allocation5 + $0x9f4] sm:$0xf] }
 0x131   :  { %2970 = vmatpush.bf16.msra.mxu3 %v11708_v56  ;;  %v1450_v34 = vpack.c.bf16 %v1443_v27, %v1442_v26  ;;  %v11680_v56 = vor.u32 %v15250_v44, %v11679_v39  ;;  %v11865_v33 = vld [vmem:[#allocation5 + $0x9f8] sm:$0xf0]  ;;  %v11583_v37 = vld [vmem:[#allocation2 + $0xc] sm:$0xf]  ;;  %v15226_v38 = vld [vmem:[#allocation2 + $0x24] sm:$0xf0]  ;;  %v11804_v39 = vor.u32 %v15279_v17, %v11801_v21 }
 0x132   :  { %2914 = vmatpush.bf16.msra.mxu0 %v11632_v7  ;;  %v1415_v40 = vpop.f32.mrf.mxu2  ;;  %v1380_v49 = vpop.f32.mrf.mxu0  ;;  %v11612_v7 = vor.u32 %v15231_v53, %v11609_v54  ;;  %v15225_v45 = vld [vmem:[#allocation2 + $0x10] sm:$0xf]  ;;  %v11585_v46 = vld [vmem:[#allocation2 + $0x28] sm:$0xf0]  ;;  %v11868_v47 = vor.u32 %v15295_v32, %v11865_v33  ;;  %v11855_v53 = vld [vmem:[#allocation5 + $0x9e0] sm:$0xf] }
 0x133   :  { %2933 = vmatpush.bf16.msra.mxu1 %v11696_v8  ;;  %v1434_v41 = vpop.f32.mrf.mxu3  ;;  %1454 = vst [vmem:[#allocation3 + $0x20] sm:$0xff] %v1450_v34  ;;  %v1416_v48 = vadd.f32 %v1415_v40, %v16431_v19  ;;  %v1399_v50 = vpop.f32.mrf.mxu1  ;;  %v11608_v8 = vor.u32 %v15232_v59, %v11607_v58  ;;  %v11800_v40 = vor.u32 %v15280_v23, %v11799_v22  ;;  %v15294_v58 = vld [vmem:[#allocation5 + $0x9e4] sm:$0xf0]  ;;  %v15293_v59 = vld [vmem:[#allocation5 + $0x9e4] sm:$0xf] }
 0x134   :  { %2952 = vmatpush.bf16.msra.mxu2 %v11636_v2  ;;  %v1381_v2 = vadd.f32 %v1380_v49, %v16428_v3  ;;  %v11793_v49 = vld [vmem:[#allocation5 + $0x968] sm:$0xf0]  ;;  %v15273_v21 = vld [vmem:[#allocation5 + $0x944] sm:$0xf] }
 0x135   :  { %2971 = vmatpush.bf16.msra.mxu3 %v11700_v9  ;;  %v1435_v55 = vadd.f32 %v1434_v41, %v1416_v48  ;;  %2615 = vmatmul.bf16.gmra.mxu0 %v11448_v42  ;;  %v15230_v9 = vld [vmem:[#allocation5 + $0x804] sm:$0xf0]  ;;  %v11864_v41 = vor.u32 %v15296_v29, %v11863_v28  ;;  %v15277_v48 = vld [vmem:[#allocation5 + $0x964] sm:$0xf]  ;;  %v11857_v60 = vld [vmem:[#allocation5 + $0x9e8] sm:$0xf0] }
 0x136   :  { %2915 = vmatpush.bf16.msra.mxu0 %v11624_v31  ;;  %2634 = vmatmul.bf16.gmra.mxu1 %v11452_v43  ;;  %v1400_v24 = vadd.f32 %v1399_v50, %v1381_v2  ;;  %v11600_v31 = vor.u32 %v15230_v9, %v11599_v6  ;;  %v11783_v9 = vld [vmem:[#allocation5 + $0x950] sm:$0xf]  ;;  %v11777_v22 = vld [vmem:[#allocation5 + $0x948] sm:$0xf0]  ;;  %v11839_v28 = vld [vmem:[#allocation5 + $0x9c0] sm:$0xf] }
 0x137   :  { %2934 = vmatpush.bf16.msra.mxu1 %v11688_v35  ;;  %v1445_v1 = vmax.f32 %v1435_v55, 0.0  ;;  %2653 = vmatmul.bf16.gmra.mxu2 %v11448_v42  ;;  %v11664_v35 = vor.u32 %v15246_v11, %v11663_v10  ;;  %v15276_v10 = vld [vmem:[#allocation5 + $0x954] sm:$0xf0]  ;;  %v11847_v11 = vld [vmem:[#allocation5 + $0x9d0] sm:$0xf] }
 0x138   :  { %2953 = vmatpush.bf16.msra.mxu2 %v11628_v30  ;;  %2672 = vmatmul.bf16.gmra.mxu3 %v11452_v43  ;;  %v11604_v30 = vor.u32 %v15229_v4, %v11601_v5  ;;  %v1446_v42 = vmax.f32 %v1400_v24, 0.0  ;;  %v15275_v4 = vld [vmem:[#allocation5 + $0x954] sm:$0xf]  ;;  %v11785_v5 = vld [vmem:[#allocation5 + $0x958] sm:$0xf0] }
 0x139   :  { %2972 = vmatpush.bf16.msra.mxu3 %v11692_v36  ;;  %v1451_v12 = vpack.c.bf16 %v1445_v1, %v1444_v0  ;;  %v11668_v36 = vor.u32 %v15245_v15, %v11665_v16  ;;  %v11796_v1 = vor.u32 %v15277_v48, %v11793_v49  ;;  %v15289_v32 = vld [vmem:[#allocation5 + $0x9c4] sm:$0xf]  ;;  %v11841_v33 = vld [vmem:[#allocation5 + $0x9c8] sm:$0xf0]  ;;  %v15272_v48 = vld [vmem:[#allocation5 + $0x934] sm:$0xf0] }
 0x13a   :  { %2916 = vmatpush.bf16.msra.mxu0 %v11616_v52  ;;  %v1418_v18 = vpop.f32.mrf.mxu2  ;;  %v1382_v26 = vpop.f32.mrf.mxu0  ;;  %v15278_v52 = vld [vmem:[#allocation5 + $0x964] sm:$0xf0]  ;;  %v11831_v49 = vld [vmem:[#allocation5 + $0x9b0] sm:$0xf] }
 0x13b   :  { %2935 = vmatpush.bf16.msra.mxu1 %v11680_v56  ;;  %v1437_v20 = vpop.f32.mrf.mxu3  ;;  %1455 = vst [vmem:[#allocation3 + $0x98] sm:$0xff] %v1451_v12  ;;  %v1419_v25 = vadd.f32 %v1418_v18, %v16431_v19  ;;  %v1401_v27 = vpop.f32.mrf.mxu1  ;;  %v1383_v44 = vadd.f32 %v1382_v26, %v16428_v3  ;;  %v11584_v56 = vor.u32 %v15226_v38, %v11583_v37  ;;  %v15292_v12 = vld [vmem:[#allocation5 + $0x9d4] sm:$0xf0]  ;;  %v11775_v26 = vld [vmem:[#allocation5 + $0x940] sm:$0xf] }
 0x13c   :  { %2954 = vmatpush.bf16.msra.mxu2 %v11620_v51  ;;  %v11791_v51 = vld [vmem:[#allocation5 + $0x960] sm:$0xf]  ;;  %v11788_v18 = vor.u32 %v15275_v4, %v11785_v5  ;;  %v11848_v24 = vor.u32 %v15292_v12, %v11847_v11  ;;  %v11780_v38 = vor.u32 %v15273_v21, %v11777_v22  ;;  %v11825_v11 = vld [vmem:[#allocation5 + $0x9a8] sm:$0xf0] }
 0x13d   :  { %2973 = vmatpush.bf16.msra.mxu3 %v11684_v57  ;;  %v1438_v34 = vadd.f32 %v1437_v20, %v1419_v25  ;;  %v11588_v57 = vor.u32 %v15225_v45, %v11585_v46  ;;  %v1402_v61 = vadd.f32 %v1401_v27, %v1383_v44  ;;  %v11792_v2 = vor.u32 %v15278_v52, %v11791_v51  ;;  %v15274_v27 = vld [vmem:[#allocation5 + $0x944] sm:$0xf0]  ;;  %v11591_v45 = vld [vmem:[#allocation2 + $0x44] sm:$0xf]  ;;  %v15228_v46 = vld [vmem:[#allocation2 + $0x5c] sm:$0xf0] }
 0x13e   :  { %2917 = vmatpush.bf16.msra.mxu0 %v11608_v8  ;;  %v11860_v8 = vor.u32 %v15293_v59, %v11857_v60  ;;  %v11784_v20 = vor.u32 %v15276_v10, %v11783_v9  ;;  %v11844_v44 = vor.u32 %v15289_v32, %v11841_v33  ;;  %v15287_v51 = vld [vmem:[#allocation5 + $0x9b4] sm:$0xf]  ;;  %v11833_v52 = vld [vmem:[#allocation5 + $0x9b8] sm:$0xf0]  ;;  %v15269_v60 = vld [vmem:[#allocation5 + $0x924] sm:$0xf] }
 0x13f   :  { %2936 = vmatpush.bf16.msra.mxu1 %v11672_v13  ;;  %v1447_v43 = vmax.f32 %v1438_v34, 0.0  ;;  %v15291_v13 = vld [vmem:[#allocation5 + $0x9d4] sm:$0xf]  ;;  %v1448_v15 = vmax.f32 %v1402_v61, 0.0  ;;  %v11761_v61 = vld [vmem:[#allocation5 + $0x928] sm:$0xf0] }
 0x140   :  { %2955 = vmatpush.bf16.msra.mxu2 %v11612_v7  ;;  %v11856_v7 = vor.u32 %v15294_v58, %v11855_v53  ;;  %v11823_v4 = vld [vmem:[#allocation5 + $0x9a0] sm:$0xf]  ;;  %v15286_v9 = vld [vmem:[#allocation5 + $0x9a4] sm:$0xf0]  ;;  %v15285_v10 = vld [vmem:[#allocation5 + $0x9a4] sm:$0xf] }
 0x141   :  { %2974 = vmatpush.bf16.msra.mxu3 %v11676_v14  ;;  %v1452_v50 = vpack.c.bf16 %v1447_v43, %v1446_v42  ;;  %v11849_v14 = vld [vmem:[#allocation5 + $0x9d8] sm:$0xf0]  ;;  %v11824_v22 = vor.u32 %v15286_v9, %v11823_v4  ;;  %v15265_v33 = vld [vmem:[#allocation5 + $0x904] sm:$0xf] }
 0x142   :  { %2918 = vmatpush.bf16.msra.mxu0 %v11600_v31  ;;  %v1420_v54 = vpop.f32.mrf.mxu2  ;;  %v1684_v63 = vpop.f32.mrf.mxu0  ;;  %v11852_v25 = vor.u32 %v15291_v13, %v11849_v14  ;;  %v15290_v31 = vld [vmem:[#allocation5 + $0x9c4] sm:$0xf0] }
 0x143   :  { %2937 = vmatpush.bf16.msra.mxu1 %v11664_v35  ;;  %v1439_v55 = vpop.f32.mrf.mxu3  ;;  %1456 = vst [vmem:[#allocation3 + $0x110] sm:$0xff] %v1452_v50  ;;  %v1421_v62 = vadd.f32 %v1420_v54, %v16431_v19  ;;  %v1703_v0 = vpop.f32.mrf.mxu1  ;;  %v1685_v17 = vadd.f32 %v1684_v63, %v16428_v3  ;;  %v11840_v43 = vor.u32 %v15290_v31, %v11839_v28  ;;  %v15288_v50 = vld [vmem:[#allocation5 + $0x9b4] sm:$0xf0]  ;;  %v15283_v28 = vld [vmem:[#allocation5 + $0x994] sm:$0xf] }
 0x144   :  { %2956 = vmatpush.bf16.msra.mxu2 %v11604_v30  ;;  %v11832_v63 = vor.u32 %v15288_v50, %v11831_v49  ;;  %v11945_v49 = vld [vmem:[#allocation5 + $0xa78] sm:$0xf0]  ;;  %v11943_v50 = vld [vmem:[#allocation5 + $0xa70] sm:$0xf] }
 0x145   :  { %2975 = vmatpush.bf16.msra.mxu3 %v11668_v36  ;;  %v1440_v6 = vadd.f32 %v1439_v55, %v1421_v62  ;;  %2919 = vmatmul.bf16.vlgmr.msra.gmra.mxu0 %v11584_v56  ;;  %v1704_v34 = vadd.f32 %v1703_v0, %v1685_v17  ;;  %v11836_v0 = vor.u32 %v15287_v51, %v11833_v52  ;;  %v15316_v51 = vld [vmem:[#allocation5 + $0xa74] sm:$0xf0] }
 0x146   :  { %3220 = vmatpush.bf16.msrb.mxu0 %v11800_v40  ;;  %2938 = vmatmul.bf16.vlgmr.msra.gmra.mxu1 %v11588_v57  ;;  %v15271_v40 = vld [vmem:[#allocation5 + $0x934] sm:$0xf] }
 0x147   :  { %3239 = vmatpush.bf16.msrb.mxu1 %v11864_v41  ;;  %v1449_v16 = vmax.f32 %v1440_v6, 0.0  ;;  %2957 = vmatmul.bf16.vlgmr.msra.gmra.mxu2 %v11584_v56  ;;  %v11769_v41 = vld [vmem:[#allocation5 + $0x938] sm:$0xf0]  ;;  %v1751_v53 = vmax.f32 %v1704_v34, 0.0  ;;  %v15227_v56 = vld [vmem:[#allocation2 + $0x48] sm:$0xf] }
 0x148   :  { %3258 = vmatpush.bf16.msrb.mxu2 %v11804_v39  ;;  %2976 = vmatmul.bf16.vlgmr.msra.gmra.mxu3 %v11588_v57  ;;  %v11776_v39 = vor.u32 %v15274_v27, %v11775_v26  ;;  %v11593_v57 = vld [vmem:[#allocation2 + $0x60] sm:$0xf0]  ;;  %v11772_v58 = vor.u32 %v15271_v40, %v11769_v41  ;;  %v11815_v26 = vld [vmem:[#allocation5 + $0x990] sm:$0xf]  ;;  %v15284_v27 = vld [vmem:[#allocation5 + $0x994] sm:$0xf0] }
 0x149   :  { %3277 = vmatpush.bf16.msrb.mxu3 %v11868_v47  ;;  %v1453_v23 = vpack.c.bf16 %v1449_v16, %v1448_v15  ;;  %v11767_v47 = vld [vmem:[#allocation5 + $0x930] sm:$0xf]  ;;  %v11764_v16 = vor.u32 %v15269_v60, %v11761_v61  ;;  %v11745_v34 = vld [vmem:[#allocation5 + $0x908] sm:$0xf0]  ;;  %v15282_v40 = vld [vmem:[#allocation5 + $0x984] sm:$0xf0] }
 0x14a   :  { %3221 = vmatpush.bf16.msrb.mxu0 %v11792_v2  ;;  %v1722_v29 = vpop.f32.mrf.mxu2  ;;  %v1686_v36 = vpop.f32.mrf.mxu0  ;;  %v11768_v59 = vor.u32 %v15272_v48, %v11767_v47  ;;  %v15270_v2 = vld [vmem:[#allocation5 + $0x924] sm:$0xf0]  ;;  %v15331_v60 = vld [vmem:[#allocation5 + $0xaf4] sm:$0xf]  ;;  %v12009_v61 = vld [vmem:[#allocation5 + $0xaf8] sm:$0xf0] }
 0x14b   :  { %3240 = vmatpush.bf16.msrb.mxu1 %v11856_v7  ;;  %v1741_v30 = vpop.f32.mrf.mxu3  ;;  %1457 = vst [vmem:[#allocation3 + $0x188] sm:$0xff] %v1453_v23  ;;  %v1723_v35 = vadd.f32 %v1722_v29, %v16431_v19  ;;  %v1705_v37 = vpop.f32.mrf.mxu1  ;;  %v1687_v55 = vadd.f32 %v1686_v36, %v16428_v3  ;;  %v11592_v7 = vor.u32 %v15228_v46, %v11591_v45  ;;  %v11817_v29 = vld [vmem:[#allocation5 + $0x998] sm:$0xf0]  ;;  %v11809_v45 = vld [vmem:[#allocation5 + $0x988] sm:$0xf0] }
 0x14c   :  { %3259 = vmatpush.bf16.msrb.mxu2 %v11796_v1  ;;  %v11759_v1 = vld [vmem:[#allocation5 + $0x920] sm:$0xf]  ;;  %v11828_v23 = vor.u32 %v15285_v10, %v11825_v11  ;;  %v15315_v46 = vld [vmem:[#allocation5 + $0xa74] sm:$0xf]  ;;  %v15261_v10 = vld [vmem:[#allocation2 + $0x10] sm:$0xf] }
 0x14d   :  { %3278 = vmatpush.bf16.msrb.mxu3 %v11860_v8  ;;  %v1742_v42 = vadd.f32 %v1741_v30, %v1723_v35  ;;  %v11596_v8 = vor.u32 %v15227_v56, %v11593_v57  ;;  %v1706_v12 = vadd.f32 %v1705_v37, %v1687_v55  ;;  %v11760_v17 = vor.u32 %v15270_v2, %v11759_v1  ;;  %v11743_v35 = vld [vmem:[#allocation5 + $0x900] sm:$0xf]  ;;  %v12007_v56 = vld [vmem:[#allocation5 + $0xaf0] sm:$0xf]  ;;  %v15332_v57 = vld [vmem:[#allocation5 + $0xaf4] sm:$0xf0] }
 0x14e   :  { %3222 = vmatpush.bf16.msrb.mxu0 %v11784_v20  ;;  %v11753_v20 = vld [vmem:[#allocation5 + $0x918] sm:$0xf0]  ;;  %v11727_v1 = vld [vmem:[#allocation2 + $0xc] sm:$0xf]  ;;  %v15262_v2 = vld [vmem:[#allocation2 + $0x24] sm:$0xf0]  ;;  %v11948_v4 = vor.u32 %v15315_v46, %v11945_v49 }
 0x14f   :  { %3241 = vmatpush.bf16.msrb.mxu1 %v11848_v24  ;;  %v1752_v54 = vmax.f32 %v1742_v42, 0.0  ;;  %v11751_v24 = vld [vmem:[#allocation5 + $0x910] sm:$0xf]  ;;  %v1753_v30 = vmax.f32 %v1706_v12, 0.0  ;;  %v11816_v42 = vor.u32 %v15284_v27, %v11815_v26  ;;  %v11729_v11 = vld [vmem:[#allocation2 + $0x28] sm:$0xf0]  ;;  %v12012_v12 = vor.u32 %v15331_v60, %v12009_v61 }
 0x150   :  { %3260 = vmatpush.bf16.msrb.mxu2 %v11788_v18  ;;  %v15267_v18 = vld [vmem:[#allocation5 + $0x914] sm:$0xf]  ;;  %v12001_v26 = vld [vmem:[#allocation5 + $0xae8] sm:$0xf0]  ;;  %v15309_v49 = vld [vmem:[#allocation5 + $0xa44] sm:$0xf] }
 0x151   :  { %3279 = vmatpush.bf16.msrb.mxu3 %v11852_v25  ;;  %v1759_v62 = vpack.c.bf16 %v1752_v54, %v1751_v53  ;;  %v15268_v25 = vld [vmem:[#allocation5 + $0x914] sm:$0xf0]  ;;  %v11756_v36 = vor.u32 %v15267_v18, %v11753_v20  ;;  %v11999_v18 = vld [vmem:[#allocation5 + $0xae0] sm:$0xf]  ;;  %v15325_v60 = vld [vmem:[#allocation5 + $0xac4] sm:$0xf] }
 0x152   :  { %3223 = vmatpush.bf16.msrb.mxu0 %v11776_v39  ;;  %v1724_v5 = vpop.f32.mrf.mxu2  ;;  %v1689_v14 = vpop.f32.mrf.mxu0  ;;  %v11752_v37 = vor.u32 %v15268_v25, %v11751_v24  ;;  %v11807_v39 = vld [vmem:[#allocation5 + $0x980] sm:$0xf]  ;;  %v15330_v24 = vld [vmem:[#allocation5 + $0xae4] sm:$0xf0]  ;;  %v15329_v25 = vld [vmem:[#allocation5 + $0xae4] sm:$0xf] }
 0x153   :  { %3242 = vmatpush.bf16.msrb.mxu1 %v11840_v43  ;;  %v1743_v6 = vpop.f32.mrf.mxu3  ;;  %1763 = vst [vmem:[#allocation3 + $0x28] sm:$0xff] %v1759_v62  ;;  %v1725_v13 = vadd.f32 %v1724_v5, %v16431_v19  ;;  %v1708_v15 = vpop.f32.mrf.mxu1  ;;  %v1690_v32 = vadd.f32 %v1689_v14, %v16428_v3  ;;  %v11820_v43 = vor.u32 %v15283_v28, %v11817_v29  ;;  %v11937_v14 = vld [vmem:[#allocation5 + $0xa68] sm:$0xf0] }
 0x154   :  { %3261 = vmatpush.bf16.msrb.mxu2 %v11780_v38  ;;  %v15266_v38 = vld [vmem:[#allocation5 + $0x904] sm:$0xf0]  ;;  %v11944_v5 = vor.u32 %v15316_v51, %v11943_v50  ;;  %v11921_v50 = vld [vmem:[#allocation5 + $0xa48] sm:$0xf0] }
 0x155   :  { %3280 = vmatpush.bf16.msrb.mxu3 %v11844_v44  ;;  %v1744_v21 = vadd.f32 %v1743_v6, %v1725_v13  ;;  %2924 = vmatmul.bf16.gmra.mxu0 %v11592_v7  ;;  %v15281_v44 = vld [vmem:[#allocation5 + $0x984] sm:$0xf]  ;;  %v1709_v52 = vadd.f32 %v1708_v15, %v1690_v32  ;;  %v12008_v6 = vor.u32 %v15332_v57, %v12007_v56  ;;  %v11983_v56 = vld [vmem:[#allocation5 + $0xac0] sm:$0xf]  ;;  %v11985_v61 = vld [vmem:[#allocation5 + $0xac8] sm:$0xf0] }
 0x156   :  { %3224 = vmatpush.bf16.msrb.mxu0 %v11768_v59  ;;  %2943 = vmatmul.bf16.gmra.mxu1 %v11596_v8  ;;  %v11744_v59 = vor.u32 %v15266_v38, %v11743_v35  ;;  %v15313_v13 = vld [vmem:[#allocation5 + $0xa64] sm:$0xf]  ;;  %v11927_v38 = vld [vmem:[#allocation5 + $0xa50] sm:$0xf] }
 0x157   :  { %3243 = vmatpush.bf16.msrb.mxu1 %v11832_v63  ;;  %v1754_v31 = vmax.f32 %v1744_v21, 0.0  ;;  %2962 = vmatmul.bf16.gmra.mxu2 %v11592_v7  ;;  %v11808_v63 = vor.u32 %v15282_v40, %v11807_v39  ;;  %v1755_v7 = vmax.f32 %v1709_v52, 0.0  ;;  %v15312_v39 = vld [vmem:[#allocation5 + $0xa54] sm:$0xf0]  ;;  %v11991_v40 = vld [vmem:[#allocation5 + $0xad0] sm:$0xf] }
 0x158   :  { %3262 = vmatpush.bf16.msrb.mxu2 %v11772_v58  ;;  %2981 = vmatmul.bf16.gmra.mxu3 %v11596_v8  ;;  %v11748_v58 = vor.u32 %v15265_v33, %v11745_v34  ;;  %v15311_v33 = vld [vmem:[#allocation5 + $0xa54] sm:$0xf]  ;;  %v11929_v34 = vld [vmem:[#allocation5 + $0xa58] sm:$0xf0] }
 0x159   :  { %3281 = vmatpush.bf16.msrb.mxu3 %v11836_v0  ;;  %v1760_v41 = vpack.c.bf16 %v1754_v31, %v1753_v30  ;;  %v11812_v0 = vor.u32 %v15281_v44, %v11809_v45  ;;  %v11940_v31 = vor.u32 %v15313_v13, %v11937_v14  ;;  %v15308_v13 = vld [vmem:[#allocation5 + $0xa34] sm:$0xf0]  ;;  %v11975_v14 = vld [vmem:[#allocation5 + $0xab0] sm:$0xf] }
 0x15a   :  { %3225 = vmatpush.bf16.msrb.mxu0 %v11760_v17  ;;  %v1727_v47 = vpop.f32.mrf.mxu2  ;;  %v1691_v54 = vpop.f32.mrf.mxu0  ;;  %v15314_v17 = vld [vmem:[#allocation5 + $0xa64] sm:$0xf0] }
 0x15b   :  { %3244 = vmatpush.bf16.msrb.mxu1 %v11824_v22  ;;  %v1746_v48 = vpop.f32.mrf.mxu3  ;;  %1764 = vst [vmem:[#allocation3 + $0xa0] sm:$0xff] %v1760_v41  ;;  %v1728_v53 = vadd.f32 %v1727_v47, %v16431_v19  ;;  %v1710_v55 = vpop.f32.mrf.mxu1  ;;  %v1692_v9 = vadd.f32 %v1691_v54, %v16428_v3  ;;  %v11728_v22 = vor.u32 %v15262_v2, %v11727_v1  ;;  %v15328_v41 = vld [vmem:[#allocation5 + $0xad4] sm:$0xf0]  ;;  %v11919_v54 = vld [vmem:[#allocation5 + $0xa40] sm:$0xf] }
 0x15c   :  { %3263 = vmatpush.bf16.msrb.mxu2 %v11764_v16  ;;  %v11935_v16 = vld [vmem:[#allocation5 + $0xa60] sm:$0xf]  ;;  %v11932_v47 = vor.u32 %v15311_v33, %v11929_v34  ;;  %v11992_v52 = vor.u32 %v15328_v41, %v11991_v40  ;;  %v11924_v2 = vor.u32 %v15309_v49, %v11921_v50  ;;  %v11969_v40 = vld [vmem:[#allocation5 + $0xaa8] sm:$0xf0] }
 0x15d   :  { %3282 = vmatpush.bf16.msrb.mxu3 %v11828_v23  ;;  %v1747_v62 = vadd.f32 %v1746_v48, %v1728_v53  ;;  %v11732_v23 = vor.u32 %v15261_v10, %v11729_v11  ;;  %v1711_v27 = vadd.f32 %v1710_v55, %v1692_v9  ;;  %v11936_v32 = vor.u32 %v15314_v17, %v11935_v16  ;;  %v15310_v55 = vld [vmem:[#allocation5 + $0xa44] sm:$0xf0]  ;;  %v11735_v10 = vld [vmem:[#allocation2 + $0x44] sm:$0xf]  ;;  %v15264_v11 = vld [vmem:[#allocation2 + $0x5c] sm:$0xf0] }
 0x15e   :  { %3226 = vmatpush.bf16.msrb.mxu0 %v11752_v37  ;;  %v12004_v37 = vor.u32 %v15329_v25, %v12001_v26  ;;  %v11928_v48 = vor.u32 %v15312_v39, %v11927_v38  ;;  %v11988_v9 = vor.u32 %v15325_v60, %v11985_v61  ;;  %v15323_v16 = vld [vmem:[#allocation5 + $0xab4] sm:$0xf]  ;;  %v11977_v17 = vld [vmem:[#allocation5 + $0xab8] sm:$0xf0]  ;;  %v15305_v26 = vld [vmem:[#allocation5 + $0xa24] sm:$0xf] }
 0x15f   :  { %3245 = vmatpush.bf16.msrb.mxu1 %v11816_v42  ;;  %v1756_v8 = vmax.f32 %v1747_v62, 0.0  ;;  %v15327_v42 = vld [vmem:[#allocation5 + $0xad4] sm:$0xf]  ;;  %v1757_v44 = vmax.f32 %v1711_v27, 0.0  ;;  %v11905_v27 = vld [vmem:[#allocation5 + $0xa28] sm:$0xf0] }
 0x160   :  { %3264 = vmatpush.bf16.msrb.mxu2 %v11756_v36  ;;  %v12000_v36 = vor.u32 %v15330_v24, %v11999_v18  ;;  %v11967_v33 = vld [vmem:[#allocation5 + $0xaa0] sm:$0xf]  ;;  %v15322_v38 = vld [vmem:[#allocation5 + $0xaa4] sm:$0xf0]  ;;  %v15321_v39 = vld [vmem:[#allocation5 + $0xaa4] sm:$0xf] }
 0x161   :  { %3283 = vmatpush.bf16.msrb.mxu3 %v11820_v43  ;;  %v1761_v15 = vpack.c.bf16 %v1756_v8, %v1755_v7  ;;  %v11993_v43 = vld [vmem:[#allocation5 + $0xad8] sm:$0xf0]  ;;  %v11968_v50 = vor.u32 %v15322_v38, %v11967_v33  ;;  %v15301_v61 = vld [vmem:[#allocation5 + $0xa04] sm:$0xf] }
 0x162   :  { %3227 = vmatpush.bf16.msrb.mxu0 %v11744_v59  ;;  %v1729_v20 = vpop.f32.mrf.mxu2  ;;  %v1993_v29 = vpop.f32.mrf.mxu0  ;;  %v11996_v53 = vor.u32 %v15327_v42, %v11993_v43  ;;  %v15326_v59 = vld [vmem:[#allocation5 + $0xac4] sm:$0xf0] }
 0x163   :  { %3246 = vmatpush.bf16.msrb.mxu1 %v11808_v63  ;;  %v1748_v21 = vpop.f32.mrf.mxu3  ;;  %1765 = vst [vmem:[#allocation3 + $0x118] sm:$0xff] %v1761_v15  ;;  %v1730_v28 = vadd.f32 %v1729_v20, %v16431_v19  ;;  %v2012_v30 = vpop.f32.mrf.mxu1  ;;  %v1994_v46 = vadd.f32 %v1993_v29, %v16428_v3  ;;  %v11984_v8 = vor.u32 %v15326_v59, %v11983_v56  ;;  %v15324_v15 = vld [vmem:[#allocation5 + $0xab4] sm:$0xf0]  ;;  %v15319_v56 = vld [vmem:[#allocation5 + $0xa94] sm:$0xf] }
 0x164   :  { %3265 = vmatpush.bf16.msrb.mxu2 %v11748_v58  ;;  %v11976_v29 = vor.u32 %v15324_v15, %v11975_v14  ;;  %v12089_v14 = vld [vmem:[#allocation5 + $0xb78] sm:$0xf0]  ;;  %v12087_v15 = vld [vmem:[#allocation5 + $0xb70] sm:$0xf] }
 0x165   :  { %3284 = vmatpush.bf16.msrb.mxu3 %v11812_v0  ;;  %v1749_v35 = vadd.f32 %v1748_v21, %v1730_v28  ;;  %3228 = vmatmul.bf16.vlgmr.msrb.gmra.mxu0 %v11728_v22  ;;  %v2013_v62 = vadd.f32 %v2012_v30, %v1994_v46  ;;  %v11980_v30 = vor.u32 %v15323_v16, %v11977_v17  ;;  %v15352_v16 = vld [vmem:[#allocation5 + $0xb74] sm:$0xf0] }
 0x166   :  { %3529 = vmatpush.bf16.msra.mxu0 %v11944_v5  ;;  %3247 = vmatmul.bf16.vlgmr.msrb.gmra.mxu1 %v11732_v23  ;;  %v15307_v5 = vld [vmem:[#allocation5 + $0xa34] sm:$0xf] }
 0x167   :  { %3548 = vmatpush.bf16.msra.mxu1 %v12008_v6  ;;  %v1758_v45 = vmax.f32 %v1749_v35, 0.0  ;;  %3266 = vmatmul.bf16.vlgmr.msrb.gmra.mxu2 %v11728_v22  ;;  %v11913_v6 = vld [vmem:[#allocation5 + $0xa38] sm:$0xf0]  ;;  %v2060_v18 = vmax.f32 %v2013_v62, 0.0  ;;  %v15263_v22 = vld [vmem:[#allocation2 + $0x48] sm:$0xf] }
 0x168   :  { %3567 = vmatpush.bf16.msra.mxu2 %v11948_v4  ;;  %3285 = vmatmul.bf16.vlgmr.msrb.gmra.mxu3 %v11732_v23  ;;  %v11920_v4 = vor.u32 %v15310_v55, %v11919_v54  ;;  %v11737_v23 = vld [vmem:[#allocation2 + $0x60] sm:$0xf0]  ;;  %v11916_v24 = vor.u32 %v15307_v5, %v11913_v6  ;;  %v11959_v54 = vld [vmem:[#allocation5 + $0xa90] sm:$0xf]  ;;  %v15320_v55 = vld [vmem:[#allocation5 + $0xa94] sm:$0xf0] }
 0x169   :  { %3586 = vmatpush.bf16.msra.mxu3 %v12012_v12  ;;  %v1762_v51 = vpack.c.bf16 %v1758_v45, %v1757_v44  ;;  %v11911_v12 = vld [vmem:[#allocation5 + $0xa30] sm:$0xf]  ;;  %v11908_v45 = vor.u32 %v15305_v26, %v11905_v27  ;;  %v11889_v62 = vld [vmem:[#allocation5 + $0xa08] sm:$0xf0]  ;;  %v15318_v5 = vld [vmem:[#allocation5 + $0xa84] sm:$0xf0] }
 0x16a   :  { %3530 = vmatpush.bf16.msra.mxu0 %v11936_v32  ;;  %v2031_v57 = vpop.f32.mrf.mxu2  ;;  %v1995_v0 = vpop.f32.mrf.mxu0  ;;  %v11912_v25 = vor.u32 %v15308_v13, %v11911_v12  ;;  %v15306_v32 = vld [vmem:[#allocation5 + $0xa24] sm:$0xf0]  ;;  %v15367_v26 = vld [vmem:[#allocation5 + $0xbf4] sm:$0xf]  ;;  %v12153_v27 = vld [vmem:[#allocation5 + $0xbf8] sm:$0xf0] }
 0x16b   :  { %3549 = vmatpush.bf16.msra.mxu1 %v12000_v36  ;;  %v2050_v58 = vpop.f32.mrf.mxu3  ;;  %1766 = vst [vmem:[#allocation3 + $0x190] sm:$0xff] %v1762_v51  ;;  %v2032_v63 = vadd.f32 %v2031_v57, %v16431_v19  ;;  %v2014_v1 = vpop.f32.mrf.mxu1  ;;  %v1996_v21 = vadd.f32 %v1995_v0, %v16428_v3  ;;  %v11736_v36 = vor.u32 %v15264_v11, %v11735_v10  ;;  %v11961_v57 = vld [vmem:[#allocation5 + $0xa98] sm:$0xf0]  ;;  %v11953_v10 = vld [vmem:[#allocation5 + $0xa88] sm:$0xf0] }
 0x16c   :  { %3568 = vmatpush.bf16.msra.mxu2 %v11940_v31  ;;  %v11903_v31 = vld [vmem:[#allocation5 + $0xa20] sm:$0xf]  ;;  %v11972_v51 = vor.u32 %v15321_v39, %v11969_v40  ;;  %v15351_v11 = vld [vmem:[#allocation5 + $0xb74] sm:$0xf]  ;;  %v11873_v40 = vld [vmem:[#allocation2 + $0x2c] sm:$0xf0] }
 0x16d   :  { %3587 = vmatpush.bf16.msra.mxu3 %v12004_v37  ;;  %v2051_v7 = vadd.f32 %v2050_v58, %v2032_v63  ;;  %v11740_v37 = vor.u32 %v15263_v22, %v11737_v23  ;;  %v2015_v41 = vadd.f32 %v2014_v1, %v1996_v21  ;;  %v11904_v46 = vor.u32 %v15306_v32, %v11903_v31  ;;  %v11887_v63 = vld [vmem:[#allocation5 + $0xa00] sm:$0xf]  ;;  %v12151_v22 = vld [vmem:[#allocation5 + $0xbf0] sm:$0xf]  ;;  %v15368_v23 = vld [vmem:[#allocation5 + $0xbf4] sm:$0xf0] }
 0x16e   :  { %3531 = vmatpush.bf16.msra.mxu0 %v11928_v48  ;;  %v11897_v48 = vld [vmem:[#allocation5 + $0xa18] sm:$0xf0]  ;;  %v11871_v31 = vld [vmem:[#allocation2 + $0x10] sm:$0xf]  ;;  %v15298_v32 = vld [vmem:[#allocation2 + $0x28] sm:$0xf0]  ;;  %v12092_v33 = vor.u32 %v15351_v11, %v12089_v14 }
 0x16f   :  { %3550 = vmatpush.bf16.msra.mxu1 %v11992_v52  ;;  %v2061_v20 = vmax.f32 %v2051_v7, 0.0  ;;  %v11895_v52 = vld [vmem:[#allocation5 + $0xa10] sm:$0xf]  ;;  %v2062_v58 = vmax.f32 %v2015_v41, 0.0  ;;  %v11960_v7 = vor.u32 %v15320_v55, %v11959_v54  ;;  %v15297_v39 = vld [vmem:[#allocation2 + $0x14] sm:$0xf]  ;;  %v12156_v41 = vor.u32 %v15367_v26, %v12153_v27 }
 0x170   :  { %3569 = vmatpush.bf16.msra.mxu2 %v11932_v47  ;;  %v15303_v47 = vld [vmem:[#allocation5 + $0xa14] sm:$0xf]  ;;  %v12145_v54 = vld [vmem:[#allocation5 + $0xbe8] sm:$0xf0]  ;;  %v15345_v14 = vld [vmem:[#allocation5 + $0xb44] sm:$0xf] }
 0x171   :  { %3588 = vmatpush.bf16.msra.mxu3 %v11996_v53  ;;  %v2068_v28 = vpack.c.bf16 %v2061_v20, %v2060_v18  ;;  %v15304_v53 = vld [vmem:[#allocation5 + $0xa14] sm:$0xf0]  ;;  %v11900_v0 = vor.u32 %v15303_v47, %v11897_v48  ;;  %v12143_v47 = vld [vmem:[#allocation5 + $0xbe0] sm:$0xf]  ;;  %v15361_v26 = vld [vmem:[#allocation5 + $0xbc4] sm:$0xf] }
 0x172   :  { %3532 = vmatpush.bf16.msra.mxu0 %v11920_v4  ;;  %v2033_v34 = vpop.f32.mrf.mxu2  ;;  %v1998_v43 = vpop.f32.mrf.mxu0  ;;  %v11896_v1 = vor.u32 %v15304_v53, %v11895_v52  ;;  %v11951_v4 = vld [vmem:[#allocation5 + $0xa80] sm:$0xf]  ;;  %v15366_v52 = vld [vmem:[#allocation5 + $0xbe4] sm:$0xf0]  ;;  %v15365_v53 = vld [vmem:[#allocation5 + $0xbe4] sm:$0xf] }
 0x173   :  { %3551 = vmatpush.bf16.msra.mxu1 %v11984_v8  ;;  %v2052_v35 = vpop.f32.mrf.mxu3  ;;  %2072 = vst [vmem:[#allocation3 + $0x30] sm:$0xff] %v2068_v28  ;;  %v2034_v42 = vadd.f32 %v2033_v34, %v16431_v19  ;;  %v2017_v44 = vpop.f32.mrf.mxu1  ;;  %v1999_v60 = vadd.f32 %v1998_v43, %v16428_v3  ;;  %v11964_v8 = vor.u32 %v15319_v56, %v11961_v57  ;;  %v12081_v43 = vld [vmem:[#allocation5 + $0xb68] sm:$0xf0] }
 0x174   :  { %3570 = vmatpush.bf16.msra.mxu2 %v11924_v2  ;;  %v15302_v2 = vld [vmem:[#allocation5 + $0xa04] sm:$0xf0]  ;;  %v12088_v34 = vor.u32 %v15352_v16, %v12087_v15  ;;  %v12065_v15 = vld [vmem:[#allocation5 + $0xb48] sm:$0xf0] }
 0x175   :  { %3589 = vmatpush.bf16.msra.mxu3 %v11988_v9  ;;  %v2053_v49 = vadd.f32 %v2052_v35, %v2034_v42  ;;  %3233 = vmatmul.bf16.gmra.mxu0 %v11736_v36  ;;  %v15317_v9 = vld [vmem:[#allocation5 + $0xa84] sm:$0xf]  ;;  %v2018_v17 = vadd.f32 %v2017_v44, %v1999_v60  ;;  %v12152_v35 = vor.u32 %v15368_v23, %v12151_v22  ;;  %v12127_v22 = vld [vmem:[#allocation5 + $0xbc0] sm:$0xf]  ;;  %v12129_v27 = vld [vmem:[#allocation5 + $0xbc8] sm:$0xf0] }
 0x176   :  { %3533 = vmatpush.bf16.msra.mxu0 %v11912_v25  ;;  %3252 = vmatmul.bf16.gmra.mxu1 %v11740_v37  ;;  %v11888_v25 = vor.u32 %v15302_v2, %v11887_v63  ;;  %v15349_v42 = vld [vmem:[#allocation5 + $0xb64] sm:$0xf]  ;;  %v12071_v2 = vld [vmem:[#allocation5 + $0xb50] sm:$0xf] }
 0x177   :  { %3552 = vmatpush.bf16.msra.mxu1 %v11976_v29  ;;  %v2063_v59 = vmax.f32 %v2053_v49, 0.0  ;;  %3271 = vmatmul.bf16.gmra.mxu2 %v11736_v36  ;;  %v11952_v29 = vor.u32 %v15318_v5, %v11951_v4  ;;  %v2064_v36 = vmax.f32 %v2018_v17, 0.0  ;;  %v15348_v4 = vld [vmem:[#allocation5 + $0xb54] sm:$0xf0]  ;;  %v12135_v5 = vld [vmem:[#allocation5 + $0xbd0] sm:$0xf] }
 0x178   :  { %3571 = vmatpush.bf16.msra.mxu2 %v11916_v24  ;;  %3290 = vmatmul.bf16.gmra.mxu3 %v11740_v37  ;;  %v11892_v24 = vor.u32 %v15301_v61, %v11889_v62  ;;  %v15347_v61 = vld [vmem:[#allocation5 + $0xb54] sm:$0xf]  ;;  %v12073_v62 = vld [vmem:[#allocation5 + $0xb58] sm:$0xf0] }
 0x179   :  { %3590 = vmatpush.bf16.msra.mxu3 %v11980_v30  ;;  %v2069_v6 = vpack.c.bf16 %v2063_v59, %v2062_v58  ;;  %v11956_v30 = vor.u32 %v15317_v9, %v11953_v10  ;;  %v12084_v59 = vor.u32 %v15349_v42, %v12081_v43  ;;  %v15344_v42 = vld [vmem:[#allocation5 + $0xb34] sm:$0xf0]  ;;  %v12119_v43 = vld [vmem:[#allocation5 + $0xbb0] sm:$0xf] }
 0x17a   :  { %3534 = vmatpush.bf16.msra.mxu0 %v11904_v46  ;;  %v2036_v12 = vpop.f32.mrf.mxu2  ;;  %v2000_v20 = vpop.f32.mrf.mxu0  ;;  %v15350_v46 = vld [vmem:[#allocation5 + $0xb64] sm:$0xf0] }
 0x17b   :  { %3553 = vmatpush.bf16.msra.mxu1 %v11968_v50  ;;  %v2055_v13 = vpop.f32.mrf.mxu3  ;;  %2073 = vst [vmem:[#allocation3 + $0xa8] sm:$0xff] %v2069_v6  ;;  %v2037_v18 = vadd.f32 %v2036_v12, %v16431_v19  ;;  %v2019_v21 = vpop.f32.mrf.mxu1  ;;  %v2001_v38 = vadd.f32 %v2000_v20, %v16428_v3  ;;  %v11872_v50 = vor.u32 %v15298_v32, %v11871_v31  ;;  %v15364_v6 = vld [vmem:[#allocation5 + $0xbd4] sm:$0xf0]  ;;  %v12063_v20 = vld [vmem:[#allocation5 + $0xb40] sm:$0xf] }
 0x17c   :  { %3572 = vmatpush.bf16.msra.mxu2 %v11908_v45  ;;  %v12079_v45 = vld [vmem:[#allocation5 + $0xb60] sm:$0xf]  ;;  %v12076_v12 = vor.u32 %v15347_v61, %v12073_v62  ;;  %v12136_v17 = vor.u32 %v15364_v6, %v12135_v5  ;;  %v12068_v32 = vor.u32 %v15345_v14, %v12065_v15  ;;  %v12113_v5 = vld [vmem:[#allocation5 + $0xba8] sm:$0xf0] }
 0x17d   :  { %3591 = vmatpush.bf16.msra.mxu3 %v11972_v51  ;;  %v2056_v28 = vadd.f32 %v2055_v13, %v2037_v18  ;;  %v11876_v51 = vor.u32 %v15297_v39, %v11873_v40  ;;  %v2020_v55 = vadd.f32 %v2019_v21, %v2001_v38  ;;  %v12080_v60 = vor.u32 %v15350_v46, %v12079_v45  ;;  %v15346_v21 = vld [vmem:[#allocation5 + $0xb44] sm:$0xf0]  ;;  %v15300_v40 = vld [vmem:[#allocation2 + $0x60] sm:$0xf0]  ;;  %v15359_v45 = vld [vmem:[#allocation5 + $0xbb4] sm:$0xf] }
 0x17e   :  { %3535 = vmatpush.bf16.msra.mxu0 %v11896_v1  ;;  %v12148_v1 = vor.u32 %v15365_v53, %v12145_v54  ;;  %v12072_v13 = vor.u32 %v15348_v4, %v12071_v2  ;;  %v12132_v38 = vor.u32 %v15361_v26, %v12129_v27  ;;  %v11879_v39 = vld [vmem:[#allocation2 + $0x48] sm:$0xf]  ;;  %v12121_v46 = vld [vmem:[#allocation5 + $0xbb8] sm:$0xf0]  ;;  %v15341_v54 = vld [vmem:[#allocation5 + $0xb24] sm:$0xf] }
 0x17f   :  { %3554 = vmatpush.bf16.msra.mxu1 %v11960_v7  ;;  %v2065_v37 = vmax.f32 %v2056_v28, 0.0  ;;  %v15363_v7 = vld [vmem:[#allocation5 + $0xbd4] sm:$0xf]  ;;  %v2066_v9 = vmax.f32 %v2020_v55, 0.0  ;;  %v12049_v55 = vld [vmem:[#allocation5 + $0xb28] sm:$0xf0] }
 0x180   :  { %3573 = vmatpush.bf16.msra.mxu2 %v11900_v0  ;;  %v12144_v0 = vor.u32 %v15366_v52, %v12143_v47  ;;  %v12111_v61 = vld [vmem:[#allocation5 + $0xba0] sm:$0xf]  ;;  %v15358_v2 = vld [vmem:[#allocation5 + $0xba4] sm:$0xf0]  ;;  %v15357_v4 = vld [vmem:[#allocation5 + $0xba4] sm:$0xf] }
 0x181   :  { %3592 = vmatpush.bf16.msra.mxu3 %v11964_v8  ;;  %v2070_v44 = vpack.c.bf16 %v2065_v37, %v2064_v36  ;;  %v12137_v8 = vld [vmem:[#allocation5 + $0xbd8] sm:$0xf0]  ;;  %v12112_v15 = vor.u32 %v15358_v2, %v12111_v61  ;;  %v15337_v27 = vld [vmem:[#allocation5 + $0xb04] sm:$0xf] }
 0x182   :  { %3536 = vmatpush.bf16.msra.mxu0 %v11888_v25  ;;  %v2038_v48 = vpop.f32.mrf.mxu2  ;;  %v2302_v57 = vpop.f32.mrf.mxu0  ;;  %v12140_v18 = vor.u32 %v15363_v7, %v12137_v8  ;;  %v15362_v25 = vld [vmem:[#allocation5 + $0xbc4] sm:$0xf0] }
 0x183   :  { %3555 = vmatpush.bf16.msra.mxu1 %v11952_v29  ;;  %v2057_v49 = vpop.f32.mrf.mxu3  ;;  %2074 = vst [vmem:[#allocation3 + $0x120] sm:$0xff] %v2070_v44  ;;  %v2039_v56 = vadd.f32 %v2038_v48, %v16431_v19  ;;  %v2321_v58 = vpop.f32.mrf.mxu1  ;;  %v2303_v11 = vadd.f32 %v2302_v57, %v16428_v3  ;;  %v12128_v37 = vor.u32 %v15362_v25, %v12127_v22  ;;  %v15360_v44 = vld [vmem:[#allocation5 + $0xbb4] sm:$0xf0]  ;;  %v15355_v22 = vld [vmem:[#allocation5 + $0xb94] sm:$0xf] }
 0x184   :  { %3574 = vmatpush.bf16.msra.mxu2 %v11892_v24  ;;  %v12120_v57 = vor.u32 %v15360_v44, %v12119_v43  ;;  %v12233_v43 = vld [vmem:[#allocation5 + $0xc78] sm:$0xf0]  ;;  %v12231_v44 = vld [vmem:[#allocation5 + $0xc70] sm:$0xf] }
 0x185   :  { %3593 = vmatpush.bf16.msra.mxu3 %v11956_v30  ;;  %v2058_v63 = vadd.f32 %v2057_v49, %v2039_v56  ;;  %3537 = vmatmul.bf16.vlgmr.msra.gmra.mxu0 %v11872_v50  ;;  %v2322_v28 = vadd.f32 %v2321_v58, %v2303_v11  ;;  %v12124_v58 = vor.u32 %v15359_v45, %v12121_v46  ;;  %v15388_v45 = vld [vmem:[#allocation5 + $0xc74] sm:$0xf0] }
 0x186   :  { %3838 = vmatpush.bf16.msrb.mxu0 %v12088_v34  ;;  %3556 = vmatmul.bf16.vlgmr.msra.gmra.mxu1 %v11876_v51  ;;  %v15343_v34 = vld [vmem:[#allocation5 + $0xb34] sm:$0xf] }
 0x187   :  { %3857 = vmatpush.bf16.msrb.mxu1 %v12152_v35  ;;  %v2067_v10 = vmax.f32 %v2058_v63, 0.0  ;;  %3575 = vmatmul.bf16.vlgmr.msra.gmra.mxu2 %v11872_v50  ;;  %v12057_v35 = vld [vmem:[#allocation5 + $0xb38] sm:$0xf0]  ;;  %v2369_v47 = vmax.f32 %v2322_v28, 0.0  ;;  %v15299_v50 = vld [vmem:[#allocation2 + $0x4c] sm:$0xf] }
 0x188   :  { %3876 = vmatpush.bf16.msrb.mxu2 %v12092_v33  ;;  %3594 = vmatmul.bf16.vlgmr.msra.gmra.mxu3 %v11876_v51  ;;  %v12064_v33 = vor.u32 %v15346_v21, %v12063_v20  ;;  %v11881_v51 = vld [vmem:[#allocation2 + $0x64] sm:$0xf0]  ;;  %v12060_v52 = vor.u32 %v15343_v34, %v12057_v35  ;;  %v12103_v20 = vld [vmem:[#allocation5 + $0xb90] sm:$0xf]  ;;  %v15356_v21 = vld [vmem:[#allocation5 + $0xb94] sm:$0xf0] }
 0x189   :  { %3895 = vmatpush.bf16.msrb.mxu3 %v12156_v41  ;;  %v2071_v16 = vpack.c.bf16 %v2067_v10, %v2066_v9  ;;  %v12055_v41 = vld [vmem:[#allocation5 + $0xb30] sm:$0xf]  ;;  %v12052_v10 = vor.u32 %v15341_v54, %v12049_v55  ;;  %v12033_v28 = vld [vmem:[#allocation5 + $0xb08] sm:$0xf0]  ;;  %v15354_v34 = vld [vmem:[#allocation5 + $0xb84] sm:$0xf0] }
 0x18a   :  { %3839 = vmatpush.bf16.msrb.mxu0 %v12080_v60  ;;  %v2340_v23 = vpop.f32.mrf.mxu2  ;;  %v2304_v30 = vpop.f32.mrf.mxu0  ;;  %v12056_v53 = vor.u32 %v15344_v42, %v12055_v41  ;;  %v15342_v60 = vld [vmem:[#allocation5 + $0xb24] sm:$0xf0]  ;;  %v15403_v54 = vld [vmem:[#allocation5 + $0xcf4] sm:$0xf]  ;;  %v12297_v55 = vld [vmem:[#allocation5 + $0xcf8] sm:$0xf0] }
 0x18b   :  { %3858 = vmatpush.bf16.msrb.mxu1 %v12144_v0  ;;  %v2359_v24 = vpop.f32.mrf.mxu3  ;;  %2075 = vst [vmem:[#allocation3 + $0x198] sm:$0xff] %v2071_v16  ;;  %v2341_v29 = vadd.f32 %v2340_v23, %v16431_v19  ;;  %v2323_v31 = vpop.f32.mrf.mxu1  ;;  %v2305_v49 = vadd.f32 %v2304_v30, %v16428_v3  ;;  %v11880_v0 = vor.u32 %v15300_v40, %v11879_v39  ;;  %v12105_v23 = vld [vmem:[#allocation5 + $0xb98] sm:$0xf0]  ;;  %v12097_v39 = vld [vmem:[#allocation5 + $0xb88] sm:$0xf0] }
 0x18c   :  { %3877 = vmatpush.bf16.msrb.mxu2 %v12084_v59  ;;  %v12047_v59 = vld [vmem:[#allocation5 + $0xb20] sm:$0xf]  ;;  %v12116_v16 = vor.u32 %v15357_v4, %v12113_v5  ;;  %v15387_v40 = vld [vmem:[#allocation5 + $0xc74] sm:$0xf]  ;;  %v12017_v5 = vld [vmem:[#allocation2 + $0x2c] sm:$0xf0] }
 0x18d   :  { %3896 = vmatpush.bf16.msrb.mxu3 %v12148_v1  ;;  %v2360_v36 = vadd.f32 %v2359_v24, %v2341_v29  ;;  %v11884_v1 = vor.u32 %v15299_v50, %v11881_v51  ;;  %v2324_v6 = vadd.f32 %v2323_v31, %v2305_v49  ;;  %v12048_v11 = vor.u32 %v15342_v60, %v12047_v59  ;;  %v12031_v29 = vld [vmem:[#allocation5 + $0xb00] sm:$0xf]  ;;  %v12295_v50 = vld [vmem:[#allocation5 + $0xcf0] sm:$0xf]  ;;  %v15404_v51 = vld [vmem:[#allocation5 + $0xcf4] sm:$0xf0] }
 0x18e   :  { %3840 = vmatpush.bf16.msrb.mxu0 %v12072_v13  ;;  %v12041_v13 = vld [vmem:[#allocation5 + $0xb18] sm:$0xf0]  ;;  %v12015_v59 = vld [vmem:[#allocation2 + $0x10] sm:$0xf]  ;;  %v15334_v60 = vld [vmem:[#allocation2 + $0x28] sm:$0xf0]  ;;  %v12236_v61 = vor.u32 %v15387_v40, %v12233_v43 }
 0x18f   :  { %3859 = vmatpush.bf16.msrb.mxu1 %v12136_v17  ;;  %v2370_v48 = vmax.f32 %v2360_v36, 0.0  ;;  %v12039_v17 = vld [vmem:[#allocation5 + $0xb10] sm:$0xf]  ;;  %v2371_v24 = vmax.f32 %v2324_v6, 0.0  ;;  %v12104_v36 = vor.u32 %v15356_v21, %v12103_v20  ;;  %v15333_v4 = vld [vmem:[#allocation2 + $0x14] sm:$0xf]  ;;  %v12300_v6 = vor.u32 %v15403_v54, %v12297_v55 }
 0x190   :  { %3878 = vmatpush.bf16.msrb.mxu2 %v12076_v12  ;;  %v15339_v12 = vld [vmem:[#allocation5 + $0xb14] sm:$0xf]  ;;  %v12289_v20 = vld [vmem:[#allocation5 + $0xce8] sm:$0xf0]  ;;  %v15381_v43 = vld [vmem:[#allocation5 + $0xc44] sm:$0xf] }
 0x191   :  { %3897 = vmatpush.bf16.msrb.mxu3 %v12140_v18  ;;  %v2377_v56 = vpack.c.bf16 %v2370_v48, %v2369_v47  ;;  %v15340_v18 = vld [vmem:[#allocation5 + $0xb14] sm:$0xf0]  ;;  %v12044_v30 = vor.u32 %v15339_v12, %v12041_v13  ;;  %v12287_v12 = vld [vmem:[#allocation5 + $0xce0] sm:$0xf]  ;;  %v15397_v54 = vld [vmem:[#allocation5 + $0xcc4] sm:$0xf] }
 0x192   :  { %3841 = vmatpush.bf16.msrb.mxu0 %v12064_v33  ;;  %v2342_v62 = vpop.f32.mrf.mxu2  ;;  %v2307_v8 = vpop.f32.mrf.mxu0  ;;  %v12040_v31 = vor.u32 %v15340_v18, %v12039_v17  ;;  %v12095_v33 = vld [vmem:[#allocation5 + $0xb80] sm:$0xf]  ;;  %v15402_v17 = vld [vmem:[#allocation5 + $0xce4] sm:$0xf0]  ;;  %v15401_v18 = vld [vmem:[#allocation5 + $0xce4] sm:$0xf] }
 0x193   :  { %3860 = vmatpush.bf16.msrb.mxu1 %v12128_v37  ;;  %v2361_v63 = vpop.f32.mrf.mxu3  ;;  %2381 = vst [vmem:[#allocation3 + $0x38] sm:$0xff] %v2377_v56  ;;  %v2343_v7 = vadd.f32 %v2342_v62, %v16431_v19  ;;  %v2326_v9 = vpop.f32.mrf.mxu1  ;;  %v2308_v26 = vadd.f32 %v2307_v8, %v16428_v3  ;;  %v12108_v37 = vor.u32 %v15355_v22, %v12105_v23  ;;  %v12225_v8 = vld [vmem:[#allocation5 + $0xc68] sm:$0xf0] }
 0x194   :  { %3879 = vmatpush.bf16.msrb.mxu2 %v12068_v32  ;;  %v15338_v32 = vld [vmem:[#allocation5 + $0xb04] sm:$0xf0]  ;;  %v12232_v62 = vor.u32 %v15388_v45, %v12231_v44  ;;  %v12209_v44 = vld [vmem:[#allocation5 + $0xc48] sm:$0xf0] }
 0x195   :  { %3898 = vmatpush.bf16.msrb.mxu3 %v12132_v38  ;;  %v2362_v14 = vadd.f32 %v2361_v63, %v2343_v7  ;;  %3542 = vmatmul.bf16.gmra.mxu0 %v11880_v0  ;;  %v15353_v38 = vld [vmem:[#allocation5 + $0xb84] sm:$0xf]  ;;  %v2327_v46 = vadd.f32 %v2326_v9, %v2308_v26  ;;  %v12296_v63 = vor.u32 %v15404_v51, %v12295_v50  ;;  %v12271_v50 = vld [vmem:[#allocation5 + $0xcc0] sm:$0xf]  ;;  %v12273_v55 = vld [vmem:[#allocation5 + $0xcc8] sm:$0xf0] }
 0x196   :  { %3842 = vmatpush.bf16.msrb.mxu0 %v12056_v53  ;;  %3561 = vmatmul.bf16.gmra.mxu1 %v11884_v1  ;;  %v12032_v53 = vor.u32 %v15338_v32, %v12031_v29  ;;  %v15385_v7 = vld [vmem:[#allocation5 + $0xc64] sm:$0xf]  ;;  %v12215_v32 = vld [vmem:[#allocation5 + $0xc50] sm:$0xf] }
 0x197   :  { %3861 = vmatpush.bf16.msrb.mxu1 %v12120_v57  ;;  %v2372_v25 = vmax.f32 %v2362_v14, 0.0  ;;  %3580 = vmatmul.bf16.gmra.mxu2 %v11880_v0  ;;  %v12096_v57 = vor.u32 %v15354_v34, %v12095_v33  ;;  %v2373_v0 = vmax.f32 %v2327_v46, 0.0  ;;  %v15384_v33 = vld [vmem:[#allocation5 + $0xc54] sm:$0xf0]  ;;  %v12279_v34 = vld [vmem:[#allocation5 + $0xcd0] sm:$0xf] }
 0x198   :  { %3880 = vmatpush.bf16.msrb.mxu2 %v12060_v52  ;;  %3599 = vmatmul.bf16.gmra.mxu3 %v11884_v1  ;;  %v12036_v52 = vor.u32 %v15337_v27, %v12033_v28  ;;  %v15383_v27 = vld [vmem:[#allocation5 + $0xc54] sm:$0xf]  ;;  %v12217_v28 = vld [vmem:[#allocation5 + $0xc58] sm:$0xf0] }
 0x199   :  { %3899 = vmatpush.bf16.msrb.mxu3 %v12124_v58  ;;  %v2378_v35 = vpack.c.bf16 %v2372_v25, %v2371_v24  ;;  %v12100_v58 = vor.u32 %v15353_v38, %v12097_v39  ;;  %v12228_v25 = vor.u32 %v15385_v7, %v12225_v8  ;;  %v15380_v7 = vld [vmem:[#allocation5 + $0xc34] sm:$0xf0]  ;;  %v12263_v8 = vld [vmem:[#allocation5 + $0xcb0] sm:$0xf] }
 0x19a   :  { %3843 = vmatpush.bf16.msrb.mxu0 %v12048_v11  ;;  %v2345_v41 = vpop.f32.mrf.mxu2  ;;  %v2309_v48 = vpop.f32.mrf.mxu0  ;;  %v15386_v11 = vld [vmem:[#allocation5 + $0xc64] sm:$0xf0] }
 0x19b   :  { %3862 = vmatpush.bf16.msrb.mxu1 %v12112_v15  ;;  %v2364_v42 = vpop.f32.mrf.mxu3  ;;  %2382 = vst [vmem:[#allocation3 + $0xb0] sm:$0xff] %v2378_v35  ;;  %v2346_v47 = vadd.f32 %v2345_v41, %v16431_v19  ;;  %v2328_v49 = vpop.f32.mrf.mxu1  ;;  %v2310_v2 = vadd.f32 %v2309_v48, %v16428_v3  ;;  %v12016_v15 = vor.u32 %v15334_v60, %v12015_v59  ;;  %v15400_v35 = vld [vmem:[#allocation5 + $0xcd4] sm:$0xf0]  ;;  %v12207_v48 = vld [vmem:[#allocation5 + $0xc40] sm:$0xf] }
 0x19c   :  { %3881 = vmatpush.bf16.msrb.mxu2 %v12052_v10  ;;  %v12223_v10 = vld [vmem:[#allocation5 + $0xc60] sm:$0xf]  ;;  %v12220_v41 = vor.u32 %v15383_v27, %v12217_v28  ;;  %v12280_v46 = vor.u32 %v15400_v35, %v12279_v34  ;;  %v12212_v60 = vor.u32 %v15381_v43, %v12209_v44  ;;  %v12257_v34 = vld [vmem:[#allocation5 + $0xca8] sm:$0xf0] }
 0x19d   :  { %3900 = vmatpush.bf16.msrb.mxu3 %v12116_v16  ;;  %v2365_v56 = vadd.f32 %v2364_v42, %v2346_v47  ;;  %v12020_v16 = vor.u32 %v15333_v4, %v12017_v5  ;;  %v2329_v21 = vadd.f32 %v2328_v49, %v2310_v2  ;;  %v12224_v26 = vor.u32 %v15386_v11, %v12223_v10  ;;  %v15382_v49 = vld [vmem:[#allocation5 + $0xc44] sm:$0xf0]  ;;  %v15336_v5 = vld [vmem:[#allocation2 + $0x60] sm:$0xf0]  ;;  %v15395_v10 = vld [vmem:[#allocation5 + $0xcb4] sm:$0xf] }
 0x19e   :  { %3844 = vmatpush.bf16.msrb.mxu0 %v12040_v31  ;;  %v12292_v31 = vor.u32 %v15401_v18, %v12289_v20  ;;  %v12216_v42 = vor.u32 %v15384_v33, %v12215_v32  ;;  %v12276_v2 = vor.u32 %v15397_v54, %v12273_v55  ;;  %v12023_v4 = vld [vmem:[#allocation2 + $0x48] sm:$0xf]  ;;  %v12265_v11 = vld [vmem:[#allocation5 + $0xcb8] sm:$0xf0]  ;;  %v15377_v20 = vld [vmem:[#allocation5 + $0xc24] sm:$0xf] }
 0x19f   :  { %3863 = vmatpush.bf16.msrb.mxu1 %v12104_v36  ;;  %v2374_v1 = vmax.f32 %v2365_v56, 0.0  ;;  %v15399_v36 = vld [vmem:[#allocation5 + $0xcd4] sm:$0xf]  ;;  %v2375_v38 = vmax.f32 %v2329_v21, 0.0  ;;  %v12193_v21 = vld [vmem:[#allocation5 + $0xc28] sm:$0xf0] }
 0x1a0   :  { %3882 = vmatpush.bf16.msrb.mxu2 %v12044_v30  ;;  %v12288_v30 = vor.u32 %v15402_v17, %v12287_v12  ;;  %v12255_v27 = vld [vmem:[#allocation5 + $0xca0] sm:$0xf]  ;;  %v15394_v32 = vld [vmem:[#allocation5 + $0xca4] sm:$0xf0]  ;;  %v15393_v33 = vld [vmem:[#allocation5 + $0xca4] sm:$0xf] }
 0x1a1   :  { %3901 = vmatpush.bf16.msrb.mxu3 %v12108_v37  ;;  %v2379_v9 = vpack.c.bf16 %v2374_v1, %v2373_v0  ;;  %v12281_v37 = vld [vmem:[#allocation5 + $0xcd8] sm:$0xf0]  ;;  %v12256_v44 = vor.u32 %v15394_v32, %v12255_v27  ;;  %v15373_v55 = vld [vmem:[#allocation5 + $0xc04] sm:$0xf] }
 0x1a2   :  { %3845 = vmatpush.bf16.msrb.mxu0 %v12032_v53  ;;  %v2347_v13 = vpop.f32.mrf.mxu2  ;;  %v2611_v23 = vpop.f32.mrf.mxu0  ;;  %v12284_v47 = vor.u32 %v15399_v36, %v12281_v37  ;;  %v15398_v53 = vld [vmem:[#allocation5 + $0xcc4] sm:$0xf0] }
 0x1a3   :  { %3864 = vmatpush.bf16.msrb.mxu1 %v12096_v57  ;;  %v2366_v14 = vpop.f32.mrf.mxu3  ;;  %2383 = vst [vmem:[#allocation3 + $0x128] sm:$0xff] %v2379_v9  ;;  %v2348_v22 = vadd.f32 %v2347_v13, %v16431_v19  ;;  %v2630_v24 = vpop.f32.mrf.mxu1  ;;  %v2612_v40 = vadd.f32 %v2611_v23, %v16428_v3  ;;  %v12272_v1 = vor.u32 %v15398_v53, %v12271_v50  ;;  %v15396_v9 = vld [vmem:[#allocation5 + $0xcb4] sm:$0xf0]  ;;  %v15391_v50 = vld [vmem:[#allocation5 + $0xc94] sm:$0xf] }
 0x1a4   :  { %3883 = vmatpush.bf16.msrb.mxu2 %v12036_v52  ;;  %v12264_v23 = vor.u32 %v15396_v9, %v12263_v8  ;;  %v15466_v8 = vld [vmem:[#allocation7 + $0x174] sm:$0xf0]  ;;  %v12415_v9 = vld [vmem:[#allocation7 + $0x70] sm:$0xf] }
 0x1a5   :  { %3902 = vmatpush.bf16.msrb.mxu3 %v12100_v58  ;;  %v2367_v29 = vadd.f32 %v2366_v14, %v2348_v22  ;;  %3846 = vmatmul.bf16.vlgmr.msrb.gmra.mxu0 %v12016_v15  ;;  %v2631_v56 = vadd.f32 %v2630_v24, %v2612_v40  ;;  %v12268_v24 = vor.u32 %v15395_v10, %v12265_v11  ;;  %v15434_v10 = vld [vmem:[#allocation7 + $0x74] sm:$0xf0] }
 0x1a6   :  { %4147 = vmatpush.bf16.msra.mxu0 %v12232_v62  ;;  %3865 = vmatmul.bf16.vlgmr.msrb.gmra.mxu1 %v12020_v16  ;;  %v15379_v62 = vld [vmem:[#allocation5 + $0xc34] sm:$0xf] }
 0x1a7   :  { %4166 = vmatpush.bf16.msra.mxu1 %v12296_v63  ;;  %v2376_v39 = vmax.f32 %v2367_v29, 0.0  ;;  %3884 = vmatmul.bf16.vlgmr.msrb.gmra.mxu2 %v12016_v15  ;;  %v12201_v63 = vld [vmem:[#allocation5 + $0xc38] sm:$0xf0]  ;;  %v2678_v12 = vmax.f32 %v2631_v56, 0.0  ;;  %v15335_v15 = vld [vmem:[#allocation2 + $0x4c] sm:$0xf] }
 0x1a8   :  { %4185 = vmatpush.bf16.msra.mxu2 %v12236_v61  ;;  %3903 = vmatmul.bf16.vlgmr.msrb.gmra.mxu3 %v12020_v16  ;;  %v12208_v61 = vor.u32 %v15382_v49, %v12207_v48  ;;  %v12025_v16 = vld [vmem:[#allocation2 + $0x64] sm:$0xf0]  ;;  %v12204_v17 = vor.u32 %v15379_v62, %v12201_v63  ;;  %v12247_v48 = vld [vmem:[#allocation5 + $0xc90] sm:$0xf]  ;;  %v15392_v49 = vld [vmem:[#allocation5 + $0xc94] sm:$0xf0] }
 0x1a9   :  { %4204 = vmatpush.bf16.msra.mxu3 %v12300_v6  ;;  %v2380_v45 = vpack.c.bf16 %v2376_v39, %v2375_v38  ;;  %v12199_v6 = vld [vmem:[#allocation5 + $0xc30] sm:$0xf]  ;;  %v12196_v39 = vor.u32 %v15377_v20, %v12193_v21  ;;  %v12177_v56 = vld [vmem:[#allocation5 + $0xc08] sm:$0xf0]  ;;  %v15390_v62 = vld [vmem:[#allocation5 + $0xc84] sm:$0xf0] }
 0x1aa   :  { %4148 = vmatpush.bf16.msra.mxu0 %v12224_v26  ;;  %v2649_v51 = vpop.f32.mrf.mxu2  ;;  %v2613_v58 = vpop.f32.mrf.mxu0  ;;  %v12200_v18 = vor.u32 %v15380_v7, %v12199_v6  ;;  %v15378_v26 = vld [vmem:[#allocation5 + $0xc24] sm:$0xf0]  ;;  %v12607_v20 = vld [vmem:[#allocation7 + $0x1f0] sm:$0xf]  ;;  %v15482_v21 = vld [vmem:[#allocation7 + $0x1f4] sm:$0xf0] }
 0x1ab   :  { %4167 = vmatpush.bf16.msra.mxu1 %v12288_v30  ;;  %v2668_v52 = vpop.f32.mrf.mxu3  ;;  %2384 = vst [vmem:[#allocation3 + $0x1a0] sm:$0xff] %v2380_v45  ;;  %v2650_v57 = vadd.f32 %v2649_v51, %v16431_v19  ;;  %v2632_v59 = vpop.f32.mrf.mxu1  ;;  %v2614_v14 = vadd.f32 %v2613_v58, %v16428_v3  ;;  %v12024_v30 = vor.u32 %v15336_v5, %v12023_v4  ;;  %v12249_v51 = vld [vmem:[#allocation5 + $0xc98] sm:$0xf0]  ;;  %v12241_v4 = vld [vmem:[#allocation5 + $0xc88] sm:$0xf0] }
 0x1ac   :  { %4186 = vmatpush.bf16.msra.mxu2 %v12228_v25  ;;  %v12191_v25 = vld [vmem:[#allocation5 + $0xc20] sm:$0xf]  ;;  %v12260_v45 = vor.u32 %v15393_v33, %v12257_v34  ;;  %v12543_v5 = vld [vmem:[#allocation7 + $0x170] sm:$0xf]  ;;  %v15369_v33 = vld [vmem:[#allocation2 + $0x14] sm:$0xf] }
 0x1ad   :  { %4205 = vmatpush.bf16.msra.mxu3 %v12292_v31  ;;  %v2669_v0 = vadd.f32 %v2668_v52, %v2650_v57  ;;  %v12028_v31 = vor.u32 %v15335_v15, %v12025_v16  ;;  %v2633_v35 = vadd.f32 %v2632_v59, %v2614_v14  ;;  %v12192_v40 = vor.u32 %v15378_v26, %v12191_v25  ;;  %v12175_v57 = vld [vmem:[#allocation5 + $0xc00] sm:$0xf]  ;;  %v12479_v15 = vld [vmem:[#allocation7 + $0xf0] sm:$0xf]  ;;  %v15450_v16 = vld [vmem:[#allocation7 + $0xf4] sm:$0xf0] }
 0x1ae   :  { %4149 = vmatpush.bf16.msra.mxu0 %v12216_v42  ;;  %v12185_v42 = vld [vmem:[#allocation5 + $0xc18] sm:$0xf0]  ;;  %v12159_v25 = vld [vmem:[#allocation2 + $0x10] sm:$0xf]  ;;  %v15370_v26 = vld [vmem:[#allocation2 + $0x28] sm:$0xf0]  ;;  %v12544_v27 = vor.u32 %v15466_v8, %v12543_v5 }
 0x1af   :  { %4168 = vmatpush.bf16.msra.mxu1 %v12280_v46  ;;  %v2679_v13 = vmax.f32 %v2669_v0, 0.0  ;;  %v12183_v46 = vld [vmem:[#allocation5 + $0xc10] sm:$0xf]  ;;  %v2680_v52 = vmax.f32 %v2633_v35, 0.0  ;;  %v12248_v0 = vor.u32 %v15392_v49, %v12247_v48  ;;  %v12608_v35 = vor.u32 %v15482_v21, %v12607_v20  ;;  %v15480_v48 = vld [vmem:[#allocation7 + $0x1e4] sm:$0xf0] }
 0x1b0   :  { %4187 = vmatpush.bf16.msra.mxu2 %v12220_v41  ;;  %v15375_v41 = vld [vmem:[#allocation5 + $0xc14] sm:$0xf]  ;;  %v12161_v34 = vld [vmem:[#allocation2 + $0x2c] sm:$0xf0]  ;;  %v12519_v8 = vld [vmem:[#allocation7 + $0x140] sm:$0xf] }
 0x1b1   :  { %4206 = vmatpush.bf16.msra.mxu3 %v12284_v47  ;;  %v2686_v22 = vpack.c.bf16 %v2679_v13, %v2678_v12  ;;  %v15376_v47 = vld [vmem:[#allocation5 + $0xc14] sm:$0xf0]  ;;  %v12188_v58 = vor.u32 %v15375_v41, %v12185_v42  ;;  %v12471_v41 = vld [vmem:[#allocation7 + $0xe0] sm:$0xf]  ;;  %v15476_v21 = vld [vmem:[#allocation7 + $0x1c4] sm:$0xf0] }
 0x1b2   :  { %4150 = vmatpush.bf16.msra.mxu0 %v12208_v61  ;;  %v2651_v28 = vpop.f32.mrf.mxu2  ;;  %v2616_v37 = vpop.f32.mrf.mxu0  ;;  %v12184_v59 = vor.u32 %v15376_v47, %v12183_v46  ;;  %v12239_v61 = vld [vmem:[#allocation5 + $0xc80] sm:$0xf]  ;;  %v15448_v46 = vld [vmem:[#allocation7 + $0xe4] sm:$0xf0] }
 0x1b3   :  { %4169 = vmatpush.bf16.msra.mxu1 %v12272_v1  ;;  %v2670_v29 = vpop.f32.mrf.mxu3  ;;  %2690 = vst [vmem:[#allocation3 + $0x40] sm:$0xff] %v2686_v22  ;;  %v2652_v36 = vadd.f32 %v2651_v28, %v16431_v19  ;;  %v2635_v38 = vpop.f32.mrf.mxu1  ;;  %v2617_v54 = vadd.f32 %v2616_v37, %v16428_v3  ;;  %v12252_v1 = vor.u32 %v15391_v50, %v12249_v51  ;;  %v15464_v37 = vld [vmem:[#allocation7 + $0x164] sm:$0xf0]  ;;  %v12599_v47 = vld [vmem:[#allocation7 + $0x1e0] sm:$0xf] }
 0x1b4   :  { %4188 = vmatpush.bf16.msra.mxu2 %v12212_v60  ;;  %v15374_v60 = vld [vmem:[#allocation5 + $0xc04] sm:$0xf0]  ;;  %v12416_v28 = vor.u32 %v15434_v10, %v12415_v9  ;;  %v12583_v20 = vld [vmem:[#allocation7 + $0x1c0] sm:$0xf] }
 0x1b5   :  { %4207 = vmatpush.bf16.msra.mxu3 %v12276_v2  ;;  %v2671_v43 = vadd.f32 %v2670_v29, %v2652_v36  ;;  %3851 = vmatmul.bf16.gmra.mxu0 %v12024_v30  ;;  %v15389_v2 = vld [vmem:[#allocation5 + $0xc84] sm:$0xf]  ;;  %v2636_v11 = vadd.f32 %v2635_v38, %v2617_v54  ;;  %v12480_v29 = vor.u32 %v15450_v16, %v12479_v15  ;;  %v12535_v36 = vld [vmem:[#allocation7 + $0x160] sm:$0xf]  ;;  %v15460_v9 = vld [vmem:[#allocation7 + $0x144] sm:$0xf0] }
 0x1b6   :  { %4151 = vmatpush.bf16.msra.mxu0 %v12200_v18  ;;  %3870 = vmatmul.bf16.gmra.mxu1 %v12028_v31  ;;  %v12176_v18 = vor.u32 %v15374_v60, %v12175_v57  ;;  %v12399_v60 = vld [vmem:[#allocation7 + $0x50] sm:$0xf]  ;;  %v12455_v15 = vld [vmem:[#allocation7 + $0xc0] sm:$0xf] }
 0x1b7   :  { %4170 = vmatpush.bf16.msra.mxu1 %v12264_v23  ;;  %v2681_v53 = vmax.f32 %v2671_v43, 0.0  ;;  %3889 = vmatmul.bf16.gmra.mxu2 %v12024_v30  ;;  %v12240_v23 = vor.u32 %v15390_v62, %v12239_v61  ;;  %v2682_v30 = vmax.f32 %v2636_v11, 0.0  ;;  %v15430_v61 = vld [vmem:[#allocation7 + $0x54] sm:$0xf0]  ;;  %v12463_v62 = vld [vmem:[#allocation7 + $0xd0] sm:$0xf] }
 0x1b8   :  { %4189 = vmatpush.bf16.msra.mxu2 %v12204_v17  ;;  %3908 = vmatmul.bf16.gmra.mxu3 %v12028_v31  ;;  %v12180_v17 = vor.u32 %v15373_v55, %v12177_v56  ;;  %v12527_v55 = vld [vmem:[#allocation7 + $0x150] sm:$0xf]  ;;  %v15462_v56 = vld [vmem:[#allocation7 + $0x154] sm:$0xf0] }
 0x1b9   :  { %4208 = vmatpush.bf16.msra.mxu3 %v12268_v24  ;;  %v2687_v63 = vpack.c.bf16 %v2681_v53, %v2680_v52  ;;  %v12244_v24 = vor.u32 %v15389_v2, %v12241_v4  ;;  %v12536_v53 = vor.u32 %v15464_v37, %v12535_v36  ;;  %v15426_v36 = vld [vmem:[#allocation7 + $0x34] sm:$0xf0]  ;;  %v12447_v37 = vld [vmem:[#allocation7 + $0xb0] sm:$0xf] }
 0x1ba   :  { %4152 = vmatpush.bf16.msra.mxu0 %v12192_v40  ;;  %v2654_v6 = vpop.f32.mrf.mxu2  ;;  %v2618_v13 = vpop.f32.mrf.mxu0  ;;  %v15432_v40 = vld [vmem:[#allocation7 + $0x64] sm:$0xf0] }
 0x1bb   :  { %4171 = vmatpush.bf16.msra.mxu1 %v12256_v44  ;;  %v2673_v7 = vpop.f32.mrf.mxu3  ;;  %2691 = vst [vmem:[#allocation3 + $0xb8] sm:$0xff] %v2687_v63  ;;  %v2655_v12 = vadd.f32 %v2654_v6, %v16431_v19  ;;  %v2637_v14 = vpop.f32.mrf.mxu1  ;;  %v2619_v32 = vadd.f32 %v2618_v13, %v16428_v3  ;;  %v12160_v44 = vor.u32 %v15370_v26, %v12159_v25  ;;  %v15446_v63 = vld [vmem:[#allocation7 + $0xd4] sm:$0xf0]  ;;  %v12391_v13 = vld [vmem:[#allocation7 + $0x40] sm:$0xf] }
 0x1bc   :  { %4190 = vmatpush.bf16.msra.mxu2 %v12196_v39  ;;  %v12407_v39 = vld [vmem:[#allocation7 + $0x60] sm:$0xf]  ;;  %v12528_v6 = vor.u32 %v15462_v56, %v12527_v55  ;;  %v12464_v11 = vor.u32 %v15446_v63, %v12463_v62  ;;  %v12520_v26 = vor.u32 %v15460_v9, %v12519_v8  ;;  %v15472_v62 = vld [vmem:[#allocation7 + $0x1a4] sm:$0xf0]  ;;  %v12367_v8 = vld [vmem:[#allocation7 + $0x10] sm:$0xf] }
 0x1bd   :  { %4209 = vmatpush.bf16.msra.mxu3 %v12260_v45  ;;  %v2674_v22 = vadd.f32 %v2673_v7, %v2655_v12  ;;  %v12164_v45 = vor.u32 %v15369_v33, %v12161_v34  ;;  %v2638_v49 = vadd.f32 %v2637_v14, %v2619_v32  ;;  %v12408_v54 = vor.u32 %v15432_v40, %v12407_v39  ;;  %v15428_v14 = vld [vmem:[#allocation7 + $0x44] sm:$0xf0]  ;;  %v15372_v34 = vld [vmem:[#allocation2 + $0x60] sm:$0xf0]  ;;  %v12575_v39 = vld [vmem:[#allocation7 + $0x1b0] sm:$0xf] }
 0x1be   :  { %4153 = vmatpush.bf16.msra.mxu0 %v12184_v59  ;;  %v12600_v59 = vor.u32 %v15480_v48, %v12599_v47  ;;  %v12400_v7 = vor.u32 %v15430_v61, %v12399_v60  ;;  %v12584_v32 = vor.u32 %v15476_v21, %v12583_v20  ;;  %v12167_v33 = vld [vmem:[#allocation2 + $0x48] sm:$0xf]  ;;  %v15474_v40 = vld [vmem:[#allocation7 + $0x1b4] sm:$0xf0]  ;;  %v12503_v48 = vld [vmem:[#allocation7 + $0x120] sm:$0xf] }
 0x1bf   :  { %4172 = vmatpush.bf16.msra.mxu1 %v12248_v0  ;;  %v2683_v31 = vmax.f32 %v2674_v22, 0.0  ;;  %v12591_v0 = vld [vmem:[#allocation7 + $0x1d0] sm:$0xf]  ;;  %v2684_v2 = vmax.f32 %v2638_v49, 0.0  ;;  %v15456_v49 = vld [vmem:[#allocation7 + $0x124] sm:$0xf0] }
 0x1c0   :  { %4191 = vmatpush.bf16.msra.mxu2 %v12188_v58  ;;  %v12472_v58 = vor.u32 %v15448_v46, %v12471_v41  ;;  %v12439_v55 = vld [vmem:[#allocation7 + $0xa0] sm:$0xf]  ;;  %v15440_v60 = vld [vmem:[#allocation7 + $0xa4] sm:$0xf0]  ;;  %v15422_v9 = vld [vmem:[#allocation7 + $0x14] sm:$0xf0] }
 0x1c1   :  { %4210 = vmatpush.bf16.msra.mxu3 %v12252_v1  ;;  %v2688_v38 = vpack.c.bf16 %v2683_v31, %v2682_v30  ;;  %v15478_v1 = vld [vmem:[#allocation7 + $0x1d4] sm:$0xf0]  ;;  %v12567_v61 = vld [vmem:[#allocation7 + $0x1a0] sm:$0xf] }
 0x1c2   :  { %4154 = vmatpush.bf16.msra.mxu0 %v12176_v18  ;;  %v2656_v42 = vpop.f32.mrf.mxu2  ;;  %v2920_v51 = vpop.f32.mrf.mxu0  ;;  %v12592_v12 = vor.u32 %v15478_v1, %v12591_v0  ;;  %v15444_v18 = vld [vmem:[#allocation7 + $0xc4] sm:$0xf0] }
 0x1c3   :  { %4173 = vmatpush.bf16.msra.mxu1 %v12240_v23  ;;  %v2675_v43 = vpop.f32.mrf.mxu3  ;;  %2692 = vst [vmem:[#allocation3 + $0x130] sm:$0xff] %v2688_v38  ;;  %v2657_v50 = vadd.f32 %v2656_v42, %v16431_v19  ;;  %v2939_v52 = vpop.f32.mrf.mxu1  ;;  %v2921_v5 = vadd.f32 %v2920_v51, %v16428_v3  ;;  %v12456_v31 = vor.u32 %v15444_v18, %v12455_v15  ;;  %v15442_v38 = vld [vmem:[#allocation7 + $0xb4] sm:$0xf0]  ;;  %v12559_v15 = vld [vmem:[#allocation7 + $0x190] sm:$0xf] }
 0x1c4   :  { %4192 = vmatpush.bf16.msra.mxu2 %v12180_v17  ;;  %v12448_v51 = vor.u32 %v15442_v38, %v12447_v37  ;;  %v16532_v18 = vld [vmem:[#allocation7 + $0x104] sm:$0xf0]  ;;  %v12743_v38 = vld [vmem:[#allocation7 + $0x300] sm:$0xf] }
 0x1c5   :  { %4211 = vmatpush.bf16.msra.mxu3 %v12244_v24  ;;  %v2676_v57 = vadd.f32 %v2675_v43, %v2657_v50  ;;  %4155 = vmatmul.bf16.vlgmr.msra.gmra.mxu0 %v12160_v44  ;;  %v2940_v22 = vadd.f32 %v2939_v52, %v2921_v5  ;;  %v12576_v52 = vor.u32 %v15474_v40, %v12575_v39  ;;  %v16535_v39 = vld [vmem:[#allocation7 + $0x2f0] sm:$0xf]  ;;  %v16537_v40 = vld [vmem:[#allocation7 + $0x2f4] sm:$0xf0] }
 0x1c6   :  { %4920 = vmatpush.bf16.msrb.mxu0 %v12416_v28  ;;  %4174 = vmatmul.bf16.vlgmr.msra.gmra.mxu1 %v12164_v45  ;;  %v12511_v28 = vld [vmem:[#allocation7 + $0x130] sm:$0xf]  ;;  %v12504_v5 = vor.u32 %v15456_v49, %v12503_v48  ;;  %v165_v48 = vld [vmem:[%s17172_s0 + $0x68] sm:$0xff] }
 0x1c7   :  { %4939 = vmatpush.bf16.msrb.mxu1 %v12480_v29  ;;  %v2685_v4 = vmax.f32 %v2676_v57, 0.0  ;;  %4193 = vmatmul.bf16.vlgmr.msra.gmra.mxu2 %v12160_v44  ;;  %v15458_v29 = vld [vmem:[#allocation7 + $0x134] sm:$0xf0]  ;;  %v2987_v41 = vmax.f32 %v2940_v22, 0.0  ;;  %v15371_v44 = vld [vmem:[#allocation2 + $0x4c] sm:$0xf] }
 0x1c8   :  { %4958 = vmatpush.bf16.msrb.mxu2 %v12544_v27  ;;  %4212 = vmatmul.bf16.vlgmr.msra.gmra.mxu3 %v12164_v45  ;;  %v12392_v27 = vor.u32 %v15428_v14, %v12391_v13  ;;  %v12169_v45 = vld [vmem:[#allocation2 + $0x64] sm:$0xf0]  ;;  %v12512_v46 = vor.u32 %v15458_v29, %v12511_v28  ;;  %v12431_v13 = vld [vmem:[#allocation7 + $0x90] sm:$0xf]  ;;  %v15438_v14 = vld [vmem:[#allocation7 + $0x94] sm:$0xf0] }
 0x1c9   :  { %4977 = vmatpush.bf16.msrb.mxu3 %v12608_v35  ;;  %v2689_v10 = vpack.c.bf16 %v2685_v4, %v2684_v2  ;;  %v12383_v35 = vld [vmem:[#allocation7 + $0x30] sm:$0xf]  ;;  %v15436_v28 = vld [vmem:[#allocation7 + $0x84] sm:$0xf0]  ;;  %v12551_v29 = vld [vmem:[#allocation7 + $0x180] sm:$0xf] }
 0x1ca   :  { %4921 = vmatpush.bf16.msrb.mxu0 %v12408_v54  ;;  %v2958_v16 = vpop.f32.mrf.mxu2  ;;  %v2922_v24 = vpop.f32.mrf.mxu0  ;;  %v12384_v47 = vor.u32 %v15426_v36, %v12383_v35  ;;  %v15424_v54 = vld [vmem:[#allocation7 + $0x24] sm:$0xf0]  ;;  %v12495_v4 = vld [vmem:[#allocation7 + $0x110] sm:$0xf]  ;;  %v15498_v35 = vld [vmem:[#allocation7 + $0x274] sm:$0xf0] }
 0x1cb   :  { %4940 = vmatpush.bf16.msrb.mxu1 %v12472_v58  ;;  %v2977_v17 = vpop.f32.mrf.mxu3  ;;  %2693 = vst [vmem:[#allocation3 + $0x1a8] sm:$0xff] %v2689_v10  ;;  %v2959_v23 = vadd.f32 %v2958_v16, %v16431_v19  ;;  %v2941_v25 = vpop.f32.mrf.mxu1  ;;  %v2923_v43 = vadd.f32 %v2922_v24, %v16428_v3  ;;  %v12168_v58 = vor.u32 %v15372_v34, %v12167_v33  ;;  %v15470_v16 = vld [vmem:[#allocation7 + $0x194] sm:$0xf0]  ;;  %v15420_v24 = vld [vmem:[#allocation7 + $0x4] sm:$0xf0] }
 0x1cc   :  { %4959 = vmatpush.bf16.msrb.mxu2 %v12536_v53  ;;  %v12375_v53 = vld [vmem:[#allocation7 + $0x20] sm:$0xf]  ;;  %v15468_v33 = vld [vmem:[#allocation7 + $0x184] sm:$0xf0]  ;;  %v12671_v34 = vld [vmem:[#allocation7 + $0x270] sm:$0xf] }
 0x1cd   :  { %4978 = vmatpush.bf16.msrb.mxu3 %v12600_v59  ;;  %v2978_v30 = vadd.f32 %v2977_v17, %v2959_v23  ;;  %v12172_v59 = vor.u32 %v15371_v44, %v12169_v45  ;;  %v2942_v63 = vadd.f32 %v2941_v25, %v2923_v43  ;;  %v16530_v17 = vld [vmem:[#allocation7 + $0x100] sm:$0xf] }
 0x1ce   :  { %4922 = vmatpush.bf16.msrb.mxu0 %v12400_v7  ;;  %v15454_v7 = vld [vmem:[#allocation7 + $0x114] sm:$0xf0]  ;;  %v12359_v23 = vld [vmem:[#allocation7] sm:$0xf]  ;;  %v12488_v45 = vor.u32 %v16532_v18, %v16530_v17 }
 0x1cf   :  { %4941 = vmatpush.bf16.msrb.mxu1 %v12464_v11  ;;  %v2988_v42 = vmax.f32 %v2978_v30, 0.0  ;;  %v12440_v11 = vor.u32 %v15440_v60, %v12439_v55  ;;  %v2989_v20 = vmax.f32 %v2942_v63, 0.0  ;;  %v12496_v25 = vor.u32 %v15454_v7, %v12495_v4  ;;  %v12305_v60 = vld [vmem:[#allocation2 + $0x1c] sm:$0xf0] }
 0x1d0   :  { %4960 = vmatpush.bf16.msrb.mxu2 %v12528_v6  ;;  %v12376_v6 = vor.u32 %v15424_v54, %v12375_v53  ;;  %v12360_v49 = vor.u32 %v15420_v24, %v12359_v23  ;;  %v12552_v55 = vor.u32 %v15468_v33, %v12551_v29  ;;  %v12655_v29 = vld [vmem:[#allocation7 + $0x250] sm:$0xf] }
 0x1d1   :  { %4979 = vmatpush.bf16.msrb.mxu3 %v12592_v12  ;;  %v2995_v50 = vpack.c.bf16 %v2988_v42, %v2987_v41  ;;  %v12568_v12 = vor.u32 %v15472_v62, %v12567_v61  ;;  %v12311_v61 = vld [vmem:[#allocation2 + $0x8] sm:$0xf]  ;;  %v15409_v62 = vld [vmem:[#allocation2 + $0x20] sm:$0xf0] }
 0x1d2   :  { %4923 = vmatpush.bf16.msrb.mxu0 %v12392_v27  ;;  %v2960_v56 = vpop.f32.mrf.mxu2  ;;  %v2925_v1 = vpop.f32.mrf.mxu0  ;;  %v12423_v27 = vld [vmem:[#allocation7 + $0x80] sm:$0xf]  ;;  %v16557_v18 = vor.u32 %v15409_v62, %v12311_v61 }
 0x1d3   :  { %4942 = vmatpush.bf16.msrb.mxu1 %v12456_v31  ;;  %v2979_v57 = vpop.f32.mrf.mxu3  ;;  %2999 = vst [vmem:[#allocation3 + $0x48] sm:$0xff] %v2995_v50  ;;  %v2961_v0 = vadd.f32 %v2960_v56, %v16431_v19  ;;  %v2944_v2 = vpop.f32.mrf.mxu1  ;;  %v2926_v22 = vadd.f32 %v2925_v1, %v16428_v3  ;;  %v12432_v31 = vor.u32 %v15438_v14, %v12431_v13  ;;  %v12303_v56 = vld [vmem:[#allocation2] sm:$0xf]  ;;  %v15512_v13 = vld [vmem:[#allocation7 + $0x2e4] sm:$0xf0] }
 0x1d4   :  { %4961 = vmatpush.bf16.msrb.mxu2 %v12520_v26  ;;  %v12368_v26 = vor.u32 %v15422_v9, %v12367_v8  ;;  %v12424_v50 = vor.u32 %v15436_v28, %v12423_v27  ;;  %v12736_v1 = vor.u32 %v16537_v40, %v16535_v39  ;;  %v12313_v8 = vld [vmem:[#allocation2 + $0x24] sm:$0xf0]  ;;  %v12663_v9 = vld [vmem:[#allocation7 + $0x260] sm:$0xf] }
 0x1d5   :  { %4980 = vmatpush.bf16.msrb.mxu3 %v12584_v32  ;;  %v2980_v10 = vadd.f32 %v2979_v57, %v2961_v0  ;;  %4160 = vmatmul.bf16.gmra.mxu0 %v12168_v58  ;;  %v12560_v32 = vor.u32 %v15470_v16, %v12559_v15  ;;  %v2945_v41 = vadd.f32 %v2944_v2, %v2926_v22  ;;  %v15408_v57 = vld [vmem:[#allocation2 + $0x18] sm:$0xf0]  ;;  %v172_v62 = vld [vmem:[%s17172_s0 + $0xa0] sm:$0xff] }
 0x1d6   :  { %4924 = vmatpush.bf16.msrb.mxu0 %v12384_v47  ;;  %4179 = vmatmul.bf16.gmra.mxu1 %v12172_v59  ;;  %v158_v47 = vld [vmem:[%s17172_s0 + $0x30] sm:$0xff]  ;;  %v12672_v0 = vor.u32 %v15498_v35, %v12671_v34  ;;  %v16553_v16 = vor.u32 %v15408_v57, %v12303_v56  ;;  %v15510_v34 = vld [vmem:[#allocation7 + $0x2d4] sm:$0xf0]  ;;  %v12601_v56 = vld [vmem:[#allocation7 + $0x1e8] sm:$0xf0] }
 0x1d7   :  { %4943 = vmatpush.bf16.msrb.mxu1 %v12448_v51  ;;  %v2990_v21 = vmax.f32 %v2980_v10, 0.0  ;;  %4198 = vmatmul.bf16.gmra.mxu2 %v12168_v58  ;;  %v15433_v51 = vld [vmem:[#allocation7 + $0x74] sm:$0xf]  ;;  %v183_v53 = vpack.c.bf16 %v158_v47, %v158_v47  ;;  %v15405_v58 = vld [vmem:[#allocation2 + $0x4] sm:$0xf]  ;;  %v2991_v2 = vmax.f32 %v2945_v41, 0.0 }
 0x1d8   :  { %4962 = vmatpush.bf16.msrb.mxu2 %v12512_v46  ;;  %4217 = vmatmul.bf16.gmra.mxu3 %v12172_v59  ;;  %v15516_v46 = vld [vmem:[#allocation7 + $0x304] sm:$0xf0]  ;;  %v187_v59 = vpack.c.bf16 %v165_v48, %v165_v48  ;;  %v16555_v17 = vor.u32 %v15405_v58, %v12305_v60  ;;  %v15481_v35 = vld [vmem:[#allocation7 + $0x1f4] sm:$0xf] }
 0x1d9   :  { %4981 = vmatpush.bf16.msrb.mxu3 %v12576_v52  ;;  %v2996_v30 = vpack.c.bf16 %v2990_v21, %v2989_v20  ;;  %v12417_v52 = vld [vmem:[#allocation7 + $0x78] sm:$0xf0]  ;;  %v12744_v63 = vor.u32 %v15516_v46, %v12743_v38  ;;  %200 = vst.msk [vmem:[#allocation2 + $0x18] sm:$0xf] %vm199_vm0, %v183_v53  ;;  %v15431_v20 = vld [vmem:[#allocation7 + $0x64] sm:$0xf] }
 0x1da   :  { %4925 = vmatpush.bf16.msrb.mxu0 %v12376_v6  ;;  %v2963_v36 = vpop.f32.mrf.mxu2  ;;  %v2927_v43 = vpop.f32.mrf.mxu0  ;;  %v15406_v6 = vld [vmem:[#allocation2 + $0xc] sm:$0xf]  ;;  %v12420_v7 = vor.u32 %v15433_v51, %v12417_v52  ;;  %204 = vst.msk [vmem:[#allocation2 + $0x34] sm:$0xf] %vm199_vm0, %v187_v59  ;;  %v12401_v38 = vld [vmem:[#allocation7 + $0x58] sm:$0xf0] }
 0x1db   :  { %4944 = vmatpush.bf16.msrb.mxu1 %v12440_v11  ;;  %v2982_v37 = vpop.f32.mrf.mxu3  ;;  %3000 = vst [vmem:[#allocation3 + $0xc0] sm:$0xff] %v2996_v30  ;;  %v2964_v42 = vadd.f32 %v2963_v36, %v16431_v19  ;;  %v2946_v44 = vpop.f32.mrf.mxu1  ;;  %v15496_v11 = vld [vmem:[#allocation7 + $0x264] sm:$0xf0]  ;;  %v12409_v21 = vld [vmem:[#allocation7 + $0x68] sm:$0xf0] }
 0x1dc   :  { %4963 = vmatpush.bf16.msrb.mxu2 %v12504_v5  ;;  %v2928_v5 = vadd.f32 %v2927_v43, %v16428_v3  ;;  %v12664_v27 = vor.u32 %v15496_v11, %v12663_v9  ;;  %v15494_v30 = vld [vmem:[#allocation7 + $0x254] sm:$0xf0]  ;;  %v12412_v33 = vor.u32 %v15431_v20, %v12409_v21  ;;  %v12609_v36 = vld [vmem:[#allocation7 + $0x1f8] sm:$0xf0]  ;;  %v15492_v46 = vld [vmem:[#allocation7 + $0x244] sm:$0xf0] }
 0x1dd   :  { %4982 = vmatpush.bf16.msrb.mxu3 %v12568_v12  ;;  %v2983_v54 = vadd.f32 %v2982_v37, %v2964_v42  ;;  %v12727_v12 = vld [vmem:[#allocation7 + $0x2e0] sm:$0xf]  ;;  %v15429_v37 = vld [vmem:[#allocation7 + $0x54] sm:$0xf]  ;;  %v12612_v39 = vor.u32 %v15481_v35, %v12609_v36  ;;  %v12656_v43 = vor.u32 %v15494_v30, %v12655_v29  ;;  %v15479_v51 = vld [vmem:[#allocation7 + $0x1e4] sm:$0xf] }
 0x1de   :  { %4926 = vmatpush.bf16.msrb.mxu0 %v12368_v26  ;;  %v2947_v22 = vadd.f32 %v2946_v44, %v2928_v5  ;;  %v16560_v26 = vor.u32 %v15406_v6, %v12313_v8  ;;  %v12728_v28 = vor.u32 %v15512_v13, %v12727_v12  ;;  %v12404_v48 = vor.u32 %v15429_v37, %v12401_v38  ;;  %v12331_v8 = vld [vmem:[#allocation2 + $0x38] sm:$0xf]  ;;  %v15415_v9 = vld [vmem:[#allocation2 + $0x50] sm:$0xf0]  ;;  %v15416_v20 = vld [vmem:[#allocation2 + $0x58] sm:$0xf0] }
 0x1df   :  { %4945 = vmatpush.bf16.msrb.mxu1 %v12432_v31  ;;  %v2992_v4 = vmax.f32 %v2983_v54, 0.0  ;;  %v12719_v31 = vld [vmem:[#allocation7 + $0x2d0] sm:$0xf]  ;;  %v15427_v54 = vld [vmem:[#allocation7 + $0x44] sm:$0xf]  ;;  %v12604_v61 = vor.u32 %v15479_v51, %v12601_v56  ;;  %v191_v5 = vpack.c.bf16 %v172_v62, %v172_v62 }
 0x1e0   :  { %4964 = vmatpush.bf16.msrb.mxu2 %v12496_v25  ;;  %v2993_v40 = vmax.f32 %v2947_v22, 0.0  ;;  %v12720_v44 = vor.u32 %v15510_v34, %v12719_v31  ;;  %v12333_v11 = vld [vmem:[#allocation2 + $0x54] sm:$0xf0]  ;;  %v15477_v13 = vld [vmem:[#allocation7 + $0x1d4] sm:$0xf] }
 0x1e1   :  { %4983 = vmatpush.bf16.msrb.mxu3 %v12560_v32  ;;  %v2997_v10 = vpack.c.bf16 %v2992_v4, %v2991_v2  ;;  %v15490_v2 = vld [vmem:[#allocation7 + $0x234] sm:$0xf0]  ;;  %v12703_v4 = vld [vmem:[#allocation7 + $0x2b0] sm:$0xf]  ;;  %v15413_v21 = vld [vmem:[#allocation2 + $0x44] sm:$0xf] }
 0x1e2   :  { %4927 = vmatpush.bf16.msrb.mxu0 %v12360_v49  ;;  %v2965_v14 = vpop.f32.mrf.mxu2  ;;  %v3229_v24 = vpop.f32.mrf.mxu0  ;;  %v12711_v49 = vld [vmem:[#allocation7 + $0x2c0] sm:$0xf]  ;;  %v15506_v12 = vld [vmem:[#allocation7 + $0x2b4] sm:$0xf0]  ;;  %v15425_v22 = vld [vmem:[#allocation7 + $0x34] sm:$0xf] }
 0x1e3   :  { %4946 = vmatpush.bf16.msrb.mxu1 %v12424_v50  ;;  %v2984_v15 = vpop.f32.mrf.mxu3  ;;  %3001 = vst [vmem:[#allocation3 + $0x138] sm:$0xff] %v2997_v10  ;;  %v2966_v23 = vadd.f32 %v2965_v14, %v16431_v19  ;;  %v3248_v25 = vpop.f32.mrf.mxu1  ;;  %v3230_v42 = vadd.f32 %v3229_v24, %v16428_v3  ;;  %v15508_v50 = vld [vmem:[#allocation7 + $0x2c4] sm:$0xf0]  ;;  %v15412_v10 = vld [vmem:[#allocation2 + $0x3c] sm:$0xf] }
 0x1e4   :  { %4965 = vmatpush.bf16.msrb.mxu2 %v12488_v45  ;;  %v12647_v45 = vld [vmem:[#allocation7 + $0x240] sm:$0xf]  ;;  %v12593_v14 = vld [vmem:[#allocation7 + $0x1d8] sm:$0xf0]  ;;  %v15488_v34 = vld [vmem:[#allocation7 + $0x224] sm:$0xf0] }
 0x1e5   :  { %4984 = vmatpush.bf16.msrb.mxu3 %v12552_v55  ;;  %v2985_v32 = vadd.f32 %v2984_v15, %v2966_v23  ;;  %4928 = vmatmul.bf16.vlgmr.msrb.gmra.mxu0 %v16553_v16  ;;  %v12393_v55 = vld [vmem:[#allocation7 + $0x48] sm:$0xf0]  ;;  %v3249_v57 = vadd.f32 %v3248_v25, %v3230_v42  ;;  %v12339_v15 = vld [vmem:[#allocation2 + $0x40] sm:$0xf]  ;;  %v12385_v23 = vld [vmem:[#allocation7 + $0x38] sm:$0xf0]  ;;  %v12596_v24 = vor.u32 %v15477_v13, %v12593_v14 }
 0x1e6   :  { %4996 = vmatpush.bf16.msra.mxu0 %v12672_v0  ;;  %4947 = vmatmul.bf16.vlgmr.msrb.gmra.mxu1 %v16555_v17  ;;  %v12712_v0 = vor.u32 %v15508_v50, %v12711_v49  ;;  %v179_v25 = vld [vmem:[%s17172_s0 + $0xd8] sm:$0xff]  ;;  %v12341_v30 = vld [vmem:[#allocation2 + $0x5c] sm:$0xf0]  ;;  %208 = vst.msk [vmem:[#allocation2 + $0x50] sm:$0xf] %vm199_vm0, %v191_v5  ;;  %v12388_v37 = vor.u32 %v15425_v22, %v12385_v23 }
 0x1e7   :  { %5015 = vmatpush.bf16.msra.mxu1 %v12736_v1  ;;  %v2994_v41 = vmax.f32 %v2985_v32, 0.0  ;;  %4966 = vmatmul.bf16.vlgmr.msrb.gmra.mxu2 %v16557_v18  ;;  %v12639_v1 = vld [vmem:[#allocation7 + $0x230] sm:$0xf]  ;;  %v12631_v31 = vld [vmem:[#allocation7 + $0x220] sm:$0xf] }
 0x1e8   :  { %5041 = vmatpush.bf16.msra.mxu2 %v12744_v63  ;;  %4985 = vmatmul.bf16.vlgmr.msrb.gmra.mxu3 %v16560_v26  ;;  %v12648_v63 = vor.u32 %v15492_v46, %v12647_v45  ;;  %v12640_v32 = vor.u32 %v15490_v2, %v12639_v1  ;;  %v12695_v35 = vld [vmem:[#allocation7 + $0x2a0] sm:$0xf]  ;;  %v15504_v38 = vld [vmem:[#allocation7 + $0x2a4] sm:$0xf0]  ;;  %v16578_v45 = vor.u32 %v15412_v10, %v12333_v11  ;;  %v15423_v46 = vld [vmem:[#allocation7 + $0x24] sm:$0xf] }
 0x1e9   :  { %5053 = vmatpush.bf16.msra.mxu3 %v12420_v7  ;;  %v2998_v47 = vpack.c.bf16 %v2994_v41, %v2993_v40  ;;  %v12396_v7 = vor.u32 %v15427_v54, %v12393_v55  ;;  %v12585_v40 = vld [vmem:[#allocation7 + $0x1c8] sm:$0xf0]  ;;  %v195_v41 = vpack.c.bf16 %v179_v25, %v179_v25  ;;  %v16583_v54 = vor.u32 %v15413_v21, %v12341_v30  ;;  %v12369_v1 = vld [vmem:[#allocation7 + $0x18] sm:$0xf0]  ;;  %v15500_v13 = vld [vmem:[#allocation7 + $0x284] sm:$0xf0] }
 0x1ea   :  { %4997 = vmatpush.bf16.msra.mxu0 %v12664_v27  ;;  %v3267_v52 = vpop.f32.mrf.mxu2  ;;  %v3231_v59 = vpop.f32.mrf.mxu0  ;;  %v3296_v27 = vmax.f32 %v3249_v57, 0.0  ;;  %v12632_v55 = vor.u32 %v15488_v34, %v12631_v31  ;;  %v12696_v56 = vor.u32 %v15504_v38, %v12695_v35  ;;  %v12623_v57 = vld [vmem:[#allocation7 + $0x210] sm:$0xf]  ;;  %v12577_v2 = vld [vmem:[#allocation7 + $0x1b8] sm:$0xf0] }
 0x1eb   :  { %5016 = vmatpush.bf16.msra.mxu1 %v12728_v28  ;;  %v3286_v53 = vpop.f32.mrf.mxu3  ;;  %3002 = vst [vmem:[#allocation3 + $0x1b0] sm:$0xff] %v2998_v47  ;;  %v3268_v58 = vadd.f32 %v3267_v52, %v16431_v19  ;;  %v3250_v60 = vpop.f32.mrf.mxu1  ;;  %v3232_v29 = vadd.f32 %v3231_v59, %v16428_v3  ;;  %v12377_v47 = vld [vmem:[#allocation7 + $0x28] sm:$0xf0]  ;;  %v12687_v59 = vld [vmem:[#allocation7 + $0x290] sm:$0xf] }
 0x1ec   :  { %5110 = vmatpush.bf16.msrb.mxu2 %v12612_v39  ;;  %v15475_v39 = vld [vmem:[#allocation7 + $0x1c4] sm:$0xf]  ;;  %v12380_v62 = vor.u32 %v15423_v46, %v12377_v47  ;;  %212 = vst.msk [vmem:[#allocation2 + $0x6c] sm:$0xf] %vm199_vm0, %v195_v41  ;;  %v15449_v22 = vld [vmem:[#allocation7 + $0xf4] sm:$0xf] }
 0x1ed   :  { %5054 = vmatpush.bf16.msra.mxu3 %v12412_v33  ;;  %v3287_v6 = vadd.f32 %v3286_v53, %v3268_v58  ;;  %v12704_v33 = vor.u32 %v15506_v12, %v12703_v4  ;;  %v3251_v49 = vadd.f32 %v3250_v60, %v3232_v29  ;;  %v16581_v53 = vor.u32 %v15416_v20, %v12339_v15  ;;  %v15486_v58 = vld [vmem:[#allocation7 + $0x214] sm:$0xf0]  ;;  %v15473_v60 = vld [vmem:[#allocation7 + $0x1b4] sm:$0xf]  ;;  %v15419_v14 = vld [vmem:[#allocation7 + $0x4] sm:$0xf] }
 0x1ee   :  { %4998 = vmatpush.bf16.msra.mxu0 %v12656_v43  ;;  %v12580_v10 = vor.u32 %v15473_v60, %v12577_v2  ;;  %v12624_v11 = vor.u32 %v15486_v58, %v12623_v57  ;;  %v12361_v15 = vld [vmem:[#allocation7 + $0x8] sm:$0xf0]  ;;  %v15471_v23 = vld [vmem:[#allocation7 + $0x1a4] sm:$0xf]  ;;  %v15465_v29 = vld [vmem:[#allocation7 + $0x174] sm:$0xf] }
 0x1ef   :  { %5017 = vmatpush.bf16.msra.mxu1 %v12720_v44  ;;  %v3297_v28 = vmax.f32 %v3287_v6, 0.0  ;;  %v16576_v44 = vor.u32 %v15415_v9, %v12331_v8  ;;  %v3298_v4 = vmax.f32 %v3251_v49, 0.0  ;;  %v15484_v8 = vld [vmem:[#allocation7 + $0x204] sm:$0xf0]  ;;  %v12679_v9 = vld [vmem:[#allocation7 + $0x280] sm:$0xf]  ;;  %v12364_v41 = vor.u32 %v15419_v14, %v12361_v15 }
 0x1f0   :  { %5111 = vmatpush.bf16.msrb.mxu2 %v12604_v61  ;;  %v12545_v30 = vld [vmem:[#allocation7 + $0x178] sm:$0xf0]  ;;  %v15469_v47 = vld [vmem:[#allocation7 + $0x194] sm:$0xf]  ;;  %v15463_v60 = vld [vmem:[#allocation7 + $0x164] sm:$0xf] }
 0x1f1   :  { %5055 = vmatpush.bf16.msra.mxu3 %v12404_v48  ;;  %v3304_v36 = vpack.c.bf16 %v3297_v28, %v3296_v27  ;;  %v12588_v48 = vor.u32 %v15475_v39, %v12585_v40  ;;  %v12481_v28 = vld [vmem:[#allocation7 + $0xf8] sm:$0xf0]  ;;  %v12680_v39 = vor.u32 %v15500_v13, %v12679_v9  ;;  %v15407_v49 = vld [vmem:[#allocation2 + $0x14] sm:$0xf]  ;;  %v12553_v13 = vld [vmem:[#allocation7 + $0x188] sm:$0xf0] }
 0x1f2   :  { %4999 = vmatpush.bf16.msra.mxu0 %v12648_v63  ;;  %v3269_v42 = vpop.f32.mrf.mxu2  ;;  %v3234_v51 = vpop.f32.mrf.mxu0  ;;  %v15502_v63 = vld [vmem:[#allocation7 + $0x294] sm:$0xf0]  ;;  %v12484_v46 = vor.u32 %v15449_v22, %v12481_v28 }
 0x1f3   :  { %5018 = vmatpush.bf16.msra.mxu1 %v12712_v0  ;;  %v3288_v43 = vpop.f32.mrf.mxu3  ;;  %3308 = vst [vmem:[#allocation3 + $0x50] sm:$0xff] %v3304_v36  ;;  %v3270_v50 = vadd.f32 %v3269_v42, %v16431_v19  ;;  %v3253_v52 = vpop.f32.mrf.mxu1  ;;  %v15421_v0 = vld [vmem:[#allocation7 + $0x14] sm:$0xf]  ;;  %v3235_v6 = vadd.f32 %v3234_v51, %v16428_v3  ;;  %v12688_v12 = vor.u32 %v15502_v63, %v12687_v59  ;;  %v12319_v42 = vld [vmem:[#allocation2 + $0x10] sm:$0xf] }
 0x1f4   :  { %5112 = vmatpush.bf16.msrb.mxu2 %v12596_v24  ;;  %v12372_v21 = vor.u32 %v15421_v0, %v12369_v1  ;;  %v12569_v24 = vld [vmem:[#allocation7 + $0x1a8] sm:$0xf0]  ;;  %v15497_v36 = vld [vmem:[#allocation7 + $0x274] sm:$0xf]  ;;  %v12321_v59 = vld [vmem:[#allocation2 + $0x2c] sm:$0xf0] }
 0x1f5   :  { %5056 = vmatpush.bf16.msra.mxu3 %v12396_v7  ;;  %v3289_v61 = vadd.f32 %v3288_v43, %v3270_v50  ;;  %4933 = vmatmul.bf16.gmra.mxu0 %v16576_v44  ;;  %v12615_v7 = vld [vmem:[#allocation7 + $0x200] sm:$0xf]  ;;  %v12572_v31 = vor.u32 %v15471_v23, %v12569_v24  ;;  %v15410_v43 = vld [vmem:[#allocation2 + $0x28] sm:$0xf0]  ;;  %v12548_v50 = vor.u32 %v15465_v29, %v12545_v30  ;;  %v15411_v63 = vld [vmem:[#allocation2 + $0x30] sm:$0xf0] }
 0x1f6   :  { %5000 = vmatpush.bf16.msra.mxu0 %v12640_v32  ;;  %4952 = vmatmul.bf16.gmra.mxu1 %v16578_v45  ;;  %v3254_v32 = vadd.f32 %v3253_v52, %v3235_v6  ;;  %v12616_v38 = vor.u32 %v15484_v8, %v12615_v7  ;;  %v15447_v52 = vld [vmem:[#allocation7 + $0xe4] sm:$0xf]  ;;  %v12537_v0 = vld [vmem:[#allocation7 + $0x168] sm:$0xf0]  ;;  %v15445_v6 = vld [vmem:[#allocation7 + $0xd4] sm:$0xf]  ;;  %v16593_v9 = vor.u32 %v15410_v43, %v12319_v42 }
 0x1f7   :  { %5019 = vmatpush.bf16.msra.mxu1 %v12704_v33  ;;  %v3299_v5 = vmax.f32 %v3289_v61, 0.0  ;;  %4971 = vmatmul.bf16.gmra.mxu2 %v16581_v53  ;;  %v12327_v61 = vld [vmem:[#allocation2 + $0x18] sm:$0xf]  ;;  %v12540_v23 = vor.u32 %v15463_v60, %v12537_v0  ;;  %v12529_v29 = vld [vmem:[#allocation7 + $0x158] sm:$0xf0] }
 0x1f8   :  { %5113 = vmatpush.bf16.msrb.mxu2 %v12588_v48  ;;  %4990 = vmatmul.bf16.gmra.mxu3 %v16583_v54  ;;  %v12561_v48 = vld [vmem:[#allocation7 + $0x198] sm:$0xf0]  ;;  %v16598_v22 = vor.u32 %v15411_v63, %v12327_v61  ;;  %v15493_v30 = vld [vmem:[#allocation7 + $0x254] sm:$0xf]  ;;  %v12347_v60 = vld [vmem:[#allocation2 + $0x48] sm:$0xf] }
 0x1f9   :  { %5057 = vmatpush.bf16.msra.mxu3 %v12388_v37  ;;  %v3305_v20 = vpack.c.bf16 %v3299_v5, %v3298_v4  ;;  %v12673_v37 = vld [vmem:[#allocation7 + $0x278] sm:$0xf0]  ;;  %v15495_v4 = vld [vmem:[#allocation7 + $0x264] sm:$0xf]  ;;  %v12665_v5 = vld [vmem:[#allocation7 + $0x268] sm:$0xf0] }
 0x1fa   :  { %5001 = vmatpush.bf16.msra.mxu0 %v12632_v55  ;;  %v3272_v25 = vpop.f32.mrf.mxu2  ;;  %v3236_v34 = vpop.f32.mrf.mxu0  ;;  %v12676_v51 = vor.u32 %v15497_v36, %v12673_v37  ;;  %v12473_v55 = vld [vmem:[#allocation7 + $0xe8] sm:$0xf0]  ;;  %v12668_v24 = vor.u32 %v15495_v4, %v12665_v5  ;;  %v15417_v0 = vld [vmem:[#allocation2 + $0x60] sm:$0xf0]  ;;  %v15489_v4 = vld [vmem:[#allocation7 + $0x234] sm:$0xf] }
 0x1fb   :  { %5020 = vmatpush.bf16.msra.mxu1 %v12696_v56  ;;  %v3291_v27 = vpop.f32.mrf.mxu3  ;;  %3309 = vst [vmem:[#allocation3 + $0xc8] sm:$0xff] %v3305_v20  ;;  %v3273_v33 = vadd.f32 %v3272_v25, %v16431_v19  ;;  %v3255_v35 = vpop.f32.mrf.mxu1  ;;  %v3300_v56 = vmax.f32 %v3254_v32, 0.0  ;;  %v3237_v58 = vadd.f32 %v3236_v34, %v16428_v3  ;;  %v12476_v2 = vor.u32 %v15447_v52, %v12473_v55  ;;  %v15461_v25 = vld [vmem:[#allocation7 + $0x154] sm:$0xf]  ;;  %v12457_v34 = vld [vmem:[#allocation7 + $0xc8] sm:$0xf0] }
 0x1fc   :  { %5114 = vmatpush.bf16.msrb.mxu2 %v12580_v10  ;;  %v16595_v10 = vor.u32 %v15407_v49, %v12321_v59  ;;  %v12449_v52 = vld [vmem:[#allocation7 + $0xb8] sm:$0xf0]  ;;  %v15535_v55 = vld [vmem:[#allocation10 + $0x30] sm:$0xff] }
 0x1fd   :  { %5058 = vmatpush.bf16.msra.mxu3 %v12380_v62  ;;  %v3292_v40 = vadd.f32 %v3291_v27, %v3273_v33  ;;  %v12564_v62 = vor.u32 %v15469_v47, %v12561_v48  ;;  %v3256_v14 = vadd.f32 %v3255_v35, %v3237_v58  ;;  %v15443_v33 = vld [vmem:[#allocation7 + $0xc4] sm:$0xf]  ;;  %v15536_v35 = vld [vmem:[#allocation10 + $0x38] sm:$0xff]  ;;  %v12641_v5 = vld [vmem:[#allocation7 + $0x238] sm:$0xf0] }
 0x1fe   :  { %5002 = vmatpush.bf16.msra.mxu0 %v12624_v11  ;;  %v12465_v11 = vld [vmem:[#allocation7 + $0xd8] sm:$0xf0]  ;;  %v12460_v43 = vor.u32 %v15443_v33, %v12457_v34  ;;  %v15491_v47 = vld [vmem:[#allocation7 + $0x244] sm:$0xf]  ;;  %v12649_v48 = vld [vmem:[#allocation7 + $0x248] sm:$0xf0]  ;;  %v16608_v34 = vor.u32 %v15417_v0, %v12347_v60 }
 0x1ff   :  { %5021 = vmatpush.bf16.msra.mxu1 %v12688_v12  ;;  %v3301_v57 = vmax.f32 %v3292_v40, 0.0  ;;  %v15467_v12 = vld [vmem:[#allocation7 + $0x184] sm:$0xf]  ;;  %v12468_v28 = vor.u32 %v15445_v6, %v12465_v11  ;;  %v3302_v36 = vmax.f32 %v3256_v14, 0.0  ;;  %v12652_v61 = vor.u32 %v15491_v47, %v12649_v48  ;;  %v15414_v14 = vld [vmem:[#allocation2 + $0x4c] sm:$0xf] }
 0x200   :  { %5115 = vmatpush.bf16.msrb.mxu2 %v12572_v31  ;;  %v12657_v31 = vld [vmem:[#allocation7 + $0x258] sm:$0xf0]  ;;  %v12556_v32 = vor.u32 %v15467_v12, %v12553_v13  ;;  %v15439_v6 = vld [vmem:[#allocation7 + $0xa4] sm:$0xf]  ;;  %v15453_v47 = vld [vmem:[#allocation7 + $0x114] sm:$0xf] }
 0x201   :  { %5059 = vmatpush.bf16.msra.mxu3 %v12372_v21  ;;  %v3306_v1 = vpack.c.bf16 %v3301_v57, %v3300_v56  ;;  %v12660_v40 = vor.u32 %v15493_v30, %v12657_v31  ;;  %v15487_v30 = vld [vmem:[#allocation7 + $0x224] sm:$0xf]  ;;  %v12633_v31 = vld [vmem:[#allocation7 + $0x228] sm:$0xf0]  ;;  %v12497_v48 = vld [vmem:[#allocation7 + $0x118] sm:$0xf0] }
 0x202   :  { %5003 = vmatpush.bf16.msra.mxu0 %v12616_v38  ;;  %v3274_v7 = vpop.f32.mrf.mxu2  ;;  %v3538_v20 = vpop.f32.mrf.mxu0  ;;  %v15451_v0 = vld [vmem:[#allocation7 + $0x104] sm:$0xf] }
 0x203   :  { %5022 = vmatpush.bf16.msra.mxu1 %v12680_v39  ;;  %v3293_v8 = vpop.f32.mrf.mxu3  ;;  %3310 = vst [vmem:[#allocation3 + $0x140] sm:$0xff] %v3306_v1  ;;  %v3275_v15 = vadd.f32 %v3274_v7, %v16431_v19  ;;  %v3557_v21 = vpop.f32.mrf.mxu1  ;;  %v3539_v38 = vadd.f32 %v3538_v20, %v16428_v3  ;;  %v12532_v39 = vor.u32 %v15461_v25, %v12529_v29  ;;  %v12441_v7 = vld [vmem:[#allocation7 + $0xa8] sm:$0xf0]  ;;  %v12355_v20 = vld [vmem:[#allocation2 + $0x50] sm:$0xf] }
 0x204   :  { %5116 = vmatpush.bf16.msrb.mxu2 %v12564_v62  ;;  %v15457_v62 = vld [vmem:[#allocation7 + $0x134] sm:$0xf]  ;;  %v15455_v25 = vld [vmem:[#allocation7 + $0x124] sm:$0xf]  ;;  %v12505_v29 = vld [vmem:[#allocation7 + $0x128] sm:$0xf0] }
 0x205   :  { %5060 = vmatpush.bf16.msra.mxu3 %v12364_v41  ;;  %v3294_v27 = vadd.f32 %v3293_v8, %v3275_v15  ;;  %5004 = vmatmul.bf16.vlgmr.msra.gmra.mxu0 %v16593_v9  ;;  %v15459_v41 = vld [vmem:[#allocation7 + $0x144] sm:$0xf]  ;;  %v15534_v8 = vld [vmem:[#allocation10 + $0x28] sm:$0xff]  ;;  %v12349_v15 = vld [vmem:[#allocation2 + $0x64] sm:$0xf0] }
 0x206   :  { %5072 = vmatpush.bf16.msrb.mxu0 %v12484_v46  ;;  %5023 = vmatmul.bf16.vlgmr.msra.gmra.mxu1 %v16595_v10  ;;  %v12521_v46 = vld [vmem:[#allocation7 + $0x148] sm:$0xf0] }
 0x207   :  { %5091 = vmatpush.bf16.msrb.mxu1 %v12548_v50  ;;  %v3303_v37 = vmax.f32 %v3294_v27, 0.0  ;;  %12749 = vmatmul.msk.bf16.vlgmr.msra.gmra.mxu2 %vm4913_vm1, %v16598_v22  ;;  %v12524_v59 = vor.u32 %v15459_v41, %v12521_v46  ;;  %v12636_v46 = vor.u32 %v15487_v30, %v12633_v31  ;;  %v16293_v31 = vmov 0  }
 0x208   :  { %5061 = vmatmul.bf16.vlgmr.msra.gmra.mxu3 %v16553_v16  ;;  %5117 = vmatpush.bf16.msrb.mxu2 %v12556_v32  ;;  %v3558_v16 = vadd.f32 %v3557_v21, %v3539_v38  ;;  %v15418_v21 = vld [vmem:[#allocation2 + $0x68] sm:$0xf0]  ;;  %213 = vst [vmem:[#allocation3] sm:$0xff] %v16293_v31 }
 0x209   :  { %5129 = vmatpush.bf16.msrb.mxu3 %v12676_v51  ;;  %v3307_v42 = vpack.c.bf16 %v3303_v37, %v3302_v36  ;;  %v15441_v51 = vld [vmem:[#allocation7 + $0xb4] sm:$0xf]  ;;  %v12433_v37 = vld [vmem:[#allocation7 + $0x98] sm:$0xf0]  ;;  %214 = vst [vmem:[#allocation3 + $0x78] sm:$0xff] %v16293_v31 }
 0x20a   :  { %5073 = vmatpush.bf16.msrb.mxu0 %v12476_v2  ;;  %v3576_v49 = vpop.f32.mrf.mxu2  ;;  %v3540_v57 = vpop.f32.mrf.mxu0  ;;  %v12452_v1 = vor.u32 %v15441_v51, %v12449_v52  ;;  %v12513_v2 = vld [vmem:[#allocation7 + $0x138] sm:$0xf0]  ;;  %v3605_v11 = vmax.f32 %v3558_v16, 0.0  ;;  %v15437_v36 = vld [vmem:[#allocation7 + $0x94] sm:$0xf]  ;;  %215 = vst [vmem:[#allocation3 + $0xf0] sm:$0xff] %v16293_v31 }
 0x20b   :  { %5092 = vmatpush.bf16.msrb.mxu1 %v12540_v23  ;;  %v3595_v50 = vpop.f32.mrf.mxu3  ;;  %3311 = vst [vmem:[#allocation3 + $0x1b8] sm:$0xff] %v3307_v42  ;;  %v3577_v56 = vadd.f32 %v3576_v49, %v16431_v19  ;;  %v3559_v58 = vpop.f32.mrf.mxu1  ;;  %v3541_v13 = vadd.f32 %v3540_v57, %v16428_v3  ;;  %v12516_v23 = vor.u32 %v15457_v62, %v12513_v2  ;;  %v15485_v51 = vld [vmem:[#allocation7 + $0x214] sm:$0xf]  ;;  %v12625_v52 = vld [vmem:[#allocation7 + $0x218] sm:$0xf0] }
 0x20c   :  { %5662 = vmatpush.bf16.msra.mxu2 %v15536_v35  ;;  %v16610_v35 = vor.u32 %v15414_v14, %v12349_v15  ;;  %v16613_v42 = vor.u32 %v15418_v21, %v12355_v20  ;;  %v15435_v16 = vld [vmem:[#allocation7 + $0x84] sm:$0xf]  ;;  %v12737_v62 = vld [vmem:[#allocation7 + $0x2f8] sm:$0xf0]  ;;  %v12628_v60 = vor.u32 %v15485_v51, %v12625_v52  ;;  %216 = vst [vmem:[#allocation3 + $0x168] sm:$0xff] %v16293_v31 }
 0x20d   :  { %5130 = vmatpush.bf16.msrb.mxu3 %v12668_v24  ;;  %v3596_v63 = vadd.f32 %v3595_v50, %v3577_v56  ;;  %v12644_v24 = vor.u32 %v15489_v4, %v12641_v5  ;;  %v3560_v38 = vadd.f32 %v3559_v58, %v3541_v13  ;;  %v12436_v50 = vor.u32 %v15437_v36, %v12433_v37  ;;  %v12425_v56 = vld [vmem:[#allocation7 + $0x88] sm:$0xf0]  ;;  %v15483_v5 = vld [vmem:[#allocation7 + $0x204] sm:$0xf]  ;;  %v12689_v31 = vld [vmem:[#allocation7 + $0x298] sm:$0xf0] }
 0x20e   :  { %5074 = vmatpush.bf16.msrb.mxu0 %v12468_v28  ;;  %v12444_v28 = vor.u32 %v15439_v6, %v12441_v7  ;;  %v12428_v4 = vor.u32 %v15435_v16, %v12425_v56  ;;  %v12617_v6 = vld [vmem:[#allocation7 + $0x208] sm:$0xf0]  ;;  %v15515_v13 = vld [vmem:[#allocation7 + $0x304] sm:$0xf]  ;;  %v15542_v56 = vld [vmem:[#allocation10 + $0x68] sm:$0xff] }
 0x20f   :  { %5093 = vmatpush.bf16.msrb.mxu1 %v12532_v39  ;;  %v3606_v12 = vmax.f32 %v3596_v63, 0.0  ;;  %v3607_v57 = vmax.f32 %v3560_v38, 0.0  ;;  %v12500_v63 = vor.u32 %v15453_v47, %v12497_v48  ;;  %v15532_v7 = vld [vmem:[#allocation10 + $0x18] sm:$0xff] }
 0x210   :  { %5663 = vmatpush.bf16.msra.mxu2 %v15535_v55  ;;  %v15533_v55 = vld [vmem:[#allocation10 + $0x20] sm:$0xff] }
 0x211   :  { %5131 = vmatpush.bf16.msrb.mxu3 %v12660_v40  ;;  %v3613_v27 = vpack.c.bf16 %v3606_v12, %v3605_v11 }
 0x212   :  { %5075 = vmatpush.bf16.msrb.mxu0 %v12460_v43  ;;  %v3578_v32 = vpop.f32.mrf.mxu2  ;;  %v3543_v40 = vpop.f32.mrf.mxu0  ;;  %v12508_v43 = vor.u32 %v15455_v25, %v12505_v29  ;;  %v15544_v29 = vld [vmem:[#allocation10 + $0x78] sm:$0xff] }
 0x213   :  { %5094 = vmatpush.bf16.msrb.mxu1 %v12524_v59  ;;  %v3597_v33 = vpop.f32.mrf.mxu3  ;;  %3617 = vst [vmem:[#allocation3 + $0x58] sm:$0xff] %v3613_v27  ;;  %v3579_v39 = vadd.f32 %v3578_v32, %v16431_v19  ;;  %v3562_v41 = vpop.f32.mrf.mxu1  ;;  %v3544_v59 = vadd.f32 %v3543_v40, %v16428_v3  ;;  %v12620_v27 = vor.u32 %v15483_v5, %v12617_v6  ;;  %v15543_v40 = vld [vmem:[#allocation10 + $0x70] sm:$0xff]  ;;  %v15568_v5 = vld [vmem:[#allocation10 + $0x138] sm:$0xff] }
 0x214   :  { %5664 = vmatpush.bf16.msra.mxu2 %v15534_v8 }
 0x215   :  { %5132 = vmatpush.bf16.msrb.mxu3 %v12652_v61  ;;  %v3598_v49 = vadd.f32 %v3597_v33, %v3579_v39  ;;  %5009 = vmatmul.bf16.gmra.mxu0 %v16608_v34  ;;  %v15513_v61 = vld [vmem:[#allocation7 + $0x2f4] sm:$0xf]  ;;  %v3563_v14 = vadd.f32 %v3562_v41, %v3544_v59  ;;  %v15531_v33 = vld [vmem:[#allocation10 + $0x10] sm:$0xff]  ;;  %v15560_v59 = vld [vmem:[#allocation10 + $0xf8] sm:$0xff] }
 0x216   :  { %5076 = vmatpush.bf16.msrb.mxu0 %v12452_v1  ;;  %5028 = vmatmul.bf16.gmra.mxu1 %v16610_v35  ;;  %v12489_v1 = vld [vmem:[#allocation7 + $0x108] sm:$0xf0]  ;;  %v12740_v12 = vor.u32 %v15513_v61, %v12737_v62  ;;  %v15509_v41 = vld [vmem:[#allocation7 + $0x2d4] sm:$0xf] }
 0x217   :  { %5095 = vmatpush.bf16.msrb.mxu1 %v12516_v23  ;;  %v3608_v58 = vmax.f32 %v3598_v49, 0.0  ;;  %12750 = vmatmul.msk.bf16.gmra.mxu2 %vm4913_vm1, %v16613_v42  ;;  %v15511_v23 = vld [vmem:[#allocation7 + $0x2e4] sm:$0xf]  ;;  %v12492_v25 = vor.u32 %v15451_v0, %v12489_v1  ;;  %v3609_v36 = vmax.f32 %v3563_v14, 0.0  ;;  %v15541_v0 = vld [vmem:[#allocation10 + $0x60] sm:$0xff] }
 0x218   :  { %5066 = vmatmul.bf16.gmra.mxu3 %v16576_v44  ;;  %5665 = vmatpush.bf16.msra.mxu2 %v15533_v55  ;;  %v12745_v44 = vld [vmem:[#allocation7 + $0x308] sm:$0xf0]  ;;  %v15530_v55 = vld [vmem:[#allocation10 + $0x8] sm:$0xff]  ;;  %v15529_v1 = vld [vmem:[#allocation10] sm:$0xff] }
 0x219   :  { %5133 = vmatpush.bf16.msrb.mxu3 %v12644_v24  ;;  %v3614_v2 = vpack.c.bf16 %v3608_v58, %v3607_v57  ;;  %v12729_v24 = vld [vmem:[#allocation7 + $0x2e8] sm:$0xf0]  ;;  %v12748_v30 = vor.u32 %v15515_v13, %v12745_v44  ;;  %v15507_v57 = vld [vmem:[#allocation7 + $0x2c4] sm:$0xf] }
 0x21a   :  { %5077 = vmatpush.bf16.msrb.mxu0 %v12444_v28  ;;  %v3581_v8 = vpop.f32.mrf.mxu2  ;;  %v3545_v20 = vpop.f32.mrf.mxu0  ;;  %v12732_v32 = vor.u32 %v15511_v23, %v12729_v24  ;;  %v12713_v58 = vld [vmem:[#allocation7 + $0x2c8] sm:$0xf0]  ;;  %v15503_v14 = vld [vmem:[#allocation7 + $0x2a4] sm:$0xf] }
 0x21b   :  { %5096 = vmatpush.bf16.msrb.mxu1 %v12508_v43  ;;  %v3600_v11 = vpop.f32.mrf.mxu3  ;;  %3618 = vst [vmem:[#allocation3 + $0xd0] sm:$0xff] %v3614_v2  ;;  %v3582_v15 = vadd.f32 %v3581_v8, %v16431_v19  ;;  %v3564_v21 = vpop.f32.mrf.mxu1  ;;  %v3546_v38 = vadd.f32 %v3545_v20, %v16428_v3  ;;  %v12721_v43 = vld [vmem:[#allocation7 + $0x2d8] sm:$0xf0]  ;;  %v15540_v13 = vld [vmem:[#allocation10 + $0x58] sm:$0xff]  ;;  %v15567_v20 = vld [vmem:[#allocation10 + $0x130] sm:$0xff] }
 0x21c   :  { %5666 = vmatpush.bf16.msra.mxu2 %v15532_v7  ;;  %v12724_v52 = vor.u32 %v15509_v41, %v12721_v43  ;;  %v15559_v7 = vld [vmem:[#allocation10 + $0xf0] sm:$0xff]  ;;  %v15538_v43 = vld [vmem:[#allocation10 + $0x48] sm:$0xff] }
 0x21d   :  { %5134 = vmatpush.bf16.msrb.mxu3 %v12636_v46  ;;  %v3601_v28 = vadd.f32 %v3600_v11, %v3582_v15  ;;  %v3565_v48 = vadd.f32 %v3564_v21, %v3546_v38  ;;  %v12697_v15 = vld [vmem:[#allocation7 + $0x2a8] sm:$0xf0]  ;;  %v15558_v21 = vld [vmem:[#allocation10 + $0xe8] sm:$0xff] }
 0x21e   :  { %5078 = vmatpush.bf16.msrb.mxu0 %v12436_v50 }
 0x21f   :  { %5097 = vmatpush.bf16.msrb.mxu1 %v12500_v63  ;;  %v3610_v37 = vmax.f32 %v3601_v28, 0.0  ;;  %v3611_v61 = vmax.f32 %v3565_v48, 0.0  ;;  %v15539_v28 = vld [vmem:[#allocation10 + $0x50] sm:$0xff] }
 0x220   :  { %5667 = vmatpush.bf16.msra.mxu2 %v15531_v33  ;;  %v15499_v48 = vld [vmem:[#allocation7 + $0x284] sm:$0xf] }
 0x221   :  { %5135 = vmatpush.bf16.msrb.mxu3 %v12628_v60  ;;  %v3615_v39 = vpack.c.bf16 %v3610_v37, %v3609_v36  ;;  %v12716_v60 = vor.u32 %v15507_v57, %v12713_v58  ;;  %v15537_v58 = vld [vmem:[#allocation10 + $0x40] sm:$0xff] }
 0x222   :  { %5079 = vmatpush.bf16.msrb.mxu0 %v12428_v4  ;;  %v3583_v46 = vpop.f32.mrf.mxu2  ;;  %v3847_v50 = vpop.f32.mrf.mxu0  ;;  %v15505_v4 = vld [vmem:[#allocation7 + $0x2b4] sm:$0xf] }
 0x223   :  { %5098 = vmatpush.bf16.msrb.mxu1 %v12492_v25  ;;  %v3602_v47 = vpop.f32.mrf.mxu3  ;;  %3619 = vst [vmem:[#allocation3 + $0x148] sm:$0xff] %v3615_v39  ;;  %v3584_v49 = vadd.f32 %v3583_v46, %v16431_v19  ;;  %v3866_v51 = vpop.f32.mrf.mxu1  ;;  %v3848_v63 = vadd.f32 %v3847_v50, %v16428_v3  ;;  %v15557_v46 = vld [vmem:[#allocation10 + $0xe0] sm:$0xff] }
 0x224   :  { %5668 = vmatpush.bf16.msra.mxu2 %v15530_v55  ;;  %v15565_v50 = vld [vmem:[#allocation10 + $0x120] sm:$0xff] }
 0x225   :  { %5136 = vmatpush.bf16.msrb.mxu3 %v12620_v27  ;;  %v3603_v16 = vadd.f32 %v3602_v47, %v3584_v49  ;;  %5080 = vmatmul.bf16.vlgmr.msrb.gmra.mxu0 %v16555_v17  ;;  %v12705_v17 = vld [vmem:[#allocation7 + $0x2b8] sm:$0xf0]  ;;  %v3867_v8 = vadd.f32 %v3866_v51, %v3848_v63  ;;  %v12700_v27 = vor.u32 %v15503_v14, %v12697_v15  ;;  %v12681_v49 = vld [vmem:[#allocation7 + $0x288] sm:$0xf0] }
 0x226   :  { %5148 = vmatpush.bf16.msra.mxu0 %v12740_v12  ;;  %5099 = vmatmul.bf16.vlgmr.msrb.gmra.mxu1 %v16557_v18  ;;  %v12708_v12 = vor.u32 %v15505_v4, %v12705_v17  ;;  %v15575_v4 = vld [vmem:[#allocation10 + $0x170] sm:$0xff] }
 0x227   :  { %5174 = vmatpush.bf16.msra.mxu1 %v12748_v30  ;;  %v3612_v62 = vmax.f32 %v3603_v16, 0.0  ;;  %5118 = vmatmul.bf16.vlgmr.msrb.gmra.mxu2 %v16560_v26  ;;  %v3914_v23 = vmax.f32 %v3867_v8, 0.0  ;;  %v15501_v30 = vld [vmem:[#allocation7 + $0x294] sm:$0xf]  ;;  %v12684_v16 = vor.u32 %v15499_v48, %v12681_v49  ;;  %v15563_v17 = vld [vmem:[#allocation10 + $0x110] sm:$0xff]  ;;  %v15612_v48 = vld [vmem:[#allocation10 + $0x238] sm:$0xff] }
 0x228   :  { %5137 = vmatmul.bf16.vlgmr.msrb.gmra.mxu3 %v16593_v9  ;;  %5669 = vmatpush.bf16.msra.mxu2 %v15529_v1  ;;  %v12692_v41 = vor.u32 %v15501_v30, %v12689_v31  ;;  %v15517_v8 = vld [vmem:[#allocation3 + $0x4] sm:$0xf]  ;;  %v15604_v49 = vld [vmem:[#allocation10 + $0x1f8] sm:$0xff] }
 0x229   :  { %5681 = vmatpush.bf16.msra.mxu3 %v15544_v29  ;;  %v3616_v2 = vpack.c.bf16 %v3612_v62, %v3611_v61  ;;  %v15564_v62 = vld [vmem:[#allocation10 + $0x118] sm:$0xff]  ;;  %v15549_v30 = vld [vmem:[#allocation10 + $0xa0] sm:$0xff] }
 0x22a   :  { %5149 = vmatpush.bf16.msra.mxu0 %v12732_v32  ;;  %v3885_v18 = vpop.f32.mrf.mxu2  ;;  %v3849_v11 = vpop.f32.mrf.mxu0  ;;  %v15566_v32 = vld [vmem:[#allocation10 + $0x128] sm:$0xff]  ;;  %v15553_v31 = vld [vmem:[#allocation10 + $0xc0] sm:$0xff] }
 0x22b   :  { %5719 = vmatpush.bf16.msrb.mxu1 %v15560_v59  ;;  %v3904_v6 = vpop.f32.mrf.mxu3  ;;  %3620 = vst [vmem:[#allocation3 + $0x1c0] sm:$0xff] %v3616_v2  ;;  %v3886_v26 = vadd.f32 %v3885_v18, %v16431_v19  ;;  %v3868_v9 = vpop.f32.mrf.mxu1  ;;  %v3850_v25 = vadd.f32 %v3849_v11, %v16428_v3  ;;  %v15552_v59 = vld [vmem:[#allocation10 + $0xb8] sm:$0xff]  ;;  %v15551_v2 = vld [vmem:[#allocation10 + $0xb0] sm:$0xff] }
 0x22c   :  { %5738 = vmatpush.bf16.msrb.mxu2 %v15568_v5  ;;  %v12757_v11 = vld [vmem:[#allocation3 + $0x78] sm:$0xf0] }
 0x22d   :  { %5682 = vmatpush.bf16.msra.mxu3 %v15543_v40  ;;  %v3905_v44 = vadd.f32 %v3904_v6, %v3886_v26  ;;  %v3869_v37 = vadd.f32 %v3868_v9, %v3850_v25  ;;  %v15520_v26 = vld [vmem:[#allocation3 + $0x74] sm:$0xf0]  ;;  %v15554_v9 = vld [vmem:[#allocation10 + $0xc8] sm:$0xff]  ;;  %v12760_v25 = vor.u32 %v15517_v8, %v12757_v11  ;;  %v15609_v11 = vld [vmem:[#allocation10 + $0x220] sm:$0xff] }
 0x22e   :  { %5150 = vmatpush.bf16.msra.mxu0 %v12724_v52 }
 0x22f   :  { %5720 = vmatpush.bf16.msrb.mxu1 %v15559_v7  ;;  %v3915_v24 = vmax.f32 %v3905_v44, 0.0  ;;  %v3916_v51 = vmax.f32 %v3869_v37, 0.0  ;;  %v12755_v7 = vld [vmem:[#allocation3] sm:$0xf] }
 0x230   :  { %5739 = vmatpush.bf16.msrb.mxu2 %v15567_v20  ;;  %v15573_v37 = vld [vmem:[#allocation10 + $0x160] sm:$0xff] }
 0x231   :  { %5683 = vmatpush.bf16.msra.mxu3 %v15542_v56  ;;  %v3922_v29 = vpack.c.bf16 %v3915_v24, %v3914_v23  ;;  %v15556_v56 = vld [vmem:[#allocation10 + $0xd8] sm:$0xff]  ;;  %v12756_v24 = vor.u32 %v15520_v26, %v12755_v7  ;;  %v15602_v7 = vld [vmem:[#allocation10 + $0x1e8] sm:$0xff]  ;;  %v15545_v26 = vld [vmem:[#allocation10 + $0x80] sm:$0xff] }
 0x232   :  { %5151 = vmatpush.bf16.msra.mxu0 %v12716_v60  ;;  %v3887_v33 = vpop.f32.mrf.mxu2  ;;  %v3852_v39 = vpop.f32.mrf.mxu0 }
 0x233   :  { %v3906_v36 = vpop.f32.mrf.mxu3  ;;  %5721 = vmatpush.bf16.msrb.mxu1 %v15558_v21  ;;  %3926 = vst [vmem:[#allocation3 + $0x60] sm:$0xff] %v3922_v29  ;;  %v3888_v38 = vadd.f32 %v3887_v33, %v16431_v19  ;;  %v3871_v40 = vpop.f32.mrf.mxu1  ;;  %v3853_v55 = vadd.f32 %v3852_v39, %v16428_v3 }
 0x234   :  { %5740 = vmatpush.bf16.msrb.mxu2 %v15566_v32 }
 0x235   :  { %5684 = vmatpush.bf16.msra.mxu3 %v15541_v0  ;;  %v3907_v47 = vadd.f32 %v3906_v36, %v3888_v38  ;;  %5085 = vmatmul.bf16.gmra.mxu0 %v16578_v45  ;;  %v3872_v63 = vadd.f32 %v3871_v40, %v3853_v55  ;;  %v15561_v38 = vld [vmem:[#allocation10 + $0x100] sm:$0xff]  ;;  %v15548_v40 = vld [vmem:[#allocation10 + $0x98] sm:$0xff]  ;;  %v15611_v55 = vld [vmem:[#allocation10 + $0x230] sm:$0xff] }
 0x236   :  { %5152 = vmatpush.bf16.msra.mxu0 %v12708_v12  ;;  %5104 = vmatmul.bf16.gmra.mxu1 %v16581_v53  ;;  %v15576_v53 = vld [vmem:[#allocation10 + $0x178] sm:$0xff] }
 0x237   :  { %v3917_v52 = vmax.f32 %v3907_v47, 0.0  ;;  %5123 = vmatmul.bf16.gmra.mxu2 %v16583_v54  ;;  %5722 = vmatpush.bf16.msrb.mxu1 %v15557_v46  ;;  %v3918_v5 = vmax.f32 %v3872_v63, 0.0 }
 0x238   :  { %5142 = vmatmul.bf16.gmra.mxu3 %v16608_v34  ;;  %5741 = vmatpush.bf16.msrb.mxu2 %v15565_v50  ;;  %v15555_v34 = vld [vmem:[#allocation10 + $0xd0] sm:$0xff]  ;;  %v15572_v50 = vld [vmem:[#allocation10 + $0x158] sm:$0xff] }
 0x239   :  { %5685 = vmatpush.bf16.msra.mxu3 %v15540_v13  ;;  %v3923_v57 = vpack.c.bf16 %v3917_v52, %v3916_v51  ;;  %v15550_v13 = vld [vmem:[#allocation10 + $0xa8] sm:$0xff]  ;;  %v15547_v52 = vld [vmem:[#allocation10 + $0x90] sm:$0xff] }
 0x23a   :  { %5153 = vmatpush.bf16.msra.mxu0 %v12700_v27  ;;  %v3890_v45 = vpop.f32.mrf.mxu2  ;;  %v3854_v54 = vpop.f32.mrf.mxu0  ;;  %v15574_v27 = vld [vmem:[#allocation10 + $0x168] sm:$0xff] }
 0x23b   :  { %v3909_v61 = vpop.f32.mrf.mxu3  ;;  %3927 = vst [vmem:[#allocation3 + $0xd8] sm:$0xff] %v3923_v57  ;;  %v3891_v60 = vadd.f32 %v3890_v45, %v16431_v19  ;;  %v3873_v0 = vpop.f32.mrf.mxu1  ;;  %5723 = vmatpush.bf16.msrb.mxu1 %v15556_v56  ;;  %v3855_v6 = vadd.f32 %v3854_v54, %v16428_v3  ;;  %v15526_v45 = vld [vmem:[#allocation3 + $0x164] sm:$0xf0] }
 0x23c   :  { %5742 = vmatpush.bf16.msrb.mxu2 %v15564_v62  ;;  %v15571_v62 = vld [vmem:[#allocation10 + $0x150] sm:$0xff]  ;;  %v15610_v54 = vld [vmem:[#allocation10 + $0x228] sm:$0xff] }
 0x23d   :  { %5686 = vmatpush.bf16.msra.mxu3 %v15539_v28  ;;  %v3910_v1 = vadd.f32 %v3909_v61, %v3891_v60  ;;  %v3874_v15 = vadd.f32 %v3873_v0, %v3855_v6  ;;  %v15562_v28 = vld [vmem:[#allocation10 + $0x108] sm:$0xff]  ;;  %v15523_v61 = vld [vmem:[#allocation3 + $0xf4] sm:$0xf] }
 0x23e   :  { %5154 = vmatpush.bf16.msra.mxu0 %v12692_v41  ;;  %v15546_v60 = vld [vmem:[#allocation10 + $0x88] sm:$0xff] }
 0x23f   :  { %v3919_v18 = vmax.f32 %v3910_v1, 0.0  ;;  %5724 = vmatpush.bf16.msrb.mxu1 %v15555_v34  ;;  %v3920_v32 = vmax.f32 %v3874_v15, 0.0  ;;  %v15570_v6 = vld [vmem:[#allocation10 + $0x148] sm:$0xff]  ;;  %v15601_v15 = vld [vmem:[#allocation10 + $0x1e0] sm:$0xff] }
 0x240   :  { %5743 = vmatpush.bf16.msrb.mxu2 %v15563_v17 }
 0x241   :  { %5687 = vmatpush.bf16.msra.mxu3 %v15538_v43  ;;  %v3924_v12 = vpack.c.bf16 %v3919_v18, %v3918_v5 }
 0x242   :  { %5155 = vmatpush.bf16.msra.mxu0 %v12684_v16  ;;  %v3892_v44 = vpop.f32.mrf.mxu2  ;;  %v4156_v21 = vpop.f32.mrf.mxu0  ;;  %v15603_v16 = vld [vmem:[#allocation10 + $0x1f0] sm:$0xff] }
 0x243   :  { %v3911_v14 = vpop.f32.mrf.mxu3  ;;  %3928 = vst [vmem:[#allocation3 + $0x150] sm:$0xff] %v3924_v12  ;;  %v3893_v20 = vadd.f32 %v3892_v44, %v16431_v19  ;;  %v4175_v23 = vpop.f32.mrf.mxu1  ;;  %5725 = vmatpush.bf16.msrb.mxu1 %v15554_v9  ;;  %v4157_v36 = vadd.f32 %v4156_v21, %v16428_v3  ;;  %v15596_v9 = vld [vmem:[#allocation10 + $0x1b8] sm:$0xff] }
 0x244   :  { %5744 = vmatpush.bf16.msrb.mxu2 %v15562_v28  ;;  %v15620_v21 = vld [vmem:[#allocation10 + $0x278] sm:$0xff] }
 0x245   :  { %5688 = vmatpush.bf16.msra.mxu3 %v15537_v58  ;;  %v3912_v29 = vadd.f32 %v3911_v14, %v3893_v20  ;;  %5156 = vmatmul.bf16.vlgmr.msra.gmra.mxu0 %v16595_v10  ;;  %v4176_v10 = vadd.f32 %v4175_v23, %v4157_v36  ;;  %v15569_v14 = vld [vmem:[#allocation10 + $0x140] sm:$0xff]  ;;  %v15608_v23 = vld [vmem:[#allocation10 + $0x218] sm:$0xff]  ;;  %v15594_v36 = vld [vmem:[#allocation10 + $0x1a8] sm:$0xff] }
 0x246   :  { %5700 = vmatpush.bf16.msrb.mxu0 %v15552_v59  ;;  %12751 = vmatmul.msk.bf16.vlgmr.msra.gmra.mxu1 %vm4913_vm1, %v16598_v22  ;;  %v12779_v59 = vld [vmem:[#allocation3 + $0xf0] sm:$0xf] }
 0x247   :  { %v3921_v33 = vmax.f32 %v3912_v29, 0.0  ;;  %5670 = vmatmul.bf16.vlgmr.msra.gmra.mxu2 %v12756_v24  ;;  %5726 = vmatpush.bf16.msrb.mxu1 %v15553_v31  ;;  %v4223_v56 = vmax.f32 %v4176_v10, 0.0  ;;  %v12780_v5 = vor.u32 %v15526_v45, %v12779_v59  ;;  %v12765_v10 = vld [vmem:[#allocation3 + $0x80] sm:$0xf0] }
 0x248   :  { %5689 = vmatmul.bf16.vlgmr.msra.gmra.mxu3 %v12760_v25  ;;  %5745 = vmatpush.bf16.msrb.mxu2 %v15561_v38 }
 0x249   :  { %5757 = vmatpush.bf16.msrb.mxu3 %v15576_v53  ;;  %v3925_v39 = vpack.c.bf16 %v3921_v33, %v3920_v32  ;;  %v12781_v53 = vld [vmem:[#allocation3 + $0x168] sm:$0xf0]  ;;  %v15619_v32 = vld [vmem:[#allocation10 + $0x270] sm:$0xff] }
 0x24a   :  { %5701 = vmatpush.bf16.msrb.mxu0 %v15551_v2  ;;  %v4194_v41 = vpop.f32.mrf.mxu2  ;;  %v4158_v46 = vpop.f32.mrf.mxu0  ;;  %v12784_v18 = vor.u32 %v15523_v61, %v12781_v53  ;;  %v15607_v33 = vld [vmem:[#allocation10 + $0x210] sm:$0xff] }
 0x24b   :  { %v4213_v43 = vpop.f32.mrf.mxu3  ;;  %3929 = vst [vmem:[#allocation3 + $0x1c8] sm:$0xff] %v3925_v39  ;;  %v4195_v22 = vadd.f32 %v4194_v41, %v16431_v19  ;;  %v4177_v47 = vpop.f32.mrf.mxu1  ;;  %6264 = vmatpush.bf16.msra.mxu1 %v15604_v49  ;;  %v4159_v58 = vadd.f32 %v4158_v46, %v16428_v3  ;;  %v15599_v41 = vld [vmem:[#allocation10 + $0x1d0] sm:$0xff]  ;;  %v15606_v46 = vld [vmem:[#allocation10 + $0x208] sm:$0xff] }
 0x24c   :  { %6283 = vmatpush.bf16.msra.mxu2 %v15612_v48  ;;  %v12763_v49 = vld [vmem:[#allocation3 + $0x8] sm:$0xf]  ;;  %v15519_v53 = vld [vmem:[#allocation3 + $0x14] sm:$0xf] }
 0x24d   :  { %5758 = vmatpush.bf16.msrb.mxu3 %v15575_v4  ;;  %v4214_v51 = vadd.f32 %v4213_v43, %v4195_v22  ;;  %v4178_v1 = vadd.f32 %v4177_v47, %v4159_v58  ;;  %v15618_v22 = vld [vmem:[#allocation10 + $0x268] sm:$0xff] }
 0x24e   :  { %5702 = vmatpush.bf16.msrb.mxu0 %v15550_v13  ;;  %v12771_v58 = vld [vmem:[#allocation3 + $0x10] sm:$0xf] }
 0x24f   :  { %v4224_v57 = vmax.f32 %v4214_v51, 0.0  ;;  %6265 = vmatpush.bf16.msra.mxu1 %v15603_v16  ;;  %v4225_v12 = vmax.f32 %v4178_v1, 0.0  ;;  %v12773_v51 = vld [vmem:[#allocation3 + $0x88] sm:$0xf0]  ;;  %v15605_v1 = vld [vmem:[#allocation10 + $0x200] sm:$0xff] }
 0x250   :  { %6284 = vmatpush.bf16.msra.mxu2 %v15611_v55 }
 0x251   :  { %5759 = vmatpush.bf16.msrb.mxu3 %v15574_v27  ;;  %v4231_v63 = vpack.c.bf16 %v4224_v57, %v4223_v56  ;;  %v15518_v57 = vld [vmem:[#allocation3 + $0xc] sm:$0xf] }
 0x252   :  { %5703 = vmatpush.bf16.msrb.mxu0 %v15549_v30  ;;  %v4196_v0 = vpop.f32.mrf.mxu2  ;;  %v4161_v4 = vpop.f32.mrf.mxu0  ;;  %v15600_v30 = vld [vmem:[#allocation10 + $0x1d8] sm:$0xff]  ;;  %v12768_v61 = vor.u32 %v15518_v57, %v12765_v10 }
 0x253   :  { %v4215_v34 = vpop.f32.mrf.mxu3  ;;  %4235 = vst [vmem:[#allocation3 + $0x68] sm:$0xff] %v4231_v63  ;;  %v4197_v2 = vadd.f32 %v4196_v0, %v16431_v19  ;;  %v4180_v17 = vpop.f32.mrf.mxu1  ;;  %v4162_v44 = vadd.f32 %v4161_v4, %v16428_v3  ;;  %6266 = vmatpush.bf16.msra.mxu1 %v15602_v7  ;;  %v15598_v63 = vld [vmem:[#allocation10 + $0x1c8] sm:$0xff]  ;;  %v12776_v0 = vor.u32 %v15519_v53, %v12773_v51  ;;  %v15664_v57 = vld [vmem:[#allocation10 + $0x378] sm:$0xff] }
 0x254   :  { %6285 = vmatpush.bf16.msra.mxu2 %v15610_v54 }
 0x255   :  { %5760 = vmatpush.bf16.msrb.mxu3 %v15573_v37  ;;  %v4216_v8 = vadd.f32 %v4215_v34, %v4197_v2  ;;  %5161 = vmatmul.bf16.gmra.mxu0 %v16610_v35  ;;  %v4181_v25 = vadd.f32 %v4180_v17, %v4162_v44  ;;  %v15617_v34 = vld [vmem:[#allocation10 + $0x260] sm:$0xff] }
 0x256   :  { %5704 = vmatpush.bf16.msrb.mxu0 %v15548_v40  ;;  %12752 = vmatmul.msk.bf16.gmra.mxu1 %vm4913_vm1, %v16613_v42  ;;  %v15595_v42 = vld [vmem:[#allocation10 + $0x1b0] sm:$0xff]  ;;  %v15521_v40 = vld [vmem:[#allocation3 + $0x7c] sm:$0xf0] }
 0x257   :  { %v4226_v13 = vmax.f32 %v4216_v8, 0.0  ;;  %5675 = vmatmul.bf16.gmra.mxu2 %v12780_v5  ;;  %6267 = vmatpush.bf16.msra.mxu1 %v15601_v15  ;;  %v4227_v37 = vmax.f32 %v4181_v25, 0.0  ;;  %v12764_v45 = vor.u32 %v15521_v40, %v12763_v49  ;;  %v15656_v5 = vld [vmem:[#allocation10 + $0x338] sm:$0xff]  ;;  %v15591_v15 = vld [vmem:[#allocation10 + $0x190] sm:$0xff] }
 0x258   :  { %5694 = vmatmul.bf16.gmra.mxu3 %v12784_v18  ;;  %6286 = vmatpush.bf16.msra.mxu2 %v15609_v11  ;;  %v15592_v18 = vld [vmem:[#allocation10 + $0x198] sm:$0xff]  ;;  %v15527_v25 = vld [vmem:[#allocation3 + $0x16c] sm:$0xf0] }
 0x259   :  { %5761 = vmatpush.bf16.msrb.mxu3 %v15572_v50  ;;  %v4232_v20 = vpack.c.bf16 %v4226_v13, %v4225_v12  ;;  %v15522_v50 = vld [vmem:[#allocation3 + $0x84] sm:$0xf0]  ;;  %v15616_v8 = vld [vmem:[#allocation10 + $0x258] sm:$0xff] }
 0x25a   :  { %5705 = vmatpush.bf16.msrb.mxu0 %v15547_v52  ;;  %v4199_v35 = vpop.f32.mrf.mxu2  ;;  %v4163_v28 = vpop.f32.mrf.mxu0  ;;  %v12772_v54 = vor.u32 %v15522_v50, %v12771_v58  ;;  %v12787_v40 = vld [vmem:[#allocation3 + $0xf8] sm:$0xf]  ;;  %v15633_v58 = vld [vmem:[#allocation10 + $0x2e0] sm:$0xff] }
 0x25b   :  { %v4218_v24 = vpop.f32.mrf.mxu3  ;;  %4236 = vst [vmem:[#allocation3 + $0xe0] sm:$0xff] %v4232_v20  ;;  %v4200_v27 = vadd.f32 %v4199_v35, %v16431_v19  ;;  %v4182_v29 = vpop.f32.mrf.mxu1  ;;  %v4164_v39 = vadd.f32 %v4163_v28, %v16428_v3  ;;  %6268 = vmatpush.bf16.msra.mxu1 %v15600_v30  ;;  %v12789_v28 = vld [vmem:[#allocation3 + $0x170] sm:$0xf0]  ;;  %v15634_v30 = vld [vmem:[#allocation10 + $0x2e8] sm:$0xff]  ;;  %v12788_v10 = vor.u32 %v15527_v25, %v12787_v40  ;;  %v15661_v25 = vld [vmem:[#allocation10 + $0x360] sm:$0xff] }
 0x25c   :  { %6287 = vmatpush.bf16.msra.mxu2 %v15608_v23  ;;  %v15655_v23 = vld [vmem:[#allocation10 + $0x330] sm:$0xff] }
 0x25d   :  { %5762 = vmatpush.bf16.msrb.mxu3 %v15571_v62  ;;  %v4219_v31 = vadd.f32 %v4218_v24, %v4200_v27  ;;  %v4183_v52 = vadd.f32 %v4182_v29, %v4164_v39  ;;  %v15593_v62 = vld [vmem:[#allocation10 + $0x1a0] sm:$0xff]  ;;  %v15635_v24 = vld [vmem:[#allocation10 + $0x2f0] sm:$0xff]  ;;  %v15590_v27 = vld [vmem:[#allocation10 + $0x188] sm:$0xff] }
 0x25e   :  { %5706 = vmatpush.bf16.msrb.mxu0 %v15546_v60  ;;  %v15614_v29 = vld [vmem:[#allocation10 + $0x248] sm:$0xff] }
 0x25f   :  { %v4228_v38 = vmax.f32 %v4219_v31, 0.0  ;;  %6269 = vmatpush.bf16.msra.mxu1 %v15599_v41  ;;  %v4229_v4 = vmax.f32 %v4183_v52, 0.0  ;;  %v15524_v41 = vld [vmem:[#allocation3 + $0xfc] sm:$0xf]  ;;  %v15613_v52 = vld [vmem:[#allocation10 + $0x240] sm:$0xff] }
 0x260   :  { %6288 = vmatpush.bf16.msra.mxu2 %v15607_v33  ;;  %v15528_v33 = vld [vmem:[#allocation3 + $0x174] sm:$0xf0] }
 0x261   :  { %5763 = vmatpush.bf16.msrb.mxu3 %v15570_v6  ;;  %v4233_v43 = vpack.c.bf16 %v4228_v38, %v4227_v37  ;;  %v15597_v6 = vld [vmem:[#allocation10 + $0x1c0] sm:$0xff] }
 0x262   :  { %5707 = vmatpush.bf16.msrb.mxu0 %v15545_v26  ;;  %v4201_v47 = vpop.f32.mrf.mxu2  ;;  %v4929_v16 = vpop.f32.mrf.mxu0  ;;  %v15636_v26 = vld [vmem:[#allocation10 + $0x2f8] sm:$0xff] }
 0x263   :  { %v4220_v48 = vpop.f32.mrf.mxu3  ;;  %4237 = vst [vmem:[#allocation3 + $0x158] sm:$0xff] %v4233_v43  ;;  %v4202_v55 = vadd.f32 %v4201_v47, %v16431_v19  ;;  %v4948_v56 = vpop.f32.mrf.mxu1  ;;  %v4930_v59 = vadd.f32 %v4929_v16, %v16428_v3  ;;  %6270 = vmatpush.bf16.msra.mxu1 %v15598_v63  ;;  %v15525_v47 = vld [vmem:[#allocation3 + $0x104] sm:$0xf]  ;;  %v15632_v63 = vld [vmem:[#allocation10 + $0x2d8] sm:$0xff] }
 0x264   :  { %6289 = vmatpush.bf16.msra.mxu2 %v15606_v46  ;;  %v12795_v46 = vld [vmem:[#allocation3 + $0x100] sm:$0xf] }
 0x265   :  { %5764 = vmatpush.bf16.msrb.mxu3 %v15569_v14  ;;  %v4221_v60 = vadd.f32 %v4220_v48, %v4202_v55  ;;  %v4949_v2 = vadd.f32 %v4948_v56, %v4930_v59  ;;  %5708 = vmatmul.bf16.vlgmr.msrb.gmra.mxu0 %v12764_v45  ;;  %v15589_v48 = vld [vmem:[#allocation10 + $0x180] sm:$0xff]  ;;  %v12796_v50 = vor.u32 %v15528_v33, %v12795_v46  ;;  %v15628_v55 = vld [vmem:[#allocation10 + $0x2b8] sm:$0xff]  ;;  %v15627_v45 = vld [vmem:[#allocation10 + $0x2b0] sm:$0xff] }
 0x266   :  { %6245 = vmatpush.bf16.msra.mxu0 %v15596_v9  ;;  %5727 = vmatmul.bf16.vlgmr.msrb.gmra.mxu1 %v12768_v61  ;;  %v15653_v16 = vld [vmem:[#allocation10 + $0x320] sm:$0xff]  ;;  %v15652_v59 = vld [vmem:[#allocation10 + $0x318] sm:$0xff]  ;;  %v15622_v46 = vld [vmem:[#allocation10 + $0x288] sm:$0xff] }
 0x267   :  { %v4230_v17 = vmax.f32 %v4221_v60, 0.0  ;;  %5746 = vmatmul.bf16.vlgmr.msrb.gmra.mxu2 %v12772_v54  ;;  %6271 = vmatpush.bf16.msra.mxu1 %v15597_v6  ;;  %v15650_v6 = vld [vmem:[#allocation10 + $0x308] sm:$0xff]  ;;  %v15688_v33 = vld [vmem:[#allocation10 + $0x438] sm:$0xff] }
 0x268   :  { %5765 = vmatmul.bf16.vlgmr.msrb.gmra.mxu3 %v12776_v0  ;;  %6290 = vmatpush.bf16.msra.mxu2 %v15605_v1 }
 0x269   :  { %6302 = vmatpush.bf16.msra.mxu3 %v15620_v21  ;;  %v4234_v7 = vpack.c.bf16 %v4230_v17, %v4229_v4  ;;  %v15615_v21 = vld [vmem:[#allocation10 + $0x250] sm:$0xff] }
 0x26a   :  { %6246 = vmatpush.bf16.msra.mxu0 %v15595_v42  ;;  %v4967_v11 = vpop.f32.mrf.mxu2  ;;  %v4931_v13 = vpop.f32.mrf.mxu0  ;;  %v15654_v42 = vld [vmem:[#allocation10 + $0x328] sm:$0xff]  ;;  %v15651_v4 = vld [vmem:[#allocation10 + $0x310] sm:$0xff] }
 0x26b   :  { %v4986_v9 = vpop.f32.mrf.mxu3  ;;  %4238 = vst [vmem:[#allocation3 + $0x1d0] sm:$0xff] %v4234_v7  ;;  %v4968_v12 = vadd.f32 %v4967_v11, %v4949_v2  ;;  %v4950_v44 = vpop.f32.mrf.mxu1  ;;  %v4932_v14 = vadd.f32 %v4931_v13, %v16428_v3  ;;  %6340 = vmatpush.bf16.msrb.mxu1 %v15636_v26  ;;  %v15626_v2 = vld [vmem:[#allocation10 + $0x2a8] sm:$0xff]  ;;  %v15625_v26 = vld [vmem:[#allocation10 + $0x2a0] sm:$0xff] }
 0x26c   :  { %6828 = vmatpush.bf16.msrb.mxu2 %v15656_v5  ;;  %v15662_v5 = vld [vmem:[#allocation10 + $0x368] sm:$0xff] }
 0x26d   :  { %6303 = vmatpush.bf16.msra.mxu3 %v15619_v32  ;;  %v16656_v20 = vadd.f32 %v4986_v9, %v4968_v12  ;;  %v4951_v35 = vadd.f32 %v4950_v44, %v4932_v14  ;;  %v15580_v7 = vld [vmem:[#allocation3 + $0x84] sm:$0xf0]  ;;  %v13005_v12 = vld [vmem:[#allocation3 + $0x90] sm:$0xf0] }
 0x26e   :  { %6247 = vmatpush.bf16.msra.mxu0 %v15594_v36  ;;  %v12797_v36 = vld [vmem:[#allocation3 + $0x178] sm:$0xf0] }
 0x26f   :  { %6341 = vmatpush.bf16.msrb.mxu1 %v15635_v24  ;;  %v12800_v51 = vor.u32 %v15525_v47, %v12797_v36  ;;  %v15660_v36 = vld [vmem:[#allocation10 + $0x358] sm:$0xff]  ;;  %v15687_v47 = vld [vmem:[#allocation10 + $0x430] sm:$0xff] }
 0x270   :  { %6829 = vmatpush.bf16.msrb.mxu2 %v15655_v23  ;;  %v13003_v23 = vld [vmem:[#allocation3 + $0x18] sm:$0xf] }
 0x271   :  { %6304 = vmatpush.bf16.msra.mxu3 %v15618_v22  ;;  %v12792_v22 = vor.u32 %v15524_v41, %v12789_v28 }
 0x272   :  { %6248 = vmatpush.bf16.msra.mxu0 %v15593_v62  ;;  %v4969_v31 = vpop.f32.mrf.mxu2  ;;  %v4934_v38 = vpop.f32.mrf.mxu0  ;;  %v15663_v62 = vld [vmem:[#allocation10 + $0x370] sm:$0xff] }
 0x273   :  { %v4988_v32 = vpop.f32.mrf.mxu3  ;;  %v4970_v37 = vadd.f32 %v4969_v31, %v4951_v35  ;;  %v4953_v39 = vpop.f32.mrf.mxu1  ;;  %v4935_v43 = vadd.f32 %v4934_v38, %v16428_v3  ;;  %6342 = vmatpush.bf16.msrb.mxu1 %v15634_v30  ;;  %v15624_v31 = vld [vmem:[#allocation10 + $0x298] sm:$0xff]  ;;  %v15623_v38 = vld [vmem:[#allocation10 + $0x290] sm:$0xff] }
 0x274   :  { %6830 = vmatpush.bf16.msrb.mxu2 %v15654_v42  ;;  %v15578_v42 = vld [vmem:[#allocation3 + $0x1c] sm:$0xf] }
 0x275   :  { %6305 = vmatpush.bf16.msra.mxu3 %v15617_v34  ;;  %v16659_v49 = vadd.f32 %v4988_v32, %v4970_v37  ;;  %v4954_v56 = vadd.f32 %v4953_v39, %v4935_v43  ;;  %5713 = vmatmul.bf16.gmra.mxu0 %v12788_v10  ;;  %v13008_v30 = vor.u32 %v15578_v42, %v13005_v12  ;;  %v15649_v32 = vld [vmem:[#allocation10 + $0x300] sm:$0xff]  ;;  %v15680_v39 = vld [vmem:[#allocation10 + $0x3f8] sm:$0xff] }
 0x276   :  { %6249 = vmatpush.bf16.msra.mxu0 %v15592_v18  ;;  %5732 = vmatmul.bf16.gmra.mxu1 %v12792_v22  ;;  %v15631_v18 = vld [vmem:[#allocation10 + $0x2d0] sm:$0xff]  ;;  %v15629_v37 = vld [vmem:[#allocation10 + $0x2c0] sm:$0xff]  ;;  %v15676_v12 = vld [vmem:[#allocation10 + $0x3d8] sm:$0xff] }
 0x277   :  { %5751 = vmatmul.bf16.gmra.mxu2 %v12796_v50  ;;  %6343 = vmatpush.bf16.msrb.mxu1 %v15633_v58  ;;  %v15659_v22 = vld [vmem:[#allocation10 + $0x350] sm:$0xff]  ;;  %v15686_v50 = vld [vmem:[#allocation10 + $0x428] sm:$0xff] }
 0x278   :  { %5770 = vmatmul.bf16.gmra.mxu3 %v12800_v51  ;;  %6831 = vmatpush.bf16.msrb.mxu2 %v15653_v16  ;;  %v15586_v51 = vld [vmem:[#allocation3 + $0x174] sm:$0xf0]  ;;  %v15621_v16 = vld [vmem:[#allocation10 + $0x280] sm:$0xff] }
 0x279   :  { %6306 = vmatpush.bf16.msra.mxu3 %v15616_v8  ;;  %v12997_v8 = vld [vmem:[#allocation3 + $0x88] sm:$0xf0]  ;;  %v15582_v42 = vld [vmem:[#allocation3 + $0x94] sm:$0xf0] }
 0x27a   :  { %6250 = vmatpush.bf16.msra.mxu0 %v15591_v15  ;;  %v4972_v61 = vpop.f32.mrf.mxu2  ;;  %v4936_v54 = vpop.f32.mrf.mxu0  ;;  %v12995_v15 = vld [vmem:[#allocation3 + $0x10] sm:$0xf] }
 0x27b   :  { %v4991_v53 = vpop.f32.mrf.mxu3  ;;  %v4973_v60 = vadd.f32 %v4972_v61, %v4954_v56  ;;  %v4955_v0 = vpop.f32.mrf.mxu1  ;;  %v4937_v34 = vadd.f32 %v4936_v54, %v16428_v3  ;;  %6344 = vmatpush.bf16.msrb.mxu1 %v15632_v63  ;;  %v15581_v3 = vld [vmem:[#allocation3 + $0x8c] sm:$0xf0]  ;;  %v12996_v35 = vor.u32 %v15580_v7, %v12995_v15  ;;  %v15583_v63 = vld [vmem:[#allocation3 + $0x104] sm:$0xf] }
 0x27c   :  { %6832 = vmatpush.bf16.msrb.mxu2 %v15652_v59  ;;  %v15678_v56 = vld [vmem:[#allocation10 + $0x3e8] sm:$0xff]  ;;  %v15587_v59 = vld [vmem:[#allocation3 + $0x17c] sm:$0xf0] }
 0x27d   :  { %6307 = vmatpush.bf16.msra.mxu3 %v15615_v21  ;;  %v16662_v1 = vadd.f32 %v4991_v53, %v4973_v60  ;;  %v4956_v17 = vadd.f32 %v4955_v0, %v4937_v34  ;;  %v15577_v21 = vld [vmem:[#allocation3 + $0x14] sm:$0xf]  ;;  %v13027_v60 = vld [vmem:[#allocation3 + $0x108] sm:$0xf]  ;;  %v15584_v34 = vld [vmem:[#allocation3 + $0x10c] sm:$0xf] }
 0x27e   :  { %6251 = vmatpush.bf16.msra.mxu0 %v15590_v27  ;;  %v13000_v24 = vor.u32 %v15577_v21, %v12997_v8  ;;  %v15630_v27 = vld [vmem:[#allocation10 + $0x2c8] sm:$0xff]  ;;  %v15677_v7 = vld [vmem:[#allocation10 + $0x3e0] sm:$0xff]  ;;  %v15671_v8 = vld [vmem:[#allocation10 + $0x3b0] sm:$0xff] }
 0x27f   :  { %6345 = vmatpush.bf16.msrb.mxu1 %v15631_v18  ;;  %v15696_v18 = vld [vmem:[#allocation10 + $0x478] sm:$0xff]  ;;  %v15670_v21 = vld [vmem:[#allocation10 + $0x3a8] sm:$0xff] }
 0x280   :  { %6833 = vmatpush.bf16.msrb.mxu2 %v15651_v4  ;;  %v15672_v4 = vld [vmem:[#allocation10 + $0x3b8] sm:$0xff] }
 0x281   :  { %6308 = vmatpush.bf16.msra.mxu3 %v15614_v29  ;;  %v13004_v29 = vor.u32 %v15581_v3, %v13003_v23  ;;  %v15694_v23 = vld [vmem:[#allocation10 + $0x468] sm:$0xff] }
 0x282   :  { %6252 = vmatpush.bf16.msra.mxu0 %v15589_v48  ;;  %v4974_v11 = vpop.f32.mrf.mxu2  ;;  %v16664_v44 = vpop.f32.mrf.mxu0  ;;  %v15679_v48 = vld [vmem:[#allocation10 + $0x3f0] sm:$0xff] }
 0x283   :  { %v4993_v9 = vpop.f32.mrf.mxu3  ;;  %v4975_v13 = vadd.f32 %v4974_v11, %v4956_v17  ;;  %v16666_v14 = vpop.f32.mrf.mxu1  ;;  %6346 = vmatpush.bf16.msrb.mxu1 %v15630_v27  ;;  %v13028_v17 = vor.u32 %v15587_v59, %v13027_v60  ;;  %v15684_v11 = vld [vmem:[#allocation10 + $0x418] sm:$0xff]  ;;  %v15681_v59 = vld [vmem:[#allocation10 + $0x400] sm:$0xff] }
 0x284   :  { %6834 = vmatpush.bf16.msrb.mxu2 %v15650_v6  ;;  %v15685_v6 = vld [vmem:[#allocation10 + $0x420] sm:$0xff]  ;;  %v13013_v27 = vld [vmem:[#allocation3 + $0x98] sm:$0xf0] }
 0x285   :  { %6309 = vmatpush.bf16.msra.mxu3 %v15613_v52  ;;  %v16668_v28 = vadd.f32 %v4993_v9, %v4975_v13  ;;  %6253 = vmatmul.bf16.vlgmr.msra.gmra.mxu0 %v12996_v35  ;;  %v15658_v52 = vld [vmem:[#allocation10 + $0x348] sm:$0xff]  ;;  %v15683_v35 = vld [vmem:[#allocation10 + $0x410] sm:$0xff] }
 0x286   :  { %6321 = vmatpush.bf16.msrb.mxu0 %v15628_v55  ;;  %6272 = vmatmul.bf16.vlgmr.msra.gmra.mxu1 %v13000_v24  ;;  %v13021_v55 = vld [vmem:[#allocation3 + $0x178] sm:$0xf0]  ;;  %v15675_v24 = vld [vmem:[#allocation10 + $0x3d0] sm:$0xff] }
 0x287   :  { %6291 = vmatmul.bf16.vlgmr.msra.gmra.mxu2 %v13004_v29  ;;  %6347 = vmatpush.bf16.msrb.mxu1 %v15629_v37  ;;  %v13024_v0 = vor.u32 %v15583_v63, %v13021_v55  ;;  %v15693_v29 = vld [vmem:[#allocation10 + $0x460] sm:$0xff] }
 0x288   :  { %6310 = vmatmul.bf16.vlgmr.msra.gmra.mxu3 %v13008_v30  ;;  %6835 = vmatpush.bf16.msrb.mxu2 %v15649_v32  ;;  %v15682_v30 = vld [vmem:[#allocation10 + $0x408] sm:$0xff] }
 0x289   :  { %6847 = vmatpush.bf16.msrb.mxu3 %v15664_v57 }
 0x28a   :  { %6322 = vmatpush.bf16.msrb.mxu0 %v15627_v45  ;;  %v16670_v40 = vpop.f32.mrf.mxu2  ;;  %v16674_v43 = vpop.f32.mrf.mxu0  ;;  %v13029_v45 = vld [vmem:[#allocation3 + $0x180] sm:$0xf0] }
 0x28b   :  { %v16672_v41 = vpop.f32.mrf.mxu3  ;;  %v16676_v10 = vpop.f32.mrf.mxu1  ;;  %6885 = vmatpush.bf16.msra.mxu1 %v15680_v39  ;;  %v13011_v39 = vld [vmem:[#allocation3 + $0x20] sm:$0xf] }
 0x28c   :  { %6904 = vmatpush.bf16.msra.mxu2 %v15688_v33  ;;  %v15640_v33 = vld [vmem:[#allocation3 + $0x94] sm:$0xf0] }
 0x28d   :  { %6848 = vmatpush.bf16.msrb.mxu3 %v15663_v62  ;;  %v13019_v62 = vld [vmem:[#allocation3 + $0x100] sm:$0xf] }
 0x28e   :  { %6323 = vmatpush.bf16.msrb.mxu0 %v15626_v2  ;;  %v13020_v54 = vor.u32 %v15586_v51, %v13019_v62  ;;  %v15657_v2 = vld [vmem:[#allocation10 + $0x340] sm:$0xff]  ;;  %v15668_v51 = vld [vmem:[#allocation10 + $0x398] sm:$0xff]  ;;  %v15691_v62 = vld [vmem:[#allocation10 + $0x450] sm:$0xff] }
 0x28f   :  { %6886 = vmatpush.bf16.msra.mxu1 %v15679_v48 }
 0x290   :  { %6905 = vmatpush.bf16.msra.mxu2 %v15687_v47  ;;  %v13012_v47 = vor.u32 %v15582_v42, %v13011_v39  ;;  %v15740_v39 = vld [vmem:[#allocation10 + $0x578] sm:$0xff] }
 0x291   :  { %6849 = vmatpush.bf16.msrb.mxu3 %v15662_v5  ;;  %v13032_v5 = vor.u32 %v15584_v34, %v13029_v45  ;;  %v15667_v45 = vld [vmem:[#allocation10 + $0x390] sm:$0xff]  ;;  %v15666_v34 = vld [vmem:[#allocation10 + $0x388] sm:$0xff] }
 0x292   :  { %6324 = vmatpush.bf16.msrb.mxu0 %v15625_v26  ;;  %v16678_v57 = vpop.f32.mrf.mxu2  ;;  %v16682_v61 = vpop.f32.mrf.mxu0  ;;  %v15695_v26 = vld [vmem:[#allocation10 + $0x470] sm:$0xff] }
 0x293   :  { %v16680_v58 = vpop.f32.mrf.mxu3  ;;  %v16684_v53 = vpop.f32.mrf.mxu1  ;;  %6887 = vmatpush.bf16.msra.mxu1 %v15678_v56  ;;  %v15692_v56 = vld [vmem:[#allocation10 + $0x458] sm:$0xff] }
 0x294   :  { %6906 = vmatpush.bf16.msra.mxu2 %v15686_v50  ;;  %v15637_v50 = vld [vmem:[#allocation3 + $0x24] sm:$0xf] }
 0x295   :  { %6850 = vmatpush.bf16.msrb.mxu3 %v15661_v25  ;;  %6258 = vmatmul.bf16.gmra.mxu0 %v13020_v54  ;;  %v15669_v25 = vld [vmem:[#allocation10 + $0x3a0] sm:$0xff] }
 0x296   :  { %6325 = vmatpush.bf16.msrb.mxu0 %v15624_v31  ;;  %6277 = vmatmul.bf16.gmra.mxu1 %v13024_v0 }
 0x297   :  { %6296 = vmatmul.bf16.gmra.mxu2 %v13028_v17  ;;  %6888 = vmatpush.bf16.msra.mxu1 %v15677_v7  ;;  %v15732_v17 = vld [vmem:[#allocation10 + $0x538] sm:$0xff]  ;;  %v15665_v7 = vld [vmem:[#allocation10 + $0x380] sm:$0xff] }
 0x298   :  { %6315 = vmatmul.bf16.gmra.mxu3 %v13032_v5  ;;  %6907 = vmatpush.bf16.msra.mxu2 %v15685_v6  ;;  %v15724_v5 = vld [vmem:[#allocation10 + $0x4f8] sm:$0xff]  ;;  %v15588_v6 = vld [vmem:[#allocation3 + $0x184] sm:$0xf0] }
 0x299   :  { %6851 = vmatpush.bf16.msrb.mxu3 %v15660_v36  ;;  %v13237_v36 = vld [vmem:[#allocation3 + $0x98] sm:$0xf0] }
 0x29a   :  { %6326 = vmatpush.bf16.msrb.mxu0 %v15623_v38  ;;  %v16686_v9 = vpop.f32.mrf.mxu2  ;;  %v16690_v13 = vpop.f32.mrf.mxu0 }
 0x29b   :  { %v16688_v3 = vpop.f32.mrf.mxu3  ;;  %v16692_v15 = vpop.f32.mrf.mxu1  ;;  %6889 = vmatpush.bf16.msra.mxu1 %v15676_v12 }
 0x29c   :  { %6908 = vmatpush.bf16.msra.mxu2 %v15684_v11  ;;  %v15716_v11 = vld [vmem:[#allocation10 + $0x4b8] sm:$0xff] }
 0x29d   :  { %6852 = vmatpush.bf16.msrb.mxu3 %v15659_v22  ;;  %v15579_v22 = vld [vmem:[#allocation3 + $0x24] sm:$0xf] }
 0x29e   :  { %6327 = vmatpush.bf16.msrb.mxu0 %v15622_v46  ;;  %v13235_v46 = vld [vmem:[#allocation3 + $0x20] sm:$0xf]  ;;  %v13016_v48 = vor.u32 %v15579_v22, %v13013_v27  ;;  %v15585_v27 = vld [vmem:[#allocation3 + $0x114] sm:$0xf] }
 0x29f   :  { %6890 = vmatpush.bf16.msra.mxu1 %v15675_v24  ;;  %v13236_v55 = vor.u32 %v15640_v33, %v13235_v46  ;;  %v15723_v22 = vld [vmem:[#allocation10 + $0x4f0] sm:$0xff] }
 0x2a0   :  { %6909 = vmatpush.bf16.msra.mxu2 %v15683_v35  ;;  %v13261_v35 = vld [vmem:[#allocation3 + $0x188] sm:$0xf0] }
 0x2a1   :  { %6853 = vmatpush.bf16.msrb.mxu3 %v15658_v52  ;;  %v15674_v52 = vld [vmem:[#allocation10 + $0x3c8] sm:$0xff] }
 0x2a2   :  { %6328 = vmatpush.bf16.msrb.mxu0 %v15621_v16  ;;  %v16694_v31 = vpop.f32.mrf.mxu2  ;;  %v16698_v37 = vpop.f32.mrf.mxu0  ;;  %v13240_v16 = vor.u32 %v15637_v50, %v13237_v36  ;;  %v15643_v36 = vld [vmem:[#allocation3 + $0x114] sm:$0xf]  ;;  %v15730_v50 = vld [vmem:[#allocation10 + $0x528] sm:$0xff] }
 0x2a3   :  { %v16696_v32 = vpop.f32.mrf.mxu3  ;;  %v16700_v38 = vpop.f32.mrf.mxu1  ;;  %6891 = vmatpush.bf16.msra.mxu1 %v15674_v52 }
 0x2a4   :  { %6910 = vmatpush.bf16.msra.mxu2 %v15682_v30 }
 0x2a5   :  { %6854 = vmatpush.bf16.msrb.mxu3 %v15657_v2  ;;  %6329 = vmatmul.bf16.vlgmr.msrb.gmra.mxu0 %v13012_v47  ;;  %v15673_v2 = vld [vmem:[#allocation10 + $0x3c0] sm:$0xff]  ;;  %v13264_v47 = vor.u32 %v15643_v36, %v13261_v35 }
 0x2a6   :  { %6866 = vmatpush.bf16.msra.mxu0 %v15672_v4  ;;  %6348 = vmatmul.bf16.vlgmr.msrb.gmra.mxu1 %v13016_v48  ;;  %v15690_v4 = vld [vmem:[#allocation10 + $0x448] sm:$0xff]  ;;  %v15715_v48 = vld [vmem:[#allocation10 + $0x4b0] sm:$0xff] }
 0x2a7   :  { %6836 = vmatmul.bf16.vlgmr.msrb.gmra.mxu2 %v13236_v55  ;;  %6892 = vmatpush.bf16.msra.mxu1 %v15673_v2  ;;  %v15739_v55 = vld [vmem:[#allocation10 + $0x570] sm:$0xff]  ;;  %v13243_v35 = vld [vmem:[#allocation3 + $0x28] sm:$0xf] }
 0x2a8   :  { %6855 = vmatmul.bf16.vlgmr.msrb.gmra.mxu3 %v13240_v16  ;;  %6911 = vmatpush.bf16.msra.mxu2 %v15681_v59  ;;  %v15722_v16 = vld [vmem:[#allocation10 + $0x4e8] sm:$0xff]  ;;  %v15729_v59 = vld [vmem:[#allocation10 + $0x520] sm:$0xff] }
 0x2a9   :  { %6923 = vmatpush.bf16.msra.mxu3 %v15696_v18  ;;  %v15731_v18 = vld [vmem:[#allocation10 + $0x530] sm:$0xff] }
 0x2aa   :  { %6867 = vmatpush.bf16.msra.mxu0 %v15671_v8  ;;  %v16702_v63 = vpop.f32.mrf.mxu2  ;;  %v16706_v54 = vpop.f32.mrf.mxu0  ;;  %v13037_v8 = vld [vmem:[#allocation3 + $0x188] sm:$0xf0] }
 0x2ab   :  { %v16704_v60 = vpop.f32.mrf.mxu3  ;;  %v16708_v0 = vpop.f32.mrf.mxu1  ;;  %7430 = vmatpush.bf16.msrb.mxu1 %v15724_v5  ;;  %v13040_v33 = vor.u32 %v15585_v27, %v13037_v8  ;;  %v15728_v5 = vld [vmem:[#allocation10 + $0x518] sm:$0xff]  ;;  %v15727_v27 = vld [vmem:[#allocation10 + $0x510] sm:$0xff] }
 0x2ac   :  { %7449 = vmatpush.bf16.msrb.mxu2 %v15732_v17  ;;  %v15713_v17 = vld [vmem:[#allocation10 + $0x4a0] sm:$0xff] }
 0x2ad   :  { %6924 = vmatpush.bf16.msra.mxu3 %v15695_v26  ;;  %v15689_v26 = vld [vmem:[#allocation10 + $0x440] sm:$0xff] }
 0x2ae   :  { %6868 = vmatpush.bf16.msra.mxu0 %v15670_v21  ;;  %v15641_v8 = vld [vmem:[#allocation3 + $0x9c] sm:$0xf0] }
 0x2af   :  { %7431 = vmatpush.bf16.msrb.mxu1 %v15723_v22 }
 0x2b0   :  { %7450 = vmatpush.bf16.msrb.mxu2 %v15731_v18  ;;  %v5006_v18 = vadd.f32 %v16664_v44, %v16656_v20 }
 0x2b1   :  { %6925 = vmatpush.bf16.msra.mxu3 %v15694_v23  ;;  %v15646_v23 = vld [vmem:[#allocation3 + $0x184] sm:$0xf0] }
 0x2b2   :  { %6869 = vmatpush.bf16.msra.mxu0 %v15669_v25  ;;  %v16710_v12 = vpop.f32.mrf.mxu2  ;;  %v16714_v24 = vpop.f32.mrf.mxu0  ;;  %v13035_v25 = vld [vmem:[#allocation3 + $0x110] sm:$0xf]  ;;  %v5025_v20 = vadd.f32 %v16666_v14, %v5006_v18  ;;  %v15639_v14 = vld [vmem:[#allocation3 + $0x34] sm:$0xf]  ;;  %v15725_v18 = vld [vmem:[#allocation10 + $0x500] sm:$0xff] }
 0x2b3   :  { %v16712_v21 = vpop.f32.mrf.mxu3  ;;  %v16716_v42 = vpop.f32.mrf.mxu1  ;;  %v13036_v30 = vor.u32 %v15588_v6, %v13035_v25  ;;  %7432 = vmatpush.bf16.msrb.mxu1 %v15722_v16  ;;  %v5065_v6 = vadd.f32 %v16680_v58, %v16431_v19  ;;  %v15712_v25 = vld [vmem:[#allocation10 + $0x498] sm:$0xff] }
 0x2b4   :  { %7451 = vmatpush.bf16.msrb.mxu2 %v15730_v50 }
 0x2b5   :  { %6926 = vmatpush.bf16.msra.mxu3 %v15693_v29  ;;  %v13259_v29 = vld [vmem:[#allocation3 + $0x110] sm:$0xf]  ;;  %6334 = vmatmul.bf16.gmra.mxu0 %v13036_v30  ;;  %v13253_v30 = vld [vmem:[#allocation3 + $0xa8] sm:$0xf0] }
 0x2b6   :  { %6870 = vmatpush.bf16.msra.mxu0 %v15668_v51  ;;  %v13260_v46 = vor.u32 %v15646_v23, %v13259_v29  ;;  %v5063_v51 = vadd.f32 %v16672_v41, %v16431_v19  ;;  %6353 = vmatmul.bf16.gmra.mxu1 %v13040_v33  ;;  %v15720_v23 = vld [vmem:[#allocation10 + $0x4d8] sm:$0xff]  ;;  %v15638_v29 = vld [vmem:[#allocation3 + $0x2c] sm:$0xf]  ;;  %v13256_v16 = vor.u32 %v15639_v14, %v13253_v30 }
 0x2b8   :  { %6841 = vmatmul.bf16.gmra.mxu2 %v13260_v46  ;;  %6860 = vmatmul.bf16.gmra.mxu3 %v13264_v47  ;;  %v5082_v52 = vadd.f32 %v16698_v37, %v5063_v51  ;;  %v15738_v37 = vld [vmem:[#allocation10 + $0x568] sm:$0xff]  ;;  %v5044_v47 = vadd.f32 %v16670_v40, %v5025_v20  ;;  %v15719_v51 = vld [vmem:[#allocation10 + $0x4d0] sm:$0xff]  ;;  %v5068_v40 = vadd.f32 %v16688_v3, %v16431_v19 }
 0x2b9   :  { %6927 = vmatpush.bf16.msra.mxu3 %v15692_v56  ;;  %v15714_v56 = vld [vmem:[#allocation10 + $0x4a8] sm:$0xff]  ;;  %7452 = vmatpush.bf16.msrb.mxu2 %v15729_v59  ;;  %v5011_v20 = vadd.f32 %v16682_v61, %v16662_v1  ;;  %v15784_v1 = vld [vmem:[#allocation10 + $0x678] sm:$0xff] }
 0x2ba   :  { %6871 = vmatpush.bf16.msra.mxu0 %v15667_v45  ;;  %v16721_v45 = vpop.f32.mrf.mxu2  ;;  %v5101_v2 = vadd.f32 %v16700_v38, %v5082_v52  ;;  %v13245_v38 = vld [vmem:[#allocation3 + $0xa0] sm:$0xf0]  ;;  %v13251_v46 = vld [vmem:[#allocation3 + $0x30] sm:$0xf]  ;;  %v5008_v52 = vadd.f32 %v16674_v43, %v16659_v49 }
 0x2bb   :  { %v16727_v41 = vpop.f32.mrf.mxu1  ;;  %v13248_v22 = vor.u32 %v15638_v29, %v13245_v38  ;;  %v15726_v59 = vld [vmem:[#allocation10 + $0x508] sm:$0xff]  ;;  %v15735_v43 = vld [vmem:[#allocation10 + $0x550] sm:$0xff] }
 0x2bc   :  { %v5027_v3 = vadd.f32 %v16676_v10, %v5008_v52  ;;  %v15717_v10 = vld [vmem:[#allocation10 + $0x4c0] sm:$0xff] }
 0x2bd   :  { %6928 = vmatpush.bf16.msra.mxu3 %v15691_v62  ;;  %v16723_v62 = vpop.f32.mrf.mxu3  ;;  %7453 = vmatpush.bf16.msrb.mxu2 %v15728_v5  ;;  %v15710_v5 = vld [vmem:[#allocation10 + $0x488] sm:$0xff] }
 0x2be   :  { %6872 = vmatpush.bf16.msra.mxu0 %v15666_v34  ;;  %v16725_v34 = vpop.f32.mrf.mxu0 }
 0x2c1   :  { %6929 = vmatpush.bf16.msra.mxu3 %v15690_v4  ;;  %v15721_v4 = vld [vmem:[#allocation10 + $0x4e0] sm:$0xff]  ;;  %7454 = vmatpush.bf16.msrb.mxu2 %v15727_v27  ;;  %v15756_v27 = vld [vmem:[#allocation10 + $0x5f8] sm:$0xff] }
 0x2c2   :  { %6873 = vmatpush.bf16.msra.mxu0 %v15665_v7  ;;  %v5120_v7 = vadd.f32 %v16702_v63, %v5101_v2  ;;  %7433 = vmatpush.bf16.msrb.mxu1 %v15721_v4  ;;  %v16738_v58 = vpop.f32.mrf.mxu2  ;;  %v5087_v4 = vadd.f32 %v16714_v24, %v5068_v40  ;;  %v15747_v40 = vld [vmem:[#allocation10 + $0x5b0] sm:$0xff] }
 0x2c3   :  { %v5176_v36 = vpop.f32.mrf.mxu1 }
 0x2c4   :  { %v5139_v44 = vadd.f32 %v16704_v60, %v5120_v7  ;;  %v15736_v60 = vld [vmem:[#allocation10 + $0x558] sm:$0xff] }
 0x2c5   :  { %6930 = vmatpush.bf16.msra.mxu3 %v15689_v26  ;;  %v5084_v26 = vadd.f32 %v16706_v54, %v5065_v6  ;;  %v16740_v63 = vpop.f32.mrf.mxu3  ;;  %v15642_v54 = vld [vmem:[#allocation3 + $0xa4] sm:$0xf0]  ;;  %7455 = vmatpush.bf16.msrb.mxu2 %v15726_v59  ;;  %v15645_v59 = vld [vmem:[#allocation3 + $0x124] sm:$0xf] }
 0x2c6   :  { %7411 = vmatpush.bf16.msrb.mxu0 %v15716_v11  ;;  %v15737_v11 = vld [vmem:[#allocation10 + $0x560] sm:$0xff]  ;;  %v5157_v33 = vpop.f32.mrf.mxu0  ;;  %7434 = vmatpush.bf16.msrb.mxu1 %v15720_v23  ;;  %v5106_v23 = vadd.f32 %v16716_v42, %v5087_v4  ;;  %v15748_v42 = vld [vmem:[#allocation10 + $0x5b8] sm:$0xff]  ;;  %v15783_v4 = vld [vmem:[#allocation10 + $0x670] sm:$0xff] }
 0x2c7   :  { %v5158_v50 = vadd.f32 %v5157_v33, %v5139_v44  ;;  %6893 = vmatmul.bf16.vlgmr.msra.gmra.mxu1 %v13248_v22  ;;  %v5070_v44 = vadd.f32 %v16696_v32, %v16431_v19  ;;  %v15733_v22 = vld [vmem:[#allocation10 + $0x540] sm:$0xff]  ;;  %v5030_v19 = vadd.f32 %v16684_v53, %v5011_v20 }
 0x2c8   :  { %6931 = vmatmul.bf16.vlgmr.msra.gmra.mxu3 %v13256_v16  ;;  %v15775_v16 = vld [vmem:[#allocation10 + $0x630] sm:$0xff] }
 0x2c9   :  { %7468 = vmatpush.bf16.msrb.mxu3 %v15740_v39  ;;  %v13244_v39 = vor.u32 %v15641_v8, %v13243_v35  ;;  %v5177_v2 = vadd.f32 %v5176_v36, %v5158_v50  ;;  %7456 = vmatpush.bf16.msrb.mxu2 %v15725_v18  ;;  %v5089_v33 = vadd.f32 %v16725_v34, %v5070_v44  ;;  %v15648_v34 = vld [vmem:[#allocation3 + $0x194] sm:$0xf0]  ;;  %v13277_v50 = vld [vmem:[#allocation3 + $0x198] sm:$0xf0]  ;;  %v15746_v18 = vld [vmem:[#allocation10 + $0x5a8] sm:$0xff] }
 0x2ca   :  { %7412 = vmatpush.bf16.msrb.mxu0 %v15715_v48  ;;  %v5103_v48 = vadd.f32 %v16708_v0, %v5084_v26  ;;  %7435 = vmatpush.bf16.msrb.mxu1 %v15719_v51  ;;  %v16752_v7 = vpop.f32.mrf.mxu2  ;;  %v15776_v26 = vld [vmem:[#allocation10 + $0x638] sm:$0xff] }
 0x2cb   :  { %6874 = vmatmul.bf16.vlgmr.msra.gmra.mxu0 %v13244_v39  ;;  %v5187_v49 = vmax.f32 %v5177_v2, 0.0  ;;  %v5178_v38 = vpop.f32.mrf.mxu1  ;;  %v13269_v39 = vld [vmem:[#allocation3 + $0x190] sm:$0xf0]  ;;  %v5108_v53 = vadd.f32 %v16727_v41, %v5089_v33 }
 0x2cc   :  { %v5122_v0 = vadd.f32 %v16710_v12, %v5103_v48  ;;  %v15644_v48 = vld [vmem:[#allocation3 + $0x11c] sm:$0xf] }
 0x2cd   :  { %7469 = vmatpush.bf16.msrb.mxu3 %v15739_v55  ;;  %v13252_v55 = vor.u32 %v15642_v54, %v13251_v46  ;;  %v16754_v8 = vpop.f32.mrf.mxu3  ;;  %v15647_v54 = vld [vmem:[#allocation3 + $0x18c] sm:$0xf0]  ;;  %v13267_v46 = vld [vmem:[#allocation3 + $0x118] sm:$0xf]  ;;  %v13272_v52 = vor.u32 %v15644_v48, %v13269_v39 }
 0x2ce   :  { %7413 = vmatpush.bf16.msrb.mxu0 %v15714_v56  ;;  %v15711_v56 = vld [vmem:[#allocation10 + $0x490] sm:$0xff]  ;;  %v5141_v12 = vadd.f32 %v16712_v21, %v5122_v0  ;;  %v5159_v24 = vpop.f32.mrf.mxu0  ;;  %v15709_v21 = vld [vmem:[#allocation10 + $0x480] sm:$0xff]  ;;  %v13268_v51 = vor.u32 %v15647_v54, %v13267_v46  ;;  %v13477_v54 = vld [vmem:[#allocation3 + $0xa8] sm:$0xf0] }
 0x2cf   :  { %6912 = vmatmul.bf16.vlgmr.msra.gmra.mxu2 %v13252_v55  ;;  %v13275_v55 = vld [vmem:[#allocation3 + $0x120] sm:$0xf]  ;;  %v15755_v0 = vld [vmem:[#allocation10 + $0x5f0] sm:$0xff] }
 0x2d0   :  { %v5160_v35 = vadd.f32 %v5159_v24, %v5141_v12  ;;  %7994 = vmatpush.bf16.msra.mxu2 %v15776_v26  ;;  %v13276_v2 = vor.u32 %v15648_v34, %v13275_v55  ;;  %v15782_v12 = vld [vmem:[#allocation10 + $0x668] sm:$0xff]  ;;  %v16781_v24 = vld [vmem:[#allocation12] ss:$0 sm:$0xff]  ;;  %v13483_v48 = vld [vmem:[#allocation3 + $0x38] sm:$0xf] }
 0x2d1   :  { %7470 = vmatpush.bf16.msrb.mxu3 %v15738_v37  ;;  %v5186_v37 = vmax.f32 %v5044_v47, 0.0  ;;  %v5672_v20 = vadd.f32 %v16781_v24, %v16752_v7  ;;  %v15701_v46 = vld [vmem:[#allocation3 + $0xac] sm:$0xf0] }
 0x2d2   :  { %7414 = vmatpush.bf16.msrb.mxu0 %v15713_v17  ;;  %v15718_v17 = vld [vmem:[#allocation10 + $0x4c8] sm:$0xff]  ;;  %v5179_v29 = vadd.f32 %v5178_v38, %v5160_v35  ;;  %v15771_v34 = vld [vmem:[#allocation10 + $0x610] sm:$0xff] }
 0x2d3   :  { %v5194_v6 = vpack.c.bf16 %v5187_v49, %v5186_v37  ;;  %7436 = vmatpush.bf16.msrb.mxu1 %v15718_v17  ;;  %v13280_v37 = vor.u32 %v15645_v59, %v13277_v50  ;;  %v15774_v49 = vld [vmem:[#allocation10 + $0x628] sm:$0xff]  ;;  %v5127_v17 = vadd.f32 %v16738_v58, %v5108_v53  ;;  %v5691_v7 = vadd.f32 %v16754_v8, %v5672_v20  ;;  %v15779_v53 = vld [vmem:[#allocation10 + $0x650] sm:$0xff]  ;;  %v13499_v20 = vld [vmem:[#allocation3 + $0x120] sm:$0xf] }
 0x2d4   :  { %v5189_v36 = vmax.f32 %v5179_v29, 0.0  ;;  %7995 = vmatpush.bf16.msra.mxu2 %v15775_v16  ;;  %v15744_v29 = vld [vmem:[#allocation10 + $0x598] sm:$0xff]  ;;  %v13484_v16 = vor.u32 %v15701_v46, %v13483_v48  ;;  %v15770_v8 = vld [vmem:[#allocation10 + $0x608] sm:$0xff] }
 0x2d5   :  { %7471 = vmatpush.bf16.msrb.mxu3 %v15737_v11  ;;  %v5046_v11 = vadd.f32 %v16678_v57, %v5027_v3  ;;  %5198 = vst [vmem:[#allocation3 + $0x70] sm:$0xff] %v5194_v6  ;;  %v5125_v57 = vadd.f32 %v16721_v45, %v5106_v23  ;;  %v16766_v45 = vpop.f32.mrf.mxu2  ;;  %v16768_v47 = vpop.f32.mrf.mxu3  ;;  %v15754_v3 = vld [vmem:[#allocation10 + $0x5e8] sm:$0xff]  ;;  %v15773_v23 = vld [vmem:[#allocation10 + $0x620] sm:$0xff] }
 0x2d6   :  { %7415 = vmatpush.bf16.msrb.mxu0 %v15712_v25  ;;  %v15734_v25 = vld [vmem:[#allocation10 + $0x548] sm:$0xff]  ;;  %v5162_v14 = vpop.f32.mrf.mxu0 }
 0x2d7   :  { %v5188_v30 = vmax.f32 %v5046_v11, 0.0  ;;  %7437 = vmatpush.bf16.msrb.mxu1 %v15717_v10  ;;  %v5144_v61 = vadd.f32 %v16723_v62, %v5125_v57  ;;  %v15745_v10 = vld [vmem:[#allocation10 + $0x5a0] sm:$0xff]  ;;  %v15742_v59 = vld [vmem:[#allocation10 + $0x588] sm:$0xff] }
 0x2d8   :  { %6898 = vmatmul.bf16.gmra.mxu1 %v13272_v52  ;;  %6936 = vmatmul.bf16.gmra.mxu3 %v13280_v37  ;;  %v15751_v52 = vld [vmem:[#allocation10 + $0x5d0] sm:$0xff]  ;;  %v15704_v46 = vld [vmem:[#allocation3 + $0x12c] sm:$0xf] }
 0x2d9   :  { %7472 = vmatpush.bf16.msrb.mxu3 %v15736_v60  ;;  %v5195_v32 = vpack.c.bf16 %v5189_v36, %v5188_v30  ;;  %v5181_v60 = vpop.f32.mrf.mxu1  ;;  %v5163_v62 = vadd.f32 %v5162_v14, %v5144_v61  ;;  %7996 = vmatpush.bf16.msra.mxu2 %v15774_v49  ;;  %v15780_v30 = vld [vmem:[#allocation10 + $0x658] sm:$0xff] }
 0x2da   :  { %7416 = vmatpush.bf16.msrb.mxu0 %v15711_v56  ;;  %v5049_v56 = vadd.f32 %v16686_v9, %v5030_v19 }
 0x2db   :  { %7506 = vmatpush.bf16.msra.mxu1 %v15756_v27  ;;  %5199 = vst [vmem:[#allocation3 + $0xe8] sm:$0xff] %v5195_v32  ;;  %v5182_v9 = vadd.f32 %v5181_v60, %v5163_v62  ;;  %6879 = vmatmul.bf16.gmra.mxu0 %v13268_v51  ;;  %v15697_v32 = vld [vmem:[#allocation3 + $0x34] sm:$0xf]  ;;  %v15698_v60 = vld [vmem:[#allocation3 + $0x3c] sm:$0xf]  ;;  %v5674_v62 = vadd.f32 %v16781_v24, %v16766_v45  ;;  %v15741_v45 = vld [vmem:[#allocation10 + $0x580] sm:$0xff] }
 0x2dc   :  { %v5190_v41 = vmax.f32 %v5049_v56, 0.0  ;;  %v13480_v14 = vor.u32 %v15697_v32, %v13477_v54  ;;  %v15743_v51 = vld [vmem:[#allocation10 + $0x590] sm:$0xff]  ;;  %v15703_v54 = vld [vmem:[#allocation3 + $0x124] sm:$0xf] }
 0x2dd   :  { %7473 = vmatpush.bf16.msrb.mxu3 %v15735_v43  ;;  %v5013_v43 = vadd.f32 %v16690_v13, %v16668_v28  ;;  %v5146_v28 = vadd.f32 %v16740_v63, %v5127_v17  ;;  %v16777_v58 = vpop.f32.mrf.mxu2  ;;  %v16779_v26 = vpop.f32.mrf.mxu3  ;;  %7997 = vmatpush.bf16.msra.mxu2 %v15773_v23  ;;  %v15781_v63 = vld [vmem:[#allocation10 + $0x660] sm:$0xff]  ;;  %v5693_v49 = vadd.f32 %v16768_v47, %v5674_v62  ;;  %v15807_v23 = vld [vmem:[#allocation10 + $0x730] sm:$0xff] }
 0x2de   :  { %7417 = vmatpush.bf16.msrb.mxu0 %v15710_v5  ;;  %v5191_v5 = vmax.f32 %v5182_v9, 0.0  ;;  %v5164_v38 = vpop.f32.mrf.mxu0  ;;  %v5677_v47 = vadd.f32 %v16781_v24, %v16777_v58 }
 0x2df   :  { %6917 = vmatmul.bf16.gmra.mxu2 %v13276_v2  ;;  %7507 = vmatpush.bf16.msra.mxu1 %v15755_v0  ;;  %v5032_v6 = vadd.f32 %v16692_v15, %v5013_v43  ;;  %v15753_v15 = vld [vmem:[#allocation10 + $0x5e0] sm:$0xff]  ;;  %v15778_v2 = vld [vmem:[#allocation10 + $0x648] sm:$0xff] }
 0x2e0   :  { %v5196_v13 = vpack.c.bf16 %v5191_v5, %v5190_v41  ;;  %v15769_v41 = vld [vmem:[#allocation10 + $0x600] sm:$0xff]  ;;  %v5696_v58 = vadd.f32 %v16779_v26, %v5677_v47  ;;  %v13717_v47 = vld [vmem:[#allocation3 + $0xb8] sm:$0xf0] }
 0x2e1   :  { %7474 = vmatpush.bf16.msrb.mxu3 %v15734_v25  ;;  %v5183_v11 = vpop.f32.mrf.mxu1  ;;  %v5051_v35 = vadd.f32 %v16694_v31, %v5032_v6  ;;  %v5165_v25 = vadd.f32 %v5164_v38, %v5146_v28  ;;  %v15752_v31 = vld [vmem:[#allocation10 + $0x5d8] sm:$0xff]  ;;  %v15749_v5 = vld [vmem:[#allocation10 + $0x5c0] sm:$0xff] }
 0x2e2   :  { %7418 = vmatpush.bf16.msrb.mxu0 %v15709_v21  ;;  %5200 = vst [vmem:[#allocation3 + $0x160] sm:$0xff] %v5196_v13  ;;  %v15772_v21 = vld [vmem:[#allocation10 + $0x618] sm:$0xff]  ;;  %v15777_v6 = vld [vmem:[#allocation10 + $0x640] sm:$0xff] }
 0x2e3   :  { %7508 = vmatpush.bf16.msra.mxu1 %v15754_v3  ;;  %v5184_v27 = vadd.f32 %v5183_v11, %v5165_v25  ;;  %v5192_v44 = vmax.f32 %v5051_v35, 0.0  ;;  %7998 = vmatpush.bf16.msra.mxu2 %v15772_v21  ;;  %v15792_v28 = vld [vmem:[#allocation10 + $0x6b8] sm:$0xff] }
 0x2e4   :  { %v15800_v13 = vld [vmem:[#allocation10 + $0x6f8] sm:$0xff] }
 0x2e5   :  { %7475 = vmatpush.bf16.msrb.mxu3 %v15733_v22  ;;  %v5193_v57 = vmax.f32 %v5184_v27, 0.0  ;;  %v16786_v36 = vpop.f32.mrf.mxu2  ;;  %v16788_v39 = vpop.f32.mrf.mxu3  ;;  %v13475_v22 = vld [vmem:[#allocation3 + $0x30] sm:$0xf]  ;;  %v15816_v38 = vld [vmem:[#allocation10 + $0x778] sm:$0xff] }
 0x2e6   :  { %7487 = vmatpush.bf16.msra.mxu0 %v15748_v42  ;;  %v15700_v42 = vld [vmem:[#allocation3 + $0xa4] sm:$0xf0]  ;;  %v5709_v19 = vpop.f32.mrf.mxu0  ;;  %v5679_v26 = vadd.f32 %v16781_v24, %v16786_v36 }
 0x2e7   :  { %7509 = vmatpush.bf16.msra.mxu1 %v15753_v15  ;;  %v5197_v33 = vpack.c.bf16 %v5193_v57, %v5192_v44  ;;  %v13476_v50 = vor.u32 %v15700_v42, %v13475_v22  ;;  %v5710_v55 = vadd.f32 %v5709_v19, %v5691_v7  ;;  %7999 = vmatpush.bf16.msra.mxu2 %v15771_v34  ;;  %v13501_v15 = vld [vmem:[#allocation3 + $0x198] sm:$0xf0]  ;;  %v15707_v44 = vld [vmem:[#allocation3 + $0x19c] sm:$0xf0]  ;;  %v13509_v57 = vld [vmem:[#allocation3 + $0x1a0] sm:$0xf0] }
 0x2e8   :  { %7438 = vmatmul.bf16.vlgmr.msrb.gmra.mxu1 %v13480_v14  ;;  %v13504_v22 = vor.u32 %v15703_v54, %v13501_v15  ;;  %v15815_v7 = vld [vmem:[#allocation10 + $0x770] sm:$0xff]  ;;  %v13512_v48 = vor.u32 %v15704_v46, %v13509_v57  ;;  %v15806_v34 = vld [vmem:[#allocation10 + $0x728] sm:$0xff]  ;;  %v5698_v62 = vadd.f32 %v16788_v39, %v5679_v26  ;;  %v15812_v39 = vld [vmem:[#allocation10 + $0x758] sm:$0xff] }
 0x2e9   :  { %8013 = vmatpush.bf16.msra.mxu3 %v15784_v1  ;;  %v13485_v1 = vld [vmem:[#allocation3 + $0xb0] sm:$0xf0]  ;;  %v5728_v61 = vpop.f32.mrf.mxu1  ;;  %5201 = vst [vmem:[#allocation3 + $0x1d8] sm:$0xff] %v5197_v33  ;;  %v15794_v54 = vld [vmem:[#allocation10 + $0x6c8] sm:$0xff]  ;;  %v15844_v26 = vld [vmem:[#allocation10 + $0x7f8] sm:$0xff] }
 0x2ea   :  { %7488 = vmatpush.bf16.msra.mxu0 %v15747_v40  ;;  %v13488_v56 = vor.u32 %v15698_v60, %v13485_v1  ;;  %v15750_v40 = vld [vmem:[#allocation10 + $0x5c8] sm:$0xff]  ;;  %v5729_v0 = vadd.f32 %v5728_v61, %v5710_v55  ;;  %v15799_v1 = vld [vmem:[#allocation10 + $0x6f0] sm:$0xff] }
 0x2eb   :  { %7510 = vmatpush.bf16.msra.mxu1 %v15752_v31  ;;  %7419 = vmatmul.bf16.vlgmr.msrb.gmra.mxu0 %v13476_v50  ;;  %v15790_v50 = vld [vmem:[#allocation10 + $0x6a8] sm:$0xff] }
 0x2ec   :  { %7476 = vmatmul.bf16.vlgmr.msrb.gmra.mxu3 %v13488_v56  ;;  %8000 = vmatpush.bf16.msra.mxu2 %v15770_v8  ;;  %v15798_v60 = vld [vmem:[#allocation10 + $0x6e8] sm:$0xff]  ;;  %v15789_v56 = vld [vmem:[#allocation10 + $0x6a0] sm:$0xff] }
 0x2ed   :  { %8014 = vmatpush.bf16.msra.mxu3 %v15783_v4  ;;  %v5747_v37 = vpop.f32.mrf.mxu2  ;;  %v5766_v4 = vpop.f32.mrf.mxu3 }
 0x2ee   :  { %7489 = vmatpush.bf16.msra.mxu0 %v15746_v18  ;;  %v5748_v43 = vadd.f32 %v5747_v37, %v5729_v0  ;;  %v5711_v17 = vpop.f32.mrf.mxu0  ;;  %v15808_v18 = vld [vmem:[#allocation10 + $0x738] sm:$0xff]  ;;  %v15797_v0 = vld [vmem:[#allocation10 + $0x6e0] sm:$0xff] }
 0x2ef   :  { %7457 = vmatmul.bf16.vlgmr.msrb.gmra.mxu2 %v13484_v16  ;;  %7511 = vmatpush.bf16.msra.mxu1 %v15751_v52  ;;  %v15805_v16 = vld [vmem:[#allocation10 + $0x720] sm:$0xff] }
 0x2f0   :  { %v5767_v3 = vadd.f32 %v5766_v4, %v5748_v43  ;;  %8001 = vmatpush.bf16.msra.mxu2 %v15769_v41  ;;  %v15788_v43 = vld [vmem:[#allocation10 + $0x698] sm:$0xff] }
 0x2f1   :  { %8015 = vmatpush.bf16.msra.mxu3 %v15782_v12  ;;  %v5730_v9 = vpop.f32.mrf.mxu1  ;;  %v5712_v12 = vadd.f32 %v5711_v17, %v5693_v49  ;;  %v15804_v49 = vld [vmem:[#allocation10 + $0x718] sm:$0xff] }
 0x2f2   :  { %7490 = vmatpush.bf16.msra.mxu0 %v15745_v10  ;;  %v5776_v11 = vmax.f32 %v5767_v3, 0.0  ;;  %v15706_v10 = vld [vmem:[#allocation3 + $0x194] sm:$0xf0] }
 0x2f3   :  { %7512 = vmatpush.bf16.msra.mxu1 %v15750_v40  ;;  %v5731_v25 = vadd.f32 %v5730_v9, %v5712_v12  ;;  %v13500_v33 = vor.u32 %v15706_v10, %v13499_v20  ;;  %v15702_v9 = vld [vmem:[#allocation3 + $0xb4] sm:$0xf0]  ;;  %v13715_v10 = vld [vmem:[#allocation3 + $0x40] sm:$0xf] }
 0x2f4   :  { %8070 = vmatpush.bf16.msrb.mxu2 %v15808_v18  ;;  %v5780_v35 = vpack.c.bf16 %v5776_v11, %v5776_v11  ;;  %v15796_v41 = vld [vmem:[#allocation10 + $0x6d8] sm:$0xff]  ;;  %v15803_v3 = vld [vmem:[#allocation10 + $0x710] sm:$0xff] }
 0x2f5   :  { %8016 = vmatpush.bf16.msra.mxu3 %v15781_v63  ;;  %v15791_v63 = vld [vmem:[#allocation10 + $0x6b0] sm:$0xff]  ;;  %v5749_v21 = vpop.f32.mrf.mxu2  ;;  %v5768_v27 = vpop.f32.mrf.mxu3  ;;  %v13493_v18 = vld [vmem:[#allocation3 + $0xb8] sm:$0xf0] }
 0x2f6   :  { %7491 = vmatpush.bf16.msra.mxu0 %v15744_v29  ;;  %5784 = vst [vmem:[#allocation4] sm:$0xf] %v5780_v35  ;;  %v5750_v29 = vadd.f32 %v5749_v21, %v5731_v25  ;;  %v5714_v31 = vpop.f32.mrf.mxu0  ;;  %v15787_v12 = vld [vmem:[#allocation10 + $0x690] sm:$0xff]  ;;  %v15699_v25 = vld [vmem:[#allocation3 + $0x44] sm:$0xf] }
 0x2f7   :  { %7513 = vmatpush.bf16.msra.mxu1 %v15749_v5  ;;  %v5715_v61 = vadd.f32 %v5714_v31, %v5696_v58  ;;  %v15757_v21 = vld [vmem:[#allocation3 + $0x44] sm:$0xf]  ;;  %v15811_v20 = vld [vmem:[#allocation10 + $0x750] sm:$0xff]  ;;  %v15786_v31 = vld [vmem:[#allocation10 + $0x688] sm:$0xff] }
 0x2f8   :  { %8071 = vmatpush.bf16.msrb.mxu2 %v15807_v23  ;;  %v5769_v19 = vadd.f32 %v5768_v27, %v5750_v29  ;;  %7443 = vmatmul.bf16.gmra.mxu1 %v13504_v22  ;;  %v15795_v27 = vld [vmem:[#allocation10 + $0x6d0] sm:$0xff]  ;;  %v13720_v58 = vor.u32 %v15757_v21, %v13717_v47  ;;  %v15802_v29 = vld [vmem:[#allocation10 + $0x708] sm:$0xff]  ;;  %v15801_v22 = vld [vmem:[#allocation10 + $0x700] sm:$0xff] }
 0x2f9   :  { %8017 = vmatpush.bf16.msra.mxu3 %v15780_v30  ;;  %v5733_v42 = vpop.f32.mrf.mxu1  ;;  %v13507_v30 = vld [vmem:[#allocation3 + $0x128] sm:$0xf]  ;;  %v15832_v21 = vld [vmem:[#allocation10 + $0x798] sm:$0xff] }
 0x2fa   :  { %7492 = vmatpush.bf16.msra.mxu0 %v15743_v51  ;;  %v13508_v32 = vor.u32 %v15707_v44, %v13507_v30  ;;  %v5777_v14 = vmax.f32 %v5769_v19, 0.0  ;;  %v15814_v51 = vld [vmem:[#allocation10 + $0x768] sm:$0xff]  ;;  %v5734_v55 = vadd.f32 %v5733_v42, %v5715_v61  ;;  %v15785_v61 = vld [vmem:[#allocation10 + $0x680] sm:$0xff] }
 0x2fb   :  { %8051 = vmatpush.bf16.msrb.mxu1 %v15800_v13  ;;  %7424 = vmatmul.bf16.gmra.mxu0 %v13500_v33  ;;  %v13491_v13 = vld [vmem:[#allocation3 + $0x40] sm:$0xf]  ;;  %v15810_v30 = vld [vmem:[#allocation10 + $0x748] sm:$0xff] }
 0x2fc   :  { %7481 = vmatmul.bf16.gmra.mxu3 %v13512_v48  ;;  %v5781_v52 = vpack.c.bf16 %v5777_v14, %v5777_v14  ;;  %8072 = vmatpush.bf16.msrb.mxu2 %v15806_v34  ;;  %v13492_v15 = vor.u32 %v15702_v9, %v13491_v13  ;;  %v15809_v48 = vld [vmem:[#allocation10 + $0x740] sm:$0xff]  ;;  %v15852_v34 = vld [vmem:[#allocation10 + $0x838] sm:$0xff]  ;;  %v15859_v9 = vld [vmem:[#allocation10 + $0x870] sm:$0xff] }
 0x2fd   :  { %8018 = vmatpush.bf16.msra.mxu3 %v15779_v53  ;;  %v5752_v53 = vpop.f32.mrf.mxu2  ;;  %v5771_v8 = vpop.f32.mrf.mxu3  ;;  %v15860_v14 = vld [vmem:[#allocation10 + $0x878] sm:$0xff]  ;;  %v15833_v47 = vld [vmem:[#allocation10 + $0x7a0] sm:$0xff] }
 0x2fe   :  { %7493 = vmatpush.bf16.msra.mxu0 %v15742_v59  ;;  %5785 = vst [vmem:[#allocation4 + $0x1c] sm:$0xf] %v5781_v52  ;;  %v5753_v59 = vadd.f32 %v5752_v53, %v5734_v55  ;;  %v5716_v36 = vpop.f32.mrf.mxu0  ;;  %v13517_v52 = vld [vmem:[#allocation3 + $0x1a8] sm:$0xf0] }
 0x2ff   :  { %7462 = vmatmul.bf16.gmra.mxu2 %v13508_v32  ;;  %8052 = vmatpush.bf16.msrb.mxu1 %v15799_v1  ;;  %v5717_v4 = vadd.f32 %v5716_v36, %v5698_v62  ;;  %v15793_v32 = vld [vmem:[#allocation10 + $0x6c0] sm:$0xff]  ;;  %v13741_v53 = vld [vmem:[#allocation3 + $0x1a8] sm:$0xf0]  ;;  %v15705_v36 = vld [vmem:[#allocation3 + $0x134] sm:$0xf] }
 0x300   :  { %v5772_v37 = vadd.f32 %v5771_v8, %v5753_v59  ;;  %8073 = vmatpush.bf16.msrb.mxu2 %v15805_v16  ;;  %v13515_v59 = vld [vmem:[#allocation3 + $0x130] sm:$0xf] }
 0x301   :  { %8019 = vmatpush.bf16.msra.mxu3 %v15778_v2  ;;  %v5735_v40 = vpop.f32.mrf.mxu1  ;;  %v15813_v2 = vld [vmem:[#allocation10 + $0x760] sm:$0xff] }
 0x302   :  { %7494 = vmatpush.bf16.msra.mxu0 %v15741_v45  ;;  %v5778_v17 = vmax.f32 %v5772_v37, 0.0  ;;  %v5736_v5 = vadd.f32 %v5735_v40, %v5717_v4  ;;  %v13739_v40 = vld [vmem:[#allocation3 + $0x130] sm:$0xf]  ;;  %v15763_v37 = vld [vmem:[#allocation3 + $0x134] sm:$0xf] }
 0x303   :  { %8053 = vmatpush.bf16.msrb.mxu1 %v15798_v60  ;;  %v15851_v60 = vld [vmem:[#allocation10 + $0x830] sm:$0xff] }
 0x304   :  { %v5782_v45 = vpack.c.bf16 %v5778_v17, %v5778_v17  ;;  %8074 = vmatpush.bf16.msrb.mxu2 %v15804_v49  ;;  %v15835_v4 = vld [vmem:[#allocation10 + $0x7b0] sm:$0xff]  ;;  %v13744_v17 = vor.u32 %v15763_v37, %v13741_v53 }
 0x305   :  { %8020 = vmatpush.bf16.msra.mxu3 %v15777_v6  ;;  %v5754_v6 = vpop.f32.mrf.mxu2  ;;  %v15843_v49 = vld [vmem:[#allocation10 + $0x7f0] sm:$0xff] }
 0x306   :  { %8032 = vmatpush.bf16.msrb.mxu0 %v15792_v28  ;;  %v5773_v28 = vpop.f32.mrf.mxu3  ;;  %5786 = vst [vmem:[#allocation4 + $0x38] sm:$0xf] %v5782_v45  ;;  %v5755_v11 = vadd.f32 %v5754_v6, %v5736_v5  ;;  %v16800_v23 = vpop.f32.mrf.mxu0  ;;  %v15834_v45 = vld [vmem:[#allocation10 + $0x7a8] sm:$0xff] }
 0x307   :  { %8054 = vmatpush.bf16.msrb.mxu1 %v15797_v0  ;;  %v15842_v5 = vld [vmem:[#allocation10 + $0x7e8] sm:$0xff] }
 0x308   :  { %v5774_v44 = vadd.f32 %v5773_v28, %v5755_v11  ;;  %8075 = vmatpush.bf16.msrb.mxu2 %v15803_v3  ;;  %v15849_v3 = vld [vmem:[#allocation10 + $0x820] sm:$0xff] }
 0x309   :  { %8089 = vmatpush.bf16.msrb.mxu3 %v15816_v38  ;;  %v15760_v38 = vld [vmem:[#allocation3 + $0xb4] sm:$0xf0]  ;;  %v16802_v35 = vpop.f32.mrf.mxu1  ;;  %v15841_v11 = vld [vmem:[#allocation10 + $0x7e0] sm:$0xff] }
 0x30a   :  { %8033 = vmatpush.bf16.msrb.mxu0 %v15791_v63  ;;  %v13496_v63 = vor.u32 %v15699_v25, %v13493_v18  ;;  %v13716_v57 = vor.u32 %v15760_v38, %v13715_v10  ;;  %v5779_v42 = vmax.f32 %v5774_v44, 0.0  ;;  %v15858_v18 = vld [vmem:[#allocation10 + $0x868] sm:$0xff]  ;;  %v15848_v25 = vld [vmem:[#allocation10 + $0x818] sm:$0xff]  ;;  %v15847_v44 = vld [vmem:[#allocation10 + $0x810] sm:$0xff] }
 0x30b   :  { %8055 = vmatpush.bf16.msrb.mxu1 %v15796_v41  ;;  %7495 = vmatmul.bf16.vlgmr.msra.gmra.mxu0 %v13492_v15  ;;  %v15850_v41 = vld [vmem:[#allocation10 + $0x828] sm:$0xff] }
 0x30c   :  { %7514 = vmatmul.bf16.vlgmr.msra.gmra.mxu1 %v13496_v63  ;;  %8021 = vmatmul.bf16.vlgmr.msra.gmra.mxu3 %v13720_v58  ;;  %v5783_v33 = vpack.c.bf16 %v5779_v42, %v5779_v42  ;;  %v15761_v63 = vld [vmem:[#allocation3 + $0xbc] sm:$0xf0]  ;;  %v15762_v42 = vld [vmem:[#allocation3 + $0xc4] sm:$0xf0] }
 0x30d   :  { %8090 = vmatpush.bf16.msrb.mxu3 %v15815_v7  ;;  %8076 = vmatpush.bf16.msrb.mxu2 %v15802_v29  ;;  %v16804_v46 = vpop.f32.mrf.mxu2 }
 0x30e   :  { %8034 = vmatpush.bf16.msrb.mxu0 %v15790_v50  ;;  %v16806_v1 = vpop.f32.mrf.mxu3  ;;  %5787 = vst [vmem:[#allocation4 + $0x54] sm:$0xf] %v5783_v33  ;;  %v16808_v7 = vpop.f32.mrf.mxu0  ;;  %v15836_v50 = vld [vmem:[#allocation10 + $0x7b8] sm:$0xff] }
 0x30f   :  { %8002 = vmatmul.bf16.vlgmr.msra.gmra.mxu2 %v13716_v57  ;;  %8056 = vmatpush.bf16.msrb.mxu1 %v15795_v27  ;;  %v6257_v15 = vadd.f32 %v16781_v24, %v16808_v7  ;;  %v15840_v27 = vld [vmem:[#allocation10 + $0x7d8] sm:$0xff]  ;;  %v13731_v7 = vld [vmem:[#allocation3 + $0x50] sm:$0xf] }
 0x311   :  { %8091 = vmatpush.bf16.msrb.mxu3 %v15814_v51  ;;  %v16810_v19 = vpop.f32.mrf.mxu1  ;;  %8077 = vmatpush.bf16.msrb.mxu2 %v15801_v22  ;;  %v15708_v51 = vld [vmem:[#allocation3 + $0x1a4] sm:$0xf0] }
 0x312   :  { %8035 = vmatpush.bf16.msrb.mxu0 %v15789_v56  ;;  %v15766_v56 = vld [vmem:[#allocation3 + $0x1a4] sm:$0xf0]  ;;  %v13516_v0 = vor.u32 %v15708_v51, %v13515_v59 }
 0x313   :  { %8057 = vmatpush.bf16.msrb.mxu1 %v15794_v54  ;;  %v13733_v54 = vld [vmem:[#allocation3 + $0xc8] sm:$0xf0] }
 0x314   :  { %v15846_v51 = vld [vmem:[#allocation10 + $0x808] sm:$0xff] }
 0x315   :  { %8092 = vmatpush.bf16.msrb.mxu3 %v15813_v2  ;;  %8615 = vmatpush.bf16.msra.mxu2 %v15852_v34  ;;  %v16812_v55 = vpop.f32.mrf.mxu2  ;;  %v13520_v2 = vor.u32 %v15705_v36, %v13517_v52  ;;  %v15759_v34 = vld [vmem:[#allocation3 + $0x54] sm:$0xf]  ;;  %v15830_v59 = vld [vmem:[#allocation10 + $0x788] sm:$0xff] }
 0x316   :  { %8036 = vmatpush.bf16.msrb.mxu0 %v15788_v43  ;;  %v16814_v16 = vpop.f32.mrf.mxu3  ;;  %v16816_v8 = vpop.f32.mrf.mxu0  ;;  %v13740_v43 = vor.u32 %v15766_v56, %v13739_v40  ;;  %v15838_v36 = vld [vmem:[#allocation10 + $0x7c8] sm:$0xff] }
 0x317   :  { %8058 = vmatpush.bf16.msrb.mxu1 %v15793_v32  ;;  %v15854_v40 = vld [vmem:[#allocation10 + $0x848] sm:$0xff] }
 0x319   :  { %8093 = vmatpush.bf16.msrb.mxu3 %v15812_v39  ;;  %v16818_v62 = vpop.f32.mrf.mxu1  ;;  %8616 = vmatpush.bf16.msra.mxu2 %v15851_v60  ;;  %v6255_v39 = vadd.f32 %v16781_v24, %v16800_v23  ;;  %v15857_v23 = vld [vmem:[#allocation10 + $0x860] sm:$0xff]  ;;  %v15855_v60 = vld [vmem:[#allocation10 + $0x850] sm:$0xff] }
 0x31a   :  { %8037 = vmatpush.bf16.msrb.mxu0 %v15787_v12 }
 0x31b   :  { %8596 = vmatpush.bf16.msra.mxu1 %v15844_v26  ;;  %7500 = vmatmul.bf16.gmra.mxu0 %v13516_v0  ;;  %v6274_v38 = vadd.f32 %v16802_v35, %v6255_v39  ;;  %v15856_v35 = vld [vmem:[#allocation10 + $0x858] sm:$0xff]  ;;  %v13732_v26 = vor.u32 %v15762_v42, %v13731_v7  ;;  %v15845_v0 = vld [vmem:[#allocation10 + $0x800] sm:$0xff] }
 0x31c   :  { %7519 = vmatmul.bf16.gmra.mxu1 %v13520_v2  ;;  %8026 = vmatmul.bf16.gmra.mxu3 %v13744_v17  ;;  %v15837_v39 = vld [vmem:[#allocation10 + $0x7c0] sm:$0xff] }
 0x31d   :  { %8094 = vmatpush.bf16.msrb.mxu3 %v15811_v20  ;;  %8617 = vmatpush.bf16.msra.mxu2 %v15850_v41  ;;  %v16822_v12 = vpop.f32.mrf.mxu2  ;;  %v6293_v10 = vadd.f32 %v16804_v46, %v6274_v38  ;;  %v13725_v20 = vld [vmem:[#allocation3 + $0xc0] sm:$0xf0]  ;;  %v15758_v46 = vld [vmem:[#allocation3 + $0x4c] sm:$0xf]  ;;  %v15904_v38 = vld [vmem:[#allocation10 + $0x978] sm:$0xff] }
 0x31e   :  { %8038 = vmatpush.bf16.msrb.mxu0 %v15786_v31  ;;  %v16824_v6 = vpop.f32.mrf.mxu3  ;;  %v16826_v28 = vpop.f32.mrf.mxu0  ;;  %v13723_v31 = vld [vmem:[#allocation3 + $0x48] sm:$0xf] }
 0x31f   :  { %8007 = vmatmul.bf16.gmra.mxu2 %v13740_v43  ;;  %8597 = vmatpush.bf16.msra.mxu1 %v15843_v49  ;;  %v6312_v57 = vadd.f32 %v16806_v1, %v6293_v10  ;;  %v13724_v22 = vor.u32 %v15761_v63, %v13723_v31  ;;  %v15831_v1 = vld [vmem:[#allocation10 + $0x790] sm:$0xff]  ;;  %v15896_v49 = vld [vmem:[#allocation10 + $0x938] sm:$0xff]  ;;  %v15829_v41 = vld [vmem:[#allocation10 + $0x780] sm:$0xff] }
 0x320   :  { %v15867_v31 = vld [vmem:[#allocation10 + $0x8b0] sm:$0xff] }
 0x321   :  { %8095 = vmatpush.bf16.msrb.mxu3 %v15810_v30  ;;  %v16828_v13 = vpop.f32.mrf.mxu1  ;;  %8618 = vmatpush.bf16.msra.mxu2 %v15849_v3  ;;  %v15876_v3 = vld [vmem:[#allocation10 + $0x8f8] sm:$0xff] }
 0x322   :  { %8039 = vmatpush.bf16.msrb.mxu0 %v15785_v61  ;;  %v6276_v61 = vadd.f32 %v16810_v19, %v6257_v15  ;;  %v6260_v19 = vadd.f32 %v16781_v24, %v16816_v8 }
 0x323   :  { %8598 = vmatpush.bf16.msra.mxu1 %v15842_v5 }
 0x324   :  { %v6295_v52 = vadd.f32 %v16812_v55, %v6276_v61  ;;  %v6279_v8 = vadd.f32 %v16818_v62, %v6260_v19  ;;  %v15893_v19 = vld [vmem:[#allocation10 + $0x920] sm:$0xff] }
 0x325   :  { %8096 = vmatpush.bf16.msrb.mxu3 %v15809_v48  ;;  %8619 = vmatpush.bf16.msra.mxu2 %v15848_v25  ;;  %v16835_v58 = vpop.f32.mrf.mxu2  ;;  %v13728_v48 = vor.u32 %v15758_v46, %v13725_v20  ;;  %v13749_v25 = vld [vmem:[#allocation3 + $0x1b0] sm:$0xf0]  ;;  %v13757_v20 = vld [vmem:[#allocation3 + $0x1b8] sm:$0xf0] }
 0x326   :  { %8577 = vmatpush.bf16.msra.mxu0 %v15836_v50  ;;  %v16837_v29 = vpop.f32.mrf.mxu3  ;;  %v6330_v30 = vpop.f32.mrf.mxu0  ;;  %v15839_v50 = vld [vmem:[#allocation10 + $0x7d0] sm:$0xff]  ;;  %v6314_v2 = vadd.f32 %v16814_v16, %v6295_v52  ;;  %v15868_v16 = vld [vmem:[#allocation10 + $0x8b8] sm:$0xff]  ;;  %v6298_v5 = vadd.f32 %v16822_v12, %v6279_v8 }
 0x327   :  { %8599 = vmatpush.bf16.msra.mxu1 %v15841_v11  ;;  %v6331_v32 = vadd.f32 %v6330_v30, %v6312_v57  ;;  %v13747_v11 = vld [vmem:[#allocation3 + $0x138] sm:$0xf]  ;;  %v13955_v8 = vld [vmem:[#allocation3 + $0x50] sm:$0xf] }
 0x328   :  { %v6317_v10 = vadd.f32 %v16824_v6, %v6298_v5  ;;  %v15895_v57 = vld [vmem:[#allocation10 + $0x930] sm:$0xff] }
 0x329   :  { %8634 = vmatpush.bf16.msra.mxu3 %v15860_v14  ;;  %v6349_v33 = vpop.f32.mrf.mxu1  ;;  %v13736_v14 = vor.u32 %v15759_v34, %v13733_v54  ;;  %8620 = vmatpush.bf16.msra.mxu2 %v15847_v44  ;;  %v13755_v44 = vld [vmem:[#allocation3 + $0x140] sm:$0xf]  ;;  %v15903_v46 = vld [vmem:[#allocation10 + $0x970] sm:$0xff] }
 0x32a   :  { %8578 = vmatpush.bf16.msra.mxu0 %v15835_v4  ;;  %v6350_v56 = vadd.f32 %v6349_v33, %v6331_v32  ;;  %v15765_v33 = vld [vmem:[#allocation3 + $0x144] sm:$0xf]  ;;  %v15894_v32 = vld [vmem:[#allocation10 + $0x928] sm:$0xff]  ;;  %v15817_v5 = vld [vmem:[#allocation3 + $0x54] sm:$0xf] }
 0x32b   :  { %8600 = vmatpush.bf16.msra.mxu1 %v15840_v27  ;;  %8040 = vmatmul.bf16.vlgmr.msrb.gmra.mxu0 %v13724_v22  ;;  %v15768_v27 = vld [vmem:[#allocation3 + $0x1b4] sm:$0xf0]  ;;  %v13760_v61 = vor.u32 %v15765_v33, %v13757_v20 }
 0x32c   :  { %8059 = vmatmul.bf16.vlgmr.msrb.gmra.mxu1 %v13728_v48  ;;  %8097 = vmatmul.bf16.vlgmr.msrb.gmra.mxu3 %v13736_v14  ;;  %v6359_v53 = vmax.f32 %v6350_v56, 0.0  ;;  %v15875_v22 = vld [vmem:[#allocation10 + $0x8f0] sm:$0xff]  ;;  %v13756_v7 = vor.u32 %v15768_v27, %v13755_v44  ;;  %v15866_v48 = vld [vmem:[#allocation10 + $0x8a8] sm:$0xff] }
 0x32d   :  { %8635 = vmatpush.bf16.msra.mxu3 %v15859_v9  ;;  %8621 = vmatpush.bf16.msra.mxu2 %v15846_v51  ;;  %v16844_v37 = vpop.f32.mrf.mxu2  ;;  %v15899_v27 = vld [vmem:[#allocation10 + $0x950] sm:$0xff]  ;;  %v15890_v44 = vld [vmem:[#allocation10 + $0x908] sm:$0xff] }
 0x32e   :  { %8579 = vmatpush.bf16.msra.mxu0 %v15834_v45  ;;  %v6363_v55 = vpack.c.bf16 %v6359_v53, %v6359_v53  ;;  %v16846_v4 = vpop.f32.mrf.mxu3  ;;  %v6332_v43 = vpop.f32.mrf.mxu0  ;;  %v15853_v45 = vld [vmem:[#allocation10 + $0x840] sm:$0xff] }
 0x32f   :  { %8078 = vmatmul.bf16.vlgmr.msrb.gmra.mxu2 %v13732_v26  ;;  %8601 = vmatpush.bf16.msra.mxu1 %v15839_v50  ;;  %v6333_v9 = vadd.f32 %v6332_v43, %v6314_v2  ;;  %v15874_v50 = vld [vmem:[#allocation10 + $0x8e8] sm:$0xff]  ;;  %v15865_v53 = vld [vmem:[#allocation10 + $0x8a0] sm:$0xff]  ;;  %v15864_v2 = vld [vmem:[#allocation10 + $0x898] sm:$0xff] }
 0x330   :  { %6367 = vst [vmem:[#allocation4 + $0x4] sm:$0xf] %v6363_v55  ;;  %v15902_v26 = vld [vmem:[#allocation10 + $0x968] sm:$0xff]  ;;  %v6838_v55 = vadd.f32 %v16781_v24, %v16844_v37  ;;  %v15872_v43 = vld [vmem:[#allocation10 + $0x8d8] sm:$0xff] }
 0x331   :  { %8636 = vmatpush.bf16.msra.mxu3 %v15858_v18  ;;  %v6351_v17 = vpop.f32.mrf.mxu1  ;;  %8622 = vmatpush.bf16.msra.mxu2 %v15845_v0  ;;  %v15892_v0 = vld [vmem:[#allocation10 + $0x918] sm:$0xff] }
 0x332   :  { %8580 = vmatpush.bf16.msra.mxu0 %v15833_v47  ;;  %v6352_v18 = vadd.f32 %v6351_v17, %v6333_v9  ;;  %v6262_v47 = vadd.f32 %v16781_v24, %v16826_v28  ;;  %v15900_v17 = vld [vmem:[#allocation10 + $0x958] sm:$0xff]  ;;  %v15820_v9 = vld [vmem:[#allocation3 + $0xc4] sm:$0xf0]  ;;  %v6857_v37 = vadd.f32 %v16846_v4, %v6838_v55 }
 0x333   :  { %8602 = vmatpush.bf16.msra.mxu1 %v15838_v36  ;;  %v15873_v36 = vld [vmem:[#allocation10 + $0x8e0] sm:$0xff]  ;;  %v15862_v4 = vld [vmem:[#allocation10 + $0x888] sm:$0xff] }
 0x334   :  { %v6360_v62 = vmax.f32 %v6352_v18, 0.0  ;;  %v6281_v42 = vadd.f32 %v16828_v13, %v6262_v47  ;;  %v15821_v18 = vld [vmem:[#allocation3 + $0xcc] sm:$0xf0] }
 0x335   :  { %8637 = vmatpush.bf16.msra.mxu3 %v15857_v23  ;;  %9160 = vmatpush.bf16.msrb.mxu2 %v15896_v49  ;;  %v15767_v23 = vld [vmem:[#allocation3 + $0x1ac] sm:$0xf0]  ;;  %v16853_v63 = vpop.f32.mrf.mxu2 }
 0x336   :  { %8581 = vmatpush.bf16.msra.mxu0 %v15832_v21  ;;  %v6364_v15 = vpack.c.bf16 %v6360_v62, %v6360_v62  ;;  %v16855_v12 = vpop.f32.mrf.mxu3  ;;  %v15764_v21 = vld [vmem:[#allocation3 + $0x13c] sm:$0xf]  ;;  %v6335_v28 = vpop.f32.mrf.mxu0  ;;  %v13748_v6 = vor.u32 %v15767_v23, %v13747_v11  ;;  %v6300_v34 = vadd.f32 %v16835_v58, %v6281_v42  ;;  %v13963_v62 = vld [vmem:[#allocation3 + $0x58] sm:$0xf]  ;;  %v15898_v42 = vld [vmem:[#allocation10 + $0x948] sm:$0xff] }
 0x337   :  { %8603 = vmatpush.bf16.msra.mxu1 %v15837_v39  ;;  %v6336_v54 = vadd.f32 %v6335_v28, %v6317_v10  ;;  %v13752_v30 = vor.u32 %v15764_v21, %v13749_v25  ;;  %v15891_v11 = vld [vmem:[#allocation10 + $0x910] sm:$0xff]  ;;  %v13956_v25 = vor.u32 %v15820_v9, %v13955_v8  ;;  %v13964_v28 = vor.u32 %v15821_v18, %v13963_v62  ;;  %v15823_v9 = vld [vmem:[#allocation3 + $0x144] sm:$0xf] }
 0x338   :  { %6368 = vst [vmem:[#allocation4 + $0x20] sm:$0xf] %v6364_v15  ;;  %v6319_v14 = vadd.f32 %v16837_v29, %v6300_v34  ;;  %v15863_v23 = vld [vmem:[#allocation10 + $0x890] sm:$0xff]  ;;  %v15818_v15 = vld [vmem:[#allocation3 + $0x5c] sm:$0xf] }
 0x339   :  { %8638 = vmatpush.bf16.msra.mxu3 %v15856_v35  ;;  %v6354_v35 = vpop.f32.mrf.mxu1  ;;  %9161 = vmatpush.bf16.msrb.mxu2 %v15895_v57  ;;  %v15871_v21 = vld [vmem:[#allocation10 + $0x8d0] sm:$0xff]  ;;  %v6840_v57 = vadd.f32 %v16781_v24, %v16853_v63  ;;  %v15897_v63 = vld [vmem:[#allocation10 + $0x940] sm:$0xff]  ;;  %v15928_v34 = vld [vmem:[#allocation10 + $0xa38] sm:$0xff] }
 0x33a   :  { %8582 = vmatpush.bf16.msra.mxu0 %v15831_v1  ;;  %v6355_v1 = vadd.f32 %v6354_v35, %v6336_v54 }
 0x33b   :  { %8672 = vmatpush.bf16.msrb.mxu1 %v15876_v3  ;;  %8045 = vmatmul.bf16.gmra.mxu0 %v13748_v6  ;;  %v13965_v3 = vld [vmem:[#allocation3 + $0xd0] sm:$0xf0]  ;;  %v6859_v33 = vadd.f32 %v16855_v12, %v6840_v57 }
 0x33c   :  { %8064 = vmatmul.bf16.gmra.mxu1 %v13752_v30  ;;  %8102 = vmatmul.bf16.gmra.mxu3 %v13760_v61  ;;  %v6361_v13 = vmax.f32 %v6355_v1, 0.0  ;;  %v13968_v35 = vor.u32 %v15818_v15, %v13965_v3  ;;  %v15889_v61 = vld [vmem:[#allocation10 + $0x900] sm:$0xff]  ;;  %v15912_v1 = vld [vmem:[#allocation10 + $0x9b8] sm:$0xff]  ;;  %v15927_v12 = vld [vmem:[#allocation10 + $0xa30] sm:$0xff] }
 0x33d   :  { %8639 = vmatpush.bf16.msra.mxu3 %v15855_v60  ;;  %9162 = vmatpush.bf16.msrb.mxu2 %v15894_v32  ;;  %v16860_v51 = vpop.f32.mrf.mxu2  ;;  %v15861_v32 = vld [vmem:[#allocation10 + $0x880] sm:$0xff]  ;;  %v15824_v3 = vld [vmem:[#allocation3 + $0x14c] sm:$0xf] }
 0x33e   :  { %8583 = vmatpush.bf16.msra.mxu0 %v15830_v59  ;;  %v6365_v60 = vpack.c.bf16 %v6361_v13, %v6361_v13  ;;  %v16862_v52 = vpop.f32.mrf.mxu3  ;;  %v6337_v58 = vpop.f32.mrf.mxu0 }
 0x33f   :  { %8083 = vmatmul.bf16.gmra.mxu2 %v13756_v7  ;;  %8673 = vmatpush.bf16.msrb.mxu1 %v15875_v22  ;;  %v6338_v59 = vadd.f32 %v6337_v58, %v6319_v14  ;;  %v15936_v14 = vld [vmem:[#allocation10 + $0xa78] sm:$0xff]  ;;  %v6843_v58 = vadd.f32 %v16781_v24, %v16860_v51 }
 0x340   :  { %6369 = vst [vmem:[#allocation4 + $0x3c] sm:$0xf] %v6365_v60  ;;  %v15911_v60 = vld [vmem:[#allocation10 + $0x9b0] sm:$0xff] }
 0x341   :  { %8640 = vmatpush.bf16.msra.mxu3 %v15854_v40  ;;  %v6356_v56 = vpop.f32.mrf.mxu1  ;;  %v15901_v40 = vld [vmem:[#allocation10 + $0x960] sm:$0xff]  ;;  %9163 = vmatpush.bf16.msrb.mxu2 %v15893_v19  ;;  %v15826_v19 = vld [vmem:[#allocation3 + $0x1b4] sm:$0xf0]  ;;  %v6862_v24 = vadd.f32 %v16862_v52, %v6843_v58  ;;  %v14197_v58 = vld [vmem:[#allocation3 + $0xd8] sm:$0xf0] }
 0x342   :  { %8584 = vmatpush.bf16.msra.mxu0 %v15829_v41  ;;  %v6357_v29 = vadd.f32 %v6356_v56, %v6338_v59  ;;  %v13957_v41 = vld [vmem:[#allocation3 + $0xc8] sm:$0xf0]  ;;  %v16877_v52 = vld [vmem:[#allocation12] ss:$0 sm:$0xff] }
 0x343   :  { %8674 = vmatpush.bf16.msrb.mxu1 %v15874_v50  ;;  %v13960_v10 = vor.u32 %v15817_v5, %v13957_v41  ;;  %v13987_v41 = vld [vmem:[#allocation3 + $0x148] sm:$0xf] }
 0x344   :  { %v6362_v49 = vmax.f32 %v6357_v29, 0.0 }
 0x345   :  { %8641 = vmatpush.bf16.msra.mxu3 %v15853_v45  ;;  %9164 = vmatpush.bf16.msrb.mxu2 %v15892_v0  ;;  %v16866_v45 = vpop.f32.mrf.mxu2  ;;  %v15919_v0 = vld [vmem:[#allocation10 + $0x9f0] sm:$0xff] }
 0x346   :  { %8653 = vmatpush.bf16.msrb.mxu0 %v15868_v16  ;;  %v6366_v39 = vpack.c.bf16 %v6362_v49, %v6362_v49  ;;  %v16868_v16 = vpop.f32.mrf.mxu3  ;;  %v13979_v49 = vld [vmem:[#allocation3 + $0x140] sm:$0xf] }
 0x347   :  { %8675 = vmatpush.bf16.msrb.mxu1 %v15873_v36 }
 0x348   :  { %6370 = vst [vmem:[#allocation4 + $0x58] sm:$0xf] %v6366_v39  ;;  %v13980_v39 = vor.u32 %v15826_v19, %v13979_v49 }
 0x349   :  { %9179 = vmatpush.bf16.msrb.mxu3 %v15904_v38  ;;  %v6875_v38 = vpop.f32.mrf.mxu0  ;;  %v6894_v47 = vpop.f32.mrf.mxu1  ;;  %9165 = vmatpush.bf16.msrb.mxu2 %v15891_v11 }
 0x34a   :  { %8654 = vmatpush.bf16.msrb.mxu0 %v15867_v31  ;;  %v6876_v20 = vadd.f32 %v6875_v38, %v6857_v37  ;;  %v15870_v31 = vld [vmem:[#allocation10 + $0x8c8] sm:$0xff] }
 0x34b   :  { %8676 = vmatpush.bf16.msrb.mxu1 %v15872_v43  ;;  %8585 = vmatmul.bf16.vlgmr.msra.gmra.mxu0 %v13956_v25  ;;  %v13989_v43 = vld [vmem:[#allocation3 + $0x1c0] sm:$0xf0]  ;;  %v15926_v37 = vld [vmem:[#allocation10 + $0xa28] sm:$0xff] }
 0x34c   :  { %8604 = vmatmul.bf16.vlgmr.msra.gmra.mxu1 %v13960_v10  ;;  %8642 = vmatmul.bf16.vlgmr.msra.gmra.mxu3 %v13968_v35  ;;  %v6895_v54 = vadd.f32 %v6894_v47, %v6876_v20  ;;  %v15910_v38 = vld [vmem:[#allocation10 + $0x9a8] sm:$0xff]  ;;  %v13992_v11 = vor.u32 %v15824_v3, %v13989_v43  ;;  %v6845_v10 = vadd.f32 %v16877_v52, %v16866_v45  ;;  %v15917_v35 = vld [vmem:[#allocation10 + $0x9e0] sm:$0xff] }
 0x34d   :  { %9180 = vmatpush.bf16.msrb.mxu3 %v15903_v46  ;;  %9166 = vmatpush.bf16.msrb.mxu2 %v15890_v44  ;;  %v15934_v25 = vld [vmem:[#allocation10 + $0xa68] sm:$0xff]  ;;  %v15933_v44 = vld [vmem:[#allocation10 + $0xa60] sm:$0xff] }
 0x34e   :  { %8655 = vmatpush.bf16.msrb.mxu0 %v15866_v48  ;;  %v6932_v30 = vpop.f32.mrf.mxu3  ;;  %v15869_v48 = vld [vmem:[#allocation10 + $0x8c0] sm:$0xff] }
 0x34f   :  { %8623 = vmatmul.bf16.vlgmr.msra.gmra.mxu2 %v13964_v28  ;;  %8677 = vmatpush.bf16.msrb.mxu1 %v15871_v21  ;;  %v15925_v21 = vld [vmem:[#allocation10 + $0xa20] sm:$0xff] }
 0x351   :  { %9181 = vmatpush.bf16.msrb.mxu3 %v15902_v26  ;;  %v6877_v46 = vpop.f32.mrf.mxu0  ;;  %v6896_v7 = vpop.f32.mrf.mxu1  ;;  %9167 = vmatpush.bf16.msrb.mxu2 %v15889_v61  ;;  %v15920_v26 = vld [vmem:[#allocation10 + $0x9f8] sm:$0xff] }
 0x352   :  { %8656 = vmatpush.bf16.msrb.mxu0 %v15865_v53  ;;  %v6913_v6 = vpop.f32.mrf.mxu2  ;;  %v6878_v50 = vadd.f32 %v6877_v46, %v6859_v33  ;;  %v13981_v53 = vld [vmem:[#allocation3 + $0x1b8] sm:$0xf0] }
 0x353   :  { %v6914_v22 = vadd.f32 %v6913_v6, %v6895_v54  ;;  %8678 = vmatpush.bf16.msrb.mxu1 %v15870_v31  ;;  %v13984_v5 = vor.u32 %v15823_v9, %v13981_v53  ;;  %v6864_v31 = vadd.f32 %v16868_v16, %v6845_v10  ;;  %v15924_v6 = vld [vmem:[#allocation10 + $0xa18] sm:$0xff]  ;;  %v15907_v16 = vld [vmem:[#allocation10 + $0x990] sm:$0xff]  ;;  %v15921_v9 = vld [vmem:[#allocation10 + $0xa00] sm:$0xff] }
 0x354   :  { %v6897_v36 = vadd.f32 %v6896_v7, %v6878_v50  ;;  %v15916_v46 = vld [vmem:[#allocation10 + $0x9d8] sm:$0xff]  ;;  %v15931_v50 = vld [vmem:[#allocation10 + $0xa50] sm:$0xff] }
 0x355   :  { %9182 = vmatpush.bf16.msrb.mxu3 %v15901_v40  ;;  %v6933_v13 = vadd.f32 %v6932_v30, %v6914_v22  ;;  %9236 = vmatpush.bf16.msra.mxu2 %v15928_v34  ;;  %v15827_v40 = vld [vmem:[#allocation3 + $0x1bc] sm:$0xf0]  ;;  %v15982_v10 = vld [vmem:[#allocation13 + $0xf4] sm:$0xf0] }
 0x356   :  { %8657 = vmatpush.bf16.msrb.mxu0 %v15864_v2  ;;  %v15935_v2 = vld [vmem:[#allocation10 + $0xa70] sm:$0xff]  ;;  %v6934_v55 = vpop.f32.mrf.mxu3  ;;  %v13988_v18 = vor.u32 %v15827_v40, %v13987_v41  ;;  %v15908_v30 = vld [vmem:[#allocation10 + $0x998] sm:$0xff] }
 0x357   :  { %v6942_v56 = vmax.f32 %v6933_v13, 0.0  ;;  %8679 = vmatpush.bf16.msrb.mxu1 %v15869_v48  ;;  %v15932_v7 = vld [vmem:[#allocation10 + $0xa58] sm:$0xff]  ;;  %v15923_v48 = vld [vmem:[#allocation10 + $0xa10] sm:$0xff] }
 0x358   :  { %v15915_v13 = vld [vmem:[#allocation10 + $0x9d0] sm:$0xff] }
 0x359   :  { %9183 = vmatpush.bf16.msrb.mxu3 %v15900_v17  ;;  %v6946_v59 = vpack.c.bf16 %v6942_v56, %v6942_v56  ;;  %9237 = vmatpush.bf16.msra.mxu2 %v15927_v12  ;;  %v6880_v17 = vpop.f32.mrf.mxu0  ;;  %v6899_v8 = vpop.f32.mrf.mxu1  ;;  %v13971_v12 = vld [vmem:[#allocation3 + $0x60] sm:$0xf] }
 0x35a   :  { %8658 = vmatpush.bf16.msrb.mxu0 %v15863_v23  ;;  %v6915_v29 = vpop.f32.mrf.mxu2  ;;  %v6881_v62 = vadd.f32 %v6880_v17, %v6862_v24  ;;  %v15918_v23 = vld [vmem:[#allocation10 + $0x9e8] sm:$0xff] }
 0x35b   :  { %9217 = vmatpush.bf16.msra.mxu1 %v15920_v26  ;;  %6950 = vst [vmem:[#allocation4 + $0x8] sm:$0xf] %v6946_v59  ;;  %v6916_v51 = vadd.f32 %v6915_v29, %v6897_v36  ;;  %8590 = vmatmul.bf16.gmra.mxu0 %v13980_v39  ;;  %v15819_v59 = vld [vmem:[#allocation3 + $0x64] sm:$0xf]  ;;  %v14195_v36 = vld [vmem:[#allocation3 + $0x60] sm:$0xf] }
 0x35c   :  { %8609 = vmatmul.bf16.gmra.mxu1 %v13984_v5  ;;  %8647 = vmatmul.bf16.gmra.mxu3 %v13992_v11  ;;  %v6900_v28 = vadd.f32 %v6899_v8, %v6881_v62  ;;  %v15922_v29 = vld [vmem:[#allocation10 + $0xa08] sm:$0xff]  ;;  %v14547_v62 = vld [vmem:[#allocation13 + $0x70] sm:$0xf]  ;;  %v15966_v11 = vld [vmem:[#allocation13 + $0x74] sm:$0xf0] }
 0x35d   :  { %9184 = vmatpush.bf16.msrb.mxu3 %v15899_v27  ;;  %v6935_v47 = vadd.f32 %v6934_v55, %v6916_v51  ;;  %9238 = vmatpush.bf16.msra.mxu2 %v15926_v37  ;;  %v15909_v27 = vld [vmem:[#allocation10 + $0x9a0] sm:$0xff]  ;;  %v15906_v55 = vld [vmem:[#allocation10 + $0x988] sm:$0xff] }
 0x35e   :  { %8659 = vmatpush.bf16.msrb.mxu0 %v15862_v4  ;;  %v6937_v57 = vpop.f32.mrf.mxu3  ;;  %v15914_v51 = vld [vmem:[#allocation10 + $0x9c8] sm:$0xff]  ;;  %v15905_v37 = vld [vmem:[#allocation10 + $0x980] sm:$0xff] }
 0x35f   :  { %9218 = vmatpush.bf16.msra.mxu1 %v15919_v0  ;;  %v6943_v15 = vmax.f32 %v6935_v47, 0.0  ;;  %8628 = vmatmul.bf16.gmra.mxu2 %v13988_v18  ;;  %v15930_v17 = vld [vmem:[#allocation10 + $0xa48] sm:$0xff]  ;;  %v15929_v47 = vld [vmem:[#allocation10 + $0xa40] sm:$0xff] }
 0x361   :  { %9185 = vmatpush.bf16.msrb.mxu3 %v15898_v42  ;;  %v6947_v20 = vpack.c.bf16 %v6943_v15, %v6943_v15  ;;  %v6882_v45 = vpop.f32.mrf.mxu0  ;;  %v6901_v54 = vpop.f32.mrf.mxu1  ;;  %9239 = vmatpush.bf16.msra.mxu2 %v15925_v21  ;;  %v14675_v15 = vld [vmem:[#allocation13 + $0x170] sm:$0xf]  ;;  %v15998_v21 = vld [vmem:[#allocation13 + $0x174] sm:$0xf0] }
 0x362   :  { %8660 = vmatpush.bf16.msrb.mxu0 %v15861_v32  ;;  %v6918_v4 = vpop.f32.mrf.mxu2  ;;  %v6883_v22 = vadd.f32 %v6882_v45, %v6864_v31  ;;  %v15822_v32 = vld [vmem:[#allocation3 + $0xd4] sm:$0xf0]  ;;  %v13995_v45 = vld [vmem:[#allocation3 + $0x150] sm:$0xf] }
 0x363   :  { %9219 = vmatpush.bf16.msra.mxu1 %v15918_v23  ;;  %6951 = vst [vmem:[#allocation4 + $0x24] sm:$0xf] %v6947_v20  ;;  %v6919_v42 = vadd.f32 %v6918_v4, %v6900_v28  ;;  %v13972_v40 = vor.u32 %v15822_v32, %v13971_v12  ;;  %v14611_v23 = vld [vmem:[#allocation13 + $0xf0] sm:$0xf]  ;;  %v14676_v20 = vor.u32 %v15998_v21, %v14675_v15  ;;  %v15828_v4 = vld [vmem:[#allocation3 + $0x1c4] sm:$0xf0] }
 0x364   :  { %v6902_v34 = vadd.f32 %v6901_v54, %v6883_v22  ;;  %v14739_v28 = vld [vmem:[#allocation13 + $0x1f0] sm:$0xf]  ;;  %v15886_v54 = vld [vmem:[#allocation3 + $0x1c4] sm:$0xf0]  ;;  %v14651_v15 = vld [vmem:[#allocation13 + $0x140] sm:$0xf] }
 0x365   :  { %9186 = vmatpush.bf16.msrb.mxu3 %v15897_v63  ;;  %v6938_v33 = vadd.f32 %v6937_v57, %v6919_v42  ;;  %9240 = vmatpush.bf16.msra.mxu2 %v15924_v6  ;;  %v13997_v57 = vld [vmem:[#allocation3 + $0x1c8] sm:$0xf0]  ;;  %v15825_v22 = vld [vmem:[#allocation3 + $0x154] sm:$0xf] }
 0x366   :  { %9198 = vmatpush.bf16.msra.mxu0 %v15912_v1  ;;  %v13973_v1 = vld [vmem:[#allocation3 + $0xd8] sm:$0xf0]  ;;  %v14221_v6 = vld [vmem:[#allocation3 + $0x1c8] sm:$0xf0]  ;;  %v14000_v32 = vor.u32 %v15825_v22, %v13997_v57  ;;  %v14515_v57 = vld [vmem:[#allocation13 + $0x30] sm:$0xf] }
 0x367   :  { %9220 = vmatpush.bf16.msra.mxu1 %v15917_v35  ;;  %v6944_v61 = vmax.f32 %v6938_v33, 0.0  ;;  %v13976_v0 = vor.u32 %v15819_v59, %v13973_v1  ;;  %v16014_v35 = vld [vmem:[#allocation13 + $0x1f4] sm:$0xf0]  ;;  %v14531_v59 = vld [vmem:[#allocation13 + $0x50] sm:$0xf] }
 0x368   :  { %v15992_v21 = vld [vmem:[#allocation13 + $0x144] sm:$0xf0]  ;;  %v15974_v22 = vld [vmem:[#allocation13 + $0xb4] sm:$0xf0] }
 0x369   :  { %9255 = vmatpush.bf16.msra.mxu3 %v15936_v14  ;;  %v6948_v63 = vpack.c.bf16 %v6944_v61, %v6944_v61  ;;  %v6939_v14 = vpop.f32.mrf.mxu3  ;;  %v16882_v19 = vpop.f32.mrf.mxu0  ;;  %9241 = vmatpush.bf16.msra.mxu2 %v15923_v48  ;;  %v13996_v61 = vor.u32 %v15828_v4, %v13995_v45  ;;  %v14539_v48 = vld [vmem:[#allocation13 + $0x60] sm:$0xf]  ;;  %v16008_v4 = vld [vmem:[#allocation13 + $0x1c4] sm:$0xf0] }
 0x36a   :  { %9199 = vmatpush.bf16.msra.mxu0 %v15911_v60  ;;  %v6920_v26 = vpop.f32.mrf.mxu2  ;;  %v15880_v60 = vld [vmem:[#allocation3 + $0xd4] sm:$0xf0]  ;;  %v16884_v53 = vpop.f32.mrf.mxu1 }
 0x36b   :  { %9221 = vmatpush.bf16.msra.mxu1 %v15916_v46  ;;  %6952 = vst [vmem:[#allocation4 + $0x40] sm:$0xf] %v6948_v63  ;;  %v6921_v56 = vadd.f32 %v6920_v26, %v6902_v34  ;;  %v14196_v43 = vor.u32 %v15880_v60, %v14195_v36  ;;  %8661 = vmatmul.bf16.vlgmr.msrb.gmra.mxu0 %v13972_v40  ;;  %v14219_v46 = vld [vmem:[#allocation3 + $0x150] sm:$0xf]  ;;  %v14603_v63 = vld [vmem:[#allocation13 + $0xe0] sm:$0xf] }
 0x36c   :  { %8680 = vmatmul.bf16.vlgmr.msrb.gmra.mxu1 %v13976_v0  ;;  %v14220_v34 = vor.u32 %v15886_v54, %v14219_v46  ;;  %v14667_v26 = vld [vmem:[#allocation13 + $0x160] sm:$0xf]  ;;  %v15962_v40 = vld [vmem:[#allocation13 + $0x54] sm:$0xf0]  ;;  %v14595_v0 = vld [vmem:[#allocation13 + $0xd0] sm:$0xf] }
 0x36d   :  { %9256 = vmatpush.bf16.msra.mxu3 %v15935_v2  ;;  %v15877_v2 = vld [vmem:[#allocation3 + $0x64] sm:$0xf]  ;;  %v6940_v49 = vadd.f32 %v6939_v14, %v6921_v56  ;;  %9242 = vmatpush.bf16.msra.mxu2 %v15922_v29  ;;  %v15996_v14 = vld [vmem:[#allocation13 + $0x164] sm:$0xf0]  ;;  %v7421_v29 = vadd.f32 %v16877_v52, %v16882_v19  ;;  %v15958_v54 = vld [vmem:[#allocation13 + $0x34] sm:$0xf0] }
 0x36e   :  { %9200 = vmatpush.bf16.msra.mxu0 %v15910_v38  ;;  %v14200_v24 = vor.u32 %v15877_v2, %v14197_v58  ;;  %v15913_v38 = vld [vmem:[#allocation10 + $0x9c0] sm:$0xff]  ;;  %v14668_v60 = vor.u32 %v15996_v14, %v14667_v26  ;;  %v16012_v56 = vld [vmem:[#allocation13 + $0x1e4] sm:$0xf0]  ;;  %v15978_v2 = vld [vmem:[#allocation13 + $0xd4] sm:$0xf0]  ;;  %v14516_v46 = vor.u32 %v15958_v54, %v14515_v57 }
 0x36f   :  { %9222 = vmatpush.bf16.msra.mxu1 %v15915_v13  ;;  %v6945_v8 = vmax.f32 %v6940_v49, 0.0  ;;  %9168 = vmatmul.bf16.vlgmr.msrb.gmra.mxu2 %v14196_v43  ;;  %v14731_v58 = vld [vmem:[#allocation13 + $0x1e0] sm:$0xf]  ;;  %v14596_v49 = vor.u32 %v15978_v2, %v14595_v0  ;;  %v14659_v43 = vld [vmem:[#allocation13 + $0x150] sm:$0xf]  ;;  %v7440_v19 = vadd.f32 %v16884_v53, %v7421_v29 }
 0x370   :  { %9187 = vmatmul.bf16.vlgmr.msrb.gmra.mxu3 %v14200_v24  ;;  %v14732_v36 = vor.u32 %v16012_v56, %v14731_v58  ;;  %v15994_v24 = vld [vmem:[#allocation13 + $0x154] sm:$0xf0]  ;;  %v14213_v26 = vld [vmem:[#allocation3 + $0xe8] sm:$0xf0]  ;;  %v14491_v54 = vld [vmem:[#allocation13] sm:$0xf] }
 0x371   :  { %9257 = vmatpush.bf16.msra.mxu3 %v15934_v25  ;;  %v6949_v41 = vpack.c.bf16 %v6945_v8, %v6945_v8  ;;  %v16888_v5 = vpop.f32.mrf.mxu3  ;;  %v16890_v18 = vpop.f32.mrf.mxu0  ;;  %9243 = vmatpush.bf16.msra.mxu2 %v15921_v9  ;;  %v14548_v25 = vor.u32 %v15966_v11, %v14547_v62  ;;  %v16010_v8 = vld [vmem:[#allocation13 + $0x1d4] sm:$0xf0]  ;;  %v14523_v62 = vld [vmem:[#allocation13 + $0x40] sm:$0xf]  ;;  %v15960_v11 = vld [vmem:[#allocation13 + $0x44] sm:$0xf0] }
 0x372   :  { %9201 = vmatpush.bf16.msra.mxu0 %v15909_v27  ;;  %v16886_v39 = vpop.f32.mrf.mxu2  ;;  %v16892_v3 = vpop.f32.mrf.mxu1  ;;  %v14612_v27 = vor.u32 %v15982_v10, %v14611_v23  ;;  %v14587_v23 = vld [vmem:[#allocation13 + $0xc0] sm:$0xf]  ;;  %v15976_v10 = vld [vmem:[#allocation13 + $0xc4] sm:$0xf0]  ;;  %v7423_v53 = vadd.f32 %v16877_v52, %v16890_v18 }
 0x373   :  { %9223 = vmatpush.bf16.msra.mxu1 %v15914_v51  ;;  %6953 = vst [vmem:[#allocation4 + $0x5c] sm:$0xf] %v6949_v41  ;;  %v14723_v51 = vld [vmem:[#allocation13 + $0x1d0] sm:$0xf] }
 0x375   :  { %9258 = vmatpush.bf16.msra.mxu3 %v15933_v44  ;;  %v14740_v44 = vor.u32 %v16014_v35, %v14739_v28  ;;  %10090 = vmatpush.bf16.msrb.mxu2 %v14676_v20  ;;  %v15881_v20 = vld [vmem:[#allocation3 + $0xdc] sm:$0xf0]  ;;  %v14588_v28 = vor.u32 %v15976_v10, %v14587_v23  ;;  %v14652_v35 = vor.u32 %v15992_v21, %v14651_v15  ;;  %v16004_v23 = vld [vmem:[#allocation13 + $0x1a4] sm:$0xf0]  ;;  %v15954_v15 = vld [vmem:[#allocation13 + $0x14] sm:$0xf0] }
 0x376   :  { %9202 = vmatpush.bf16.msra.mxu0 %v15908_v30  ;;  %v14563_v21 = vld [vmem:[#allocation13 + $0x90] sm:$0xf] }
 0x377   :  { %9224 = vmatpush.bf16.msra.mxu1 %v15913_v38 }
 0x379   :  { %9259 = vmatpush.bf16.msra.mxu3 %v15932_v7  ;;  %v16896_v42 = vpop.f32.mrf.mxu3  ;;  %v16898_v30 = vpop.f32.mrf.mxu0  ;;  %v15883_v7 = vld [vmem:[#allocation3 + $0x154] sm:$0xf]  ;;  %10091 = vmatpush.bf16.msrb.mxu2 %v14668_v60 }
 0x37a   :  { %9203 = vmatpush.bf16.msra.mxu0 %v15907_v16  ;;  %v16894_v31 = vpop.f32.mrf.mxu2  ;;  %v16900_v33 = vpop.f32.mrf.mxu1  ;;  %v15964_v16 = vld [vmem:[#allocation13 + $0x64] sm:$0xf0]  ;;  %v14224_v1 = vor.u32 %v15883_v7, %v14221_v6  ;;  %v14579_v6 = vld [vmem:[#allocation13 + $0xb0] sm:$0xf]  ;;  %v7426_v10 = vadd.f32 %v16877_v52, %v16898_v30 }
 0x37b   :  { %10071 = vmatpush.bf16.msrb.mxu1 %v14612_v27  ;;  %v14540_v13 = vor.u32 %v15964_v16, %v14539_v48  ;;  %8666 = vmatmul.bf16.gmra.mxu0 %v13996_v61  ;;  %v7459_v27 = vadd.f32 %v16886_v39, %v7440_v19  ;;  %v14580_v7 = vor.u32 %v15974_v22, %v14579_v6  ;;  %v14643_v61 = vld [vmem:[#allocation13 + $0x130] sm:$0xf]  ;;  %v14205_v48 = vld [vmem:[#allocation3 + $0xe0] sm:$0xf0]  ;;  %v15882_v16 = vld [vmem:[#allocation3 + $0xe4] sm:$0xf0] }
 0x37c   :  { %8685 = vmatmul.bf16.gmra.mxu1 %v14000_v32  ;;  %v15990_v32 = vld [vmem:[#allocation13 + $0x134] sm:$0xf0]  ;;  %v14707_v39 = vld [vmem:[#allocation13 + $0x1b0] sm:$0xf] }
 0x37d   :  { %9260 = vmatpush.bf16.msra.mxu3 %v15931_v50  ;;  %v15980_v50 = vld [vmem:[#allocation13 + $0xe4] sm:$0xf0] }
 0x37e   :  { %9204 = vmatpush.bf16.msra.mxu0 %v15906_v55  ;;  %v14604_v12 = vor.u32 %v15980_v50, %v14603_v63  ;;  %v14532_v55 = vor.u32 %v15962_v40, %v14531_v59  ;;  %v14644_v63 = vor.u32 %v15990_v32, %v14643_v61  ;;  %v14203_v50 = vld [vmem:[#allocation3 + $0x68] sm:$0xf]  ;;  %v15878_v59 = vld [vmem:[#allocation3 + $0x6c] sm:$0xf]  ;;  %v15879_v40 = vld [vmem:[#allocation3 + $0x74] sm:$0xf] }
 0x37f   :  { %9173 = vmatmul.bf16.gmra.mxu2 %v14220_v34  ;;  %v16006_v34 = vld [vmem:[#allocation13 + $0x1b4] sm:$0xf0]  ;;  %v14204_v56 = vor.u32 %v15881_v20, %v14203_v50  ;;  %v14208_v2 = vor.u32 %v15878_v59, %v14205_v48  ;;  %v15952_v61 = vld [vmem:[#allocation13 + $0x4] sm:$0xf0]  ;;  %v14555_v32 = vld [vmem:[#allocation13 + $0x80] sm:$0xf]  ;;  %v7445_v48 = vadd.f32 %v16900_v33, %v7426_v10 }
 0x380   :  { %9192 = vmatmul.bf16.gmra.mxu3 %v14224_v1  ;;  %10072 = vmatpush.bf16.msrb.mxu1 %v14604_v12  ;;  %v7478_v1 = vadd.f32 %v16888_v5, %v7459_v27  ;;  %v14708_v14 = vor.u32 %v16006_v34, %v14707_v39  ;;  %v7442_v12 = vadd.f32 %v16892_v3, %v7423_v53  ;;  %v14507_v5 = vld [vmem:[#allocation13 + $0x20] sm:$0xf]  ;;  %v15970_v27 = vld [vmem:[#allocation13 + $0x94] sm:$0xf0]  ;;  %v14691_v53 = vld [vmem:[#allocation13 + $0x190] sm:$0xf] }
 0x381   :  { %9261 = vmatpush.bf16.msra.mxu3 %v15930_v17  ;;  %v14660_v17 = vor.u32 %v15994_v24, %v14659_v43  ;;  %v16906_v41 = vpop.f32.mrf.mxu3  ;;  %v16908_v38 = vpop.f32.mrf.mxu0  ;;  %v14216_v24 = vor.u32 %v15879_v40, %v14213_v26  ;;  %v15968_v39 = vld [vmem:[#allocation13 + $0x84] sm:$0xf0]  ;;  %v14619_v34 = vld [vmem:[#allocation13 + $0x100] sm:$0xf]  ;;  %v16030_v59 = vld [vmem:[#allocation13 + $0x274] sm:$0xf0] }
 0x382   :  { %9205 = vmatpush.bf16.msra.mxu0 %v15905_v37  ;;  %v16904_v9 = vpop.f32.mrf.mxu2  ;;  %v14724_v37 = vor.u32 %v16010_v8, %v14723_v51  ;;  %v7461_v43 = vadd.f32 %v16894_v31, %v7442_v12  ;;  %v15972_v51 = vld [vmem:[#allocation13 + $0xa4] sm:$0xf0]  ;;  %v14683_v50 = vld [vmem:[#allocation13 + $0x180] sm:$0xf]  ;;  %v14549_v33 = vld [vmem:[#allocation13 + $0x78] sm:$0xf0] }
 0x383   :  { %10092 = vmatpush.bf16.msrb.mxu2 %v14660_v17  ;;  %v14635_v17 = vld [vmem:[#allocation13 + $0x120] sm:$0xf]  ;;  %v15988_v8 = vld [vmem:[#allocation13 + $0x124] sm:$0xf0]  ;;  %v7464_v40 = vadd.f32 %v16904_v9, %v7445_v48 }
 0x384   :  { %10073 = vmatpush.bf16.msrb.mxu1 %v14596_v49  ;;  %v14571_v49 = vld [vmem:[#allocation13 + $0xa0] sm:$0xf]  ;;  %v7480_v30 = vadd.f32 %v16896_v42, %v7461_v43  ;;  %v14492_v42 = vor.u32 %v15952_v61, %v14491_v54  ;;  %v16000_v12 = vld [vmem:[#allocation13 + $0x184] sm:$0xf0]  ;;  %v14227_v43 = vld [vmem:[#allocation3 + $0x158] sm:$0xf] }
 0x385   :  { %9262 = vmatpush.bf16.msra.mxu3 %v15929_v47  ;;  %v16910_v47 = vpop.f32.mrf.mxu1  ;;  %v14572_v19 = vor.u32 %v15972_v51, %v14571_v49  ;;  %v15887_v49 = vld [vmem:[#allocation3 + $0x1cc] sm:$0xf0]  ;;  %v7483_v51 = vadd.f32 %v16906_v41, %v7464_v40  ;;  %v14795_v10 = vld [vmem:[#allocation13 + $0x260] sm:$0xf] }
 0x386   :  { %10052 = vmatpush.bf16.msrb.mxu0 %v14548_v25  ;;  %v14524_v25 = vor.u32 %v15960_v11, %v14523_v62  ;;  %v14636_v62 = vor.u32 %v15988_v8, %v14635_v17  ;;  %v14699_v11 = vld [vmem:[#allocation13 + $0x1a0] sm:$0xf] }
 0x387   :  { %10093 = vmatpush.bf16.msrb.mxu2 %v14652_v35  ;;  %v14700_v31 = vor.u32 %v16004_v23, %v14699_v11  ;;  %v14564_v35 = vor.u32 %v15970_v27, %v14563_v21  ;;  %v14228_v23 = vor.u32 %v15887_v49, %v14227_v43 }
 0x388   :  { %10074 = vmatpush.bf16.msrb.mxu1 %v14588_v28 }
 0x389   :  { %10109 = vmatpush.bf16.msrb.mxu3 %v14740_v44  ;;  %v14715_v44 = vld [vmem:[#allocation13 + $0x1c0] sm:$0xf]  ;;  %v7496_v60 = vpop.f32.mrf.mxu0 }
 0x38a   :  { %10053 = vmatpush.bf16.msrb.mxu0 %v14540_v13  ;;  %v14716_v45 = vor.u32 %v16008_v4, %v14715_v44  ;;  %v16917_v18 = vpop.f32.mrf.mxu2  ;;  %v16919_v13 = vpop.f32.mrf.mxu3  ;;  %v7497_v0 = vadd.f32 %v7496_v60, %v7478_v1  ;;  %v14627_v44 = vld [vmem:[#allocation13 + $0x110] sm:$0xf]  ;;  %v15986_v4 = vld [vmem:[#allocation13 + $0x114] sm:$0xf0]  ;;  %v15984_v1 = vld [vmem:[#allocation13 + $0x104] sm:$0xf0] }
 0x38b   :  { %10094 = vmatpush.bf16.msrb.mxu2 %v14644_v63  ;;  %9206 = vmatmul.bf16.vlgmr.msra.gmra.mxu0 %v14204_v56  ;;  %v14628_v57 = vor.u32 %v15986_v4, %v14627_v44  ;;  %v14803_v60 = vld [vmem:[#allocation13 + $0x270] sm:$0xf]  ;;  %v14684_v56 = vor.u32 %v16000_v12, %v14683_v50 }
 0x38c   :  { %10075 = vmatpush.bf16.msrb.mxu1 %v14580_v7 }
 0x38d   :  { %10110 = vmatpush.bf16.msrb.mxu3 %v14732_v36  ;;  %v7515_v58 = vpop.f32.mrf.mxu1  ;;  %v14211_v36 = vld [vmem:[#allocation3 + $0x70] sm:$0xf]  ;;  %9225 = vmatmul.bf16.vlgmr.msra.gmra.mxu1 %v14208_v2  ;;  %v14804_v2 = vor.u32 %v16030_v59, %v14803_v60  ;;  %v14771_v60 = vld [vmem:[#allocation13 + $0x230] sm:$0xf]  ;;  %v14517_v59 = vld [vmem:[#allocation13 + $0x38] sm:$0xf0] }
 0x38e   :  { %10054 = vmatpush.bf16.msrb.mxu0 %v14532_v55  ;;  %v14212_v29 = vor.u32 %v15882_v16, %v14211_v36  ;;  %v15956_v55 = vld [vmem:[#allocation13 + $0x24] sm:$0xf0]  ;;  %v15965_v36 = vld [vmem:[#allocation13 + $0x74] sm:$0xf] }
 0x38f   :  { %v14508_v3 = vor.u32 %v15956_v55, %v14507_v5  ;;  %10095 = vmatpush.bf16.msrb.mxu2 %v14636_v62  ;;  %v7428_v5 = vadd.f32 %v16877_v52, %v16908_v38  ;;  %v14237_v62 = vld [vmem:[#allocation3 + $0x1d8] sm:$0xf0] }
 0x390   :  { %9244 = vmatmul.bf16.vlgmr.msra.gmra.mxu2 %v14212_v29  ;;  %9263 = vmatmul.bf16.vlgmr.msra.gmra.mxu3 %v14216_v24  ;;  %v14552_v29 = vor.u32 %v15965_v36, %v14549_v33  ;;  %v15884_v24 = vld [vmem:[#allocation3 + $0x15c] sm:$0xf] }
 0x391   :  { %10111 = vmatpush.bf16.msrb.mxu3 %v14724_v37  ;;  %v7516_v37 = vadd.f32 %v7515_v58, %v7497_v0  ;;  %10076 = vmatpush.bf16.msrb.mxu1 %v14572_v19  ;;  %v7498_v16 = vpop.f32.mrf.mxu0  ;;  %v14620_v58 = vor.u32 %v15984_v1, %v14619_v34  ;;  %v15888_v19 = vld [vmem:[#allocation3 + $0x1d4] sm:$0xf0]  ;;  %v14779_v34 = vld [vmem:[#allocation13 + $0x240] sm:$0xf]  ;;  %v16024_v1 = vld [vmem:[#allocation13 + $0x244] sm:$0xf0] }
 0x392   :  { %10055 = vmatpush.bf16.msrb.mxu0 %v14524_v25  ;;  %v14499_v25 = vld [vmem:[#allocation13 + $0x10] sm:$0xf]  ;;  %v16926_v22 = vpop.f32.mrf.mxu2  ;;  %v7499_v26 = vadd.f32 %v7498_v16, %v7480_v30 }
 0x393   :  { %v7525_v20 = vmax.f32 %v7516_v37, 0.0  ;;  %v14500_v28 = vor.u32 %v15954_v15, %v14499_v25  ;;  %10096 = vmatpush.bf16.msrb.mxu2 %v14628_v57  ;;  %v14235_v37 = vld [vmem:[#allocation3 + $0x160] sm:$0xf]  ;;  %v15885_v25 = vld [vmem:[#allocation3 + $0x164] sm:$0xf]  ;;  %v7447_v15 = vadd.f32 %v16910_v47, %v7428_v5  ;;  %v8004_v36 = vadd.f32 %v16877_v52, %v16926_v22 }
 0x394   :  { %v14240_v44 = vor.u32 %v15885_v25, %v14237_v62  ;;  %v14787_v57 = vld [vmem:[#allocation13 + $0x250] sm:$0xf]  ;;  %v15937_v5 = vld [vmem:[#allocation4 + $0x4] sm:$0xf] }
 0x395   :  { %10112 = vmatpush.bf16.msrb.mxu3 %v14716_v45  ;;  %v16002_v45 = vld [vmem:[#allocation13 + $0x194] sm:$0xf0]  ;;  %v7529_v6 = vpack.c.bf16 %v7525_v20, %v7525_v20  ;;  %v7517_v63 = vpop.f32.mrf.mxu1  ;;  %10077 = vmatpush.bf16.msrb.mxu1 %v14564_v35  ;;  %v15963_v20 = vld [vmem:[#allocation13 + $0x64] sm:$0xf]  ;;  %v14236_v35 = vor.u32 %v15888_v19, %v14235_v37  ;;  %v7466_v54 = vadd.f32 %v16917_v18, %v7447_v15  ;;  %v14509_v15 = vld [vmem:[#allocation13 + $0x28] sm:$0xf0] }
 0x396   :  { %10056 = vmatpush.bf16.msrb.mxu0 %v14516_v46  ;;  %v16928_v46 = vpop.f32.mrf.mxu3  ;;  %v14692_v7 = vor.u32 %v16002_v45, %v14691_v53  ;;  %v7518_v0 = vadd.f32 %v7517_v63, %v7499_v26  ;;  %v16026_v53 = vld [vmem:[#allocation13 + $0x254] sm:$0xf0]  ;;  %v15961_v45 = vld [vmem:[#allocation13 + $0x54] sm:$0xf]  ;;  %v14780_v26 = vor.u32 %v16024_v1, %v14779_v34  ;;  %v14493_v34 = vld [vmem:[#allocation13 + $0x8] sm:$0xf0] }
 0x397   :  { %7533 = vst [vmem:[#allocation4 + $0xc] sm:$0xf] %v7529_v6  ;;  %10097 = vmatpush.bf16.msrb.mxu2 %v14620_v58  ;;  %v14533_v6 = vld [vmem:[#allocation13 + $0x58] sm:$0xf0]  ;;  %v16022_v58 = vld [vmem:[#allocation13 + $0x234] sm:$0xf0]  ;;  %v8023_v37 = vadd.f32 %v16928_v46, %v8004_v36 }
 0x398   :  { %v7526_v55 = vmax.f32 %v7518_v0, 0.0  ;;  %v14536_v61 = vor.u32 %v15961_v45, %v14533_v6  ;;  %v14772_v40 = vor.u32 %v16022_v58, %v14771_v60  ;;  %v15981_v1 = vld [vmem:[#allocation13 + $0xf4] sm:$0xf] }
 0x399   :  { %10113 = vmatpush.bf16.msrb.mxu3 %v14708_v14  ;;  %v14556_v14 = vor.u32 %v15968_v39, %v14555_v32  ;;  %v7501_v38 = vpop.f32.mrf.mxu0  ;;  %v7485_v32 = vadd.f32 %v16919_v13, %v7466_v54  ;;  %v15957_v13 = vld [vmem:[#allocation13 + $0x34] sm:$0xf] }
 0x39a   :  { %10057 = vmatpush.bf16.msrb.mxu0 %v14508_v3  ;;  %v14229_v3 = vld [vmem:[#allocation3 + $0x1d0] sm:$0xf0]  ;;  %v7530_v17 = vpack.c.bf16 %v7526_v55, %v7526_v55  ;;  %v16935_v8 = vpop.f32.mrf.mxu2  ;;  %v7502_v41 = vadd.f32 %v7501_v38, %v7483_v51  ;;  %v14520_v0 = vor.u32 %v15957_v13, %v14517_v59  ;;  %v14437_v55 = vld [vmem:[#allocation4 + $0x1c] sm:$0xf0]  ;;  %v15941_v51 = vld [vmem:[#allocation4 + $0x20] sm:$0xf0] }
 0x39b   :  { %10078 = vmatpush.bf16.msrb.mxu1 %v14556_v14  ;;  %v14232_v21 = vor.u32 %v15884_v24, %v14229_v3  ;;  %9211 = vmatmul.bf16.gmra.mxu0 %v14228_v23  ;;  %v14525_v14 = vld [vmem:[#allocation13 + $0x48] sm:$0xf0]  ;;  %v14443_v3 = vld [vmem:[#allocation4 + $0x8] sm:$0xf]  ;;  %v14763_v38 = vld [vmem:[#allocation13 + $0x220] sm:$0xf]  ;;  %v16955_v25 = vor.u32 %v15937_v5, %v14437_v55 }
 0x39c   :  { %7534 = vst [vmem:[#allocation4 + $0x28] sm:$0xf] %v7530_v17  ;;  %v15979_v13 = vld [vmem:[#allocation13 + $0xe4] sm:$0xf]  ;;  %v15944_v55 = vld [vmem:[#allocation4 + $0x3c] sm:$0xf] }
 0x39d   :  { %10114 = vmatpush.bf16.msrb.mxu3 %v14700_v31  ;;  %v7520_v11 = vpop.f32.mrf.mxu1  ;;  %v16028_v31 = vld [vmem:[#allocation13 + $0x264] sm:$0xf0]  ;;  %9230 = vmatmul.bf16.gmra.mxu1 %v14232_v21  ;;  %v16957_v21 = vor.u32 %v15941_v51, %v14443_v3  ;;  %v16027_v59 = vld [vmem:[#allocation13 + $0x264] sm:$0xf] }
 0x39e   :  { %10058 = vmatpush.bf16.msrb.mxu0 %v14500_v28  ;;  %v16937_v9 = vpop.f32.mrf.mxu3  ;;  %v14796_v27 = vor.u32 %v16028_v31, %v14795_v10  ;;  %v14541_v28 = vld [vmem:[#allocation13 + $0x68] sm:$0xf0]  ;;  %v7521_v30 = vadd.f32 %v7520_v11, %v7502_v41  ;;  %v15938_v62 = vld [vmem:[#allocation4 + $0xc] sm:$0xf]  ;;  %v15955_v31 = vld [vmem:[#allocation13 + $0x24] sm:$0xf] }
 0x39f   :  { %v14544_v4 = vor.u32 %v15963_v20, %v14541_v28  ;;  %v16020_v11 = vld [vmem:[#allocation13 + $0x224] sm:$0xf0]  ;;  %v14512_v46 = vor.u32 %v15955_v31, %v14509_v15  ;;  %v14755_v20 = vld [vmem:[#allocation13 + $0x210] sm:$0xf]  ;;  %v16018_v28 = vld [vmem:[#allocation13 + $0x214] sm:$0xf0] }
 0x3a0   :  { %9249 = vmatmul.bf16.gmra.mxu2 %v14236_v35  ;;  %9268 = vmatmul.bf16.gmra.mxu3 %v14240_v44  ;;  %v7527_v47 = vmax.f32 %v7521_v30, 0.0  ;;  %v14764_v10 = vor.u32 %v16020_v11, %v14763_v38  ;;  %v15953_v35 = vld [vmem:[#allocation13 + $0x14] sm:$0xf]  ;;  %v8006_v44 = vadd.f32 %v16877_v52, %v16935_v8  ;;  %v14789_v11 = vld [vmem:[#allocation13 + $0x258] sm:$0xf0] }
 0x3a1   :  { %10115 = vmatpush.bf16.msrb.mxu3 %v14692_v7  ;;  %v14788_v7 = vor.u32 %v16026_v53, %v14787_v57  ;;  %v7503_v63 = vpop.f32.mrf.mxu0  ;;  %v14756_v57 = vor.u32 %v16018_v28, %v14755_v20  ;;  %v16025_v38 = vld [vmem:[#allocation13 + $0x254] sm:$0xf] }
 0x3a2   :  { %10059 = vmatpush.bf16.msrb.mxu0 %v14492_v42  ;;  %v7531_v39 = vpack.c.bf16 %v7527_v47, %v7527_v47  ;;  %v16942_v48 = vpop.f32.mrf.mxu2  ;;  %v7504_v50 = vadd.f32 %v7503_v63, %v7485_v32  ;;  %v15959_v42 = vld [vmem:[#allocation13 + $0x44] sm:$0xf]  ;;  %v8025_v54 = vadd.f32 %v16937_v9, %v8006_v44  ;;  %v16016_v32 = vld [vmem:[#allocation13 + $0x204] sm:$0xf0] }
 0x3a3   :  { %v14528_v12 = vor.u32 %v15959_v42, %v14525_v14  ;;  %v14445_v17 = vld [vmem:[#allocation4 + $0x24] sm:$0xf0]  ;;  %v14613_v42 = vld [vmem:[#allocation13 + $0xf8] sm:$0xf0]  ;;  %v16029_v14 = vld [vmem:[#allocation13 + $0x274] sm:$0xf]  ;;  %v8009_v9 = vadd.f32 %v16877_v52, %v16942_v48 }
 0x3a4   :  { %7535 = vst [vmem:[#allocation4 + $0x44] sm:$0xf] %v7531_v39  ;;  %v14616_v60 = vor.u32 %v15981_v1, %v14613_v42  ;;  %v16021_v1 = vld [vmem:[#allocation13 + $0x234] sm:$0xf] }
 0x3a5   :  { %10116 = vmatpush.bf16.msrb.mxu3 %v14684_v56  ;;  %v7522_v18 = vpop.f32.mrf.mxu1 }
 0x3a6   :  { %10128 = vmatpush.bf16.msra.mxu0 %v14804_v2  ;;  %v16944_v16 = vpop.f32.mrf.mxu3  ;;  %v7523_v56 = vadd.f32 %v7522_v18, %v7504_v50  ;;  %v14435_v2 = vld [vmem:[#allocation4] sm:$0xf]  ;;  %v15951_v18 = vld [vmem:[#allocation13 + $0x4] sm:$0xf] }
 0x3a8   :  { %v7528_v33 = vmax.f32 %v7523_v56, 0.0  ;;  %v14605_v56 = vld [vmem:[#allocation13 + $0xe8] sm:$0xf0] }
 0x3a9   :  { %10185 = vmatpush.bf16.msra.mxu3 %v14552_v29  ;;  %v15940_v29 = vld [vmem:[#allocation4 + $0x18] sm:$0xf0]  ;;  %v8041_v22 = vpop.f32.mrf.mxu0  ;;  %v14608_v48 = vor.u32 %v15979_v13, %v14605_v56  ;;  %v15971_v13 = vld [vmem:[#allocation13 + $0xa4] sm:$0xf]  ;;  %v14573_v56 = vld [vmem:[#allocation13 + $0xa8] sm:$0xf0] }
 0x3aa   :  { %10129 = vmatpush.bf16.msra.mxu0 %v14796_v27  ;;  %v7532_v49 = vpack.c.bf16 %v7528_v33, %v7528_v33  ;;  %v16948_v43 = vpop.f32.mrf.mxu2  ;;  %v16953_v23 = vor.u32 %v15940_v29, %v14435_v2  ;;  %v8042_v41 = vadd.f32 %v8041_v22, %v8023_v37  ;;  %v16959_v27 = vor.u32 %v15938_v62, %v14445_v17  ;;  %v14797_v33 = vld [vmem:[#allocation13 + $0x268] sm:$0xf0]  ;;  %v15947_v2 = vld [vmem:[#allocation4 + $0x50] sm:$0xf0]  ;;  %v14465_v29 = vld [vmem:[#allocation4 + $0x54] sm:$0xf0] }
 0x3ab   :  { %v14800_v51 = vor.u32 %v16027_v59, %v14797_v33  ;;  %v15977_v17 = vld [vmem:[#allocation13 + $0xd4] sm:$0xf]  ;;  %v8028_v37 = vadd.f32 %v16944_v16, %v8009_v9  ;;  %v14597_v62 = vld [vmem:[#allocation13 + $0xd8] sm:$0xf0]  ;;  %v15945_v20 = vld [vmem:[#allocation4 + $0x44] sm:$0xf] }
 0x3ac   :  { %7536 = vst [vmem:[#allocation4 + $0x60] sm:$0xf] %v7532_v49  ;;  %10060 = vmatmul.bf16.vlgmr.msrb.gmra.mxu0 %v16953_v23  ;;  %v15948_v49 = vld [vmem:[#allocation4 + $0x58] sm:$0xf0]  ;;  %v16019_v59 = vld [vmem:[#allocation13 + $0x224] sm:$0xf] }
 0x3ad   :  { %10186 = vmatpush.bf16.msra.mxu3 %v14544_v4  ;;  %v8060_v19 = vpop.f32.mrf.mxu1  ;;  %10079 = vmatmul.bf16.vlgmr.msrb.gmra.mxu1 %v16955_v25  ;;  %v14501_v4 = vld [vmem:[#allocation13 + $0x18] sm:$0xf0]  ;;  %v14867_v33 = vld [vmem:[#allocation13 + $0x2f0] sm:$0xf] }
 0x3ae   :  { %10130 = vmatpush.bf16.msra.mxu0 %v14788_v7  ;;  %v16950_v24 = vpop.f32.mrf.mxu3  ;;  %v14504_v53 = vor.u32 %v15953_v35, %v14501_v4  ;;  %v8061_v45 = vadd.f32 %v8060_v19, %v8042_v41  ;;  %v16973_v35 = vor.u32 %v15944_v55, %v14465_v29 }
 0x3b0   :  { %10098 = vmatmul.bf16.vlgmr.msrb.gmra.mxu2 %v16957_v21  ;;  %10117 = vmatmul.bf16.vlgmr.msrb.gmra.mxu3 %v16959_v27 }
 0x3b1   :  { %10187 = vmatpush.bf16.msra.mxu3 %v14536_v61  ;;  %v8043_v8 = vpop.f32.mrf.mxu0  ;;  %v14747_v61 = vld [vmem:[#allocation13 + $0x200] sm:$0xf] }
 0x3b2   :  { %10131 = vmatpush.bf16.msra.mxu0 %v14780_v26  ;;  %v8079_v30 = vpop.f32.mrf.mxu2  ;;  %v8044_v39 = vadd.f32 %v8043_v8, %v8025_v54  ;;  %v14748_v63 = vor.u32 %v16016_v32, %v14747_v61  ;;  %v14496_v26 = vor.u32 %v15951_v18, %v14493_v34  ;;  %v15975_v54 = vld [vmem:[#allocation13 + $0xc4] sm:$0xf]  ;;  %v14781_v8 = vld [vmem:[#allocation13 + $0x248] sm:$0xf0]  ;;  %v14581_v34 = vld [vmem:[#allocation13 + $0xb8] sm:$0xf0] }
 0x3b3   :  { %v8080_v47 = vadd.f32 %v8079_v30, %v8061_v45  ;;  %v14473_v3 = vld [vmem:[#allocation4 + $0x5c] sm:$0xf0]  ;;  %v8011_v45 = vadd.f32 %v16877_v52, %v16948_v43  ;;  %v14589_v30 = vld [vmem:[#allocation13 + $0xc8] sm:$0xf0]  ;;  %v15973_v52 = vld [vmem:[#allocation13 + $0xb4] sm:$0xf] }
 0x3b4   :  { %v16977_v4 = vor.u32 %v15945_v20, %v14473_v3  ;;  %v14592_v32 = vor.u32 %v15975_v54, %v14589_v30  ;;  %v14565_v3 = vld [vmem:[#allocation13 + $0x98] sm:$0xf0]  ;;  %v14859_v54 = vld [vmem:[#allocation13 + $0x2e0] sm:$0xf]  ;;  %v16044_v30 = vld [vmem:[#allocation13 + $0x2e4] sm:$0xf0] }
 0x3b5   :  { %10188 = vmatpush.bf16.msra.mxu3 %v14528_v12  ;;  %v8062_v7 = vpop.f32.mrf.mxu1  ;;  %v14805_v12 = vld [vmem:[#allocation13 + $0x278] sm:$0xf0]  ;;  %v8030_v43 = vadd.f32 %v16950_v24, %v8011_v45  ;;  %v14765_v24 = vld [vmem:[#allocation13 + $0x228] sm:$0xf0] }
 0x3b6   :  { %10132 = vmatpush.bf16.msra.mxu0 %v14772_v40  ;;  %v8098_v6 = vpop.f32.mrf.mxu3  ;;  %v14808_v58 = vor.u32 %v16029_v14, %v14805_v12  ;;  %v8063_v40 = vadd.f32 %v8062_v7, %v8044_v39 }
 0x3b7   :  { %v8099_v50 = vadd.f32 %v8098_v6, %v8080_v47  ;;  %v16023_v6 = vld [vmem:[#allocation13 + $0x244] sm:$0xf] }
 0x3b8   :  { %v14784_v39 = vor.u32 %v16023_v6, %v14781_v8  ;;  %v15967_v6 = vld [vmem:[#allocation13 + $0x84] sm:$0xf]  ;;  %v14557_v8 = vld [vmem:[#allocation13 + $0x88] sm:$0xf0] }
 0x3b9   :  { %10189 = vmatpush.bf16.msra.mxu3 %v14520_v0  ;;  %v8108_v36 = vmax.f32 %v8099_v50, 0.0  ;;  %v14463_v0 = vld [vmem:[#allocation4 + $0x38] sm:$0xf]  ;;  %v8046_v31 = vpop.f32.mrf.mxu0  ;;  %v14773_v50 = vld [vmem:[#allocation13 + $0x238] sm:$0xf0] }
 0x3ba   :  { %10133 = vmatpush.bf16.msra.mxu0 %v14764_v10  ;;  %v8081_v22 = vpop.f32.mrf.mxu2  ;;  %v16971_v41 = vor.u32 %v15947_v2, %v14463_v0  ;;  %v8047_v28 = vadd.f32 %v8046_v31, %v8028_v37  ;;  %v14576_v0 = vor.u32 %v15971_v13, %v14573_v56  ;;  %v16046_v2 = vld [vmem:[#allocation13 + $0x2f4] sm:$0xf0]  ;;  %v16017_v37 = vld [vmem:[#allocation13 + $0x214] sm:$0xf]  ;;  %v16043_v13 = vld [vmem:[#allocation13 + $0x2e4] sm:$0xf] }
 0x3bb   :  { %v8112_v5 = vpack.c.bf16 %v8108_v36, %v8108_v36  ;;  %v8082_v10 = vadd.f32 %v8081_v22, %v8063_v40  ;;  %v14868_v55 = vor.u32 %v16046_v2, %v14867_v33  ;;  %v14757_v22 = vld [vmem:[#allocation13 + $0x218] sm:$0xf0] }
 0x3bc   :  { %10065 = vmatmul.bf16.gmra.mxu0 %v16971_v41 }
 0x3bd   :  { %10190 = vmatpush.bf16.msra.mxu3 %v14512_v46  ;;  %8116 = vst [vmem:[#allocation4 + $0x10] sm:$0xf] %v8112_v5  ;;  %v8065_v15 = vpop.f32.mrf.mxu1  ;;  %v14471_v46 = vld [vmem:[#allocation4 + $0x40] sm:$0xf]  ;;  %10084 = vmatmul.bf16.gmra.mxu1 %v16973_v35  ;;  %v14768_v5 = vor.u32 %v16019_v59, %v14765_v24  ;;  %v14861_v59 = vld [vmem:[#allocation13 + $0x2e8] sm:$0xf0] }
 0x3be   :  { %10134 = vmatpush.bf16.msra.mxu0 %v14756_v57  ;;  %v8100_v19 = vpop.f32.mrf.mxu3  ;;  %v16975_v44 = vor.u32 %v15948_v49, %v14471_v46  ;;  %v14600_v57 = vor.u32 %v15977_v17, %v14597_v62  ;;  %v8066_v7 = vadd.f32 %v8065_v15, %v8047_v28  ;;  %v15969_v49 = vld [vmem:[#allocation13 + $0x94] sm:$0xf]  ;;  %10147 = vmatpush.bf16.msra.mxu1 %v14868_v55  ;;  %v16038_v24 = vld [vmem:[#allocation13 + $0x2b4] sm:$0xf0] }
 0x3bf   :  { %v8101_v16 = vadd.f32 %v8100_v19, %v8082_v10  ;;  %v14568_v15 = vor.u32 %v15969_v49, %v14565_v3  ;;  %v14760_v46 = vor.u32 %v16017_v37, %v14757_v22  ;;  %v14864_v33 = vor.u32 %v16043_v13, %v14861_v59  ;;  %v16036_v37 = vld [vmem:[#allocation13 + $0x2a4] sm:$0xf0]  ;;  %v16039_v22 = vld [vmem:[#allocation13 + $0x2c4] sm:$0xf] }
 0x3c0   :  { %10103 = vmatmul.bf16.gmra.mxu2 %v16975_v44  ;;  %10122 = vmatmul.bf16.gmra.mxu3 %v16977_v4  ;;  %v15995_v13 = vld [vmem:[#allocation13 + $0x164] sm:$0xf] }
 0x3c1   :  { %10191 = vmatpush.bf16.msra.mxu3 %v14504_v53  ;;  %v14792_v53 = vor.u32 %v16025_v38, %v14789_v11  ;;  %v8109_v47 = vmax.f32 %v8101_v16, 0.0  ;;  %v8048_v42 = vpop.f32.mrf.mxu0  ;;  %v16031_v59 = vld [vmem:[#allocation13 + $0x284] sm:$0xf] }
 0x3c2   :  { %10135 = vmatpush.bf16.msra.mxu0 %v14748_v63  ;;  %v8084_v63 = vpop.f32.mrf.mxu2  ;;  %v8049_v12 = vadd.f32 %v8048_v42, %v8030_v43  ;;  %v16045_v43 = vld [vmem:[#allocation13 + $0x2f4] sm:$0xf] }
 0x3c3   :  { %v8113_v61 = vpack.c.bf16 %v8109_v47, %v8109_v47  ;;  %v14860_v47 = vor.u32 %v16044_v30, %v14859_v54 }
 0x3c4   :  { %v14451_v11 = vld [vmem:[#allocation4 + $0x10] sm:$0xf] }
 0x3c5   :  { %10192 = vmatpush.bf16.msra.mxu3 %v14496_v26  ;;  %8117 = vst [vmem:[#allocation4 + $0x2c] sm:$0xf] %v8113_v61  ;;  %v8085_v26 = vadd.f32 %v8084_v63, %v8066_v7  ;;  %v8067_v14 = vpop.f32.mrf.mxu1  ;;  %v16015_v7 = vld [vmem:[#allocation13 + $0x204] sm:$0xf]  ;;  %v14749_v61 = vld [vmem:[#allocation13 + $0x208] sm:$0xf0]  ;;  %10148 = vmatpush.bf16.msra.mxu1 %v14860_v47 }
 0x3c6   :  { %10204 = vmatpush.bf16.msrb.mxu0 %v14616_v60  ;;  %v8103_v18 = vpop.f32.mrf.mxu3  ;;  %v14584_v60 = vor.u32 %v15973_v52, %v14581_v34  ;;  %v8068_v40 = vadd.f32 %v8067_v14, %v8049_v12  ;;  %v16042_v52 = vld [vmem:[#allocation13 + $0x2d4] sm:$0xf0] }
 0x3c7   :  { %v8104_v9 = vadd.f32 %v8103_v18, %v8085_v26  ;;  %v14869_v18 = vld [vmem:[#allocation13 + $0x2f8] sm:$0xf0] }
 0x3c8   :  { %v14872_v34 = vor.u32 %v16045_v43, %v14869_v18  ;;  %v14677_v18 = vld [vmem:[#allocation13 + $0x178] sm:$0xf0] }
 0x3c9   :  { %10261 = vmatpush.bf16.msrb.mxu3 %v14808_v58  ;;  %v14776_v58 = vor.u32 %v16021_v1, %v14773_v50  ;;  %v8110_v36 = vmax.f32 %v8104_v9, 0.0  ;;  %v16986_v62 = vpop.f32.mrf.mxu0 }
 0x3ca   :  { %10205 = vmatpush.bf16.msrb.mxu0 %v14608_v48  ;;  %v8086_v48 = vpop.f32.mrf.mxu2 }
 0x3cb   :  { %v8114_v29 = vpack.c.bf16 %v8110_v36, %v8110_v36  ;;  %v8087_v19 = vadd.f32 %v8086_v48, %v8068_v40  ;;  %v14835_v36 = vld [vmem:[#allocation13 + $0x2b0] sm:$0xf]  ;;  %v16041_v40 = vld [vmem:[#allocation13 + $0x2d4] sm:$0xf] }
 0x3cc   :  { %v15942_v17 = vld [vmem:[#allocation4 + $0x28] sm:$0xf0]  ;;  %v14836_v2 = vor.u32 %v16038_v24, %v14835_v36  ;;  %v14813_v36 = vld [vmem:[#allocation13 + $0x288] sm:$0xf0] }
 0x3cd   :  { %10262 = vmatpush.bf16.msrb.mxu3 %v14800_v51  ;;  %8118 = vst [vmem:[#allocation4 + $0x48] sm:$0xf] %v8114_v29  ;;  %v16988_v38 = vpop.f32.mrf.mxu1  ;;  %v16990_v10 = vor.u32 %v15942_v17, %v14451_v11  ;;  %v17014_v29 = vld [vmem:[#allocation12] ss:$0 sm:$0xff]  ;;  %v14827_v17 = vld [vmem:[#allocation13 + $0x2a0] sm:$0xf] }
 0x3ce   :  { %10206 = vmatpush.bf16.msrb.mxu0 %v14600_v57  ;;  %v8105_v51 = vpop.f32.mrf.mxu3  ;;  %v14845_v11 = vld [vmem:[#allocation13 + $0x2c8] sm:$0xf0] }
 0x3cf   :  { %v8106_v31 = vadd.f32 %v8105_v51, %v8087_v19  ;;  %10136 = vmatmul.bf16.vlgmr.msra.gmra.mxu0 %v16990_v10  ;;  %v14828_v19 = vor.u32 %v16036_v37, %v14827_v17  ;;  %v16060_v37 = vld [vmem:[#allocation13 + $0x364] sm:$0xf0] }
 0x3d0   :  { %10193 = vmatmul.bf16.vlgmr.msra.gmra.mxu3 %v16953_v23  ;;  %v14560_v23 = vor.u32 %v15967_v6, %v14557_v8 }
 0x3d1   :  { %10263 = vmatpush.bf16.msrb.mxu3 %v14792_v53  ;;  %v8111_v20 = vmax.f32 %v8106_v31, 0.0  ;;  %v16998_v53 = vpop.f32.mrf.mxu0  ;;  %v16034_v31 = vld [vmem:[#allocation13 + $0x294] sm:$0xf0] }
 0x3d2   :  { %10207 = vmatpush.bf16.msrb.mxu0 %v14592_v32  ;;  %v16994_v16 = vpop.f32.mrf.mxu2  ;;  %v14752_v32 = vor.u32 %v16015_v7, %v14749_v61  ;;  %v8589_v30 = vadd.f32 %v17014_v29, %v16998_v53  ;;  %v14829_v53 = vld [vmem:[#allocation13 + $0x2a8] sm:$0xf0] }
 0x3d3   :  { %v8115_v28 = vpack.c.bf16 %v8111_v20, %v8111_v20  ;;  %v16037_v20 = vld [vmem:[#allocation13 + $0x2b4] sm:$0xf] }
 0x3d4   :  { %v14479_v12 = vld [vmem:[#allocation4 + $0x48] sm:$0xf] }
 0x3d5   :  { %10264 = vmatpush.bf16.msrb.mxu3 %v14784_v39  ;;  %8119 = vst [vmem:[#allocation4 + $0x64] sm:$0xf] %v8115_v28  ;;  %v17000_v45 = vpop.f32.mrf.mxu1  ;;  %v14851_v39 = vld [vmem:[#allocation13 + $0x2d0] sm:$0xf]  ;;  %v14837_v28 = vld [vmem:[#allocation13 + $0x2b8] sm:$0xf0] }
 0x3d6   :  { %10208 = vmatpush.bf16.msrb.mxu0 %v14584_v60  ;;  %v16996_v57 = vpop.f32.mrf.mxu3  ;;  %v14852_v63 = vor.u32 %v16042_v52, %v14851_v39  ;;  %v14843_v60 = vld [vmem:[#allocation13 + $0x2c0] sm:$0xf]  ;;  %v16032_v39 = vld [vmem:[#allocation13 + $0x284] sm:$0xf0]  ;;  %v16035_v52 = vld [vmem:[#allocation13 + $0x2a4] sm:$0xf] }
 0x3d8   :  { %10149 = vmatpush.bf16.msra.mxu1 %v14852_v63  ;;  %v15997_v63 = vld [vmem:[#allocation13 + $0x174] sm:$0xf] }
 0x3d9   :  { %10265 = vmatpush.bf16.msrb.mxu3 %v14776_v58  ;;  %v17006_v42 = vpop.f32.mrf.mxu0  ;;  %v16040_v58 = vld [vmem:[#allocation13 + $0x2c4] sm:$0xf0] }
 0x3da   :  { %10209 = vmatpush.bf16.msrb.mxu0 %v14576_v0  ;;  %v17002_v1 = vpop.f32.mrf.mxu2  ;;  %v14844_v56 = vor.u32 %v16040_v58, %v14843_v60  ;;  %v14853_v0 = vld [vmem:[#allocation13 + $0x2d8] sm:$0xf0]  ;;  %v16033_v60 = vld [vmem:[#allocation13 + $0x294] sm:$0xf] }
 0x3db   :  { %v14856_v55 = vor.u32 %v16041_v40, %v14853_v0  ;;  %v14821_v58 = vld [vmem:[#allocation13 + $0x298] sm:$0xf0]  ;;  %v16062_v40 = vld [vmem:[#allocation13 + $0x374] sm:$0xf0] }
 0x3dc   :  { %v15949_v26 = vld [vmem:[#allocation4 + $0x60] sm:$0xf0]  ;;  %10150 = vmatpush.bf16.msra.mxu1 %v14844_v56  ;;  %v14669_v56 = vld [vmem:[#allocation13 + $0x168] sm:$0xf0] }
 0x3dd   :  { %10266 = vmatpush.bf16.msrb.mxu3 %v14768_v5  ;;  %v17008_v14 = vpop.f32.mrf.mxu1  ;;  %v17010_v9 = vor.u32 %v15949_v26, %v14479_v12  ;;  %v8587_v5 = vadd.f32 %v17014_v29, %v16986_v62  ;;  %v14819_v62 = vld [vmem:[#allocation13 + $0x290] sm:$0xf]  ;;  %v14832_v26 = vor.u32 %v16035_v52, %v14829_v53  ;;  %v14680_v12 = vor.u32 %v15997_v63, %v14677_v18  ;;  %v16058_v52 = vld [vmem:[#allocation13 + $0x354] sm:$0xf0]  ;;  %v15989_v53 = vld [vmem:[#allocation13 + $0x134] sm:$0xf] }
 0x3de   :  { %10210 = vmatpush.bf16.msrb.mxu0 %v14568_v15  ;;  %v17004_v50 = vpop.f32.mrf.mxu3  ;;  %v14820_v54 = vor.u32 %v16034_v31, %v14819_v62  ;;  %v14645_v63 = vld [vmem:[#allocation13 + $0x138] sm:$0xf0] }
 0x3df   :  { %10141 = vmatmul.bf16.gmra.mxu0 %v17010_v9 }
 0x3e0   :  { %10198 = vmatmul.bf16.gmra.mxu3 %v16971_v41  ;;  %10151 = vmatpush.bf16.msra.mxu1 %v14836_v2  ;;  %v8606_v41 = vadd.f32 %v16988_v38, %v8587_v5  ;;  %v14840_v38 = vor.u32 %v16037_v20, %v14837_v28  ;;  %v15993_v2 = vld [vmem:[#allocation13 + $0x154] sm:$0xf]  ;;  %v14661_v5 = vld [vmem:[#allocation13 + $0x158] sm:$0xf0] }
 0x3e1   :  { %10267 = vmatpush.bf16.msrb.mxu3 %v14760_v46  ;;  %v17022_v48 = vpop.f32.mrf.mxu0  ;;  %v14848_v46 = vor.u32 %v16039_v22, %v14845_v11 }
 0x3e2   :  { %10211 = vmatpush.bf16.msrb.mxu0 %v14560_v23  ;;  %v17018_v49 = vpop.f32.mrf.mxu2  ;;  %v8625_v15 = vadd.f32 %v16994_v16, %v8606_v41  ;;  %v8608_v16 = vadd.f32 %v17000_v45, %v8589_v30  ;;  %v8592_v45 = vadd.f32 %v17014_v29, %v17006_v42  ;;  %v8594_v28 = vadd.f32 %v17014_v29, %v17022_v48  ;;  %v14915_v48 = vld [vmem:[#allocation13 + $0x350] sm:$0xf] }
 0x3e4   :  { %10152 = vmatpush.bf16.msra.mxu1 %v14828_v19  ;;  %v8644_v6 = vadd.f32 %v16996_v57, %v8625_v15  ;;  %v8627_v57 = vadd.f32 %v17002_v1, %v8608_v16  ;;  %v14824_v1 = vor.u32 %v16033_v60, %v14821_v58  ;;  %v8611_v22 = vadd.f32 %v17008_v14, %v8592_v45  ;;  %v15991_v16 = vld [vmem:[#allocation13 + $0x144] sm:$0xf] }
 0x3e5   :  { %10268 = vmatpush.bf16.msrb.mxu3 %v14752_v32  ;;  %v17024_v51 = vpop.f32.mrf.mxu1  ;;  %v14811_v32 = vld [vmem:[#allocation13 + $0x280] sm:$0xf]  ;;  %v14816_v15 = vor.u32 %v16031_v59, %v14813_v36  ;;  %v15987_v36 = vld [vmem:[#allocation13 + $0x124] sm:$0xf] }
 0x3e6   :  { %10280 = vmatpush.bf16.msra.mxu0 %v14872_v34  ;;  %v17020_v3 = vpop.f32.mrf.mxu3  ;;  %v14812_v43 = vor.u32 %v16032_v39, %v14811_v32  ;;  %v8646_v41 = vadd.f32 %v17004_v50, %v8627_v57  ;;  %v8630_v50 = vadd.f32 %v17018_v49, %v8611_v22  ;;  %v8613_v49 = vadd.f32 %v17024_v51, %v8594_v28  ;;  %v14621_v28 = vld [vmem:[#allocation13 + $0x108] sm:$0xf0] }
 0x3e8   :  { %10153 = vmatpush.bf16.msra.mxu1 %v14820_v54  ;;  %v8649_v14 = vadd.f32 %v17020_v3, %v8630_v50  ;;  %v14907_v3 = vld [vmem:[#allocation13 + $0x340] sm:$0xf] }
 0x3e9   :  { %v8662_v7 = vpop.f32.mrf.mxu0 }
 0x3ea   :  { %10281 = vmatpush.bf16.msra.mxu0 %v14864_v33  ;;  %v17031_v47 = vpop.f32.mrf.mxu2  ;;  %v8663_v23 = vadd.f32 %v8662_v7, %v8644_v6  ;;  %v14672_v33 = vor.u32 %v15995_v13, %v14669_v56 }
 0x3eb   :  { %v8632_v18 = vadd.f32 %v17031_v47, %v8613_v49 }
 0x3ec   :  { %10154 = vmatpush.bf16.msra.mxu1 %v14812_v43  ;;  %v14916_v43 = vor.u32 %v16058_v52, %v14915_v48 }
 0x3ed   :  { %v8681_v61 = vpop.f32.mrf.mxu1 }
 0x3ee   :  { %10282 = vmatpush.bf16.msra.mxu0 %v14856_v55  ;;  %v17033_v8 = vpop.f32.mrf.mxu3  ;;  %v8682_v34 = vadd.f32 %v8681_v61, %v8663_v23  ;;  %v14923_v55 = vld [vmem:[#allocation13 + $0x360] sm:$0xf]  ;;  %v14653_v23 = vld [vmem:[#allocation13 + $0x148] sm:$0xf0] }
 0x3ef   :  { %10212 = vmatmul.bf16.vlgmr.msrb.gmra.mxu0 %v16955_v25  ;;  %v14931_v25 = vld [vmem:[#allocation13 + $0x370] sm:$0xf]  ;;  %v14924_v62 = vor.u32 %v16060_v37, %v14923_v55  ;;  %v14656_v39 = vor.u32 %v15991_v16, %v14653_v23  ;;  %v8651_v60 = vadd.f32 %v17033_v8, %v8632_v18  ;;  %v14933_v16 = vld [vmem:[#allocation13 + $0x378] sm:$0xf0]  ;;  %v14875_v23 = vld [vmem:[#allocation13 + $0x300] sm:$0xf] }
 0x3f0   :  { %10269 = vmatmul.bf16.vlgmr.msrb.gmra.mxu3 %v16990_v10  ;;  %v8691_v24 = vmax.f32 %v8682_v34, 0.0  ;;  %10223 = vmatpush.bf16.msrb.mxu1 %v14680_v12  ;;  %v14932_v0 = vor.u32 %v16062_v40, %v14931_v25  ;;  %v14648_v34 = vor.u32 %v15989_v53, %v14645_v63  ;;  %v14899_v25 = vld [vmem:[#allocation13 + $0x330] sm:$0xf]  ;;  %v16054_v40 = vld [vmem:[#allocation13 + $0x334] sm:$0xf0] }
 0x3f1   :  { %v8664_v19 = vpop.f32.mrf.mxu0  ;;  %v14900_v8 = vor.u32 %v16054_v40, %v14899_v25  ;;  %v16055_v40 = vld [vmem:[#allocation13 + $0x344] sm:$0xf] }
 0x3f2   :  { %10283 = vmatpush.bf16.msra.mxu0 %v14848_v46  ;;  %v8695_v42 = vpack.c.bf16 %v8691_v24, %v8691_v24  ;;  %v17042_v17 = vpop.f32.mrf.mxu2  ;;  %10166 = vmatpush.bf16.msra.mxu2 %v14932_v0  ;;  %v8665_v31 = vadd.f32 %v8664_v19, %v8646_v41  ;;  %v14664_v46 = vor.u32 %v15993_v2, %v14661_v5  ;;  %v14637_v24 = vld [vmem:[#allocation13 + $0x128] sm:$0xf0]  ;;  %v15985_v0 = vld [vmem:[#allocation13 + $0x114] sm:$0xf]  ;;  %v14629_v2 = vld [vmem:[#allocation13 + $0x118] sm:$0xf0] }
 0x3f3   :  { %v14891_v5 = vld [vmem:[#allocation13 + $0x320] sm:$0xf]  ;;  %v16052_v41 = vld [vmem:[#allocation13 + $0x324] sm:$0xf0]  ;;  %v14632_v37 = vor.u32 %v15985_v0, %v14629_v2 }
 0x3f4   :  { %8699 = vst [vmem:[#allocation4 + $0x14] sm:$0xf] %v8695_v42  ;;  %10224 = vmatpush.bf16.msrb.mxu1 %v14672_v33  ;;  %v14640_v33 = vor.u32 %v15987_v36, %v14637_v24  ;;  %v9170_v42 = vadd.f32 %v17014_v29, %v17042_v17  ;;  %v14892_v22 = vor.u32 %v16052_v41, %v14891_v5  ;;  %v16011_v24 = vld [vmem:[#allocation13 + $0x1e4] sm:$0xf]  ;;  %v16009_v5 = vld [vmem:[#allocation13 + $0x1d4] sm:$0xf] }
 0x3f5   :  { %v8683_v11 = vpop.f32.mrf.mxu1 }
 0x3f6   :  { %10284 = vmatpush.bf16.msra.mxu0 %v14840_v38  ;;  %v17044_v10 = vpop.f32.mrf.mxu3  ;;  %v8684_v20 = vadd.f32 %v8683_v11, %v8665_v31  ;;  %10167 = vmatpush.bf16.msra.mxu2 %v14924_v62 }
 0x3f8   :  { %v8692_v54 = vmax.f32 %v8684_v20, 0.0  ;;  %10225 = vmatpush.bf16.msrb.mxu1 %v14664_v46  ;;  %v15983_v20 = vld [vmem:[#allocation13 + $0x104] sm:$0xf] }
 0x3f9   :  { %v8667_v7 = vpop.f32.mrf.mxu0  ;;  %v14624_v17 = vor.u32 %v15983_v20, %v14621_v28  ;;  %v16007_v28 = vld [vmem:[#allocation13 + $0x1c4] sm:$0xf] }
 0x3fa   :  { %10285 = vmatpush.bf16.msra.mxu0 %v14832_v26  ;;  %v8696_v30 = vpack.c.bf16 %v8692_v54, %v8692_v54  ;;  %v17051_v38 = vpop.f32.mrf.mxu2  ;;  %v8668_v32 = vadd.f32 %v8667_v7, %v8649_v14  ;;  %v16056_v26 = vld [vmem:[#allocation13 + $0x344] sm:$0xf0]  ;;  %10168 = vmatpush.bf16.msra.mxu2 %v14916_v43  ;;  %v14883_v54 = vld [vmem:[#allocation13 + $0x310] sm:$0xf]  ;;  %v16050_v14 = vld [vmem:[#allocation13 + $0x314] sm:$0xf0] }
 0x3fb   :  { %v14908_v51 = vor.u32 %v16056_v26, %v14907_v3  ;;  %v15939_v56 = vld [vmem:[#allocation4 + $0x14] sm:$0xf]  ;;  %v14884_v7 = vor.u32 %v16050_v14, %v14883_v54 }
 0x3fc   :  { %8700 = vst [vmem:[#allocation4 + $0x30] sm:$0xf] %v8696_v30  ;;  %10226 = vmatpush.bf16.msrb.mxu1 %v14656_v39 }
 0x3fd   :  { %v8686_v61 = vpop.f32.mrf.mxu1 }
 0x3fe   :  { %10286 = vmatpush.bf16.msra.mxu0 %v14824_v1  ;;  %v17053_v6 = vpop.f32.mrf.mxu3  ;;  %v8687_v57 = vadd.f32 %v8686_v61, %v8668_v32  ;;  %10169 = vmatpush.bf16.msra.mxu2 %v14908_v51  ;;  %v16061_v61 = vld [vmem:[#allocation13 + $0x374] sm:$0xf]  ;;  %v16048_v32 = vld [vmem:[#allocation13 + $0x304] sm:$0xf0] }
 0x3ff   :  { %10217 = vmatmul.bf16.gmra.mxu0 %v16973_v35  ;;  %v14936_v49 = vor.u32 %v16061_v61, %v14933_v16  ;;  %v14876_v39 = vor.u32 %v16048_v32, %v14875_v23  ;;  %v16051_v61 = vld [vmem:[#allocation13 + $0x324] sm:$0xf]  ;;  %v14893_v16 = vld [vmem:[#allocation13 + $0x328] sm:$0xf0]  ;;  %v16005_v32 = vld [vmem:[#allocation13 + $0x1b4] sm:$0xf] }
 0x400   :  { %10274 = vmatmul.bf16.gmra.mxu3 %v17010_v9  ;;  %v8693_v12 = vmax.f32 %v8687_v57, 0.0  ;;  %10227 = vmatpush.bf16.msrb.mxu1 %v14648_v34  ;;  %v16059_v34 = vld [vmem:[#allocation13 + $0x364] sm:$0xf] }
 0x401   :  { %v8669_v47 = vpop.f32.mrf.mxu0 }
 0x402   :  { %10287 = vmatpush.bf16.msra.mxu0 %v14816_v15  ;;  %v8697_v58 = vpack.c.bf16 %v8693_v12, %v8693_v12  ;;  %v17060_v13 = vpop.f32.mrf.mxu2  ;;  %v8670_v9 = vadd.f32 %v8669_v47, %v8651_v60  ;;  %10170 = vmatpush.bf16.msra.mxu2 %v14900_v8  ;;  %v9189_v15 = vadd.f32 %v17044_v10, %v9170_v42  ;;  %v14925_v12 = vld [vmem:[#allocation13 + $0x368] sm:$0xf0]  ;;  %v16013_v60 = vld [vmem:[#allocation13 + $0x1f4] sm:$0xf]  ;;  %v14741_v47 = vld [vmem:[#allocation13 + $0x1f8] sm:$0xf0] }
 0x403   :  { %v14453_v35 = vld [vmem:[#allocation4 + $0x2c] sm:$0xf0]  ;;  %v9172_v10 = vadd.f32 %v17014_v29, %v17051_v38  ;;  %v14744_v36 = vor.u32 %v16013_v60, %v14741_v47 }
 0x404   :  { %8701 = vst [vmem:[#allocation4 + $0x4c] sm:$0xf] %v8697_v58  ;;  %v14456_v1 = vor.u32 %v15939_v56, %v14453_v35  ;;  %10228 = vmatpush.bf16.msrb.mxu1 %v14640_v33  ;;  %v14928_v56 = vor.u32 %v16059_v34, %v14925_v12  ;;  %v14917_v35 = vld [vmem:[#allocation13 + $0x358] sm:$0xf0]  ;;  %v14909_v8 = vld [vmem:[#allocation13 + $0x348] sm:$0xf0] }
 0x405   :  { %v8688_v59 = vpop.f32.mrf.mxu1  ;;  %v9191_v53 = vadd.f32 %v17053_v6, %v9172_v10  ;;  %v14733_v6 = vld [vmem:[#allocation13 + $0x1e8] sm:$0xf0]  ;;  %v14709_v10 = vld [vmem:[#allocation13 + $0x1b8] sm:$0xf0]  ;;  %v16003_v34 = vld [vmem:[#allocation13 + $0x1a4] sm:$0xf] }
 0x406   :  { %v17062_v45 = vpop.f32.mrf.mxu3  ;;  %v8689_v55 = vadd.f32 %v8688_v59, %v8670_v9  ;;  %10155 = vmatmul.bf16.vlgmr.msra.gmra.mxu1 %v14456_v1  ;;  %10171 = vmatpush.bf16.msra.mxu2 %v14892_v22  ;;  %v16057_v59 = vld [vmem:[#allocation13 + $0x354] sm:$0xf]  ;;  %v9175_v9 = vadd.f32 %v17014_v29, %v17060_v13  ;;  %v14736_v25 = vor.u32 %v16011_v24, %v14733_v6 }
 0x407   :  { %v14920_v33 = vor.u32 %v16057_v59, %v14917_v35  ;;  %v14912_v13 = vor.u32 %v16055_v40, %v14909_v8  ;;  %v16001_v59 = vld [vmem:[#allocation13 + $0x194] sm:$0xf]  ;;  %v14693_v35 = vld [vmem:[#allocation13 + $0x198] sm:$0xf0]  ;;  %v15999_v8 = vld [vmem:[#allocation13 + $0x184] sm:$0xf] }
 0x408   :  { %v8694_v19 = vmax.f32 %v8689_v55, 0.0  ;;  %10229 = vmatpush.bf16.msrb.mxu1 %v14632_v37  ;;  %v14725_v55 = vld [vmem:[#allocation13 + $0x1d8] sm:$0xf0]  ;;  %v9194_v37 = vadd.f32 %v17062_v45, %v9175_v9 }
 0x409   :  { %v9207_v46 = vpop.f32.mrf.mxu0 }
 0x40a   :  { %v8698_v11 = vpack.c.bf16 %v8694_v19, %v8694_v19  ;;  %v17066_v62 = vpop.f32.mrf.mxu2  ;;  %v9208_v30 = vadd.f32 %v9207_v46, %v9189_v15  ;;  %10172 = vmatpush.bf16.msra.mxu2 %v14884_v7  ;;  %v16053_v15 = vld [vmem:[#allocation13 + $0x334] sm:$0xf]  ;;  %v14901_v46 = vld [vmem:[#allocation13 + $0x338] sm:$0xf0] }
 0x40b   :  { %v15946_v18 = vld [vmem:[#allocation4 + $0x4c] sm:$0xf]  ;;  %v9177_v14 = vadd.f32 %v17014_v29, %v17066_v62  ;;  %v14904_v45 = vor.u32 %v16053_v15, %v14901_v46  ;;  %v14896_v29 = vor.u32 %v16051_v61, %v14893_v16  ;;  %v14712_v62 = vor.u32 %v16005_v32, %v14709_v10  ;;  %v10333_v16 = vld [vmem:[#allocation16 + $0x38] sm:$0xff] }
 0x40c   :  { %8702 = vst [vmem:[#allocation4 + $0x68] sm:$0xf] %v8698_v11  ;;  %10230 = vmatpush.bf16.msrb.mxu1 %v14624_v17  ;;  %v14728_v11 = vor.u32 %v16009_v5, %v14725_v55  ;;  %v14717_v17 = vld [vmem:[#allocation13 + $0x1c8] sm:$0xf0]  ;;  %v10334_v61 = vld [vmem:[#allocation16 + $0x40] sm:$0xff] }
 0x40d   :  { %v9226_v50 = vpop.f32.mrf.mxu1  ;;  %v14720_v7 = vor.u32 %v16007_v28, %v14717_v17  ;;  %v10331_v10 = vld [vmem:[#allocation16 + $0x28] sm:$0xff] }
 0x40e   :  { %v17068_v31 = vpop.f32.mrf.mxu3  ;;  %v9227_v48 = vadd.f32 %v9226_v50, %v9208_v30  ;;  %10173 = vmatpush.bf16.msra.mxu2 %v14876_v39 }
 0x40f   :  { %10288 = vmatmul.bf16.vlgmr.msra.gmra.mxu0 %v14456_v1 }
 0x410   :  { %10299 = vmatpush.bf16.msra.mxu1 %v14936_v49 }
 0x411   :  { %v9209_v3 = vpop.f32.mrf.mxu0 }
 0x412   :  { %v9210_v58 = vadd.f32 %v9209_v3, %v9191_v53  ;;  %10242 = vmatpush.bf16.msrb.mxu2 %v14744_v36  ;;  %v14885_v3 = vld [vmem:[#allocation13 + $0x318] sm:$0xf0] }
 0x413   :  { %v9245_v52 = vpop.f32.mrf.mxu2  ;;  %v14481_v57 = vld [vmem:[#allocation4 + $0x64] sm:$0xf0] }
 0x414   :  { %v9246_v63 = vadd.f32 %v9245_v52, %v9227_v48  ;;  %v14484_v51 = vor.u32 %v15946_v18, %v14481_v57  ;;  %10300 = vmatpush.bf16.msra.mxu1 %v14928_v56  ;;  %v9196_v52 = vadd.f32 %v17068_v31, %v9177_v14 }
 0x415   :  { %v9228_v26 = vpop.f32.mrf.mxu1 }
 0x416   :  { %v9264_v43 = vpop.f32.mrf.mxu3  ;;  %10160 = vmatmul.bf16.gmra.mxu1 %v14484_v51  ;;  %v9229_v2 = vadd.f32 %v9228_v26, %v9210_v58  ;;  %10243 = vmatpush.bf16.msrb.mxu2 %v14736_v25  ;;  %v14701_v26 = vld [vmem:[#allocation13 + $0x1a8] sm:$0xf0]  ;;  %v14696_v25 = vor.u32 %v16001_v59, %v14693_v35  ;;  %v10354_v59 = vld [vmem:[#allocation16 + $0xe0] sm:$0xff]  ;;  %v10353_v35 = vld [vmem:[#allocation16 + $0xd8] sm:$0xff] }
 0x417   :  { %v9265_v38 = vadd.f32 %v9264_v43, %v9246_v63  ;;  %v16049_v63 = vld [vmem:[#allocation13 + $0x314] sm:$0xf]  ;;  %v14704_v31 = vor.u32 %v16003_v34, %v14701_v26  ;;  %v14877_v58 = vld [vmem:[#allocation13 + $0x308] sm:$0xf0]  ;;  %v17118_v34 = vld [vmem:[#allocation15] sm:$0x3] }
 0x418   :  { %10301 = vmatpush.bf16.msra.mxu1 %v14920_v33  ;;  %v14888_v12 = vor.u32 %v16049_v63, %v14885_v3  ;;  %v10327_v63 = vld [vmem:[#allocation16 + $0x8] sm:$0xff] }
 0x419   :  { %v9274_v1 = vmax.f32 %v9265_v38, 0.0  ;;  %v9212_v19 = vpop.f32.mrf.mxu0  ;;  %v16047_v38 = vld [vmem:[#allocation13 + $0x304] sm:$0xf] }
 0x41a   :  { %v9213_v20 = vadd.f32 %v9212_v19, %v9194_v37  ;;  %10244 = vmatpush.bf16.msrb.mxu2 %v14728_v11 }
 0x41b   :  { %v9278_v0 = vpack.c.bf16 %v9274_v1, %v9274_v1  ;;  %v9247_v41 = vpop.f32.mrf.mxu2 }
 0x41c   :  { %v9248_v22 = vadd.f32 %v9247_v41, %v9229_v2  ;;  %10302 = vmatpush.bf16.msra.mxu1 %v14912_v13 }
 0x41d   :  { %9282 = vst [vmem:[#allocation4 + $0x18] sm:$0xf] %v9278_v0  ;;  %v9231_v54 = vpop.f32.mrf.mxu1  ;;  %v14685_v0 = vld [vmem:[#allocation13 + $0x188] sm:$0xf0] }
 0x41e   :  { %v9266_v42 = vpop.f32.mrf.mxu3  ;;  %v9232_v49 = vadd.f32 %v9231_v54, %v9213_v20  ;;  %10245 = vmatpush.bf16.msrb.mxu2 %v14720_v7  ;;  %v14688_v5 = vor.u32 %v15999_v8, %v14685_v0  ;;  %v10340_v20 = vld [vmem:[#allocation16 + $0x70] sm:$0xff]  ;;  %v10337_v54 = vld [vmem:[#allocation16 + $0x58] sm:$0xff]  ;;  %v10350_v0 = vld [vmem:[#allocation16 + $0xc0] sm:$0xff] }
 0x41f   :  { %v9267_v50 = vadd.f32 %v9266_v42, %v9248_v22  ;;  %10293 = vmatmul.bf16.gmra.mxu0 %v14484_v51 }
 0x420   :  { %10303 = vmatpush.bf16.msra.mxu1 %v14904_v45  ;;  %v10335_v45 = vld [vmem:[#allocation16 + $0x48] sm:$0xff] }
 0x421   :  { %v9275_v30 = vmax.f32 %v9267_v50, 0.0  ;;  %v9214_v53 = vpop.f32.mrf.mxu0  ;;  %v10341_v50 = vld [vmem:[#allocation16 + $0x78] sm:$0xff] }
 0x422   :  { %v9215_v57 = vadd.f32 %v9214_v53, %v9196_v52  ;;  %10246 = vmatpush.bf16.msrb.mxu2 %v14712_v62  ;;  %v10330_v52 = vld [vmem:[#allocation16 + $0x20] sm:$0xff]  ;;  %v10328_v62 = vld [vmem:[#allocation16 + $0x10] sm:$0xff] }
 0x423   :  { %v9279_v23 = vpack.c.bf16 %v9275_v30, %v9275_v30  ;;  %v9250_v39 = vpop.f32.mrf.mxu2  ;;  %v10336_v30 = vld [vmem:[#allocation16 + $0x50] sm:$0xff] }
 0x424   :  { %v9251_v43 = vadd.f32 %v9250_v39, %v9232_v49  ;;  %10304 = vmatpush.bf16.msra.mxu1 %v14896_v29  ;;  %v14459_v24 = vld [vmem:[#allocation4 + $0x18] sm:$0xf] }
 0x425   :  { %9283 = vst [vmem:[#allocation4 + $0x34] sm:$0xf] %v9279_v23  ;;  %v9233_v60 = vpop.f32.mrf.mxu1  ;;  %v10332_v49 = vld [vmem:[#allocation16 + $0x30] sm:$0xff] }
 0x426   :  { %v9269_v48 = vpop.f32.mrf.mxu3  ;;  %10231 = vmatmul.bf16.vlgmr.msrb.gmra.mxu1 %v16957_v21  ;;  %v9234_v47 = vadd.f32 %v9233_v60, %v9215_v57  ;;  %v14880_v21 = vor.u32 %v16047_v38, %v14877_v58  ;;  %10247 = vmatpush.bf16.msrb.mxu2 %v14704_v31  ;;  %v10326_v57 = vld [vmem:[#allocation16] sm:$0xff]  ;;  %v9416_v60 = vperm.slane %v17118_v34, 0  ;;  %v10356_v31 = vld [vmem:[#allocation16 + $0xf0] sm:$0xff]  ;;  %v10355_v38 = vld [vmem:[#allocation16 + $0xe8] sm:$0xff] }
 0x427   :  { %v9270_v18 = vadd.f32 %v9269_v48, %v9251_v43  ;;  %v10329_v43 = vld [vmem:[#allocation16 + $0x18] sm:$0xff] }
 0x428   :  { %10305 = vmatpush.bf16.msra.mxu1 %v14888_v12 }
 0x429   :  { %v9276_v51 = vmax.f32 %v9270_v18, 0.0  ;;  %v17083_v22 = vpop.f32.mrf.mxu0 }
 0x42a   :  { %10248 = vmatpush.bf16.msrb.mxu2 %v14696_v25 }
 0x42b   :  { %v9280_v56 = vpack.c.bf16 %v9276_v51, %v9276_v51  ;;  %v9252_v36 = vpop.f32.mrf.mxu2  ;;  %v10357_v51 = vld [vmem:[#allocation16 + $0xf8] sm:$0xff] }
 0x42c   :  { %v15943_v6 = vld [vmem:[#allocation4 + $0x30] sm:$0xf0]  ;;  %v9253_v9 = vadd.f32 %v9252_v36, %v9234_v47  ;;  %10306 = vmatpush.bf16.msra.mxu1 %v14880_v21  ;;  %10387 = vmatpush.msra.mxu3 %v10357_v51  ;;  %v10062_v47 = vadd.f32 %v17083_v22, %v9416_v60 }
 0x42d   :  { %9284 = vst [vmem:[#allocation4 + $0x50] sm:$0xf] %v9280_v56  ;;  %v14460_v1 = vor.u32 %v15943_v6, %v14459_v24  ;;  %v17085_v19 = vpop.f32.mrf.mxu1  ;;  %v10352_v6 = vld [vmem:[#allocation16 + $0xd0] sm:$0xff]  ;;  %v10351_v21 = vld [vmem:[#allocation16 + $0xc8] sm:$0xff] }
 0x42e   :  { %v9271_v33 = vpop.f32.mrf.mxu3  ;;  %10249 = vmatpush.bf16.msrb.mxu2 %v14688_v5  ;;  %10388 = vmatpush.msra.mxu3 %v10356_v31  ;;  %v10081_v24 = vadd.f32 %v17085_v19, %v10062_v47  ;;  %v10347_v19 = vld [vmem:[#allocation16 + $0xa8] sm:$0xff] }
 0x42f   :  { %v9272_v40 = vadd.f32 %v9271_v33, %v9253_v9  ;;  %10174 = vmatmul.bf16.vlgmr.msra.gmra.mxu2 %v14460_v1 }
 0x430   :  { %10389 = vmatpush.msra.mxu3 %v10355_v38 }
 0x431   :  { %v9277_v2 = vmax.f32 %v9272_v40, 0.0  ;;  %v17088_v13 = vpop.f32.mrf.mxu0 }
 0x432   :  { %10358 = vmatpush.msra.mxu2 %v10341_v50  ;;  %10390 = vmatpush.msra.mxu3 %v10354_v59  ;;  %v10064_v40 = vadd.f32 %v17088_v13, %v9416_v60 }
 0x433   :  { %v9281_v55 = vpack.c.bf16 %v9277_v2, %v9277_v2  ;;  %v10099_v39 = vpop.f32.mrf.mxu2  ;;  %v10349_v2 = vld [vmem:[#allocation16 + $0xb8] sm:$0xff] }
 0x434   :  { %v14487_v41 = vld [vmem:[#allocation4 + $0x50] sm:$0xf]  ;;  %10359 = vmatpush.msra.mxu2 %v10340_v20  ;;  %10391 = vmatpush.msra.mxu3 %v10353_v35 }
 0x435   :  { %9285 = vst [vmem:[#allocation4 + $0x6c] sm:$0xf] %v9281_v55  ;;  %v17090_v11 = vpop.f32.mrf.mxu1 }
 0x436   :  { %10236 = vmatmul.bf16.gmra.mxu1 %v16975_v44  ;;  %v17100_v17 = vpop.f32.mrf.mxu3  ;;  %10392 = vmatpush.msra.mxu3 %v10352_v6  ;;  %v10083_v5 = vadd.f32 %v17090_v11, %v10064_v40 }
 0x438   :  { %10393 = vmatpush.msra.mxu3 %v10351_v21 }
 0x439   :  { %v17092_v15 = vpop.f32.mrf.mxu0 }
 0x43a   :  { %10394 = vmatpush.msra.mxu3 %v10350_v0  ;;  %v10067_v20 = vadd.f32 %v17092_v15, %v9416_v60  ;;  %v10346_v15 = vld [vmem:[#allocation16 + $0xa0] sm:$0xff] }
 0x43b   :  { %v10101_v3 = vpop.f32.mrf.mxu2 }
 0x43c   :  { %v15950_v42 = vld [vmem:[#allocation4 + $0x68] sm:$0xf0]  ;;  %10395 = vmatpush.msra.mxu3 %v10349_v2 }
 0x43d   :  { %v14488_v37 = vor.u32 %v15950_v42, %v14487_v41  ;;  %v17094_v44 = vpop.f32.mrf.mxu1  ;;  %v10348_v41 = vld [vmem:[#allocation16 + $0xb0] sm:$0xff] }
 0x43e   :  { %v17106_v23 = vpop.f32.mrf.mxu3  ;;  %10396 = vmatpush.msra.mxu3 %v10348_v41 }
 0x43f   :  { %10179 = vmatmul.bf16.gmra.mxu2 %v14488_v37 }
 0x440   :  { %10397 = vmatpush.msra.mxu3 %v10347_v19 }
 0x441   :  { %v17096_v46 = vpop.f32.mrf.mxu0 }
 0x442   :  { %10398 = vmatpush.msra.mxu3 %v10346_v15 }
 0x443   :  { %v10104_v58 = vpop.f32.mrf.mxu2 }
 0x445   :  { %v17098_v28 = vpop.f32.mrf.mxu1 }
 0x446   :  { %10307 = vmatmul.bf16.vlgmr.msra.gmra.mxu1 %v14460_v1  ;;  %v17112_v53 = vpop.f32.mrf.mxu3  ;;  %v10100_v1 = vadd.f32 %v10099_v39, %v10081_v24 }
 0x448   :  { %v10119_v8 = vadd.f32 %v17100_v17, %v10100_v1 }
 0x44b   :  { %v10106_v33 = vpop.f32.mrf.mxu2 }
 0x44c   :  { %v17102_v14 = vpop.f32.mrf.mxu0 }
 0x44d   :  { %v10138_v55 = vadd.f32 %v17102_v14, %v10119_v8 }
 0x44e   :  { %v17120_v26 = vpop.f32.mrf.mxu3 }
 0x44f   :  { %10250 = vmatmul.bf16.vlgmr.msrb.gmra.mxu2 %v16959_v27  ;;  %v10339_v27 = vld [vmem:[#allocation16 + $0x68] sm:$0xff] }
 0x450   :  { %10360 = vmatpush.msra.mxu2 %v10339_v27 }
 0x454   :  { %v17108_v32 = vpop.f32.mrf.mxu0 }
 0x456   :  { %10312 = vmatmul.bf16.gmra.mxu1 %v14488_v37  ;;  %v17128_v36 = vpop.f32.mrf.mxu3  ;;  %v10102_v37 = vadd.f32 %v10101_v3, %v10083_v5  ;;  %v10342_v3 = vld [vmem:[#allocation16 + $0x80] sm:$0xff] }
 0x458   :  { %v10121_v11 = vadd.f32 %v17106_v23, %v10102_v37 }
 0x45a   :  { %v10140_v14 = vadd.f32 %v17108_v32, %v10121_v11 }
 0x45c   :  { %v17114_v29 = vpop.f32.mrf.mxu0 }
 0x45e   :  { %v17139_v42 = vpop.f32.mrf.mxu3 }
 0x45f   :  { %10255 = vmatmul.bf16.gmra.mxu2 %v16977_v4  ;;  %v10338_v4 = vld [vmem:[#allocation16 + $0x60] sm:$0xff] }
 0x460   :  { %10361 = vmatpush.msra.mxu2 %v10338_v4 }
 0x462   :  { %10362 = vmatpush.msra.mxu2 %v10337_v54  ;;  %v10086_v54 = vadd.f32 %v17094_v44, %v10067_v20 }
 0x464   :  { %10363 = vmatpush.msra.mxu2 %v10336_v30  ;;  %v17122_v12 = vpop.f32.mrf.mxu0  ;;  %v10105_v30 = vadd.f32 %v10104_v58, %v10086_v54  ;;  %v9417_v58 = vperm.slane %v17118_v34, 1 }
 0x466   :  { %10364 = vmatpush.msra.mxu2 %v10335_v45  ;;  %v10124_v23 = vadd.f32 %v17112_v53, %v10105_v30  ;;  %v10195_v35 = vadd.f32 %v17128_v36, %v9417_v58  ;;  %v10197_v8 = vadd.f32 %v17139_v42, %v9417_v58 }
 0x468   :  { %10365 = vmatpush.msra.mxu2 %v10334_v61 }
 0x46a   :  { %10366 = vmatpush.msra.mxu2 %v10333_v16  ;;  %v10069_v16 = vadd.f32 %v17096_v46, %v9416_v60 }
 0x46c   :  { %10367 = vmatpush.msra.mxu2 %v10332_v49  ;;  %v17131_v9 = vpop.f32.mrf.mxu0  ;;  %v10088_v32 = vadd.f32 %v17098_v28, %v10069_v16 }
 0x46d   :  { %v10214_v1 = vadd.f32 %v17131_v9, %v10195_v35 }
 0x46e   :  { %10368 = vmatpush.msra.mxu2 %v10331_v10  ;;  %v10345_v10 = vld [vmem:[#allocation16 + $0x98] sm:$0xff] }
 0x46f   :  { %10399 = vmatpush.msra.mxu3 %v10345_v10 }
 0x470   :  { %10369 = vmatpush.msra.mxu2 %v10330_v52 }
 0x472   :  { %10370 = vmatpush.msra.mxu2 %v10329_v43  ;;  %v10344_v43 = vld [vmem:[#allocation16 + $0x90] sm:$0xff] }
 0x473   :  { %10400 = vmatpush.msra.mxu3 %v10344_v43 }
 0x474   :  { %10371 = vmatpush.msra.mxu2 %v10328_v62  ;;  %v10215_v50 = vpop.f32.mrf.mxu0  ;;  %v10143_v62 = vadd.f32 %v17114_v29, %v10124_v23 }
 0x475   :  { %v10216_v0 = vadd.f32 %v10215_v50, %v10197_v8 }
 0x476   :  { %10372 = vmatpush.msra.mxu2 %v10327_v63  ;;  %v10107_v63 = vadd.f32 %v10106_v33, %v10088_v32 }
 0x478   :  { %10373 = vmatpush.msra.mxu2 %v10326_v57  ;;  %v10126_v53 = vadd.f32 %v17120_v26, %v10107_v63 }
 0x47a   :  { %v10145_v28 = vadd.f32 %v17122_v12, %v10126_v53 }
 0x47c   :  { %v10218_v39 = vpop.f32.mrf.mxu0 }
 0x483   :  { %v17104_v7 = vpop.f32.mrf.mxu1 }
 0x484   :  { %v10157_v22 = vadd.f32 %v17104_v7, %v10138_v55  ;;  %v10199_v7 = vpop.f32.mrf.mxu3  ;;  %v10220_v38 = vpop.f32.mrf.mxu0 }
 0x485   :  { %v10200_v19 = vadd.f32 %v10199_v7, %v9417_v58 }
 0x48b   :  { %v17110_v48 = vpop.f32.mrf.mxu1 }
 0x48c   :  { %v10159_v45 = vadd.f32 %v17110_v48, %v10140_v14  ;;  %v10343_v48 = vld [vmem:[#allocation16 + $0x88] sm:$0xff]  ;;  %v10201_v60 = vpop.f32.mrf.mxu3  ;;  %v10289_v26 = vpop.f32.mrf.mxu0 }
 0x48d   :  { %10401 = vmatpush.msra.mxu3 %v10343_v48  ;;  %v10202_v30 = vadd.f32 %v10201_v60, %v9417_v58 }
 0x48f   :  { %10402 = vmatpush.msra.mxu3 %v10342_v3 }
 0x493   :  { %v17116_v18 = vpop.f32.mrf.mxu1 }
 0x494   :  { %v10162_v46 = vadd.f32 %v17116_v18, %v10143_v62  ;;  %v10270_v6 = vpop.f32.mrf.mxu3  ;;  %v10291_v36 = vpop.f32.mrf.mxu0 }
 0x49b   :  { %v17125_v56 = vpop.f32.mrf.mxu1 }
 0x49c   :  { %v10164_v47 = vadd.f32 %v17125_v56, %v10145_v28  ;;  %v10272_v2 = vpop.f32.mrf.mxu3  ;;  %v10294_v14 = vpop.f32.mrf.mxu0 }
 0x4a3   :  { %v17133_v25 = vpop.f32.mrf.mxu1 }
 0x4a4   :  { %v10233_v21 = vadd.f32 %v17133_v25, %v10214_v1  ;;  %v10219_v25 = vadd.f32 %v10218_v39, %v10200_v19  ;;  %v10296_v43 = vpop.f32.mrf.mxu0 }
 0x4ab   :  { %v10234_v17 = vpop.f32.mrf.mxu1 }
 0x4ac   :  { %v10235_v5 = vadd.f32 %v10234_v17, %v10216_v0 }
 0x4b2   :  { %v10175_v13 = vpop.f32.mrf.mxu2 }
 0x4b3   :  { %v10176_v27 = vadd.f32 %v10175_v13, %v10157_v22  ;;  %v10237_v44 = vpop.f32.mrf.mxu1 }
 0x4b5   :  { %v10318_v4 = vmax.f32 %v10176_v27, 0.0  ;;  %v10238_v27 = vadd.f32 %v10237_v44, %v10219_v25 }
 0x4b7   :  { %10374 = vmatmul.f32.vlgmr.msra.gmra.mxu2 %v10318_v4  ;;  %v10275_v4 = vpop.f32.mrf.mxu3 }
 0x4ba   :  { %v10177_v61 = vpop.f32.mrf.mxu2 }
 0x4bb   :  { %v10178_v49 = vadd.f32 %v10177_v61, %v10159_v45  ;;  %v10239_v29 = vpop.f32.mrf.mxu1  ;;  %v10221_v61 = vadd.f32 %v10220_v38, %v10202_v30 }
 0x4bd   :  { %v10320_v52 = vmax.f32 %v10178_v49, 0.0  ;;  %v10240_v49 = vadd.f32 %v10239_v29, %v10221_v61 }
 0x4bf   :  { %10377 = vmatmul.f32.gmra.mxu2 %v10320_v52  ;;  %v10277_v39 = vpop.f32.mrf.mxu3 }
 0x4c2   :  { %v10180_v57 = vpop.f32.mrf.mxu2 }
 0x4c3   :  { %v10181_v51 = vadd.f32 %v10180_v57, %v10162_v46  ;;  %v10308_v33 = vpop.f32.mrf.mxu1 }
 0x4c5   :  { %v10322_v31 = vmax.f32 %v10181_v51, 0.0 }
 0x4c7   :  { %10380 = vmatmul.f32.gmra.mxu2 %v10322_v31 }
 0x4ca   :  { %v10182_v59 = vpop.f32.mrf.mxu2 }
 0x4cb   :  { %v10183_v18 = vadd.f32 %v10182_v59, %v10164_v47  ;;  %v10310_v9 = vpop.f32.mrf.mxu1 }
 0x4cd   :  { %v10324_v24 = vmax.f32 %v10183_v18, 0.0 }
 0x4cf   :  { %10383 = vmatmul.f32.gmra.mxu2 %v10324_v24 }
 0x4d2   :  { %v10251_v12 = vpop.f32.mrf.mxu2 }
 0x4d3   :  { %v10252_v40 = vadd.f32 %v10251_v12, %v10233_v21  ;;  %v10313_v45 = vpop.f32.mrf.mxu1 }
 0x4d5   :  { %v10271_v34 = vadd.f32 %v10270_v6, %v10252_v40 }
 0x4d7   :  { %v10290_v56 = vadd.f32 %v10289_v26, %v10271_v34 }
 0x4d9   :  { %v10309_v55 = vadd.f32 %v10308_v33, %v10290_v56 }
 0x4da   :  { %v10253_v41 = vpop.f32.mrf.mxu2 }
 0x4db   :  { %v10319_v37 = vmax.f32 %v10309_v55, 0.0  ;;  %v10254_v22 = vadd.f32 %v10253_v41, %v10235_v5  ;;  %v10315_v32 = vpop.f32.mrf.mxu1 }
 0x4dd   :  { %v10273_v13 = vadd.f32 %v10272_v2, %v10254_v22  ;;  %10403 = vmatmul.f32.vlgmr.msra.gmra.mxu3 %v10319_v37 }
 0x4df   :  { %v10292_v20 = vadd.f32 %v10291_v36, %v10273_v13 }
 0x4e1   :  { %v10311_v11 = vadd.f32 %v10310_v9, %v10292_v20 }
 0x4e2   :  { %v10256_v42 = vpop.f32.mrf.mxu2 }
 0x4e3   :  { %v10257_v54 = vadd.f32 %v10256_v42, %v10238_v27  ;;  %v10321_v50 = vmax.f32 %v10311_v11, 0.0 }
 0x4e5   :  { %v10276_v17 = vadd.f32 %v10275_v4, %v10257_v54  ;;  %10406 = vmatmul.f32.gmra.mxu3 %v10321_v50 }
 0x4e7   :  { %v10295_v16 = vadd.f32 %v10294_v14, %v10276_v17 }
 0x4e9   :  { %v10314_v15 = vadd.f32 %v10313_v45, %v10295_v16 }
 0x4ea   :  { %v10258_v7 = vpop.f32.mrf.mxu2 }
 0x4eb   :  { %v10259_v10 = vadd.f32 %v10258_v7, %v10240_v49  ;;  %v10323_v23 = vmax.f32 %v10314_v15, 0.0 }
 0x4ed   :  { %v10278_v52 = vadd.f32 %v10277_v39, %v10259_v10  ;;  %10409 = vmatmul.f32.gmra.mxu3 %v10323_v23 }
 0x4ef   :  { %v10297_v44 = vadd.f32 %v10296_v43, %v10278_v52 }
 0x4f1   :  { %v10316_v62 = vadd.f32 %v10315_v32, %v10297_v44 }
 0x4f3   :  { %v10325_v48 = vmax.f32 %v10316_v62, 0.0 }
 0x4f5   :  { %10412 = vmatmul.f32.gmra.mxu3 %v10325_v48 }
 0x53a   :  { %v10375_v63 = vpop.f32.mrf.mxu2 }
 0x542   :  { %v10378_v57 = vpop.f32.mrf.mxu2 }
 0x54a   :  { %v10381_v53 = vpop.f32.mrf.mxu2 }
 0x552   :  { %v10384_v28 = vpop.f32.mrf.mxu2 }
 0x560   :  { %v10404_v46 = vpop.f32.mrf.mxu3 }
 0x561   :  { %v10405_v3 = vadd.f32 %v10404_v46, %v10375_v63 }
 0x563   :  { %10416 = vst [vmem:[%s17181_s9] sm:$0xff] %v10405_v3 }
 0x568   :  { %v10407_v51 = vpop.f32.mrf.mxu3 }
 0x569   :  { %v10408_v60 = vadd.f32 %v10407_v51, %v10378_v57 }
 0x56b   :  { %10417 = vst [vmem:[%s17181_s9 + $0x8] sm:$0xff] %v10408_v60 }
 0x570   :  { %v10410_v31 = vpop.f32.mrf.mxu3 }
 0x571   :  { %v10411_v38 = vadd.f32 %v10410_v31, %v10381_v53 }
 0x573   :  { %10418 = vst [vmem:[%s17181_s9 + $0x10] sm:$0xff] %v10411_v38 }
 0x578   :  { %v10413_v29 = vpop.f32.mrf.mxu3 }
 0x579   :  { %v10414_v58 = vadd.f32 %v10413_v29, %v10384_v28 }
 0x57b   :  { %10419 = vst [vmem:[%s17181_s9 + $0x18] sm:$0xff] %v10414_v58 }
 0x57c   :  { %10424 = vsyncpa [#allocation6], 1 }
 0x57d   :  { %10425 = vsyncpa [#allocation8], 1 }
 0x57e   :  { %10426 = vsyncpa [#allocation11], 1 }
 0x57f   :  { %10427 = vsyncpa [#allocation14], 1 }
 0x580   :  { %10428 = vsyncpa [#allocation17], 1 }

</bundles_post_ra>
